<compile_context>
chip_gen: v7x
topology: tpu7x:2x2x1
jax: 0.10.0
libtpu: 0.0.40
codegen_flags: <defaults>
</compile_context>

<pallas_src>
import jax
import jax.numpy as jnp
from jax import lax
from jax.experimental import pallas as pl
from jax.experimental.pallas import tpu as pltpu


def mlp_kernel(x_ref, w1_ref, b1_ref, w2_ref, b2_ref, o_ref):
    # ---- linear_1: (TM, D) @ (D, H) + b1 ----
    h = jnp.dot(x_ref[...], w1_ref[...],
                preferred_element_type=jnp.float32,
                precision=lax.Precision.HIGHEST)
    h = h + b1_ref[...]            # (1, H) broadcasts over the batch tile
    # ---- ReLU ----
    h = jnp.maximum(h, 0.0)
    # ---- linear_2: (TM, H) @ (H, C_pad) + b2 ----
    out = jnp.dot(h, w2_ref[...],
                  preferred_element_type=jnp.float32,
                  precision=lax.Precision.HIGHEST)
    out = out + b2_ref[...]        # (1, C_pad) broadcasts over the batch tile
    o_ref[...] = out.astype(o_ref.dtype)


def prepare_params(w1, b1, w2, b2):
    """One-time parameter prep: lane-pad the class dim to a multiple of 128.

    Done ONCE, outside the per-call forward path, so the forward itself is a
    single pallas_call with no extra pad/scatter ops per invocation.
    Returns (w1, b1, w2_padded, b2_padded, n_classes).
    """
    H, C = w2.shape
    C_pad = ((C + 127) // 128) * 128
    if C_pad != C:
        w2p = jnp.zeros((H, C_pad), w2.dtype).at[:, :C].set(w2)
        b2p = jnp.zeros((1, C_pad), b2.dtype).at[:, :C].set(b2)
    else:
        w2p, b2p = w2, b2
    return w1, b1, w2p, b2p, C


def _num_tensorcores():
    """Best-effort TensorCore count of the default device (v7x=2, v5e/v6e=1)."""
    try:
        kind = jax.devices()[0].device_kind.lower()
        if "v7" in kind:
            return 2
    except Exception:
        pass
    return 1


def _pick_tm(B, num_cores):
    """Batch tile: one grid step per TensorCore when possible, capped at 512 rows."""
    per_core = -(-B // num_cores)            # ceil(B / num_cores)
    tm = ((per_core + 7) // 8) * 8           # sublane multiple
    return max(8, min(tm, 512))


def _build_call(B, D, H, C_pad, tm, single_buffer_weights):
    resident_kwargs = {}
    if single_buffer_weights:
        # Constant (0,0) blocks every step -> single-buffer them (saves VMEM +
        # one useless prologue DMA per operand).
        resident_kwargs = dict(pipeline_mode=pl.Buffered(1))
    return pl.pallas_call(
        mlp_kernel,
        out_shape=jax.ShapeDtypeStruct((B, C_pad), jnp.float32),
        grid_spec=pltpu.PrefetchScalarGridSpec(
            num_scalar_prefetch=0,
            grid=(pl.cdiv(B, tm),),
            in_specs=[
                pl.BlockSpec((tm, D), lambda i: (i, 0)),                        # x: batch-tiled
                pl.BlockSpec((D, H), lambda i: (0, 0), **resident_kwargs),      # w1: resident
                pl.BlockSpec((1, H), lambda i: (0, 0), **resident_kwargs),      # b1: resident
                pl.BlockSpec((H, C_pad), lambda i: (0, 0), **resident_kwargs),  # w2 (padded)
                pl.BlockSpec((1, C_pad), lambda i: (0, 0), **resident_kwargs),  # b2 (padded)
            ],
            out_specs=pl.BlockSpec((tm, C_pad), lambda i: (i, 0)),
        ),
        compiler_params=pltpu.CompilerParams(
            # Parallel batch axis -> sharded across both TCs on v7x; no-op on v5e/v6e.
            dimension_semantics=("parallel",),
        ),
    )


def neural_net_forward(x, w1, b1, w2p, b2p):
    """relu(x @ w1 + b1) @ w2p + b2p  ->  lane-dense (B, C_pad) logits slab.

    Slice [:, :C] only at the point where the logits are actually consumed.
    """
    B, D = x.shape
    H = w1.shape[1]
    C_pad = w2p.shape[1]
    tm = _pick_tm(B, _num_tensorcores())
    try:
        call = _build_call(B, D, H, C_pad, tm, single_buffer_weights=True)
        return call(x, w1, b1, w2p, b2p)
    except Exception:
        # TODO(synk): drop this fallback once pl.Buffered(1) single-buffering is
        # guaranteed by the deployed jax version.
        call = _build_call(B, D, H, C_pad, tm, single_buffer_weights=False)
        return call(x, w1, b1, w2p, b2p)


if __name__ == "__main__":
    # Small shapes consistent with the module's forward:
    # x: (batch, input_size); hidden_size; n_classes.
    batch, input_size, hidden_size, n_classes = 256, 256, 128, 10

    key = jax.random.PRNGKey(0)
    kx, k1, k2, k3, k4 = jax.random.split(key, 5)

    x = jax.random.normal(kx, (batch, input_size), dtype=jnp.float32)

    # Deterministic parameter init (uniform, like PyTorch's default Linear bound).
    bound1 = 1.0 / (input_size ** 0.5)
    w1 = jax.random.uniform(k1, (input_size, hidden_size), jnp.float32, -bound1, bound1)
    b1 = jax.random.uniform(k2, (1, hidden_size), jnp.float32, -bound1, bound1)

    bound2 = 1.0 / (hidden_size ** 0.5)
    w2 = jax.random.uniform(k3, (hidden_size, n_classes), jnp.float32, -bound2, bound2)
    b2 = jax.random.uniform(k4, (1, n_classes), jnp.float32, -bound2, bound2)

    # One-time parameter prep (lane-pads the class dim), outside the call path.
    w1p, b1p, w2p, b2p, C = prepare_params(w1, b1, w2, b2)
    w1p, b1p, w2p, b2p = jax.block_until_ready((w1p, b1p, w2p, b2p))

    out_padded = neural_net_forward(x, w1p, b1p, w2p, b2p)
    out_padded = jax.block_until_ready(out_padded)

    # Consumption point: slice the lane-dense slab down to the real class count.
    out = out_padded[:, :C]

    # Pure-JAX reference of the same forward pass (same HIGHEST precision).
    ref_h = jnp.maximum(jnp.dot(x, w1, precision=lax.Precision.HIGHEST) + b1, 0.0)
    ref = jnp.dot(ref_h, w2, precision=lax.Precision.HIGHEST) + b2

    assert out_padded.shape == (batch, ((n_classes + 127) // 128) * 128)
    assert out.shape == (batch, n_classes)
    assert jnp.allclose(out, ref, atol=1e-5, rtol=1e-5)

    print("KERNEL_OK")
</pallas_src>

<mosaic_0001>
module attributes {stable_mosaic.version = 11 : i64} {
  func.func @mlp_kernel(%arg0: i32, %arg1: memref<256x256xf32, #tpu.memory_space<vmem>>, %arg2: memref<256x128xf32, #tpu.memory_space<vmem>>, %arg3: memref<1x128xf32, #tpu.memory_space<vmem>>, %arg4: memref<128x128xf32, #tpu.memory_space<vmem>>, %arg5: memref<1x128xf32, #tpu.memory_space<vmem>>, %arg6: memref<256x128xf32, #tpu.memory_space<vmem>>) attributes {dimension_semantics = [#tpu.dimension_semantics<parallel>], iteration_bounds = array<i64: 1>, scalar_prefetch = 0 : i64, scratch_operands = 0 : i64, tpu.core_type = #tpu.core_type<tc>, window_params = [{transform_indices = @transform_0, window_bounds = array<i64: 256, 256>}, {pipeline_mode = #tpu.pipeline_mode<synchronous>, transform_indices = @transform_1, window_bounds = array<i64: 256, 128>}, {pipeline_mode = #tpu.pipeline_mode<synchronous>, transform_indices = @transform_2, window_bounds = array<i64: 1, 128>}, {pipeline_mode = #tpu.pipeline_mode<synchronous>, transform_indices = @transform_3, window_bounds = array<i64: 128, 128>}, {pipeline_mode = #tpu.pipeline_mode<synchronous>, transform_indices = @transform_4, window_bounds = array<i64: 1, 128>}, {transform_indices = @transform_5, window_bounds = array<i64: 256, 128>}]} {
    %c0 = arith.constant 0 : index
    %c0_0 = arith.constant 0 : index
    %0 = vector.load %arg1[%c0, %c0_0] : memref<256x256xf32, #tpu.memory_space<vmem>>, vector<256x256xf32>
    %c0_1 = arith.constant 0 : index
    %c0_2 = arith.constant 0 : index
    %1 = vector.load %arg2[%c0_1, %c0_2] : memref<256x128xf32, #tpu.memory_space<vmem>>, vector<256x128xf32>
    %cst = arith.constant dense<0.000000e+00> : vector<256x128xf32>
    %2 = tpu.matmul %0, %1, %cst {dimension_numbers = #tpu.dot_dimension_numbers<[1], [0], [0], [1], [0, 0, 1, 1], [], []>, precision = #tpu.contract_precision<fp32>} : vector<256x256xf32>, vector<256x128xf32>, vector<256x128xf32> -> vector<256x128xf32>
    %c0_3 = arith.constant 0 : index
    %c0_4 = arith.constant 0 : index
    %3 = vector.load %arg3[%c0_3, %c0_4] : memref<1x128xf32, #tpu.memory_space<vmem>>, vector<1x128xf32>
    %4 = vector.broadcast %3 : vector<1x128xf32> to vector<256x128xf32>
    %5 = arith.addf %2, %4 : vector<256x128xf32>
    %cst_5 = arith.constant 0.000000e+00 : f32
    %6 = vector.broadcast %cst_5 : f32 to vector<256x128xf32>
    %7 = arith.maximumf %5, %6 : vector<256x128xf32>
    %c0_6 = arith.constant 0 : index
    %c0_7 = arith.constant 0 : index
    %8 = vector.load %arg4[%c0_6, %c0_7] : memref<128x128xf32, #tpu.memory_space<vmem>>, vector<128x128xf32>
    %cst_8 = arith.constant dense<0.000000e+00> : vector<256x128xf32>
    %9 = tpu.matmul %7, %8, %cst_8 {dimension_numbers = #tpu.dot_dimension_numbers<[1], [0], [0], [1], [0, 0, 1, 1], [], []>, precision = #tpu.contract_precision<fp32>} : vector<256x128xf32>, vector<128x128xf32>, vector<256x128xf32> -> vector<256x128xf32>
    %c0_9 = arith.constant 0 : index
    %c0_10 = arith.constant 0 : index
    %10 = vector.load %arg5[%c0_9, %c0_10] : memref<1x128xf32, #tpu.memory_space<vmem>>, vector<1x128xf32>
    %11 = vector.broadcast %10 : vector<1x128xf32> to vector<256x128xf32>
    %12 = arith.addf %9, %11 : vector<256x128xf32>
    %c0_11 = arith.constant 0 : index
    %c0_12 = arith.constant 0 : index
    %13 = vector.load %arg6[%c0_11, %c0_12] : memref<256x128xf32, #tpu.memory_space<vmem>>, vector<256x128xf32>
    tpu.vector_store %arg6[%c0_11, %c0_12], %12 {strides = array<i32>} : memref<256x128xf32, #tpu.memory_space<vmem>>, vector<256x128xf32>,
    return
  }
  func.func @transform_0(%arg0: i32) -> (i32, i32) {
    %c0_i32 = arith.constant 0 : i32
    %c0_i32_0 = arith.constant 0 : i32
    return %arg0, %c0_i32 : i32, i32
  }
  func.func @transform_1(%arg0: i32) -> (i32, i32) {
    %c0_i32 = arith.constant 0 : i32
    %c0_i32_0 = arith.constant 0 : i32
    %c0_i32_1 = arith.constant 0 : i32
    return %c0_i32, %c0_i32_0 : i32, i32
  }
  func.func @transform_2(%arg0: i32) -> (i32, i32) {
    %c0_i32 = arith.constant 0 : i32
    %c0_i32_0 = arith.constant 0 : i32
    %c0_i32_1 = arith.constant 0 : i32
    return %c0_i32, %c0_i32_0 : i32, i32
  }
  func.func @transform_3(%arg0: i32) -> (i32, i32) {
    %c0_i32 = arith.constant 0 : i32
    %c0_i32_0 = arith.constant 0 : i32
    %c0_i32_1 = arith.constant 0 : i32
    return %c0_i32, %c0_i32_0 : i32, i32
  }
  func.func @transform_4(%arg0: i32) -> (i32, i32) {
    %c0_i32 = arith.constant 0 : i32
    %c0_i32_0 = arith.constant 0 : i32
    %c0_i32_1 = arith.constant 0 : i32
    return %c0_i32, %c0_i32_0 : i32, i32
  }
  func.func @transform_5(%arg0: i32) -> (i32, i32) {
    %c0_i32 = arith.constant 0 : i32
    %c0_i32_0 = arith.constant 0 : i32
    return %arg0, %c0_i32 : i32, i32
  }
}

module attributes {stable_mosaic.version = 11 : i64} {
  func.func @mlp_kernel(%arg0: i32, %arg1: memref<256x256xf32, #tpu.memory_space<vmem>>, %arg2: memref<256x128xf32, #tpu.memory_space<vmem>>, %arg3: memref<1x128xf32, #tpu.memory_space<vmem>>, %arg4: memref<128x128xf32, #tpu.memory_space<vmem>>, %arg5: memref<1x128xf32, #tpu.memory_space<vmem>>, %arg6: memref<256x128xf32, #tpu.memory_space<vmem>>) attributes {dimension_semantics = [#tpu.dimension_semantics<parallel>], iteration_bounds = array<i64: 1>, scalar_prefetch = 0 : i64, scratch_operands = 0 : i64, tpu.core_type = #tpu.core_type<tc>, window_params = [{transform_indices = @transform_0, window_bounds = array<i64: 256, 256>}, {pipeline_mode = #tpu.pipeline_mode<synchronous>, transform_indices = @transform_1, window_bounds = array<i64: 256, 128>}, {pipeline_mode = #tpu.pipeline_mode<synchronous>, transform_indices = @transform_2, window_bounds = array<i64: 1, 128>}, {pipeline_mode = #tpu.pipeline_mode<synchronous>, transform_indices = @transform_3, window_bounds = array<i64: 128, 128>}, {pipeline_mode = #tpu.pipeline_mode<synchronous>, transform_indices = @transform_4, window_bounds = array<i64: 1, 128>}, {transform_indices = @transform_5, window_bounds = array<i64: 256, 128>}]} {
    %c0 = arith.constant 0 : index
    %c0_0 = arith.constant 0 : index
    %0 = vector.load %arg1[%c0, %c0_0] : memref<256x256xf32, #tpu.memory_space<vmem>>, vector<256x256xf32>
    %c0_1 = arith.constant 0 : index
    %c0_2 = arith.constant 0 : index
    %1 = vector.load %arg2[%c0_1, %c0_2] : memref<256x128xf32, #tpu.memory_space<vmem>>, vector<256x128xf32>
    %cst = arith.constant dense<0.000000e+00> : vector<256x128xf32>
    %2 = tpu.matmul %0, %1, %cst {dimension_numbers = #tpu.dot_dimension_numbers<[1], [0], [0], [1], [0, 0, 1, 1], [], []>, precision = #tpu.contract_precision<fp32>} : vector<256x256xf32>, vector<256x128xf32>, vector<256x128xf32> -> vector<256x128xf32>
    %c0_3 = arith.constant 0 : index
    %c0_4 = arith.constant 0 : index
    %3 = vector.load %arg3[%c0_3, %c0_4] : memref<1x128xf32, #tpu.memory_space<vmem>>, vector<1x128xf32>
    %4 = vector.broadcast %3 : vector<1x128xf32> to vector<256x128xf32>
    %5 = arith.addf %2, %4 : vector<256x128xf32>
    %cst_5 = arith.constant 0.000000e+00 : f32
    %6 = vector.broadcast %cst_5 : f32 to vector<256x128xf32>
    %7 = arith.maximumf %5, %6 : vector<256x128xf32>
    %c0_6 = arith.constant 0 : index
    %c0_7 = arith.constant 0 : index
    %8 = vector.load %arg4[%c0_6, %c0_7] : memref<128x128xf32, #tpu.memory_space<vmem>>, vector<128x128xf32>
    %cst_8 = arith.constant dense<0.000000e+00> : vector<256x128xf32>
    %9 = tpu.matmul %7, %8, %cst_8 {dimension_numbers = #tpu.dot_dimension_numbers<[1], [0], [0], [1], [0, 0, 1, 1], [], []>, precision = #tpu.contract_precision<fp32>} : vector<256x128xf32>, vector<128x128xf32>, vector<256x128xf32> -> vector<256x128xf32>
    %c0_9 = arith.constant 0 : index
    %c0_10 = arith.constant 0 : index
    %10 = vector.load %arg5[%c0_9, %c0_10] : memref<1x128xf32, #tpu.memory_space<vmem>>, vector<1x128xf32>
    %11 = vector.broadcast %10 : vector<1x128xf32> to vector<256x128xf32>
    %12 = arith.addf %9, %11 : vector<256x128xf32>
    %c0_11 = arith.constant 0 : index
    %c0_12 = arith.constant 0 : index
    %13 = vector.load %arg6[%c0_11, %c0_12] : memref<256x128xf32, #tpu.memory_space<vmem>>, vector<256x128xf32>
    tpu.vector_store %arg6[%c0_11, %c0_12], %12 {strides = array<i32>} : memref<256x128xf32, #tpu.memory_space<vmem>>, vector<256x128xf32>,
    return
  }
  func.func @transform_0(%arg0: i32) -> (i32, i32) {
    %c0_i32 = arith.constant 0 : i32
    %c0_i32_0 = arith.constant 0 : i32
    return %arg0, %c0_i32 : i32, i32
  }
  func.func @transform_1(%arg0: i32) -> (i32, i32) {
    %c0_i32 = arith.constant 0 : i32
    %c0_i32_0 = arith.constant 0 : i32
    %c0_i32_1 = arith.constant 0 : i32
    return %c0_i32, %c0_i32_0 : i32, i32
  }
  func.func @transform_2(%arg0: i32) -> (i32, i32) {
    %c0_i32 = arith.constant 0 : i32
    %c0_i32_0 = arith.constant 0 : i32
    %c0_i32_1 = arith.constant 0 : i32
    return %c0_i32, %c0_i32_0 : i32, i32
  }
  func.func @transform_3(%arg0: i32) -> (i32, i32) {
    %c0_i32 = arith.constant 0 : i32
    %c0_i32_0 = arith.constant 0 : i32
    %c0_i32_1 = arith.constant 0 : i32
    return %c0_i32, %c0_i32_0 : i32, i32
  }
  func.func @transform_4(%arg0: i32) -> (i32, i32) {
    %c0_i32 = arith.constant 0 : i32
    %c0_i32_0 = arith.constant 0 : i32
    %c0_i32_1 = arith.constant 0 : i32
    return %c0_i32, %c0_i32_0 : i32, i32
  }
  func.func @transform_5(%arg0: i32) -> (i32, i32) {
    %c0_i32 = arith.constant 0 : i32
    %c0_i32_0 = arith.constant 0 : i32
    return %arg0, %c0_i32 : i32, i32
  }
}

</mosaic_0001>

<bundles_post_ra>
// kernel: tpu_custom_call.1
= control target key start
LH: loop header
LB: loop body
LE: loop exit
PB: predicated region body
PF: predicated region fallthrough
CT: control target
= control target key end

     0   :  { %10 = vsyncpa [#allocation3], 0  ;;  %s9533_s0 = inlined_call_operand.hbm [shape: f32[256,256], index: 0, kind: input, shape index: {}]   ;;  %s9534_s1 = inlined_call_operand.hbm [shape: f32[256,128], index: 1, kind: input, shape index: {}]   ;;  %s9535_s2 = inlined_call_operand.vmem [shape: f32[1,128], index: 2, kind: input, shape index: {}]   ;;  %s9536_s3 = inlined_call_operand.hbm [shape: f32[128,128], index: 3, kind: input, shape index: {}]   ;;  %s9537_s4 = inlined_call_operand.vmem [shape: f32[1,128], index: 4, kind: input, shape index: {}]   ;;  %s9538_s5 = inlined_call_operand.hbm [shape: f32[256,128], index: 5, kind: output, shape index: {}]  }
   0x1   :  { %11 = vsyncpa [#allocation6], 0 }
   0x2   :  { %12 = vsyncpa [#allocation4], 0  ;;  %s6739_s18 = smov [#allocation5]   ;;  %s6645_s22 = scalar_lea.hbm %s9534_s1, 4096 }
   0x3   :  { %s30_s19 = sshll.u32 %s6739_s18, 4  ;;  %p6646_p0 = scmp.ne.s32.totalorder %s9534_s1, %s6645_s22  ;;  %s31_s19 = int_to_ptr.vmem [resolvable:$true] %s30_s19 }
   0x4   :  { %p6649_p1 = scmp.lt.u32.totalorder %s6645_s22, %s9534_s1 }
   0x6   :  { %p6651_p2 = pnand %p6649_p1, %p6646_p0 }
   0x8   :  { %6654 = shalt.err (!%p6651_p2)
}
   0x9   :  { %s6655_s27 = scalar_lea.vmem %s31_s19, 4096  ;;  %p6660_p4 = scmp.lt.s32.totalorder %s31_s19, %s31_s19 }
   0xa   :  { %p6656_p3 = scmp.ne.s32.totalorder %s31_s19, %s6655_s27  ;;  %p6661_p5 = scmp.lt.s32.totalorder %s6655_s27, %s6655_s27 }
   0xc   :  { %p6662_p6 = por %p6661_p5, %p6660_p4 }
   0xe   :  { %p6663_p7 = pnand %p6662_p6, %p6656_p3 }
  0x10   :  { %6666 = shalt.err (!%p6663_p7)
}
  0x11   :  { %s6740_s28 = smov 128   ;;  %s6741_s29 = smov 8  }
  0x12   :  { %36 = dma.hbm_to_vmem [thread:$0]  %s9534_s1, 4096, %s31_s19, [#allocation6], %s6740_s28, %s6740_s28, %s6741_s29  }
  0x13   :  { %s6742_s7 = smov [#allocation2]   ;;  %s6667_s11 = scalar_lea.hbm %s9533_s0, 8192 }
  0x14   :  { %s18_s8 = sshll.u32 %s6742_s7, 4  ;;  %p6668_p8 = scmp.ne.s32.totalorder %s9533_s0, %s6667_s11  ;;  %s19_s8 = int_to_ptr.vmem [resolvable:$true] %s18_s8 }
  0x15   :  { %p6671_p9 = scmp.lt.u32.totalorder %s6667_s11, %s9533_s0 }
  0x17   :  { %p6673_p10 = pnand %p6671_p9, %p6668_p8 }
  0x19   :  { %6676 = shalt.err (!%p6673_p10)
}
  0x1a   :  { %s6677_s16 = scalar_lea.vmem %s19_s8, 8192  ;;  %p6682_p12 = scmp.lt.s32.totalorder %s19_s8, %s19_s8 }
  0x1b   :  { %p6678_p11 = scmp.ne.s32.totalorder %s19_s8, %s6677_s16  ;;  %p6683_p13 = scmp.lt.s32.totalorder %s6677_s16, %s6677_s16 }
  0x1d   :  { %p6684_p0 = por %p6683_p13, %p6682_p12 }
  0x1f   :  { %p6685_p1 = pnand %p6684_p0, %p6678_p11 }
  0x21   :  { %6688 = shalt.err (!%p6685_p1)
}
  0x22   :  { %s6743_s1 = smov 256   ;;  %s6744_s17 = smov 16  }
  0x23   :  { %24 = dma.hbm_to_vmem [thread:$0]  %s9533_s0, 8192, %s19_s8, [#allocation3], %s6743_s1, %s6743_s1, %s6744_s17  }
  0x24   :  { %s6745_s20 = smov [#allocation7]   ;;  %s6689_s24 = scalar_lea.hbm %s9536_s3, 2048 }
  0x25   :  { %s44_s21 = sshll.u32 %s6745_s20, 4  ;;  %p6690_p2 = scmp.ne.s32.totalorder %s9536_s3, %s6689_s24  ;;  %s45_s21 = int_to_ptr.vmem [resolvable:$true] %s44_s21 }
  0x26   :  { %p6693_p3 = scmp.lt.u32.totalorder %s6689_s24, %s9536_s3 }
  0x28   :  { %p6695_p4 = pnand %p6693_p3, %p6690_p2 }
  0x2a   :  { %6698 = shalt.err (!%p6695_p4)
}
  0x2b   :  { %s6699_s6 = scalar_lea.vmem %s45_s21, 2048  ;;  %p6704_p6 = scmp.lt.s32.totalorder %s45_s21, %s45_s21 }
  0x2c   :  { %p6700_p5 = scmp.ne.s32.totalorder %s45_s21, %s6699_s6  ;;  %p6705_p7 = scmp.lt.s32.totalorder %s6699_s6, %s6699_s6 }
  0x2e   :  { %p6706_p8 = por %p6705_p7, %p6704_p6 }
  0x30   :  { %p6707_p9 = pnand %p6706_p8, %p6700_p5 }
  0x32   :  { %6710 = shalt.err (!%p6707_p9)
}
  0x33   :  { %50 = dma.hbm_to_vmem [thread:$0]  %s9536_s3, 2048, %s45_s21, [#allocation6], %s6740_s28, %s6740_s28, %s6741_s29  }
  0x34   :  { %6733 = dma.done.wait [#allocation3], 8192  }
  0x35   :  { %6734 = vsyncadd [#allocation3], 4294959104 }
  0x36   :  { %6735 = dma.done.wait [#allocation6], 6144  }
  0x37   :  { %6736 = vsyncadd [#allocation6], 4294961152  ;;  %v9577_v0 = vmov 0.0|0.0   ;;  %v6822_v1 = vld [vmem:[#allocation5] sm:$0xff]  ;;  %v6824_v2 = vld [vmem:[#allocation5 + $0x8] sm:$0xff] }
  0x38   :  { %5660 = vmatprep.subr.bf16.mxu0 %v9577_v0  ;;  %5612 = vmatprep.subr.bf16.mxu1 %v9577_v0  ;;  %v6826_v3 = vld [vmem:[#allocation5 + $0x10] sm:$0xff]  ;;  %v9573_v4 = vand.u32 4294901760, %v6822_v1  ;;  %v9571_v5 = vand.u32 4294901760, %v6824_v2  ;;  %v6830_v6 = vld [vmem:[#allocation5 + $0x18] sm:$0xff]  ;;  %v6833_v8 = vld [vmem:[#allocation5 + $0x20] sm:$0xff] }
  0x39   :  { %v9569_v7 = vand.u32 4294901760, %v6826_v3  ;;  %v6835_v9 = vld [vmem:[#allocation5 + $0x28] sm:$0xff]  ;;  %v9567_v10 = vand.u32 4294901760, %v6830_v6  ;;  %v9564_v11 = vand.u32 4294901760, %v6833_v8  ;;  %v6840_v13 = vld [vmem:[#allocation5 + $0x30] sm:$0xff]  ;;  %v6842_v14 = vld [vmem:[#allocation5 + $0x38] sm:$0xff] }
  0x3a   :  { %v9563_v12 = vand.u32 4294901760, %v6835_v9  ;;  %v6847_v15 = vsub.f32 %v6822_v1, %v9573_v4  ;;  %v6852_v16 = vsub.f32 %v6824_v2, %v9571_v5  ;;  %v9560_v18 = vand.u32 4294901760, %v6840_v13  ;;  %v6912_v39 = vld [vmem:[#allocation5 + $0x40] sm:$0xff]  ;;  %v6914_v40 = vld [vmem:[#allocation5 + $0x48] sm:$0xff]  ;;  %v6916_v44 = vld [vmem:[#allocation5 + $0x50] sm:$0xff] }
  0x3b   :  { %v6857_v17 = vsub.f32 %v6826_v3, %v9569_v7  ;;  %v6863_v19 = vsub.f32 %v6830_v6, %v9567_v10  ;;  %v6868_v20 = vsub.f32 %v6833_v8, %v9564_v11  ;;  %v9559_v22 = vand.u32 4294901760, %v6842_v14  ;;  %v6921_v47 = vld [vmem:[#allocation5 + $0x58] sm:$0xff]  ;;  %v6923_v48 = vld [vmem:[#allocation5 + $0x60] sm:$0xff]  ;;  %v6929_v53 = vld [vmem:[#allocation5 + $0x68] sm:$0xff] }
  0x3c   :  { %10042 = vst [vmem:[#allocation12_spill] sm:$0xff] %v6847_v15  ;;  %10043 = vst [vmem:[#allocation13_spill] sm:$0xff] %v6852_v16  ;;  %v6873_v21 = vsub.f32 %v6835_v9, %v9563_v12  ;;  %v9548_v23 = vand.u32 4294901760, %v6847_v15  ;;  %v9545_v24 = vand.u32 4294901760, %v6852_v16  ;;  %v6882_v26 = vsub.f32 %v6840_v13, %v9560_v18  ;;  %v6931_v54 = vld [vmem:[#allocation5 + $0x70] sm:$0xff]  ;;  %v6952_v63 = vld [vmem:[#allocation5 + $0x78] sm:$0xff] }
  0x3d   :  { %10044 = vst [vmem:[#allocation14_spill] sm:$0xff] %v6857_v17  ;;  %10045 = vst [vmem:[#allocation15_spill] sm:$0xff] %v6863_v19  ;;  %v9544_v25 = vand.u32 4294901760, %v6857_v17  ;;  %v9543_v27 = vand.u32 4294901760, %v6863_v19  ;;  %v9542_v28 = vand.u32 4294901760, %v6868_v20  ;;  %v6890_v30 = vsub.f32 %v6842_v14, %v9559_v22  ;;  %v7050_v12 = vld [vmem:[#allocation5 + $0xa8] sm:$0xff] }
  0x3e   :  { %10046 = vst [vmem:[#allocation16_spill] sm:$0xff] %v6868_v20  ;;  %10047 = vst [vmem:[#allocation17_spill] sm:$0xff] %v6873_v21  ;;  %v9541_v29 = vand.u32 4294901760, %v6873_v21  ;;  %v746_v31 = vsub.f32 %v6847_v15, %v9548_v23  ;;  %v753_v32 = vsub.f32 %v6852_v16, %v9545_v24  ;;  %v9540_v34 = vand.u32 4294901760, %v6882_v26 }
  0x3f   :  { %10048 = vst [vmem:[#allocation18_spill] sm:$0xff] %v6882_v26  ;;  %10049 = vst [vmem:[#allocation19_spill] sm:$0xff] %v6890_v30  ;;  %v760_v33 = vsub.f32 %v6857_v17, %v9544_v25  ;;  %v767_v35 = vsub.f32 %v6863_v19, %v9543_v27  ;;  %v774_v36 = vsub.f32 %v6868_v20, %v9542_v28  ;;  %v9539_v38 = vand.u32 4294901760, %v6890_v30  ;;  %v6992_v27 = vld [vmem:[#allocation5 + $0x80] sm:$0xff] }
  0x40   :  { %v781_v37 = vsub.f32 %v6873_v21, %v9541_v29  ;;  %v747_v41 = vand.u32 4294901760, %v746_v31  ;;  %v754_v42 = vand.u32 4294901760, %v753_v32  ;;  %v788_v46 = vsub.f32 %v6882_v26, %v9540_v34  ;;  %10059 = vst [vmem:[#allocation29_spill] sm:$0xff] %v6992_v27  ;;  %10070 = vst [vmem:[#allocation40_spill] sm:$0xff] %v7050_v12 }
  0x41   :  { %v761_v43 = vand.u32 4294901760, %v760_v33  ;;  %v768_v45 = vand.u32 4294901760, %v767_v35  ;;  %v775_v50 = vand.u32 4294901760, %v774_v36  ;;  %v9558_v51 = vand.u32 4294901760, %v6912_v39 }
  0x42   :  { %v6925_v49 = vpack.c.bf16 %v754_v42, %v747_v41  ;;  %v9557_v52 = vand.u32 4294901760, %v6914_v40  ;;  %v782_v56 = vand.u32 4294901760, %v781_v37  ;;  %v795_v57 = vsub.f32 %v6890_v30, %v9539_v38 }
  0x43   :  { %v6933_v55 = vpack.c.bf16 %v768_v45, %v761_v43  ;;  %v9556_v58 = vand.u32 4294901760, %v6916_v44  ;;  %v6943_v59 = vsub.f32 %v6912_v39, %v9558_v51  ;;  %v9552_v61 = vand.u32 4294901760, %v6921_v47 }
  0x44   :  { %10050 = vst [vmem:[#allocation20_spill] sm:$0xff] %v6925_v49  ;;  %5662 = vmatpush1.bf16.msra.mxu0 %v6925_v49  ;;  %v6948_v60 = vsub.f32 %v6914_v40, %v9557_v52  ;;  %v9550_v62 = vand.u32 4294901760, %v6923_v48  ;;  %v789_v31 = vand.u32 4294901760, %v788_v46  ;;  %v9549_v33 = vand.u32 4294901760, %v6929_v53 }
  0x45   :  { %10051 = vst [vmem:[#allocation21_spill] sm:$0xff] %v6933_v55  ;;  %10052 = vst [vmem:[#allocation22_spill] sm:$0xff] %v6943_v59  ;;  %5663 = vmatprep.subr.bf16.mxu0 %v9577_v0  ;;  %v6958_v32 = vsub.f32 %v6916_v44, %v9556_v58  ;;  %v9551_v35 = vand.u32 4294901760, %v6931_v54  ;;  %v9546_v36 = vand.u32 4294901760, %v6943_v59  ;;  %v6967_v41 = vsub.f32 %v6921_v47, %v9552_v61  ;;  %v7020_v61 = vld [vmem:[#allocation5 + $0x98] sm:$0xff] }
  0x46   :  { %10053 = vst [vmem:[#allocation23_spill] sm:$0xff] %v6948_v60  ;;  %v9547_v37 = vand.u32 4294901760, %v6948_v60  ;;  %v6972_v42 = vsub.f32 %v6923_v48, %v9550_v62  ;;  %v796_v43 = vand.u32 4294901760, %v795_v57  ;;  %v6978_v46 = vsub.f32 %v6929_v53, %v9549_v33  ;;  %10065 = vst [vmem:[#allocation35_spill] sm:$0xff] %v7020_v61 }
  0x47   :  { %10054 = vst [vmem:[#allocation24_spill] sm:$0xff] %v6958_v32  ;;  %10055 = vst [vmem:[#allocation25_spill] sm:$0xff] %v6967_v41  ;;  %v9553_v45 = vand.u32 4294901760, %v6958_v32  ;;  %v9554_v38 = vand.u32 4294901760, %v6952_v63  ;;  %v6982_v34 = vpack.c.bf16 %v782_v56, %v775_v50  ;;  %v802_v29 = vsub.f32 %v6943_v59, %v9546_v36  ;;  %v7001_v56 = vld [vmem:[#allocation5 + $0x88] sm:$0xff] }
  0x48   :  { %10056 = vst [vmem:[#allocation26_spill] sm:$0xff] %v6972_v42  ;;  %10057 = vst [vmem:[#allocation27_spill] sm:$0xff] %v6978_v46  ;;  %5665 = vmatpush1.bf16.msra.mxu0 %v6933_v55  ;;  %v809_v57 = vsub.f32 %v6948_v60, %v9547_v37  ;;  %v9555_v28 = vand.u32 4294901760, %v6967_v41  ;;  %v9561_v25 = vand.u32 4294901760, %v6972_v42  ;;  %v9562_v24 = vand.u32 4294901760, %v6978_v46 }
  0x49   :  { %10058 = vst [vmem:[#allocation28_spill] sm:$0xff] %v6982_v34  ;;  %5666 = vmatprep.subr.bf16.mxu0 %v9577_v0  ;;  %v6999_v50 = vsub.f32 %v6931_v54, %v9551_v35  ;;  %10061 = vst [vmem:[#allocation31_spill] sm:$0xff] %v7001_v56  ;;  %v7003_v36 = vpack.c.bf16 %v796_v43, %v789_v31  ;;  %v816_v37 = vsub.f32 %v6958_v32, %v9553_v45  ;;  %v7018_v43 = vld [vmem:[#allocation5 + $0x90] sm:$0xff] }
  0x4a   :  { %v7011_v23 = vsub.f32 %v6952_v63, %v9554_v38  ;;  %v803_v33 = vand.u32 4294901760, %v802_v29  ;;  %v810_v62 = vand.u32 4294901760, %v809_v57  ;;  %v823_v35 = vsub.f32 %v6967_v41, %v9555_v28  ;;  %10064 = vst [vmem:[#allocation34_spill] sm:$0xff] %v7018_v43 }
  0x4b   :  { %10060 = vst [vmem:[#allocation30_spill] sm:$0xff] %v6999_v50  ;;  %10062 = vst [vmem:[#allocation32_spill] sm:$0xff] %v7003_v36  ;;  %v9565_v31 = vand.u32 4294901760, %v6992_v27  ;;  %v9566_v45 = vand.u32 4294901760, %v7001_v56  ;;  %v830_v38 = vsub.f32 %v6972_v42, %v9561_v25  ;;  %v837_v29 = vsub.f32 %v6978_v46, %v9562_v24  ;;  %v7047_v24 = vld [vmem:[#allocation5 + $0xa0] sm:$0xff] }
  0x4c   :  { %10063 = vst [vmem:[#allocation33_spill] sm:$0xff] %v7011_v23  ;;  %5668 = vmatpush1.bf16.msra.mxu0 %v6982_v34  ;;  %v9568_v57 = vand.u32 4294901760, %v6999_v50  ;;  %v817_v28 = vand.u32 4294901760, %v816_v37  ;;  %v9570_v58 = vand.u32 4294901760, %v7011_v23  ;;  %v9572_v52 = vand.u32 4294901760, %v7018_v43  ;;  %10069 = vst [vmem:[#allocation39_spill] sm:$0xff] %v7047_v24 }
  0x4d   :  { %5669 = vmatprep.subr.bf16.mxu0 %v9577_v0  ;;  %v9574_v51 = vand.u32 4294901760, %v7020_v61  ;;  %v7035_v22 = vpack.c.bf16 %v810_v62, %v803_v33  ;;  %v824_v18 = vand.u32 4294901760, %v823_v35  ;;  %v7040_v25 = vsub.f32 %v6992_v27, %v9565_v31  ;;  %v7055_v35 = vld [vmem:[#allocation5 + $0xb0] sm:$0xff]  ;;  %v7057_v31 = vld [vmem:[#allocation5 + $0xb8] sm:$0xff] }
  0x4e   :  { %v7045_v37 = vsub.f32 %v7001_v56, %v9566_v45  ;;  %v831_v11 = vand.u32 4294901760, %v830_v38  ;;  %v838_v62 = vand.u32 4294901760, %v837_v29  ;;  %v844_v33 = vsub.f32 %v6999_v50, %v9568_v57  ;;  %10071 = vst [vmem:[#allocation41_spill] sm:$0xff] %v7055_v35  ;;  %10072 = vst [vmem:[#allocation42_spill] sm:$0xff] %v7057_v31  ;;  %v7195_v27 = vld [vmem:[#allocation5 + $0xf0] sm:$0xff] }
  0x4f   :  { %10066 = vst [vmem:[#allocation36_spill] sm:$0xff] %v7035_v22  ;;  %10067 = vst [vmem:[#allocation37_spill] sm:$0xff] %v7040_v25  ;;  %v851_v45 = vsub.f32 %v7011_v23, %v9570_v58  ;;  %v7065_v10 = vsub.f32 %v7018_v43, %v9572_v52  ;;  %v7070_v38 = vsub.f32 %v7020_v61, %v9574_v51  ;;  %v9579_v7 = vand.u32 4294901760, %v7040_v25  ;;  %v7089_v58 = vld [vmem:[#allocation5 + $0xc0] sm:$0xff] }
  0x50   :  { %5671 = vmatpush1.bf16.msra.mxu0 %v7003_v36  ;;  %10068 = vst [vmem:[#allocation38_spill] sm:$0xff] %v7045_v37  ;;  %v7074_v57 = vpack.c.bf16 %v824_v18, %v817_v28  ;;  %v9581_v5 = vand.u32 4294901760, %v7050_v12  ;;  %v9584_v52 = vand.u32 4294901760, %v7055_v35  ;;  %v9587_v4 = vand.u32 4294901760, %v7057_v31  ;;  %10078 = vst [vmem:[#allocation47_spill] sm:$0xff] %v7089_v58 }
  0x51   :  { %5672 = vmatprep.subr.bf16.mxu0 %v9577_v0  ;;  %10073 = vst [vmem:[#allocation43_spill] sm:$0xff] %v7065_v10  ;;  %10074 = vst [vmem:[#allocation44_spill] sm:$0xff] %v7070_v38  ;;  %v845_v51 = vand.u32 4294901760, %v844_v33  ;;  %v852_v36 = vand.u32 4294901760, %v851_v45  ;;  %v10076_v18 = vand.u32 4294901760, %v7047_v24  ;;  %v858_v33 = vsub.f32 %v7040_v25, %v9579_v7  ;;  %v7116_v7 = vld [vmem:[#allocation5 + $0xc8] sm:$0xff] }
  0x52   :  { %10075 = vst [vmem:[#allocation45_spill] sm:$0xff] %v7074_v57  ;;  %v10080_v45 = vand.u32 4294901760, %v7045_v37  ;;  %10085 = vst [vmem:[#allocation52_spill] sm:$0xff] %v7116_v7  ;;  %v10088_v55 = vand.u32 4294901760, %v7070_v38  ;;  %v10092_v49 = vand.u32 4294901760, %v7089_v58 }
  0x53   :  { %v7087_v28 = vsub.f32 %v7047_v24, %v10076_v18  ;;  %v10082_v18 = vmov 0.0|0.0   ;;  %10109 = vst [vmem:[#allocation66_spill] sm:$0xff] %v7195_v27 }
  0x54   :  { %5674 = vmatpush1.bf16.msra.mxu0 %v7035_v22  ;;  %v865_v29 = vsub.f32 %v7045_v37, %v10080_v45  ;;  %v7103_v22 = vsub.f32 %v7050_v12, %v9581_v5  ;;  %v10087_v5 = vand.u32 4294901760, %v7065_v10  ;;  %v7138_v12 = vld [vmem:[#allocation2 + $0x8] sm:$0xff] }
  0x55   :  { %5675 = vmatprep.subr.bf16.mxu0 %v9577_v0  ;;  %10077 = vst [vmem:[#allocation46_spill] sm:$0xff] %v7087_v28  ;;  %v7092_v0 = vpack.c.bf16 %v838_v62, %v831_v11  ;;  %v7109_v11 = vsub.f32 %v7055_v35, %v9584_v52  ;;  %v7114_v62 = vsub.f32 %v7057_v31, %v9587_v4  ;;  %v7128_v35 = vld [vmem:[#allocation5 + $0xd0] sm:$0xff]  ;;  %v859_v4 = vand.u32 4294901760, %v858_v33 }
  0x56   :  { %10081 = vst [vmem:[#allocation49_spill] sm:$0xff] %v7103_v22  ;;  %v872_v34 = vsub.f32 %v7065_v10, %v10087_v5  ;;  %v879_v52 = vsub.f32 %v7070_v38, %v10088_v55  ;;  %10089 = vst [vmem:[#allocation54_spill] sm:$0xff] %v7128_v35  ;;  %v866_v31 = vand.u32 4294901760, %v865_v29  ;;  %v7150_v5 = vld [vmem:[#allocation5 + $0xe0] sm:$0xff]  ;;  %v10097_v43 = vand.u32 4294901760, %v7103_v22 }
  0x57   :  { %10079 = vst [vmem:[#allocation48_spill] sm:$0xff] %v7092_v0  ;;  %10083 = vst [vmem:[#allocation50_spill] sm:$0xff] %v7109_v11  ;;  %v10098_v29 = vand.u32 4294901760, %v7116_v7  ;;  %v10102_v61 = vand.u32 4294901760, %v7109_v11 }
  0x58   :  { %5677 = vmatpush1.bf16.msra.mxu0 %v7074_v57  ;;  %10084 = vst [vmem:[#allocation51_spill] sm:$0xff] %v7114_v62  ;;  %v7119_v57 = vpack.c.bf16 %v852_v36, %v845_v51  ;;  %v7133_v36 = vld [vmem:[#allocation5 + $0xd8] sm:$0xff]  ;;  %10091 = vst [vmem:[#allocation56_spill] sm:$0xff] %v7138_v12  ;;  %v873_v33 = vand.u32 4294901760, %v872_v34  ;;  %v880_v45 = vand.u32 4294901760, %v879_v52  ;;  %v10094_v51 = vand.u32 4294901760, %v7087_v28 }
  0x59   :  { %5678 = vmatprep.subr.bf16.mxu0 %v10082_v18  ;;  %10090 = vst [vmem:[#allocation55_spill] sm:$0xff] %v7133_v36  ;;  %10095 = vst [vmem:[#allocation58_spill] sm:$0xff] %v7150_v5  ;;  %v7153_v55 = vpack.c.bf16 %v866_v31, %v859_v4  ;;  %v7161_v34 = vsub.f32 %v7116_v7, %v10098_v29  ;;  %v7163_v52 = vld [vmem:[#allocation5 + $0xe8] sm:$0xff]  ;;  %v900_v4 = vsub.f32 %v7109_v11, %v10102_v61 }
  0x5a   :  { %10086 = vst [vmem:[#allocation53_spill] sm:$0xff] %v7119_v57  ;;  %v886_v24 = vsub.f32 %v7087_v28, %v10094_v51  ;;  %10100 = vst [vmem:[#allocation61_spill] sm:$0xff] %v7163_v52  ;;  %v7166_v51 = vand.u32 4294901760, %v7138_v12  ;;  %v10103_v31 = vand.u32 4294901760, %v7114_v62  ;;  %v10104_v29 = vand.u32 4294901760, %v7128_v35 }
  0x5b   :  { %10096 = vst [vmem:[#allocation59_spill] sm:$0xff] %v7153_v55  ;;  %10099 = vst [vmem:[#allocation60_spill] sm:$0xff] %v7161_v34  ;;  %v10113_v12 = vand.u32 4294901760, %v7163_v52 }
  0x5c   :  { %5680 = vmatpush1.bf16.msra.mxu0 %v7092_v0  ;;  %v7143_v0 = vsub.f32 %v7089_v58, %v10092_v49  ;;  %v893_v49 = vsub.f32 %v7103_v22, %v10097_v43  ;;  %10101 = vst [vmem:[#allocation62_spill] sm:$0xff] %v7166_v51  ;;  %v907_v43 = vsub.f32 %v7114_v62, %v10103_v31  ;;  %v10106_v58 = vand.u32 4294901760, %v7133_v36 }
  0x5d   :  { %5681 = vmatprep.subr.bf16.mxu0 %v10082_v18  ;;  %v7179_v7 = vsub.f32 %v7128_v35, %v10104_v29  ;;  %967 = vmatprep.mubr.f32.mxu0 %v7166_v51  ;;  %v887_v29 = vand.u32 4294901760, %v886_v24  ;;  %v901_v51 = vand.u32 4294901760, %v900_v4  ;;  %v7217_v61 = vsub.f32 %v7163_v52, %v10113_v12 }
  0x5e   :  { %10093 = vst [vmem:[#allocation57_spill] sm:$0xff] %v7143_v0  ;;  %v7186_v56 = vsub.f32 %v7133_v36, %v10106_v58  ;;  %v894_v35 = vand.u32 4294901760, %v893_v49  ;;  %v908_v58 = vand.u32 4294901760, %v907_v43  ;;  %v7198_v36 = vld [vmem:[#allocation5 + $0xf8] sm:$0xff]  ;;  %v10111_v31 = vand.u32 4294901760, %v7143_v0 }
  0x5f   :  { %10105 = vst [vmem:[#allocation63_spill] sm:$0xff] %v7179_v7  ;;  %10110 = vst [vmem:[#allocation67_spill] sm:$0xff] %v7198_v36  ;;  %v10120_v43 = vand.u32 4294901760, %v7198_v36 }
  0x60   :  { %5683 = vmatpush1.bf16.msra.mxu0 %v7119_v57  ;;  %10107 = vst [vmem:[#allocation64_spill] sm:$0xff] %v7186_v56  ;;  %v7192_v57 = vpack.c.bf16 %v880_v45, %v873_v33  ;;  %v914_v45 = vsub.f32 %v7143_v0, %v10111_v31  ;;  %v10112_v33 = vand.u32 4294901760, %v7150_v5  ;;  %v7223_v24 = vpack.c.bf16 %v894_v35, %v887_v29 }
  0x61   :  { %5684 = vmatprep.subr.bf16.mxu0 %v10082_v18  ;;  %v7232_v12 = vpack.c.bf16 %v908_v58, %v901_v51  ;;  %v10119_v31 = vand.u32 4294901760, %v7195_v27  ;;  %v10125_v58 = vand.u32 4294901760, %v6824_v2  ;;  %v10128_v2 = vand.u32 4294901760, %v6826_v3 }
  0x62   :  { %10108 = vst [vmem:[#allocation65_spill] sm:$0xff] %v7192_v57  ;;  %v7209_v49 = vsub.f32 %v7150_v5, %v10112_v33  ;;  %10114 = vst [vmem:[#allocation68_spill] sm:$0xff] %v7223_v24  ;;  %v10115_v33 = vand.u32 4294901760, %v7161_v34  ;;  %v915_v29 = vand.u32 4294901760, %v914_v45  ;;  %v7259_v5 = vsub.f32 %v7198_v36, %v10120_v43 }
  0x63   :  { %10116 = vst [vmem:[#allocation69_spill] sm:$0xff] %v7232_v12  ;;  %v7251_v35 = vsub.f32 %v7195_v27, %v10119_v31  ;;  %v10122_v27 = vand.u32 4294901760, %v7217_v61  ;;  %v10133_v3 = vand.u32 4294901760, %v6835_v9  ;;  %v10137_v9 = vand.u32 4294901760, %v6842_v14 }
  0x64   :  { %5686 = vmatpush1.bf16.msra.mxu0 %v7153_v55  ;;  %v921_v4 = vsub.f32 %v7161_v34, %v10115_v33  ;;  %v10117_v55 = vand.u32 4294901760, %v7179_v7  ;;  %v9611_v31 = vand.u32 4294901760, %v7259_v5  ;;  %v10141_v14 = vand.u32 4294901760, %v6912_v39  ;;  %v7372_v39 = vld [vmem:[#allocation2 + $0x20] sm:$0xff] }
  0x65   :  { %5687 = vmatprep.subr.bf16.mxu0 %v10082_v18 }
  0x66   :  { %v928_v33 = vsub.f32 %v7179_v7, %v10117_v55  ;;  %v922_v55 = vand.u32 4294901760, %v921_v4 }
  0x68   :  { %5689 = vmatpush1.bf16.msra.mxu0 %v7192_v57  ;;  %v10118_v57 = vand.u32 4294901760, %v7186_v56  ;;  %v929_v45 = vand.u32 4294901760, %v928_v33  ;;  %v7281_v33 = vpack.c.bf16 %v922_v55, %v915_v29 }
  0x69   :  { %5690 = vmatprep.subr.bf16.mxu0 %v10082_v18 }
  0x6a   :  { %v935_v51 = vsub.f32 %v7186_v56, %v10118_v57  ;;  %v949_v57 = vsub.f32 %v7217_v61, %v10122_v27  ;;  %10123 = vst [vmem:[#allocation70_spill] sm:$0xff] %v7281_v33  ;;  %v10124_v27 = vand.u32 4294901760, %v6822_v1  ;;  %v963_v1 = vsub.f32 %v7259_v5, %v9611_v31 }
  0x6c   :  { %5692 = vmatpush1.bf16.msra.mxu0 %v7223_v24  ;;  %v10121_v24 = vand.u32 4294901760, %v7209_v49  ;;  %v936_v36 = vand.u32 4294901760, %v935_v51  ;;  %v7292_v43 = vpack.c.bf16 %v10125_v58, %v10124_v27  ;;  %v950_v55 = vand.u32 4294901760, %v949_v57 }
  0x6d   :  { %5693 = vmatprep.subr.bf16.mxu0 %v10082_v18  ;;  %v10129_v58 = vand.u32 4294901760, %v6830_v6  ;;  %v964_v57 = vand.u32 4294901760, %v963_v1  ;;  %v10132_v27 = vand.u32 4294901760, %v6833_v8  ;;  %v10136_v8 = vand.u32 4294901760, %v6840_v13  ;;  %v7352_v13 = vld [vmem:[#allocation2 + $0x28] sm:$0xff] }
  0x6e   :  { %v942_v4 = vsub.f32 %v7209_v49, %v10121_v24  ;;  %v9612_v24 = vand.u32 4294901760, %v7251_v35  ;;  %10126 = vst [vmem:[#allocation71_spill] sm:$0xff] %v7292_v43  ;;  %5614 = vmatpush1.bf16.msra.mxu1 %v7292_v43  ;;  %v7296_v29 = vpack.c.bf16 %v936_v36, %v929_v45 }
  0x6f   :  { %5615 = vmatprep.subr.bf16.mxu1 %v10082_v18  ;;  %v7321_v31 = vpack.c.bf16 %v10133_v3, %v10132_v27  ;;  %v10145_v3 = vpack.c.bf16 %v6852_v16, %v6847_v15  ;;  %v10176_v15 = vld [vmem:[#allocation35_spill] sm:$0xff] }
  0x70   :  { %5695 = vmatpush1.bf16.msra.mxu0 %v7232_v12  ;;  %v943_v52 = vand.u32 4294901760, %v942_v4  ;;  %10127 = vst [vmem:[#allocation72_spill] sm:$0xff] %v7296_v29  ;;  %v956_v51 = vsub.f32 %v7251_v35, %v9612_v24  ;;  %v7309_v4 = vpack.c.bf16 %v10129_v58, %v10128_v2  ;;  %v7348_v58 = vld [vmem:[#allocation2 + $0x10] sm:$0xff]  ;;  %v10151_v24 = vpack.c.bf16 %v6863_v19, %v6857_v17  ;;  %v10167_v19 = vld [vmem:[#allocation31_spill] sm:$0xff] }
  0x71   :  { %5696 = vmatprep.subr.bf16.mxu0 %v10082_v18  ;;  %10134 = vst [vmem:[#allocation75_spill] sm:$0xff] %v7321_v31  ;;  %v7362_v27 = vand.u32 4294901760, %v7348_v58  ;;  %v10168_v17 = vand.u32 4294901760, %v10167_v19  ;;  %v7471_v19 = vld [vmem:[#allocation2 + $0x78] sm:$0xff] }
  0x72   :  { %10130 = vst [vmem:[#allocation73_spill] sm:$0xff] %v7309_v4  ;;  %5617 = vmatpush1.bf16.msra.mxu1 %v7309_v4  ;;  %v7314_v36 = vpack.c.bf16 %v950_v55, %v943_v52  ;;  %v957_v45 = vand.u32 4294901760, %v956_v51  ;;  %v7328_v52 = vld [vmem:[#allocation2] sm:$0xff]  ;;  %v7332_v51 = vld [vmem:[#allocation2 + $0x18] sm:$0xff]  ;;  %v7338_v55 = vpack.c.bf16 %v10137_v9, %v10136_v8  ;;  %v7370_v8 = vand.u32 4294901760, %v7352_v13  ;;  %10173 = vst [vmem:[#allocation93_spill] sm:$0xff] %v7471_v19 }
  0x73   :  { %5618 = vmatprep.subr.bf16.mxu1 %v10082_v18  ;;  %v7341_v1 = vand.u32 4294901760, %v7328_v52  ;;  %v7346_v2 = vand.u32 4294901760, %v7332_v51  ;;  %10144 = vst [vmem:[#allocation81_spill] sm:$0xff] %v7362_v27  ;;  %v10147_v9 = vand.u32 4294901760, %v6916_v44 }
  0x74   :  { %5698 = vmatpush1.bf16.msra.mxu0 %v7281_v33  ;;  %10131 = vst [vmem:[#allocation74_spill] sm:$0xff] %v7314_v36  ;;  %v7326_v6 = vpack.c.bf16 %v964_v57, %v957_v45  ;;  %10138 = vst [vmem:[#allocation77_spill] sm:$0xff] %v7338_v55  ;;  %v10142_v45 = vand.u32 4294901760, %v6914_v40  ;;  %v7375_v40 = vld [vmem:[#allocation2 + $0x38] sm:$0xff]  ;;  %v10160_v33 = vand.u32 4294901760, %v6952_v63  ;;  %v7444_v63 = vld [vmem:[#allocation2 + $0x50] sm:$0xff] }
  0x75   :  { %5699 = vmatprep.subr.bf16.mxu0 %v10082_v18  ;;  %10139 = vst [vmem:[#allocation78_spill] sm:$0xff] %v7341_v1  ;;  %10140 = vst [vmem:[#allocation79_spill] sm:$0xff] %v7346_v2  ;;  %v7394_v44 = vand.u32 4294901760, %v7375_v40 }
  0x76   :  { %5620 = vmatpush1.bf16.msra.mxu1 %v7321_v31  ;;  %10135 = vst [vmem:[#allocation76_spill] sm:$0xff] %v7326_v6  ;;  %v7358_v57 = vpack.c.bf16 %v10142_v45, %v10141_v14  ;;  %10146 = vst [vmem:[#allocation82_spill] sm:$0xff] %v7370_v8  ;;  %v10148_v14 = vand.u32 4294901760, %v6921_v47  ;;  %v7396_v47 = vld [vmem:[#allocation2 + $0x30] sm:$0xff] }
  0x77   :  { %5621 = vmatprep.subr.bf16.mxu1 %v10082_v18  ;;  %10152 = vst [vmem:[#allocation85_spill] sm:$0xff] %v7394_v44 }
  0x78   :  { %5701 = vmatpush1.bf16.msra.mxu0 %v7296_v29  ;;  %10143 = vst [vmem:[#allocation80_spill] sm:$0xff] %v7358_v57  ;;  %v7381_v45 = vpack.c.bf16 %v10148_v14, %v10147_v9  ;;  %v7399_v9 = vld [vmem:[#allocation2 + $0x48] sm:$0xff]  ;;  %v10153_v14 = vand.u32 4294901760, %v6923_v48  ;;  %v10157_v29 = vpack.c.bf16 %v6873_v21, %v6868_v20  ;;  %v10163_v21 = vpack.c.bf16 %v6890_v30, %v6882_v26 }
  0x79   :  { %5702 = vmatprep.subr.bf16.mxu0 %v10082_v18  ;;  %v7418_v48 = vand.u32 4294901760, %v7399_v9  ;;  %v10171_v30 = vpack.c.bf16 %v6948_v60, %v6943_v59  ;;  %v10180_v60 = vpack.c.bf16 %v6967_v41, %v6958_v32  ;;  %v10190_v41 = vpack.c.bf16 %v6978_v46, %v6972_v42 }
  0x7a   :  { %5623 = vmatpush1.bf16.msra.mxu1 %v7338_v55  ;;  %10149 = vst [vmem:[#allocation83_spill] sm:$0xff] %v7381_v45  ;;  %v10200_v46 = vpack.c.bf16 %v7011_v23, %v6999_v50  ;;  %v10205_v23 = vld [vmem:[#allocation47_spill] sm:$0xff]  ;;  %v10207_v50 = vld [vmem:[#allocation52_spill] sm:$0xff] }
  0x7b   :  { %5624 = vmatprep.subr.bf16.mxu1 %v10082_v18  ;;  %10158 = vst [vmem:[#allocation88_spill] sm:$0xff] %v7418_v48  ;;  %v10208_v42 = vand.u32 4294901760, %v10207_v50 }
  0x7c   :  { %5704 = vmatpush1.bf16.msra.mxu0 %v7314_v36 }
  0x7d   :  { %5705 = vmatprep.subr.bf16.mxu0 %v10082_v18 }
  0x7e   :  { %5626 = vmatpush1.bf16.msra.mxu1 %v7358_v57 }
  0x7f   :  { %5627 = vmatprep.subr.bf16.mxu1 %v10082_v18 }
  0x80   :  { %5707 = vmatpush1.bf16.msra.mxu0 %v7326_v6  ;;  %v10154_v6 = vand.u32 4294901760, %v6929_v53  ;;  %v7420_v53 = vld [vmem:[#allocation2 + $0x40] sm:$0xff] }
  0x81   :  { %5708 = vmatprep.subr.bf16.mxu0 %v10082_v18 }
  0x82   :  { %5629 = vmatpush1.bf16.msra.mxu1 %v7381_v45  ;;  %v7405_v36 = vpack.c.bf16 %v10154_v6, %v10153_v14  ;;  %v7423_v6 = vld [vmem:[#allocation2 + $0x58] sm:$0xff]  ;;  %v10159_v14 = vand.u32 4294901760, %v6931_v54 }
  0x83   :  { %969 = vmatmul.mubr.f32.vlgmr.msra.gmra.mrb[0].mxu0 %v7341_v1  ;;  %5630 = vmatprep.subr.bf16.mxu1 %v10082_v18  ;;  %v7442_v54 = vand.u32 4294901760, %v7423_v6 }
  0x84   :  { %5710 = vmatpush1.bf16.msra.mxu0 %v10145_v3  ;;  %974 = vmatprep.mubr.f32.mxu0 %v7346_v2  ;;  %v7386_v3 = vand.u32 4294901760, %v7372_v39  ;;  %10155 = vst [vmem:[#allocation86_spill] sm:$0xff] %v7405_v36  ;;  %v7429_v12 = vpack.c.bf16 %v10160_v33, %v10159_v14  ;;  %v7447_v33 = vld [vmem:[#allocation2 + $0x68] sm:$0xff] }
  0x85   :  { %5711 = vmatprep.subr.bf16.mxu0 %v10082_v18  ;;  %10164 = vst [vmem:[#allocation91_spill] sm:$0xff] %v7442_v54  ;;  %v10165_v14 = vld [vmem:[#allocation29_spill] sm:$0xff] }
  0x86   :  { %10150 = vst [vmem:[#allocation84_spill] sm:$0xff] %v7386_v3  ;;  %5632 = vmatpush1.bf16.msra.mxu1 %v7405_v36  ;;  %10161 = vst [vmem:[#allocation89_spill] sm:$0xff] %v7429_v12  ;;  %v10166_v20 = vand.u32 4294901760, %v10165_v14  ;;  %v7466_v14 = vand.u32 4294901760, %v7447_v33  ;;  %v10186_v36 = vld [vmem:[#allocation40_spill] sm:$0xff] }
  0x87   :  { %976 = vmatmul.mubr.f32.gmra.mrb[2].mxu0 %v7362_v27  ;;  %5633 = vmatprep.subr.bf16.mxu1 %v10082_v18  ;;  %v10187_v45 = vand.u32 4294901760, %v10186_v36  ;;  %v7519_v36 = vld [vmem:[#allocation2 + $0x98] sm:$0xff] }
  0x88   :  { %5713 = vmatpush1.bf16.msra.mxu0 %v10151_v24  ;;  %981 = vmatprep.mubr.f32.mxu0 %v7370_v8  ;;  %v7410_v24 = vand.u32 4294901760, %v7396_v47  ;;  %v7453_v16 = vpack.c.bf16 %v10168_v17, %v10166_v20  ;;  %10172 = vst [vmem:[#allocation92_spill] sm:$0xff] %v7466_v14  ;;  %v7468_v17 = vld [vmem:[#allocation2 + $0x60] sm:$0xff]  ;;  %v10174_v20 = vld [vmem:[#allocation34_spill] sm:$0xff]  ;;  %10193 = vst [vmem:[#allocation99_spill] sm:$0xff] %v7519_v36 }
  0x89   :  { %5714 = vmatprep.subr.bf16.mxu0 %v10082_v18  ;;  %v10175_v26 = vand.u32 4294901760, %v10174_v20  ;;  %v7490_v20 = vand.u32 4294901760, %v7471_v19 }
  0x8a   :  { %10156 = vst [vmem:[#allocation87_spill] sm:$0xff] %v7410_v24  ;;  %5635 = vmatpush1.bf16.msra.mxu1 %v7429_v12  ;;  %10169 = vst [vmem:[#allocation29_spill] sm:$0xff] %v7453_v16  ;;  %v10177_v12 = vand.u32 4294901760, %v10176_v15  ;;  %v7492_v15 = vld [vmem:[#allocation2 + $0x70] sm:$0xff] }
  0x8b   :  { %983 = vmatmul.mubr.f32.gmra.mrb[4].mxu0 %v7386_v3  ;;  %5636 = vmatprep.subr.bf16.mxu1 %v10082_v18  ;;  %10181 = vst [vmem:[#allocation94_spill] sm:$0xff] %v7490_v20  ;;  %10182 = vst [vmem:[#allocation95_spill] sm:$0xff] %v7492_v15 }
  0x8c   :  { %5716 = vmatpush1.bf16.msra.mxu0 %v10157_v29  ;;  %988 = vmatprep.mubr.f32.mxu0 %v7394_v44  ;;  %v7434_v29 = vand.u32 4294901760, %v7420_v53 }
  0x8d   :  { %5717 = vmatprep.subr.bf16.mxu0 %v10082_v18 }
  0x8e   :  { %10162 = vst [vmem:[#allocation90_spill] sm:$0xff] %v7434_v29  ;;  %5638 = vmatpush1.bf16.msra.mxu1 %v7453_v16  ;;  %v7477_v16 = vpack.c.bf16 %v10177_v12, %v10175_v26  ;;  %v7495_v26 = vld [vmem:[#allocation2 + $0x88] sm:$0xff]  ;;  %v10184_v12 = vld [vmem:[#allocation39_spill] sm:$0xff] }
  0x8f   :  { %990 = vmatmul.mubr.f32.gmra.mrb[6].mxu0 %v7410_v24  ;;  %5639 = vmatprep.subr.bf16.mxu1 %v10082_v18  ;;  %10183 = vst [vmem:[#allocation96_spill] sm:$0xff] %v7495_v26  ;;  %v10185_v59 = vand.u32 4294901760, %v10184_v12  ;;  %v7514_v12 = vand.u32 4294901760, %v7495_v26  ;;  %v7563_v26 = vld [vmem:[#allocation2 + $0xa0] sm:$0xff] }
  0x90   :  { %5719 = vmatpush1.bf16.msra.mxu0 %v10163_v21  ;;  %995 = vmatprep.mubr.f32.mxu0 %v7418_v48  ;;  %v7458_v21 = vand.u32 4294901760, %v7444_v63  ;;  %10178 = vst [vmem:[#allocation34_spill] sm:$0xff] %v7477_v16  ;;  %10212 = vst [vmem:[#allocation104_spill] sm:$0xff] %v7563_v26 }
  0x91   :  { %5720 = vmatprep.subr.bf16.mxu0 %v10082_v18  ;;  %10191 = vst [vmem:[#allocation97_spill] sm:$0xff] %v7514_v12 }
  0x92   :  { %10170 = vst [vmem:[#allocation31_spill] sm:$0xff] %v7458_v21  ;;  %5641 = vmatpush1.bf16.msra.mxu1 %v7477_v16  ;;  %v7501_v16 = vpack.c.bf16 %v10187_v45, %v10185_v59  ;;  %v7516_v59 = vld [vmem:[#allocation2 + $0x80] sm:$0xff]  ;;  %v10194_v45 = vld [vmem:[#allocation41_spill] sm:$0xff] }
  0x93   :  { %997 = vmatmul.mubr.f32.gmra.mrb[8].mxu0 %v7434_v29  ;;  %5642 = vmatprep.subr.bf16.mxu1 %v10082_v18  ;;  %10192 = vst [vmem:[#allocation98_spill] sm:$0xff] %v7516_v59  ;;  %v10195_v32 = vand.u32 4294901760, %v10194_v45  ;;  %v7538_v45 = vand.u32 4294901760, %v7519_v36  ;;  %v10210_v36 = vpack.c.bf16 %v7045_v37, %v7040_v25  ;;  %v10220_v25 = vld [vmem:[#allocation54_spill] sm:$0xff] }
  0x94   :  { %5722 = vmatpush1.bf16.msra.mxu0 %v10171_v30  ;;  %1002 = vmatprep.mubr.f32.mxu0 %v7442_v54  ;;  %v7482_v30 = vand.u32 4294901760, %v7468_v17  ;;  %10188 = vst [vmem:[#allocation39_spill] sm:$0xff] %v7501_v16 }
  0x95   :  { %5723 = vmatprep.subr.bf16.mxu0 %v10082_v18  ;;  %10201 = vst [vmem:[#allocation100_spill] sm:$0xff] %v7538_v45 }
  0x96   :  { %10179 = vst [vmem:[#allocation35_spill] sm:$0xff] %v7482_v30  ;;  %5644 = vmatpush1.bf16.msra.mxu1 %v7501_v16 }
  0x97   :  { %1004 = vmatmul.mubr.f32.gmra.mrb[10].mxu0 %v7458_v21  ;;  %5645 = vmatprep.subr.bf16.mxu1 %v10082_v18 }
  0x98   :  { %5725 = vmatpush1.bf16.msra.mxu0 %v10180_v60  ;;  %1009 = vmatprep.mubr.f32.mxu0 %v7466_v14  ;;  %v7506_v60 = vand.u32 4294901760, %v7492_v15  ;;  %v10196_v15 = vld [vmem:[#allocation42_spill] sm:$0xff] }
  0x99   :  { %5726 = vmatprep.subr.bf16.mxu0 %v10082_v18  ;;  %v10197_v19 = vand.u32 4294901760, %v10196_v15 }
  0x9a   :  { %10189 = vst [vmem:[#allocation40_spill] sm:$0xff] %v7506_v60 }
  0x9b   :  { %1011 = vmatmul.mubr.f32.gmra.mrb[12].mxu0 %v7482_v30  ;;  %v7525_v16 = vpack.c.bf16 %v10197_v19, %v10195_v32  ;;  %v7540_v32 = vld [vmem:[#allocation2 + $0x90] sm:$0xff]  ;;  %v7543_v19 = vld [vmem:[#allocation2 + $0xa8] sm:$0xff] }
  0x9c   :  { %5728 = vmatpush1.bf16.msra.mxu0 %v10190_v41  ;;  %1016 = vmatprep.mubr.f32.mxu0 %v7490_v20  ;;  %v7530_v41 = vand.u32 4294901760, %v7516_v59  ;;  %10202 = vst [vmem:[#allocation101_spill] sm:$0xff] %v7540_v32  ;;  %10203 = vst [vmem:[#allocation102_spill] sm:$0xff] %v7543_v19  ;;  %v7548_v15 = vand.u32 4294901760, %v7540_v32  ;;  %v7561_v59 = vand.u32 4294901760, %v7543_v19  ;;  %v7566_v32 = vld [vmem:[#allocation2 + $0xb8] sm:$0xff] }
  0x9d   :  { %5729 = vmatprep.subr.bf16.mxu0 %v10082_v18  ;;  %10198 = vst [vmem:[#allocation41_spill] sm:$0xff] %v7525_v16  ;;  %5647 = vmatpush1.bf16.msra.mxu1 %v7525_v16  ;;  %10213 = vst [vmem:[#allocation105_spill] sm:$0xff] %v7566_v32  ;;  %v7579_v50 = vand.u32 4294901760, %v7566_v32  ;;  %v10225_v32 = vpack.c.bf16 %v7103_v22, %v7087_v28  ;;  %v7603_v19 = vld [vmem:[#allocation2 + $0xc0] sm:$0xff]  ;;  %v10235_v28 = vld [vmem:[#allocation58_spill] sm:$0xff] }
  0x9e   :  { %10199 = vst [vmem:[#allocation42_spill] sm:$0xff] %v7530_v41  ;;  %5648 = vmatprep.subr.bf16.mxu1 %v10082_v18  ;;  %10204 = vst [vmem:[#allocation103_spill] sm:$0xff] %v7548_v15 }
  0x9f   :  { %1018 = vmatmul.mubr.f32.gmra.mrb[14].mxu0 %v7506_v60  ;;  %10211 = vst [vmem:[#allocation52_spill] sm:$0xff] %v7561_v59  ;;  %10216 = vst [vmem:[#allocation107_spill] sm:$0xff] %v7579_v50 }
  0xa0   :  { %5731 = vmatpush1.bf16.msra.mxu0 %v10200_v46  ;;  %1023 = vmatprep.mubr.f32.mxu0 %v7514_v12  ;;  %v10206_v46 = vand.u32 4294901760, %v10205_v23  ;;  %v7572_v23 = vand.u32 4294901760, %v7563_v26  ;;  %10227 = vst [vmem:[#allocation111_spill] sm:$0xff] %v7603_v19 }
  0xa1   :  { %5732 = vmatprep.subr.bf16.mxu0 %v10082_v18 }
  0xa2   :  { %v7554_v16 = vpack.c.bf16 %v10208_v42, %v10206_v46  ;;  %10214 = vst [vmem:[#allocation106_spill] sm:$0xff] %v7572_v23  ;;  %v10215_v42 = vpack.c.bf16 %v7070_v38, %v7065_v10  ;;  %v7584_v46 = vld [vmem:[#allocation2 + $0xc8] sm:$0xff]  ;;  %v10222_v38 = vld [vmem:[#allocation55_spill] sm:$0xff] }
  0xa3   :  { %1025 = vmatmul.mubr.f32.gmra.mrb[16].mxu0 %v7530_v41  ;;  %10218 = vst [vmem:[#allocation109_spill] sm:$0xff] %v7584_v46  ;;  %v7601_v26 = vand.u32 4294901760, %v7584_v46  ;;  %v7643_v46 = vld [vmem:[#allocation2 + $0xe0] sm:$0xff] }
  0xa4   :  { %10209 = vst [vmem:[#allocation47_spill] sm:$0xff] %v7554_v16  ;;  %5734 = vmatpush1.bf16.msra.mxu0 %v10210_v36  ;;  %1030 = vmatprep.mubr.f32.mxu0 %v7538_v45  ;;  %v7581_v36 = vld [vmem:[#allocation2 + $0xb0] sm:$0xff]  ;;  %10242 = vst [vmem:[#allocation118_spill] sm:$0xff] %v7643_v46 }
  0xa5   :  { %5735 = vmatprep.subr.bf16.mxu0 %v10082_v18  ;;  %5650 = vmatpush1.bf16.msra.mxu1 %v7554_v16  ;;  %10217 = vst [vmem:[#allocation108_spill] sm:$0xff] %v7581_v36  ;;  %v7588_v37 = vand.u32 4294901760, %v7581_v36  ;;  %v10221_v16 = vand.u32 4294901760, %v10220_v25  ;;  %10226 = vst [vmem:[#allocation55_spill] sm:$0xff] %v7601_v26  ;;  %v7606_v36 = vld [vmem:[#allocation2 + $0xd8] sm:$0xff]  ;;  %v10230_v25 = vpack.c.bf16 %v7114_v62, %v7109_v11  ;;  %v10237_v62 = vld [vmem:[#allocation61_spill] sm:$0xff] }
  0xa6   :  { %5651 = vmatprep.subr.bf16.mxu1 %v10082_v18  ;;  %10228 = vst [vmem:[#allocation112_spill] sm:$0xff] %v7606_v36 }
  0xa7   :  { %1032 = vmatmul.mubr.f32.gmra.mrb[18].mxu0 %v7548_v15  ;;  %10219 = vst [vmem:[#allocation110_spill] sm:$0xff] %v7588_v37 }
  0xa8   :  { %5737 = vmatpush1.bf16.msra.mxu0 %v10215_v42  ;;  %1037 = vmatprep.mubr.f32.mxu0 %v7561_v59  ;;  %v10223_v42 = vand.u32 4294901760, %v10222_v38  ;;  %v7619_v38 = vand.u32 4294901760, %v7606_v36  ;;  %v10240_v36 = vpack.c.bf16 %v7161_v34, %v7143_v0  ;;  %v10248_v34 = vld [vmem:[#allocation66_spill] sm:$0xff] }
  0xa9   :  { %5738 = vmatprep.subr.bf16.mxu0 %v10082_v18  ;;  %v10249_v0 = vand.u32 4294901760, %v10248_v34  ;;  %v7696_v34 = vsub.f32 %v7332_v51, %v7346_v2  ;;  %v7714_v51 = vsub.f32 %v7372_v39, %v7386_v3  ;;  %v7731_v39 = vsub.f32 %v7399_v9, %v7418_v48 }
  0xaa   :  { %v7594_v10 = vpack.c.bf16 %v10223_v42, %v10221_v16  ;;  %v7612_v16 = vand.u32 4294901760, %v7603_v19  ;;  %10231 = vst [vmem:[#allocation114_spill] sm:$0xff] %v7619_v38  ;;  %v7624_v42 = vld [vmem:[#allocation2 + $0xe8] sm:$0xff]  ;;  %v7750_v9 = vsub.f32 %v7444_v63, %v7458_v21 }
  0xab   :  { %1039 = vmatmul.mubr.f32.gmra.mrb[20].mxu0 %v7572_v23  ;;  %10233 = vst [vmem:[#allocation116_spill] sm:$0xff] %v7624_v42  ;;  %v7641_v19 = vand.u32 4294901760, %v7624_v42  ;;  %v10257_v63 = vld [vmem:[#allocation93_spill] sm:$0xff] }
  0xac   :  { %10224 = vst [vmem:[#allocation54_spill] sm:$0xff] %v7594_v10  ;;  %5740 = vmatpush1.bf16.msra.mxu0 %v10225_v32  ;;  %1044 = vmatprep.mubr.f32.mxu0 %v7579_v50  ;;  %10229 = vst [vmem:[#allocation113_spill] sm:$0xff] %v7612_v16  ;;  %v7621_v32 = vld [vmem:[#allocation2 + $0xd0] sm:$0xff] }
  0xad   :  { %5741 = vmatprep.subr.bf16.mxu0 %v10082_v18  ;;  %5653 = vmatpush1.bf16.msra.mxu1 %v7594_v10  ;;  %10232 = vst [vmem:[#allocation115_spill] sm:$0xff] %v7621_v32  ;;  %v7628_v22 = vand.u32 4294901760, %v7621_v32  ;;  %v10236_v10 = vand.u32 4294901760, %v10235_v28  ;;  %10241 = vst [vmem:[#allocation61_spill] sm:$0xff] %v7641_v19  ;;  %v7646_v32 = vld [vmem:[#allocation2 + $0xf8] sm:$0xff]  ;;  %v10245_v28 = vpack.c.bf16 %v7186_v56, %v7179_v7  ;;  %v10254_v7 = vld [vmem:[#allocation62_spill] sm:$0xff] }
  0xae   :  { %5654 = vmatprep.subr.bf16.mxu1 %v10082_v18  ;;  %10243 = vst [vmem:[#allocation119_spill] sm:$0xff] %v7646_v32 }
  0xaf   :  { %1046 = vmatmul.mubr.f32.gmra.mrb[22].mxu0 %v7588_v37  ;;  %10234 = vst [vmem:[#allocation117_spill] sm:$0xff] %v7628_v22 }
  0xb0   :  { %5743 = vmatpush1.bf16.msra.mxu0 %v10230_v25  ;;  %1051 = vmatprep.mubr.f32.mxu0 %v7601_v26  ;;  %v10238_v25 = vand.u32 4294901760, %v10237_v62  ;;  %v7659_v62 = vand.u32 4294901760, %v7646_v32  ;;  %v10255_v32 = vld [vmem:[#allocation56_spill] sm:$0xff] }
  0xb1   :  { %5744 = vmatprep.subr.bf16.mxu0 %v10082_v18  ;;  %v7680_v42 = vsub.f32 %v10255_v32, %v10254_v7  ;;  %v7767_v32 = vsub.f32 %v10257_v63, %v7490_v20  ;;  %v10262_v63 = vld [vmem:[#allocation98_spill] sm:$0xff] }
  0xb2   :  { %v7634_v11 = vpack.c.bf16 %v10238_v25, %v10236_v10  ;;  %v7652_v10 = vand.u32 4294901760, %v7643_v46  ;;  %10246 = vst [vmem:[#allocation121_spill] sm:$0xff] %v7659_v62  ;;  %v7786_v20 = vsub.f32 %v10262_v63, %v7530_v41  ;;  %v10266_v63 = vld [vmem:[#allocation102_spill] sm:$0xff] }
  0xb3   :  { %1053 = vmatmul.mubr.f32.gmra.mrb[24].mxu0 %v7612_v16  ;;  %v7803_v41 = vsub.f32 %v10266_v63, %v7561_v59  ;;  %v10271_v63 = vld [vmem:[#allocation108_spill] sm:$0xff] }
  0xb4   :  { %10239 = vst [vmem:[#allocation58_spill] sm:$0xff] %v7634_v11  ;;  %5746 = vmatpush1.bf16.msra.mxu0 %v10240_v36  ;;  %1058 = vmatprep.mubr.f32.mxu0 %v7619_v38  ;;  %10244 = vst [vmem:[#allocation120_spill] sm:$0xff] %v7652_v10  ;;  %v7661_v36 = vld [vmem:[#allocation2 + $0xf0] sm:$0xff]  ;;  %v7822_v59 = vsub.f32 %v10271_v63, %v7588_v37  ;;  %v10275_v63 = vld [vmem:[#allocation112_spill] sm:$0xff] }
  0xb5   :  { %5747 = vmatprep.subr.bf16.mxu0 %v10082_v18  ;;  %5656 = vmatpush1.bf16.msra.mxu1 %v7634_v11  ;;  %v7666_v25 = vand.u32 4294901760, %v7661_v36  ;;  %v10250_v11 = vld [vmem:[#allocation67_spill] sm:$0xff]  ;;  %v7839_v37 = vsub.f32 %v10275_v63, %v7619_v38  ;;  %v95_v63 = vld [vmem:[#allocation2 + $0x108] sm:$0xff]  ;;  %v10280_v38 = vld [vmem:[#allocation118_spill] sm:$0xff] }
  0xb6   :  { %5657 = vmatprep.subr.bf16.mxu1 %v10082_v18  ;;  %v10251_v46 = vand.u32 4294901760, %v10250_v11  ;;  %v10256_v11 = vpack.c.bf16 %v7259_v5, %v7251_v35  ;;  %v7865_v21 = vand.u32 4294901760, %v95_v63 }
  0xb7   :  { %1060 = vmatmul.mubr.f32.gmra.mrb[26].mxu0 %v7628_v22  ;;  %10247 = vst [vmem:[#allocation122_spill] sm:$0xff] %v7666_v25 }
  0xb8   :  { %5749 = vmatpush1.bf16.msra.mxu0 %v10245_v28  ;;  %1065 = vmatprep.mubr.f32.mxu0 %v7641_v19  ;;  %v7672_v56 = vpack.c.bf16 %v10251_v46, %v10249_v0  ;;  %v10253_v28 = vpack.c.bf16 %v7217_v61, %v7209_v49  ;;  %v7687_v0 = vsub.f32 %v7328_v52, %v7341_v1 }
  0xb9   :  { %5750 = vmatprep.subr.bf16.mxu0 %v10082_v18  ;;  %v7702_v52 = vsub.f32 %v7348_v58, %v7362_v27  ;;  %v7708_v46 = vsub.f32 %v7352_v13, %v7370_v8  ;;  %v7720_v58 = vsub.f32 %v7375_v40, %v7394_v44  ;;  %v7726_v13 = vsub.f32 %v7396_v47, %v7410_v24  ;;  %v103_v44 = vld [vmem:[#allocation2 + $0x148] sm:$0xff]  ;;  %v105_v8 = vld [vmem:[#allocation2 + $0x158] sm:$0xff] }
  0xba   :  { %10252 = vst [vmem:[#allocation66_spill] sm:$0xff] %v7672_v56  ;;  %5659 = vmatpush1.bf16.msra.mxu1 %v7672_v56  ;;  %v7738_v40 = vsub.f32 %v7420_v53, %v7434_v29  ;;  %v7743_v47 = vsub.f32 %v7423_v6, %v7442_v54  ;;  %v7755_v53 = vsub.f32 %v7447_v33, %v7466_v14  ;;  %v10259_v33 = vld [vmem:[#allocation95_spill] sm:$0xff]  ;;  %v10261_v14 = vld [vmem:[#allocation86_spill] sm:$0xff]  ;;  %10282 = vst [vmem:[#allocation67_spill] sm:$0xff] %v7865_v21 }
  0xbb   :  { %1067 = vmatmul.mubr.f32.gmra.mrb[28].mxu0 %v7652_v10  ;;  %6092 = vmatprep.subr.bf16.mxu1 %v10082_v18  ;;  %v7762_v6 = vsub.f32 %v7468_v17, %v7482_v30  ;;  %v10260_v17 = vld [vmem:[#allocation96_spill] sm:$0xff]  ;;  %v99_v54 = vld [vmem:[#allocation2 + $0x128] sm:$0xff] }
  0xbc   :  { %5752 = vmatpush1.bf16.msra.mxu0 %v10253_v28  ;;  %1072 = vmatprep.mubr.f32.mxu0 %v7659_v62  ;;  %v10258_v28 = vld [vmem:[#allocation83_spill] sm:$0xff]  ;;  %v7779_v30 = vsub.f32 %v10260_v17, %v7514_v12  ;;  %v10265_v17 = vld [vmem:[#allocation101_spill] sm:$0xff]  ;;  %v7894_v29 = vand.u32 4294901760, %v99_v54 }
  0xbd   :  { %5753 = vmatprep.subr.bf16.mxu0 %v10082_v18  ;;  %v7798_v12 = vsub.f32 %v10265_v17, %v7548_v15  ;;  %v10269_v17 = vld [vmem:[#allocation105_spill] sm:$0xff] }
  0xbe   :  { %v7815_v15 = vsub.f32 %v10269_v17, %v7579_v50  ;;  %v10274_v17 = vld [vmem:[#allocation111_spill] sm:$0xff]  ;;  %10288 = vst [vmem:[#allocation96_spill] sm:$0xff] %v7894_v29 }
  0xbf   :  { %1074 = vmatmul.mubr.f32.gmra.mrb[30].mxu0 %v7666_v25  ;;  %v7834_v50 = vsub.f32 %v10274_v17, %v7612_v16  ;;  %v10278_v17 = vld [vmem:[#allocation116_spill] sm:$0xff] }
  0xc0   :  { %5755 = vmatpush1.bf16.msra.mxu0 %v10256_v11  ;;  %1321 = vmatprep.mubr.f32.mxu0 %v7680_v42  ;;  %v7774_v11 = vsub.f32 %v10259_v33, %v7506_v60  ;;  %v10263_v33 = vld [vmem:[#allocation99_spill] sm:$0xff]  ;;  %v7851_v16 = vsub.f32 %v10278_v17, %v7641_v19  ;;  %v94_v17 = vld [vmem:[#allocation2 + $0x100] sm:$0xff]  ;;  %v10283_v19 = vld [vmem:[#allocation54_spill] sm:$0xff] }
  0xc1   :  { %5756 = vmatprep.subr.bf16.mxu0 %v10082_v18  ;;  %v7791_v60 = vsub.f32 %v10263_v33, %v7538_v45  ;;  %v10268_v33 = vld [vmem:[#allocation104_spill] sm:$0xff] }
  0xc2   :  { %v7810_v45 = vsub.f32 %v10268_v33, %v7572_v23  ;;  %v10272_v33 = vld [vmem:[#allocation109_spill] sm:$0xff] }
  0xc3   :  { %1324 = vmatmul.mubr.f32.vlgmr.msra.gmra.mrb[0].mxu0 %v7687_v0  ;;  %v7827_v23 = vsub.f32 %v10272_v33, %v7601_v26  ;;  %v10277_v33 = vld [vmem:[#allocation115_spill] sm:$0xff] }
  0xc4   :  { %5758 = vmatpush1.bf16.msra.mxu0 %v7292_v43  ;;  %1330 = vmatprep.mubr.f32.mxu0 %v7696_v34  ;;  %v7846_v26 = vsub.f32 %v10277_v33, %v7628_v22  ;;  %v10281_v33 = vld [vmem:[#allocation119_spill] sm:$0xff] }
  0xc5   :  { %5759 = vmatprep.subr.bf16.mxu0 %v10082_v18  ;;  %v7863_v22 = vsub.f32 %v10281_v33, %v7659_v62  ;;  %v7878_v33 = vsub.f32 %v95_v63, %v7865_v21 }
  0xc7   :  { %1333 = vmatmul.mubr.f32.gmra.mrb[2].mxu0 %v7702_v52 }
  0xc8   :  { %1339 = vmatprep.mubr.f32.mxu0 %v7708_v46  ;;  %5761 = vmatpush1.bf16.msra.mxu0 %v7309_v4  ;;  %v7920_v4 = vand.u32 4294901760, %v103_v44 }
  0xc9   :  { %5762 = vmatprep.subr.bf16.mxu0 %v10082_v18 }
  0xca   :  { %10292 = vst [vmem:[#allocation102_spill] sm:$0xff] %v7920_v4 }
  0xcb   :  { %1342 = vmatmul.mubr.f32.gmra.mrb[4].mxu0 %v7714_v51 }
  0xcc   :  { %1348 = vmatprep.mubr.f32.mxu0 %v7720_v58  ;;  %5764 = vmatpush1.bf16.msra.mxu0 %v7321_v31  ;;  %v100_v31 = vld [vmem:[#allocation2 + $0x130] sm:$0xff] }
  0xcd   :  { %5765 = vmatprep.subr.bf16.mxu0 %v10082_v18  ;;  %v7914_v3 = vand.u32 4294901760, %v100_v31 }
  0xcf   :  { %1351 = vmatmul.mubr.f32.gmra.mrb[6].mxu0 %v7726_v13  ;;  %10291 = vst [vmem:[#allocation101_spill] sm:$0xff] %v7914_v3  ;;  %v7924_v27 = vsub.f32 %v100_v31, %v7914_v3 }
  0xd0   :  { %1357 = vmatprep.mubr.f32.mxu0 %v7731_v39  ;;  %5767 = vmatpush1.bf16.msra.mxu0 %v7338_v55  ;;  %v98_v55 = vld [vmem:[#allocation2 + $0x120] sm:$0xff] }
  0xd1   :  { %5768 = vmatprep.subr.bf16.mxu0 %v10082_v18  ;;  %v7902_v48 = vand.u32 4294901760, %v98_v55 }
  0xd3   :  { %1360 = vmatmul.mubr.f32.gmra.mrb[8].mxu0 %v7738_v40  ;;  %10289 = vst [vmem:[#allocation98_spill] sm:$0xff] %v7902_v48 }
  0xd4   :  { %1366 = vmatprep.mubr.f32.mxu0 %v7743_v47  ;;  %5770 = vmatpush1.bf16.msra.mxu0 %v7358_v57  ;;  %v96_v57 = vld [vmem:[#allocation2 + $0x110] sm:$0xff] }
  0xd5   :  { %5771 = vmatprep.subr.bf16.mxu0 %v10082_v18 }
  0xd7   :  { %1369 = vmatmul.mubr.f32.gmra.mrb[10].mxu0 %v7750_v9 }
  0xd8   :  { %1375 = vmatprep.mubr.f32.mxu0 %v7755_v53  ;;  %5773 = vmatpush1.bf16.msra.mxu0 %v10258_v28  ;;  %v10264_v28 = vld [vmem:[#allocation89_spill] sm:$0xff] }
  0xd9   :  { %5774 = vmatprep.subr.bf16.mxu0 %v10082_v18 }
  0xdb   :  { %1378 = vmatmul.mubr.f32.gmra.mrb[12].mxu0 %v7762_v6 }
  0xdc   :  { %1384 = vmatprep.mubr.f32.mxu0 %v7767_v32  ;;  %5776 = vmatpush1.bf16.msra.mxu0 %v10261_v14  ;;  %v10267_v14 = vld [vmem:[#allocation29_spill] sm:$0xff] }
  0xdd   :  { %5777 = vmatprep.subr.bf16.mxu0 %v10082_v18 }
  0xdf   :  { %1387 = vmatmul.mubr.f32.gmra.mrb[14].mxu0 %v7774_v11 }
  0xe0   :  { %1393 = vmatprep.mubr.f32.mxu0 %v7779_v30  ;;  %5779 = vmatpush1.bf16.msra.mxu0 %v10264_v28  ;;  %v10270_v28 = vld [vmem:[#allocation34_spill] sm:$0xff] }
  0xe1   :  { %5780 = vmatprep.subr.bf16.mxu0 %v10082_v18 }
  0xe3   :  { %1396 = vmatmul.mubr.f32.gmra.mrb[16].mxu0 %v7786_v20 }
  0xe4   :  { %1402 = vmatprep.mubr.f32.mxu0 %v7791_v60  ;;  %5782 = vmatpush1.bf16.msra.mxu0 %v10267_v14  ;;  %v10273_v14 = vld [vmem:[#allocation39_spill] sm:$0xff] }
  0xe5   :  { %5783 = vmatprep.subr.bf16.mxu0 %v10082_v18 }
  0xe7   :  { %1405 = vmatmul.mubr.f32.gmra.mrb[18].mxu0 %v7798_v12 }
  0xe8   :  { %1411 = vmatprep.mubr.f32.mxu0 %v7803_v41  ;;  %5785 = vmatpush1.bf16.msra.mxu0 %v10270_v28  ;;  %v10276_v28 = vld [vmem:[#allocation41_spill] sm:$0xff] }
  0xe9   :  { %5786 = vmatprep.subr.bf16.mxu0 %v10082_v18 }
  0xeb   :  { %1414 = vmatmul.mubr.f32.gmra.mrb[20].mxu0 %v7810_v45 }
  0xec   :  { %1420 = vmatprep.mubr.f32.mxu0 %v7815_v15  ;;  %5788 = vmatpush1.bf16.msra.mxu0 %v10273_v14  ;;  %v10279_v14 = vld [vmem:[#allocation47_spill] sm:$0xff] }
  0xed   :  { %5789 = vmatprep.subr.bf16.mxu0 %v10082_v18 }
  0xef   :  { %1423 = vmatmul.mubr.f32.gmra.mrb[22].mxu0 %v7822_v59 }
  0xf0   :  { %1429 = vmatprep.mubr.f32.mxu0 %v7827_v23  ;;  %5791 = vmatpush1.bf16.msra.mxu0 %v10276_v28  ;;  %v7858_v28 = vsub.f32 %v10280_v38, %v7652_v10  ;;  %v7872_v38 = vsub.f32 %v7661_v36, %v7666_v25  ;;  %v7874_v10 = vand.u32 4294901760, %v94_v17  ;;  %v7888_v25 = vand.u32 4294901760, %v96_v57 }
  0xf1   :  { %5792 = vmatprep.subr.bf16.mxu0 %v10082_v18 }
  0xf2   :  { %10284 = vst [vmem:[#allocation56_spill] sm:$0xff] %v7874_v10  ;;  %v7886_v36 = vsub.f32 %v94_v17, %v7874_v10  ;;  %10287 = vst [vmem:[#allocation95_spill] sm:$0xff] %v7888_v25  ;;  %v7900_v17 = vsub.f32 %v96_v57, %v7888_v25 }
  0xf3   :  { %1432 = vmatmul.mubr.f32.gmra.mrb[24].mxu0 %v7834_v50 }
  0xf4   :  { %1438 = vmatprep.mubr.f32.mxu0 %v7839_v37  ;;  %5794 = vmatpush1.bf16.msra.mxu0 %v10279_v14  ;;  %v97_v14 = vld [vmem:[#allocation2 + $0x118] sm:$0xff] }
  0xf5   :  { %5795 = vmatprep.subr.bf16.mxu0 %v10082_v18  ;;  %v7880_v62 = vand.u32 4294901760, %v97_v14 }
  0xf7   :  { %1441 = vmatmul.mubr.f32.gmra.mrb[26].mxu0 %v7846_v26  ;;  %10285 = vst [vmem:[#allocation93_spill] sm:$0xff] %v7880_v62  ;;  %v7892_v63 = vsub.f32 %v97_v14, %v7880_v62  ;;  %v7906_v14 = vsub.f32 %v99_v54, %v7894_v29  ;;  %v102_v54 = vld [vmem:[#allocation2 + $0x140] sm:$0xff] }
  0xf8   :  { %1447 = vmatprep.mubr.f32.mxu0 %v7851_v16  ;;  %5797 = vmatpush1.bf16.msra.mxu0 %v10283_v19  ;;  %v10286_v19 = vld [vmem:[#allocation58_spill] sm:$0xff]  ;;  %v7926_v29 = vand.u32 4294901760, %v102_v54 }
  0xf9   :  { %5798 = vmatprep.subr.bf16.mxu0 %v10082_v18 }
  0xfa   :  { %10293 = vst [vmem:[#allocation104_spill] sm:$0xff] %v7926_v29  ;;  %v7936_v25 = vsub.f32 %v102_v54, %v7926_v29 }
  0xfb   :  { %1450 = vmatmul.mubr.f32.gmra.mrb[28].mxu0 %v7858_v28 }
  0xfc   :  { %1456 = vmatprep.mubr.f32.mxu0 %v7863_v22  ;;  %5800 = vmatpush1.bf16.msra.mxu0 %v10286_v19  ;;  %v101_v19 = vld [vmem:[#allocation2 + $0x138] sm:$0xff] }
  0xfd   :  { %5801 = vmatprep.subr.bf16.mxu0 %v10082_v18  ;;  %v7908_v24 = vand.u32 4294901760, %v101_v19 }
  0xff   :  { %1459 = vmatmul.mubr.f32.gmra.mrb[30].mxu0 %v7872_v38  ;;  %10290 = vst [vmem:[#allocation99_spill] sm:$0xff] %v7908_v24  ;;  %v7918_v57 = vsub.f32 %v101_v19, %v7908_v24  ;;  %v104_v19 = vld [vmem:[#allocation2 + $0x150] sm:$0xff]  ;;  %v107_v24 = vld [vmem:[#allocation2 + $0x168] sm:$0xff] }
 0x100   :  { %1465 = vmatprep.mubr.f32.mxu0 %v7878_v33  ;;  %5803 = vmatpush1.bf16.msra.mxu0 %v7672_v56  ;;  %v7912_v56 = vsub.f32 %v98_v55, %v7902_v48  ;;  %v7930_v55 = vsub.f32 %v103_v44, %v7920_v4  ;;  %v7932_v48 = vand.u32 4294901760, %v105_v8  ;;  %v7938_v2 = vand.u32 4294901760, %v104_v19  ;;  %v106_v44 = vld [vmem:[#allocation2 + $0x160] sm:$0xff]  ;;  %v109_v4 = vld [vmem:[#allocation2 + $0x178] sm:$0xff] }
 0x101   :  { %5804 = vmatprep.subr.bf16.mxu0 %v10082_v18  ;;  %v7944_v3 = vand.u32 4294901760, %v107_v24  ;;  %v7950_v1 = vand.u32 4294901760, %v106_v44  ;;  %v7956_v29 = vand.u32 4294901760, %v109_v4 }
 0x102   :  { %10294 = vst [vmem:[#allocation105_spill] sm:$0xff] %v7932_v48  ;;  %10295 = vst [vmem:[#allocation108_spill] sm:$0xff] %v7938_v2  ;;  %v7942_v31 = vsub.f32 %v105_v8, %v7932_v48  ;;  %v7948_v43 = vsub.f32 %v104_v19, %v7938_v2  ;;  %v108_v8 = vld [vmem:[#allocation2 + $0x170] sm:$0xff]  ;;  %v111_v48 = vld [vmem:[#allocation2 + $0x188] sm:$0xff] }
 0x103   :  { %1468 = vmatmul.mubr.f32.gmra.mrb[32].mxu0 %v7886_v36  ;;  %10296 = vst [vmem:[#allocation109_spill] sm:$0xff] %v7944_v3  ;;  %10298 = vst [vmem:[#allocation112_spill] sm:$0xff] %v7950_v1  ;;  %v7954_v54 = vsub.f32 %v107_v24, %v7944_v3  ;;  %v7960_v62 = vsub.f32 %v106_v44, %v7950_v1  ;;  %v7962_v10 = vand.u32 4294901760, %v108_v8  ;;  %v7968_v2 = vand.u32 4294901760, %v111_v48  ;;  %v110_v24 = vld [vmem:[#allocation2 + $0x180] sm:$0xff]  ;;  %v113_v3 = vld [vmem:[#allocation2 + $0x198] sm:$0xff] }
 0x104   :  { %1474 = vmatprep.mubr.f32.mxu0 %v7892_v63  ;;  %10297 = vst [vmem:[#allocation111_spill] sm:$0xff] %v7948_v43  ;;  %10300 = vst [vmem:[#allocation116_spill] sm:$0xff] %v7956_v29  ;;  %v7966_v19 = vsub.f32 %v109_v4, %v7956_v29  ;;  %v7974_v21 = vand.u32 4294901760, %v110_v24  ;;  %v7980_v1 = vand.u32 4294901760, %v113_v3  ;;  %v112_v4 = vld [vmem:[#allocation2 + $0x190] sm:$0xff]  ;;  %v115_v29 = vld [vmem:[#allocation2 + $0x1a8] sm:$0xff] }
 0x105   :  { %10299 = vst [vmem:[#allocation115_spill] sm:$0xff] %v7954_v54  ;;  %10301 = vst [vmem:[#allocation118_spill] sm:$0xff] %v7960_v62  ;;  %v7972_v7 = vsub.f32 %v108_v8, %v7962_v10  ;;  %v7978_v44 = vsub.f32 %v111_v48, %v7968_v2  ;;  %v114_v48 = vld [vmem:[#allocation2 + $0x1a0] sm:$0xff] }
 0x106   :  { %10302 = vst [vmem:[#allocation119_spill] sm:$0xff] %v7962_v10  ;;  %10303 = vst [vmem:[#allocation123_spill] sm:$0xff] %v7966_v19  ;;  %v7990_v8 = vsub.f32 %v113_v3, %v7980_v1  ;;  %v7992_v10 = vand.u32 4294901760, %v115_v29  ;;  %v116_v3 = vld [vmem:[#allocation2 + $0x1b0] sm:$0xff] }
 0x107   :  { %1477 = vmatmul.mubr.f32.gmra.mrb[34].mxu0 %v7900_v17  ;;  %10304 = vst [vmem:[#allocation124_spill] sm:$0xff] %v7968_v2  ;;  %10305 = vst [vmem:[#allocation125_spill] sm:$0xff] %v7972_v7  ;;  %v117_v2 = vld [vmem:[#allocation2 + $0x1b8] sm:$0xff] }
 0x108   :  { %1483 = vmatprep.mubr.f32.mxu0 %v7906_v14  ;;  %10306 = vst [vmem:[#allocation126_spill] sm:$0xff] %v7974_v21  ;;  %10307 = vst [vmem:[#allocation127_spill] sm:$0xff] %v7978_v44 }
 0x109   :  { %10308 = vst [vmem:[#allocation128_spill] sm:$0xff] %v7980_v1  ;;  %10311 = vst [vmem:[#allocation131_spill] sm:$0xff] %v7990_v8  ;;  %v119_v1 = vld [vmem:[#allocation2 + $0x1c8] sm:$0xff] }
 0x10a   :  { %10312 = vst [vmem:[#allocation132_spill] sm:$0xff] %v7992_v10 }
 0x10b   :  { %1486 = vmatmul.mubr.f32.gmra.mrb[36].mxu0 %v7912_v56 }
 0x10c   :  { %1492 = vmatprep.mubr.f32.mxu0 %v7918_v57 }
 0x10f   :  { %1495 = vmatmul.mubr.f32.gmra.mrb[38].mxu0 %v7924_v27 }
 0x110   :  { %1501 = vmatprep.mubr.f32.mxu0 %v7930_v55 }
 0x113   :  { %1504 = vmatmul.mubr.f32.gmra.mrb[40].mxu0 %v7936_v25 }
 0x114   :  { %1510 = vmatprep.mubr.f32.mxu0 %v7942_v31 }
 0x117   :  { %1513 = vmatmul.mubr.f32.gmra.mrb[42].mxu0 %v7948_v43  ;;  %v10341_v43 = vld [vmem:[#allocation20_spill] sm:$0xff] }
 0x118   :  { %1519 = vmatprep.mubr.f32.mxu0 %v7954_v54  ;;  %v7984_v54 = vsub.f32 %v110_v24, %v7974_v21  ;;  %v8002_v24 = vsub.f32 %v115_v29, %v7992_v10  ;;  %v8004_v21 = vand.u32 4294901760, %v117_v2  ;;  %v118_v29 = vld [vmem:[#allocation2 + $0x1c0] sm:$0xff]  ;;  %v121_v10 = vld [vmem:[#allocation2 + $0x1d8] sm:$0xff] }
 0x11a   :  { %10309 = vst [vmem:[#allocation129_spill] sm:$0xff] %v7984_v54  ;;  %10315 = vst [vmem:[#allocation135_spill] sm:$0xff] %v8002_v24 }
 0x11b   :  { %1522 = vmatmul.mubr.f32.gmra.mrb[44].mxu0 %v7960_v62  ;;  %v7986_v62 = vand.u32 4294901760, %v112_v4  ;;  %10316 = vst [vmem:[#allocation136_spill] sm:$0xff] %v8004_v21 }
 0x11c   :  { %1528 = vmatprep.mubr.f32.mxu0 %v7966_v19 }
 0x11d   :  { %10310 = vst [vmem:[#allocation130_spill] sm:$0xff] %v7986_v62  ;;  %v7996_v19 = vsub.f32 %v112_v4, %v7986_v62  ;;  %v8014_v4 = vsub.f32 %v117_v2, %v8004_v21  ;;  %v8016_v62 = vand.u32 4294901760, %v119_v1  ;;  %v120_v2 = vld [vmem:[#allocation2 + $0x1d0] sm:$0xff]  ;;  %v123_v21 = vld [vmem:[#allocation2 + $0x1e8] sm:$0xff] }
 0x11f   :  { %1531 = vmatmul.mubr.f32.gmra.mrb[46].mxu0 %v7972_v7  ;;  %10313 = vst [vmem:[#allocation133_spill] sm:$0xff] %v7996_v19  ;;  %v7998_v7 = vand.u32 4294901760, %v114_v48  ;;  %10319 = vst [vmem:[#allocation139_spill] sm:$0xff] %v8014_v4 }
 0x120   :  { %1537 = vmatprep.mubr.f32.mxu0 %v7978_v44  ;;  %10320 = vst [vmem:[#allocation140_spill] sm:$0xff] %v8016_v62 }
 0x121   :  { %10314 = vst [vmem:[#allocation134_spill] sm:$0xff] %v7998_v7  ;;  %v8008_v44 = vsub.f32 %v114_v48, %v7998_v7  ;;  %v8026_v48 = vsub.f32 %v119_v1, %v8016_v62  ;;  %v8028_v7 = vand.u32 4294901760, %v121_v10  ;;  %v122_v1 = vld [vmem:[#allocation2 + $0x1e0] sm:$0xff]  ;;  %v125_v62 = vld [vmem:[#allocation2 + $0x1f8] sm:$0xff] }
 0x123   :  { %1540 = vmatmul.mubr.f32.gmra.mrb[48].mxu0 %v7984_v54  ;;  %10317 = vst [vmem:[#allocation137_spill] sm:$0xff] %v8008_v44  ;;  %v8010_v54 = vand.u32 4294901760, %v116_v3  ;;  %10323 = vst [vmem:[#allocation143_spill] sm:$0xff] %v8026_v48 }
 0x124   :  { %1546 = vmatprep.mubr.f32.mxu0 %v7990_v8  ;;  %10324 = vst [vmem:[#allocation144_spill] sm:$0xff] %v8028_v7 }
 0x125   :  { %10318 = vst [vmem:[#allocation138_spill] sm:$0xff] %v8010_v54  ;;  %v8020_v8 = vsub.f32 %v116_v3, %v8010_v54  ;;  %v8038_v3 = vsub.f32 %v121_v10, %v8028_v7  ;;  %v8040_v54 = vand.u32 4294901760, %v123_v21  ;;  %v124_v10 = vld [vmem:[#allocation2 + $0x1f0] sm:$0xff] }
 0x127   :  { %1549 = vmatmul.mubr.f32.gmra.mrb[50].mxu0 %v7996_v19  ;;  %10321 = vst [vmem:[#allocation141_spill] sm:$0xff] %v8020_v8  ;;  %v8022_v19 = vand.u32 4294901760, %v118_v29  ;;  %10327 = vst [vmem:[#allocation147_spill] sm:$0xff] %v8038_v3 }
 0x128   :  { %1555 = vmatprep.mubr.f32.mxu0 %v8002_v24  ;;  %10328 = vst [vmem:[#allocation148_spill] sm:$0xff] %v8040_v54 }
 0x129   :  { %10322 = vst [vmem:[#allocation142_spill] sm:$0xff] %v8022_v19  ;;  %v8032_v24 = vsub.f32 %v118_v29, %v8022_v19  ;;  %v8050_v29 = vsub.f32 %v123_v21, %v8040_v54  ;;  %v8052_v19 = vand.u32 4294901760, %v125_v62  ;;  %v269_v21 = vand.u32 4294901760, %v7687_v0 }
 0x12b   :  { %1558 = vmatmul.mubr.f32.gmra.mrb[52].mxu0 %v8008_v44  ;;  %10325 = vst [vmem:[#allocation145_spill] sm:$0xff] %v8032_v24  ;;  %v8034_v44 = vand.u32 4294901760, %v120_v2  ;;  %10331 = vst [vmem:[#allocation151_spill] sm:$0xff] %v8050_v29 }
 0x12c   :  { %1564 = vmatprep.mubr.f32.mxu0 %v8014_v4  ;;  %10332 = vst [vmem:[#allocation152_spill] sm:$0xff] %v8052_v19 }
 0x12d   :  { %10326 = vst [vmem:[#allocation146_spill] sm:$0xff] %v8034_v44  ;;  %v8044_v4 = vsub.f32 %v120_v2, %v8034_v44  ;;  %v8062_v2 = vsub.f32 %v125_v62, %v8052_v19  ;;  %v263_v44 = vand.u32 4294901760, %v7680_v42  ;;  %v284_v62 = vand.u32 4294901760, %v7702_v52 }
 0x12f   :  { %1567 = vmatmul.mubr.f32.gmra.mrb[54].mxu0 %v8020_v8  ;;  %10329 = vst [vmem:[#allocation149_spill] sm:$0xff] %v8044_v4  ;;  %v8046_v8 = vand.u32 4294901760, %v122_v1  ;;  %10335 = vst [vmem:[#allocation155_spill] sm:$0xff] %v8062_v2 }
 0x130   :  { %1573 = vmatprep.mubr.f32.mxu0 %v8026_v48  ;;  %v8058_v48 = vand.u32 4294901760, %v124_v10 }
 0x131   :  { %10330 = vst [vmem:[#allocation150_spill] sm:$0xff] %v8046_v8  ;;  %v8056_v7 = vsub.f32 %v122_v1, %v8046_v8  ;;  %v270_v1 = vsub.f32 %v7687_v0, %v269_v21  ;;  %v278_v8 = vand.u32 4294901760, %v7696_v34  ;;  %v285_v0 = vsub.f32 %v7702_v52, %v284_v62 }
 0x132   :  { %10334 = vst [vmem:[#allocation154_spill] sm:$0xff] %v8058_v48  ;;  %v8068_v54 = vsub.f32 %v124_v10, %v8058_v48  ;;  %v10337_v10 = vld [vmem:[#allocation12_spill] sm:$0xff] }
 0x133   :  { %1576 = vmatmul.mubr.f32.gmra.mrb[56].mxu0 %v8032_v24  ;;  %10333 = vst [vmem:[#allocation153_spill] sm:$0xff] %v8056_v7  ;;  %v271_v19 = vand.u32 4294901760, %v270_v1  ;;  %v10338_v48 = vand.u32 4294901760, %v10337_v10  ;;  %v299_v1 = vand.u32 4294901760, %v7714_v51 }
 0x134   :  { %1582 = vmatprep.mubr.f32.mxu0 %v8038_v3  ;;  %10336 = vst [vmem:[#allocation156_spill] sm:$0xff] %v8068_v54  ;;  %v10339_v3 = vld [vmem:[#allocation13_spill] sm:$0xff] }
 0x137   :  { %1585 = vmatmul.mubr.f32.gmra.mrb[58].mxu0 %v8044_v4  ;;  %v264_v4 = vsub.f32 %v7680_v42, %v263_v44  ;;  %v10340_v42 = vand.u32 4294901760, %v10339_v3 }
 0x138   :  { %1591 = vmatprep.mubr.f32.mxu0 %v8050_v29 }
 0x139   :  { %v265_v29 = vand.u32 4294901760, %v264_v4  ;;  %v5805_v24 = vpack.c.bf16 %v10340_v42, %v10338_v48  ;;  %v10344_v48 = vld [vmem:[#allocation15_spill] sm:$0xff]  ;;  %v10346_v42 = vld [vmem:[#allocation21_spill] sm:$0xff] }
 0x13a   :  { %v10345_v52 = vand.u32 4294901760, %v10344_v48 }
 0x13b   :  { %1594 = vmatmul.mubr.f32.gmra.mrb[60].mxu0 %v8056_v7  ;;  %266 = vmatprep.mubr.f32.mxu1 %v265_v29  ;;  %v279_v7 = vsub.f32 %v7696_v34, %v278_v8 }
 0x13c   :  { %1600 = vmatprep.mubr.f32.mxu0 %v8062_v2  ;;  %272 = vmatmul.mubr.f32.vlgmr.msra.gmra.mrb[0].mxu1 %v271_v19  ;;  %v293_v2 = vand.u32 4294901760, %v7708_v46 }
 0x13d   :  { %v280_v4 = vand.u32 4294901760, %v279_v7  ;;  %6108 = vmatpush1.bf16.msra.mxu1 %v10341_v43  ;;  %v300_v7 = vsub.f32 %v7714_v51, %v299_v1  ;;  %v308_v43 = vand.u32 4294901760, %v7720_v58  ;;  %v10349_v51 = vld [vmem:[#allocation17_spill] sm:$0xff] }
 0x13e   :  { %6093 = vmatprep.subr.bf16.mxu1 %v10082_v18  ;;  %v294_v34 = vsub.f32 %v7708_v46, %v293_v2 }
 0x13f   :  { %1603 = vmatmul.mubr.f32.gmra.mrb[62].mxu0 %v8068_v54  ;;  %v286_v54 = vand.u32 4294901760, %v285_v0  ;;  %281 = vmatprep.mubr.f32.mxu1 %v280_v4  ;;  %v301_v10 = vand.u32 4294901760, %v300_v7  ;;  %v309_v46 = vsub.f32 %v7720_v58, %v308_v43  ;;  %v10350_v0 = vand.u32 4294901760, %v10349_v51 }
 0x140   :  { %1707 = vmatprep.mubr.f32.mxu0 %v263_v44  ;;  %v10342_v44 = vld [vmem:[#allocation14_spill] sm:$0xff]  ;;  %v295_v29 = vand.u32 4294901760, %v294_v34 }
 0x141   :  { %v10343_v19 = vand.u32 4294901760, %v10342_v44  ;;  %287 = vmatmul.mubr.f32.gmra.mrb[2].mxu1 %v286_v54  ;;  %v323_v54 = vand.u32 4294901760, %v7731_v39  ;;  %v310_v34 = vand.u32 4294901760, %v309_v46  ;;  %v10355_v46 = vld [vmem:[#allocation28_spill] sm:$0xff] }
 0x142   :  { %6109 = vmatpush1.bf16.msra.mxu1 %v10346_v42  ;;  %296 = vmatprep.mubr.f32.mxu1 %v295_v29  ;;  %v338_v29 = vand.u32 4294901760, %v7743_v47 }
 0x143   :  { %1711 = vmatmul.mubr.f32.vlgmr.msra.gmra.mrb[0].mxu0 %v269_v21  ;;  %v5808_v3 = vpack.c.bf16 %v10345_v52, %v10343_v19  ;;  %v314_v21 = vand.u32 4294901760, %v7726_v13  ;;  %6094 = vmatprep.subr.bf16.mxu1 %v10082_v18  ;;  %v324_v58 = vsub.f32 %v7731_v39, %v323_v54 }
 0x144   :  { %5806 = vmatpush1.bf16.msra.mxu0 %v5805_v24  ;;  %1718 = vmatprep.mubr.f32.mxu0 %v278_v8  ;;  %v10347_v8 = vld [vmem:[#allocation16_spill] sm:$0xff]  ;;  %v339_v39 = vsub.f32 %v7743_v47, %v338_v29 }
 0x145   :  { %5807 = vmatprep.subr.bf16.mxu0 %v10082_v18  ;;  %v10348_v24 = vand.u32 4294901760, %v10347_v8  ;;  %v315_v44 = vsub.f32 %v7726_v13, %v314_v21  ;;  %302 = vmatmul.mubr.f32.gmra.mrb[4].mxu1 %v301_v10  ;;  %v10353_v13 = vld [vmem:[#allocation19_spill] sm:$0xff]  ;;  %v325_v10 = vand.u32 4294901760, %v324_v58 }
 0x146   :  { %311 = vmatprep.mubr.f32.mxu1 %v310_v34  ;;  %v10354_v52 = vand.u32 4294901760, %v10353_v13  ;;  %6110 = vmatpush1.bf16.msra.mxu1 %v10355_v46  ;;  %v368_v13 = vand.u32 4294901760, %v7767_v32 }
 0x147   :  { %1722 = vmatmul.mubr.f32.gmra.mrb[2].mxu0 %v284_v62  ;;  %v5811_v4 = vpack.c.bf16 %v10350_v0, %v10348_v24  ;;  %v329_v62 = vand.u32 4294901760, %v7738_v40  ;;  %v316_v19 = vand.u32 4294901760, %v315_v44  ;;  %v340_v44 = vand.u32 4294901760, %v339_v39  ;;  %6095 = vmatprep.subr.bf16.mxu1 %v10082_v18 }
 0x148   :  { %1729 = vmatprep.mubr.f32.mxu0 %v293_v2  ;;  %5809 = vmatpush1.bf16.msra.mxu0 %v5808_v3  ;;  %v10351_v2 = vld [vmem:[#allocation18_spill] sm:$0xff] }
 0x149   :  { %5810 = vmatprep.subr.bf16.mxu0 %v10082_v18  ;;  %v10352_v48 = vand.u32 4294901760, %v10351_v2  ;;  %v330_v7 = vsub.f32 %v7738_v40, %v329_v62  ;;  %317 = vmatmul.mubr.f32.gmra.mrb[6].mxu1 %v316_v19  ;;  %v10358_v40 = vld [vmem:[#allocation23_spill] sm:$0xff] }
 0x14a   :  { %326 = vmatprep.mubr.f32.mxu1 %v325_v10  ;;  %v10359_v24 = vand.u32 4294901760, %v10358_v40 }
 0x14b   :  { %1733 = vmatmul.mubr.f32.gmra.mrb[4].mxu0 %v299_v1  ;;  %v5814_v3 = vpack.c.bf16 %v10354_v52, %v10352_v48  ;;  %v344_v1 = vand.u32 4294901760, %v7750_v9  ;;  %v331_v42 = vand.u32 4294901760, %v330_v7  ;;  %v10364_v7 = vld [vmem:[#allocation32_spill] sm:$0xff] }
 0x14c   :  { %1740 = vmatprep.mubr.f32.mxu0 %v308_v43  ;;  %5812 = vmatpush1.bf16.msra.mxu0 %v5811_v4  ;;  %v10356_v43 = vld [vmem:[#allocation22_spill] sm:$0xff]  ;;  %v353_v4 = vand.u32 4294901760, %v7755_v53 }
 0x14d   :  { %5813 = vmatprep.subr.bf16.mxu0 %v10082_v18  ;;  %v10357_v8 = vand.u32 4294901760, %v10356_v43  ;;  %v345_v0 = vsub.f32 %v7750_v9, %v344_v1  ;;  %332 = vmatmul.mubr.f32.gmra.mrb[8].mxu1 %v331_v42  ;;  %v10362_v9 = vld [vmem:[#allocation25_spill] sm:$0xff]  ;;  %v383_v43 = vand.u32 4294901760, %v7779_v30 }
 0x14e   :  { %341 = vmatprep.mubr.f32.mxu1 %v340_v44  ;;  %v354_v47 = vsub.f32 %v7755_v53, %v353_v4  ;;  %v10363_v58 = vand.u32 4294901760, %v10362_v9  ;;  %6111 = vmatpush1.bf16.msra.mxu1 %v10364_v7  ;;  %v369_v53 = vsub.f32 %v7767_v32, %v368_v13  ;;  %v10374_v9 = vld [vmem:[#allocation37_spill] sm:$0xff] }
 0x14f   :  { %1744 = vmatmul.mubr.f32.gmra.mrb[6].mxu0 %v314_v21  ;;  %v5817_v51 = vpack.c.bf16 %v10359_v24, %v10357_v8  ;;  %v359_v21 = vand.u32 4294901760, %v7762_v6  ;;  %v346_v34 = vand.u32 4294901760, %v345_v0  ;;  %6096 = vmatprep.subr.bf16.mxu1 %v10082_v18  ;;  %v384_v32 = vsub.f32 %v7779_v30, %v383_v43  ;;  %v10369_v24 = vld [vmem:[#allocation30_spill] sm:$0xff] }
 0x150   :  { %1751 = vmatprep.mubr.f32.mxu0 %v323_v54  ;;  %5815 = vmatpush1.bf16.msra.mxu0 %v5814_v3  ;;  %v10360_v54 = vld [vmem:[#allocation24_spill] sm:$0xff]  ;;  %v355_v52 = vand.u32 4294901760, %v354_v47  ;;  %v370_v8 = vand.u32 4294901760, %v369_v53  ;;  %v10378_v53 = vld [vmem:[#allocation43_spill] sm:$0xff] }
 0x151   :  { %5816 = vmatprep.subr.bf16.mxu0 %v10082_v18  ;;  %v10361_v19 = vand.u32 4294901760, %v10360_v54  ;;  %v360_v48 = vsub.f32 %v7762_v6, %v359_v21  ;;  %347 = vmatmul.mubr.f32.gmra.mrb[10].mxu1 %v346_v34  ;;  %v10367_v6 = vld [vmem:[#allocation27_spill] sm:$0xff]  ;;  %v398_v34 = vand.u32 4294901760, %v7791_v60  ;;  %v385_v47 = vand.u32 4294901760, %v384_v32 }
 0x152   :  { %356 = vmatprep.mubr.f32.mxu1 %v355_v52  ;;  %v10368_v42 = vand.u32 4294901760, %v10367_v6  ;;  %v413_v52 = vand.u32 4294901760, %v7803_v41 }
 0x153   :  { %1755 = vmatmul.mubr.f32.gmra.mrb[8].mxu0 %v329_v62  ;;  %v5820_v2 = vpack.c.bf16 %v10363_v58, %v10361_v19  ;;  %v374_v62 = vand.u32 4294901760, %v7774_v11  ;;  %v361_v3 = vand.u32 4294901760, %v360_v48  ;;  %v10373_v19 = vld [vmem:[#allocation36_spill] sm:$0xff]  ;;  %v399_v30 = vsub.f32 %v7791_v60, %v398_v34 }
 0x154   :  { %1762 = vmatprep.mubr.f32.mxu0 %v338_v29  ;;  %5818 = vmatpush1.bf16.msra.mxu0 %v5817_v51  ;;  %v10365_v29 = vld [vmem:[#allocation26_spill] sm:$0xff]  ;;  %v10370_v51 = vand.u32 4294901760, %v10369_v24  ;;  %v10375_v58 = vand.u32 4294901760, %v10374_v9  ;;  %v414_v60 = vsub.f32 %v7803_v41, %v413_v52  ;;  %v458_v9 = vand.u32 4294901760, %v7839_v37 }
 0x155   :  { %5819 = vmatprep.subr.bf16.mxu0 %v10082_v18  ;;  %v10366_v10 = vand.u32 4294901760, %v10365_v29  ;;  %v375_v39 = vsub.f32 %v7774_v11, %v374_v62  ;;  %362 = vmatmul.mubr.f32.gmra.mrb[12].mxu1 %v361_v3  ;;  %v10371_v11 = vld [vmem:[#allocation33_spill] sm:$0xff]  ;;  %v400_v3 = vand.u32 4294901760, %v399_v30  ;;  %v10379_v29 = vand.u32 4294901760, %v10378_v53 }
 0x156   :  { %371 = vmatprep.mubr.f32.mxu1 %v370_v8  ;;  %v10372_v0 = vand.u32 4294901760, %v10371_v11  ;;  %6112 = vmatpush1.bf16.msra.mxu1 %v10373_v19 }
 0x157   :  { %1766 = vmatmul.mubr.f32.gmra.mrb[10].mxu0 %v344_v1  ;;  %v5823_v46 = vpack.c.bf16 %v10368_v42, %v10366_v10  ;;  %v389_v1 = vand.u32 4294901760, %v7786_v20  ;;  %v376_v40 = vand.u32 4294901760, %v375_v39  ;;  %6097 = vmatprep.subr.bf16.mxu1 %v10082_v18  ;;  %v415_v39 = vand.u32 4294901760, %v414_v60 }
 0x158   :  { %1773 = vmatprep.mubr.f32.mxu0 %v353_v4  ;;  %5821 = vmatpush1.bf16.msra.mxu0 %v5820_v2  ;;  %v5826_v4 = vpack.c.bf16 %v10372_v0, %v10370_v51  ;;  %v443_v0 = vand.u32 4294901760, %v7827_v23  ;;  %v473_v60 = vand.u32 4294901760, %v7851_v16 }
 0x159   :  { %5822 = vmatprep.subr.bf16.mxu0 %v10082_v18  ;;  %v390_v44 = vsub.f32 %v7786_v20, %v389_v1  ;;  %377 = vmatmul.mubr.f32.gmra.mrb[14].mxu1 %v376_v40  ;;  %v10376_v20 = vld [vmem:[#allocation38_spill] sm:$0xff] }
 0x15a   :  { %386 = vmatprep.mubr.f32.mxu1 %v385_v47  ;;  %v10377_v2 = vand.u32 4294901760, %v10376_v20  ;;  %v10383_v40 = vld [vmem:[#allocation46_spill] sm:$0xff]  ;;  %v464_v20 = vand.u32 4294901760, %v7846_v26 }
 0x15b   :  { %1777 = vmatmul.mubr.f32.gmra.mrb[12].mxu0 %v359_v21  ;;  %v404_v21 = vand.u32 4294901760, %v7798_v12  ;;  %v391_v54 = vand.u32 4294901760, %v390_v44  ;;  %v10384_v32 = vand.u32 4294901760, %v10383_v40  ;;  %v449_v44 = vand.u32 4294901760, %v7834_v50  ;;  %v10387_v47 = vld [vmem:[#allocation50_spill] sm:$0xff]  ;;  %v10400_v40 = vld [vmem:[#allocation53_spill] sm:$0xff] }
 0x15c   :  { %1784 = vmatprep.mubr.f32.mxu0 %v368_v13  ;;  %5824 = vmatpush1.bf16.msra.mxu0 %v5823_v46  ;;  %v5829_v48 = vpack.c.bf16 %v10377_v2, %v10375_v58  ;;  %v428_v46 = vand.u32 4294901760, %v7815_v15 }
 0x15d   :  { %5825 = vmatprep.subr.bf16.mxu0 %v10082_v18  ;;  %v405_v13 = vsub.f32 %v7798_v12, %v404_v21  ;;  %392 = vmatmul.mubr.f32.gmra.mrb[16].mxu1 %v391_v54  ;;  %v10380_v12 = vld [vmem:[#allocation44_spill] sm:$0xff]  ;;  %v450_v30 = vsub.f32 %v7834_v50, %v449_v44 }
 0x15e   :  { %401 = vmatprep.mubr.f32.mxu1 %v400_v3  ;;  %v10381_v10 = vand.u32 4294901760, %v10380_v12  ;;  %v429_v41 = vsub.f32 %v7815_v15, %v428_v46  ;;  %v444_v15 = vsub.f32 %v7827_v23, %v443_v0  ;;  %v459_v23 = vsub.f32 %v7839_v37, %v458_v9  ;;  %v10394_v50 = vld [vmem:[#allocation60_spill] sm:$0xff] }
 0x15f   :  { %1788 = vmatmul.mubr.f32.gmra.mrb[14].mxu0 %v374_v62  ;;  %v419_v62 = vand.u32 4294901760, %v7810_v45  ;;  %v406_v7 = vand.u32 4294901760, %v405_v13  ;;  %v451_v2 = vand.u32 4294901760, %v450_v30  ;;  %v10392_v13 = vld [vmem:[#allocation57_spill] sm:$0xff]  ;;  %v10395_v3 = vand.u32 4294901760, %v10394_v50 }
 0x160   :  { %1795 = vmatprep.mubr.f32.mxu0 %v383_v43  ;;  %5827 = vmatpush1.bf16.msra.mxu0 %v5826_v4  ;;  %v5832_v6 = vpack.c.bf16 %v10381_v10, %v10379_v29  ;;  %v434_v43 = vand.u32 4294901760, %v7822_v59  ;;  %v430_v4 = vand.u32 4294901760, %v429_v41  ;;  %v445_v58 = vand.u32 4294901760, %v444_v15  ;;  %v10396_v10 = vld [vmem:[#allocation63_spill] sm:$0xff] }
 0x161   :  { %5828 = vmatprep.subr.bf16.mxu0 %v10082_v18  ;;  %v420_v42 = vsub.f32 %v7810_v45, %v419_v62  ;;  %407 = vmatmul.mubr.f32.gmra.mrb[18].mxu1 %v406_v7  ;;  %v10385_v45 = vld [vmem:[#allocation49_spill] sm:$0xff]  ;;  %v465_v7 = vsub.f32 %v7846_v26, %v464_v20  ;;  %v460_v53 = vand.u32 4294901760, %v459_v23  ;;  %v479_v29 = vand.u32 4294901760, %v7858_v28  ;;  %v10398_v26 = vld [vmem:[#allocation64_spill] sm:$0xff] }
 0x162   :  { %416 = vmatprep.mubr.f32.mxu1 %v415_v39  ;;  %v10386_v24 = vand.u32 4294901760, %v10385_v45  ;;  %v435_v11 = vsub.f32 %v7822_v59, %v434_v43  ;;  %v10389_v59 = vld [vmem:[#allocation51_spill] sm:$0xff]  ;;  %v474_v37 = vsub.f32 %v7851_v16, %v473_v60  ;;  %v10407_v23 = vld [vmem:[#allocation68_spill] sm:$0xff] }
 0x163   :  { %1799 = vmatmul.mubr.f32.gmra.mrb[16].mxu0 %v389_v1  ;;  %v421_v8 = vand.u32 4294901760, %v420_v42  ;;  %v10382_v1 = vld [vmem:[#allocation45_spill] sm:$0xff]  ;;  %v10390_v54 = vand.u32 4294901760, %v10389_v59  ;;  %v466_v12 = vand.u32 4294901760, %v465_v7  ;;  %v10399_v42 = vand.u32 4294901760, %v10398_v26  ;;  %v10405_v59 = vld [vmem:[#allocation59_spill] sm:$0xff] }
 0x164   :  { %1806 = vmatprep.mubr.f32.mxu0 %v398_v34  ;;  %5830 = vmatpush1.bf16.msra.mxu0 %v5829_v48  ;;  %v5835_v51 = vpack.c.bf16 %v10386_v24, %v10384_v32  ;;  %v436_v34 = vand.u32 4294901760, %v435_v11  ;;  %v10391_v48 = vld [vmem:[#allocation48_spill] sm:$0xff]  ;;  %v480_v39 = vsub.f32 %v7858_v28, %v479_v29  ;;  %v10401_v32 = vand.u32 4294901760, %v7209_v49  ;;  %v10412_v26 = vld [vmem:[#allocation118_spill] sm:$0xff] }
 0x165   :  { %5831 = vmatprep.subr.bf16.mxu0 %v10082_v18  ;;  %6113 = vmatpush1.bf16.msra.mxu1 %v10382_v1  ;;  %v494_v1 = vand.u32 4294901760, %v7872_v38  ;;  %v10402_v28 = vand.u32 4294901760, %v7217_v61  ;;  %v10403_v61 = vand.u32 4294901760, %v7251_v35  ;;  %v10404_v49 = vand.u32 4294901760, %v7259_v5 }
 0x166   :  { %422 = vmatmul.mubr.f32.gmra.mrb[20].mxu1 %v421_v8  ;;  %6098 = vmatprep.subr.bf16.mxu1 %v10082_v18  ;;  %v475_v8 = vand.u32 4294901760, %v474_v37  ;;  %v481_v41 = vand.u32 4294901760, %v480_v39  ;;  %v10410_v37 = vld [vmem:[#allocation70_spill] sm:$0xff] }
 0x167   :  { %1810 = vmatmul.mubr.f32.gmra.mrb[18].mxu0 %v404_v21  ;;  %431 = vmatprep.mubr.f32.mxu1 %v430_v4  ;;  %v10388_v21 = vand.u32 4294901760, %v10387_v47  ;;  %v5847_v45 = vpack.c.bf16 %v10402_v28, %v10401_v32  ;;  %v495_v24 = vsub.f32 %v7872_v38, %v494_v1  ;;  %v5850_v38 = vpack.c.bf16 %v10404_v49, %v10403_v61 }
 0x168   :  { %1817 = vmatprep.mubr.f32.mxu0 %v413_v52  ;;  %5833 = vmatpush1.bf16.msra.mxu0 %v5832_v6  ;;  %v10393_v52 = vand.u32 4294901760, %v10392_v13  ;;  %v10397_v6 = vand.u32 4294901760, %v10396_v10  ;;  %v524_v47 = vand.u32 4294901760, %v7900_v17 }
 0x169   :  { %5834 = vmatprep.subr.bf16.mxu0 %v10082_v18  ;;  %v5838_v19 = vpack.c.bf16 %v10390_v54, %v10388_v21  ;;  %6114 = vmatpush1.bf16.msra.mxu1 %v10391_v48  ;;  %v496_v4 = vand.u32 4294901760, %v495_v24  ;;  %v539_v54 = vand.u32 4294901760, %v7912_v56  ;;  %v10416_v24 = vld [vmem:[#allocation74_spill] sm:$0xff] }
 0x16a   :  { %437 = vmatmul.mubr.f32.gmra.mrb[22].mxu1 %v436_v34  ;;  %6099 = vmatprep.subr.bf16.mxu1 %v10082_v18  ;;  %v518_v34 = vand.u32 4294901760, %v7892_v63  ;;  %v525_v5 = vsub.f32 %v7900_v17, %v524_v47  ;;  %v548_v17 = vand.u32 4294901760, %v7918_v57 }
 0x16b   :  { %1821 = vmatmul.mubr.f32.gmra.mrb[20].mxu0 %v419_v62  ;;  %446 = vmatprep.mubr.f32.mxu1 %v445_v58  ;;  %v5841_v62 = vpack.c.bf16 %v10395_v3, %v10393_v52  ;;  %v569_v52 = vand.u32 4294901760, %v7936_v25 }
 0x16c   :  { %1828 = vmatprep.mubr.f32.mxu0 %v428_v46  ;;  %5836 = vmatpush1.bf16.msra.mxu0 %v5835_v51  ;;  %v5844_v46 = vpack.c.bf16 %v10399_v42, %v10397_v6  ;;  %v503_v51 = vand.u32 4294901760, %v7878_v33  ;;  %v519_v35 = vsub.f32 %v7892_v63, %v518_v34  ;;  %v540_v63 = vsub.f32 %v7912_v56, %v539_v54 }
 0x16d   :  { %5837 = vmatprep.subr.bf16.mxu0 %v10082_v18  ;;  %6115 = vmatpush1.bf16.msra.mxu1 %v10400_v40  ;;  %v549_v48 = vsub.f32 %v7918_v57, %v548_v17  ;;  %v563_v56 = vand.u32 4294901760, %v7930_v55  ;;  %v570_v57 = vsub.f32 %v7936_v25, %v569_v52  ;;  %v10411_v25 = vld [vmem:[#allocation115_spill] sm:$0xff]  ;;  %v599_v42 = vand.u32 4294901760, %v10412_v26  ;;  %v10415_v40 = vld [vmem:[#allocation125_spill] sm:$0xff] }
 0x16e   :  { %452 = vmatmul.mubr.f32.gmra.mrb[24].mxu1 %v451_v2  ;;  %6100 = vmatprep.subr.bf16.mxu1 %v10082_v18  ;;  %v541_v2 = vand.u32 4294901760, %v540_v63  ;;  %v593_v10 = vand.u32 4294901760, %v10411_v25 }
 0x16f   :  { %1832 = vmatmul.mubr.f32.gmra.mrb[22].mxu0 %v434_v43  ;;  %461 = vmatprep.mubr.f32.mxu1 %v460_v53  ;;  %v488_v43 = vand.u32 4294901760, %v7863_v22  ;;  %v550_v13 = vand.u32 4294901760, %v549_v48  ;;  %v564_v3 = vsub.f32 %v7930_v55, %v563_v56 }
 0x170   :  { %1839 = vmatprep.mubr.f32.mxu0 %v443_v0  ;;  %5839 = vmatpush1.bf16.msra.mxu0 %v5838_v19  ;;  %v509_v0 = vand.u32 4294901760, %v7886_v36  ;;  %v526_v19 = vand.u32 4294901760, %v525_v5  ;;  %v594_v39 = vsub.f32 %v10411_v25, %v593_v10 }
 0x171   :  { %5840 = vmatprep.subr.bf16.mxu0 %v10082_v18  ;;  %v489_v16 = vsub.f32 %v7863_v22, %v488_v43  ;;  %v504_v22 = vsub.f32 %v7878_v33, %v503_v51  ;;  %6116 = vmatpush1.bf16.msra.mxu1 %v10405_v59  ;;  %v533_v33 = vand.u32 4294901760, %v7906_v14  ;;  %v565_v7 = vand.u32 4294901760, %v564_v3 }
 0x172   :  { %467 = vmatmul.mubr.f32.gmra.mrb[26].mxu1 %v466_v12  ;;  %6101 = vmatprep.subr.bf16.mxu1 %v10082_v18 }
 0x173   :  { %1843 = vmatmul.mubr.f32.gmra.mrb[24].mxu0 %v449_v44  ;;  %476 = vmatprep.mubr.f32.mxu1 %v475_v8  ;;  %v490_v11 = vand.u32 4294901760, %v489_v16  ;;  %v510_v44 = vsub.f32 %v7886_v36, %v509_v0  ;;  %v505_v15 = vand.u32 4294901760, %v504_v22  ;;  %v520_v36 = vand.u32 4294901760, %v519_v35  ;;  %v10414_v8 = vld [vmem:[#allocation123_spill] sm:$0xff] }
 0x174   :  { %1850 = vmatprep.mubr.f32.mxu0 %v458_v9  ;;  %5842 = vmatpush1.bf16.msra.mxu0 %v5841_v62  ;;  %v534_v30 = vsub.f32 %v7906_v14, %v533_v33  ;;  %v10406_v9 = vld [vmem:[#allocation65_spill] sm:$0xff]  ;;  %v614_v16 = vand.u32 4294901760, %v10415_v40 }
 0x175   :  { %5843 = vmatprep.subr.bf16.mxu0 %v10082_v18  ;;  %v511_v21 = vand.u32 4294901760, %v510_v44  ;;  %6117 = vmatpush1.bf16.msra.mxu1 %v10406_v9  ;;  %v10408_v62 = vld [vmem:[#allocation69_spill] sm:$0xff]  ;;  %v10419_v44 = vld [vmem:[#allocation76_spill] sm:$0xff] }
 0x176   :  { %482 = vmatmul.mubr.f32.gmra.mrb[28].mxu1 %v481_v41  ;;  %v535_v58 = vand.u32 4294901760, %v534_v30  ;;  %6102 = vmatprep.subr.bf16.mxu1 %v10082_v18  ;;  %v595_v41 = vand.u32 4294901760, %v594_v39  ;;  %v10423_v30 = vld [vmem:[#allocation137_spill] sm:$0xff] }
 0x177   :  { %1854 = vmatmul.mubr.f32.gmra.mrb[26].mxu0 %v464_v20  ;;  %491 = vmatprep.mubr.f32.mxu1 %v490_v11  ;;  %v554_v20 = vand.u32 4294901760, %v7924_v27  ;;  %v659_v63 = vand.u32 4294901760, %v10423_v30 }
 0x178   :  { %1861 = vmatprep.mubr.f32.mxu0 %v473_v60  ;;  %5845 = vmatpush1.bf16.msra.mxu0 %v5844_v46  ;;  %v10409_v60 = vld [vmem:[#allocation111_spill] sm:$0xff] }
 0x179   :  { %5846 = vmatprep.subr.bf16.mxu0 %v10082_v18  ;;  %v555_v14 = vsub.f32 %v7924_v27, %v554_v20  ;;  %6118 = vmatpush1.bf16.msra.mxu1 %v10407_v23  ;;  %v578_v27 = vand.u32 4294901760, %v7942_v31  ;;  %v584_v53 = vand.u32 4294901760, %v10409_v60 }
 0x17a   :  { %497 = vmatmul.mubr.f32.gmra.mrb[30].mxu1 %v496_v4  ;;  %6103 = vmatprep.subr.bf16.mxu1 %v10082_v18  ;;  %v10418_v4 = vld [vmem:[#allocation129_spill] sm:$0xff] }
 0x17b   :  { %1865 = vmatmul.mubr.f32.gmra.mrb[28].mxu0 %v479_v29  ;;  %506 = vmatprep.mubr.f32.mxu1 %v505_v15  ;;  %v556_v50 = vand.u32 4294901760, %v555_v14  ;;  %v571_v29 = vand.u32 4294901760, %v570_v57  ;;  %v579_v12 = vsub.f32 %v7942_v31, %v578_v27  ;;  %v585_v55 = vsub.f32 %v10409_v60, %v584_v53  ;;  %v10425_v14 = vld [vmem:[#allocation141_spill] sm:$0xff] }
 0x17c   :  { %1872 = vmatprep.mubr.f32.mxu0 %v488_v43  ;;  %5848 = vmatpush1.bf16.msra.mxu0 %v5847_v45  ;;  %v600_v31 = vsub.f32 %v10412_v26, %v599_v42  ;;  %v10413_v43 = vld [vmem:[#allocation72_spill] sm:$0xff]  ;;  %v615_v45 = vsub.f32 %v10415_v40, %v614_v16  ;;  %v629_v22 = vand.u32 4294901760, %v10418_v4  ;;  %v674_v23 = vand.u32 4294901760, %v10425_v14  ;;  %v10432_v40 = vld [vmem:[#allocation155_spill] sm:$0xff] }
 0x17d   :  { %5849 = vmatprep.subr.bf16.mxu0 %v10082_v18  ;;  %6119 = vmatpush1.bf16.msra.mxu1 %v10408_v62  ;;  %v580_v6 = vand.u32 4294901760, %v579_v12  ;;  %v586_v46 = vand.u32 4294901760, %v585_v55  ;;  %v10427_v62 = vld [vmem:[#allocation145_spill] sm:$0xff] }
 0x17e   :  { %512 = vmatmul.mubr.f32.gmra.mrb[32].mxu1 %v511_v21  ;;  %6104 = vmatprep.subr.bf16.mxu1 %v10082_v18  ;;  %v601_v32 = vand.u32 4294901760, %v600_v31  ;;  %v616_v61 = vand.u32 4294901760, %v615_v45  ;;  %v10421_v21 = vld [vmem:[#allocation133_spill] sm:$0xff] }
 0x17f   :  { %1876 = vmatmul.mubr.f32.gmra.mrb[30].mxu0 %v494_v1  ;;  %521 = vmatprep.mubr.f32.mxu1 %v520_v36  ;;  %v608_v1 = vand.u32 4294901760, %v10414_v8  ;;  %v644_v59 = vand.u32 4294901760, %v10421_v21  ;;  %v10422_v36 = vld [vmem:[#allocation135_spill] sm:$0xff]  ;;  %v10431_v31 = vld [vmem:[#allocation153_spill] sm:$0xff] }
 0x180   :  { %1883 = vmatprep.mubr.f32.mxu0 %v503_v51  ;;  %5851 = vmatpush1.bf16.msra.mxu0 %v5850_v38  ;;  %v10417_v51 = vld [vmem:[#allocation127_spill] sm:$0xff]  ;;  %v630_v38 = vsub.f32 %v10418_v4, %v629_v22 }
 0x181   :  { %5852 = vmatprep.subr.bf16.mxu0 %v10082_v18  ;;  %6120 = vmatpush1.bf16.msra.mxu1 %v10410_v37  ;;  %v609_v28 = vsub.f32 %v10414_v8, %v608_v1  ;;  %v623_v11 = vand.u32 4294901760, %v10417_v51  ;;  %v10429_v37 = vld [vmem:[#allocation149_spill] sm:$0xff] }
 0x182   :  { %527 = vmatmul.mubr.f32.gmra.mrb[34].mxu1 %v526_v19  ;;  %6105 = vmatprep.subr.bf16.mxu1 %v10082_v18  ;;  %v631_v35 = vand.u32 4294901760, %v630_v38  ;;  %v704_v25 = vand.u32 4294901760, %v10429_v37  ;;  %v10437_v38 = vld [vmem:[#allocation93_spill] sm:$0xff] }
 0x183   :  { %1887 = vmatmul.mubr.f32.gmra.mrb[32].mxu0 %v509_v0  ;;  %536 = vmatprep.mubr.f32.mxu1 %v535_v58  ;;  %v610_v0 = vand.u32 4294901760, %v609_v28  ;;  %v624_v49 = vsub.f32 %v10417_v51, %v623_v11  ;;  %v660_v58 = vsub.f32 %v10423_v30, %v659_v63  ;;  %v10433_v28 = vld [vmem:[#allocation156_spill] sm:$0xff]  ;;  %v10450_v30 = vld [vmem:[#allocation75_spill] sm:$0xff] }
 0x184   :  { %1894 = vmatprep.mubr.f32.mxu0 %v518_v34  ;;  %v10420_v34 = vld [vmem:[#allocation131_spill] sm:$0xff]  ;;  %v705_v26 = vsub.f32 %v10429_v37, %v704_v25  ;;  %v734_v45 = vand.u32 4294901760, %v10433_v28  ;;  %v10474_v37 = vld [vmem:[#allocation97_spill] sm:$0xff] }
 0x185   :  { %6121 = vmatpush1.bf16.msra.mxu1 %v10413_v43  ;;  %v638_v15 = vand.u32 4294901760, %v10420_v34  ;;  %v719_v43 = vand.u32 4294901760, %v10431_v31 }
 0x186   :  { %542 = vmatmul.mubr.f32.gmra.mrb[36].mxu1 %v541_v2  ;;  %6106 = vmatprep.subr.bf16.mxu1 %v10082_v18  ;;  %v706_v8 = vand.u32 4294901760, %v705_v26  ;;  %v10478_v26 = vld [vmem:[#allocation42_spill] sm:$0xff] }
 0x187   :  { %1898 = vmatmul.mubr.f32.gmra.mrb[34].mxu0 %v524_v47  ;;  %551 = vmatprep.mubr.f32.mxu1 %v550_v13  ;;  %v625_v47 = vand.u32 4294901760, %v624_v49  ;;  %v639_v5 = vsub.f32 %v10420_v34, %v638_v15  ;;  %v10436_v49 = vld [vmem:[#allocation56_spill] sm:$0xff]  ;;  %v10439_v34 = vld [vmem:[#allocation71_spill] sm:$0xff] }
 0x188   :  { %1905 = vmatprep.mubr.f32.mxu0 %v533_v33  ;;  %v645_v33 = vsub.f32 %v10421_v21, %v644_v59  ;;  %v10442_v21 = vld [vmem:[#allocation96_spill] sm:$0xff] }
 0x189   :  { %6122 = vmatpush1.bf16.msra.mxu1 %v10416_v24  ;;  %v640_v19 = vand.u32 4294901760, %v639_v5  ;;  %v10445_v5 = vld [vmem:[#allocation73_spill] sm:$0xff] }
 0x18a   :  { %557 = vmatmul.mubr.f32.gmra.mrb[38].mxu1 %v556_v50  ;;  %6107 = vmatprep.subr.bf16.mxu1 %v10082_v18  ;;  %v646_v9 = vand.u32 4294901760, %v645_v33  ;;  %v10426_v50 = vld [vmem:[#allocation143_spill] sm:$0xff]  ;;  %v10446_v33 = vld [vmem:[#allocation98_spill] sm:$0xff] }
 0x18b   :  { %1909 = vmatmul.mubr.f32.gmra.mrb[36].mxu0 %v539_v54  ;;  %566 = vmatprep.mubr.f32.mxu1 %v565_v7  ;;  %v653_v54 = vand.u32 4294901760, %v10422_v36  ;;  %v683_v3 = vand.u32 4294901760, %v10426_v50 }
 0x18c   :  { %1916 = vmatprep.mubr.f32.mxu0 %v548_v17 }
 0x18d   :  { %6123 = vmatpush1.bf16.msra.mxu1 %v10419_v44  ;;  %v654_v17 = vsub.f32 %v10422_v36, %v653_v54  ;;  %v684_v60 = vsub.f32 %v10426_v50, %v683_v3  ;;  %v10438_v44 = vld [vmem:[#allocation78_spill] sm:$0xff]  ;;  %v10447_v36 = vld [vmem:[#allocation99_spill] sm:$0xff] }
 0x18e   :  { %572 = vmatmul.mubr.f32.gmra.mrb[40].mxu1 %v571_v29  ;;  %v10428_v29 = vld [vmem:[#allocation147_spill] sm:$0xff] }
 0x18f   :  { %1920 = vmatmul.mubr.f32.gmra.mrb[38].mxu0 %v554_v20  ;;  %581 = vmatprep.mubr.f32.mxu1 %v580_v6  ;;  %v10424_v20 = vld [vmem:[#allocation139_spill] sm:$0xff]  ;;  %v655_v48 = vand.u32 4294901760, %v654_v17  ;;  %v698_v12 = vand.u32 4294901760, %v10428_v29  ;;  %v685_v55 = vand.u32 4294901760, %v684_v60  ;;  %v10469_v60 = vld [vmem:[#allocation94_spill] sm:$0xff] }
 0x190   :  { %1927 = vmatprep.mubr.f32.mxu0 %v563_v56  ;;  %v668_v2 = vand.u32 4294901760, %v10424_v20  ;;  %v661_v56 = vand.u32 4294901760, %v660_v58  ;;  %v10453_v17 = vld [vmem:[#allocation87_spill] sm:$0xff]  ;;  %v10454_v58 = vld [vmem:[#allocation88_spill] sm:$0xff] }
 0x191   :  { %v699_v6 = vsub.f32 %v10428_v29, %v698_v12  ;;  %v10463_v50 = vld [vmem:[#allocation31_spill] sm:$0xff] }
 0x192   :  { %587 = vmatmul.mubr.f32.gmra.mrb[42].mxu1 %v586_v46  ;;  %v669_v13 = vsub.f32 %v10424_v20, %v668_v2  ;;  %v10455_v20 = vld [vmem:[#allocation77_spill] sm:$0xff]  ;;  %v10471_v29 = vld [vmem:[#allocation119_spill] sm:$0xff] }
 0x193   :  { %1931 = vmatmul.mubr.f32.gmra.mrb[40].mxu0 %v569_v52  ;;  %596 = vmatprep.mubr.f32.mxu1 %v595_v41  ;;  %v675_v52 = vsub.f32 %v10425_v14, %v674_v23  ;;  %v700_v39 = vand.u32 4294901760, %v699_v6  ;;  %v720_v41 = vsub.f32 %v10431_v31, %v719_v43  ;;  %v10458_v14 = vld [vmem:[#allocation90_spill] sm:$0xff]  ;;  %v10477_v6 = vld [vmem:[#allocation128_spill] sm:$0xff] }
 0x194   :  { %1938 = vmatprep.mubr.f32.mxu0 %v578_v27  ;;  %v670_v57 = vand.u32 4294901760, %v669_v13  ;;  %v689_v27 = vand.u32 4294901760, %v10427_v62  ;;  %v10461_v13 = vld [vmem:[#allocation108_spill] sm:$0xff] }
 0x195   :  { %v676_v7 = vand.u32 4294901760, %v675_v52  ;;  %v721_v24 = vand.u32 4294901760, %v720_v41  ;;  %v10462_v52 = vld [vmem:[#allocation109_spill] sm:$0xff]  ;;  %v10482_v31 = vld [vmem:[#allocation132_spill] sm:$0xff]  ;;  %v10486_v41 = vld [vmem:[#allocation134_spill] sm:$0xff] }
 0x196   :  { %602 = vmatmul.mubr.f32.gmra.mrb[44].mxu1 %v601_v32 }
 0x197   :  { %1942 = vmatmul.mubr.f32.gmra.mrb[42].mxu0 %v584_v53  ;;  %611 = vmatprep.mubr.f32.mxu1 %v610_v0  ;;  %v690_v53 = vsub.f32 %v10427_v62, %v689_v27  ;;  %v10466_v62 = vld [vmem:[#allocation112_spill] sm:$0xff] }
 0x198   :  { %1949 = vmatprep.mubr.f32.mxu0 %v593_v10 }
 0x199   :  { %v691_v10 = vand.u32 4294901760, %v690_v53  ;;  %v10470_v53 = vld [vmem:[#allocation86_spill] sm:$0xff] }
 0x19a   :  { %617 = vmatmul.mubr.f32.gmra.mrb[46].mxu1 %v616_v61  ;;  %v10435_v61 = vld [vmem:[#allocation62_spill] sm:$0xff] }
 0x19b   :  { %1953 = vmatmul.mubr.f32.gmra.mrb[44].mxu0 %v599_v42  ;;  %626 = vmatprep.mubr.f32.mxu1 %v625_v47  ;;  %v10430_v42 = vld [vmem:[#allocation151_spill] sm:$0xff] }
 0x19c   :  { %1960 = vmatprep.mubr.f32.mxu0 %v608_v1  ;;  %v713_v46 = vand.u32 4294901760, %v10430_v42  ;;  %v10441_v47 = vld [vmem:[#allocation95_spill] sm:$0xff] }
 0x19e   :  { %632 = vmatmul.mubr.f32.gmra.mrb[48].mxu1 %v631_v35  ;;  %v714_v1 = vsub.f32 %v10430_v42, %v713_v46  ;;  %v10444_v35 = vld [vmem:[#allocation82_spill] sm:$0xff]  ;;  %v10479_v42 = vld [vmem:[#allocation100_spill] sm:$0xff] }
 0x19f   :  { %1964 = vmatmul.mubr.f32.gmra.mrb[46].mxu0 %v614_v16  ;;  %641 = vmatprep.mubr.f32.mxu1 %v640_v19  ;;  %v728_v16 = vand.u32 4294901760, %v10432_v40  ;;  %v10449_v19 = vld [vmem:[#allocation85_spill] sm:$0xff] }
 0x1a0   :  { %1971 = vmatprep.mubr.f32.mxu0 %v623_v11  ;;  %v715_v32 = vand.u32 4294901760, %v714_v1  ;;  %v735_v11 = vsub.f32 %v10433_v28, %v734_v45  ;;  %v10485_v1 = vld [vmem:[#allocation34_spill] sm:$0xff]  ;;  %v10490_v28 = vld [vmem:[#allocation39_spill] sm:$0xff] }
 0x1a1   :  { %v729_v51 = vsub.f32 %v10432_v40, %v728_v16  ;;  %v10487_v40 = vld [vmem:[#allocation136_spill] sm:$0xff] }
 0x1a2   :  { %647 = vmatmul.mubr.f32.gmra.mrb[50].mxu1 %v646_v9  ;;  %v736_v4 = vand.u32 4294901760, %v735_v11  ;;  %v10452_v9 = vld [vmem:[#allocation102_spill] sm:$0xff]  ;;  %v10494_v11 = vld [vmem:[#allocation55_spill] sm:$0xff] }
 0x1a3   :  { %1975 = vmatmul.mubr.f32.gmra.mrb[48].mxu0 %v629_v22  ;;  %656 = vmatprep.mubr.f32.mxu1 %v655_v48  ;;  %v730_v0 = vand.u32 4294901760, %v729_v51  ;;  %v10434_v22 = vld [vmem:[#allocation67_spill] sm:$0xff]  ;;  %v10457_v48 = vld [vmem:[#allocation105_spill] sm:$0xff]  ;;  %v10493_v51 = vld [vmem:[#allocation110_spill] sm:$0xff] }
 0x1a4   :  { %1982 = vmatprep.mubr.f32.mxu0 %v638_v15  ;;  %v10440_v15 = vld [vmem:[#allocation79_spill] sm:$0xff] }
 0x1a6   :  { %662 = vmatmul.mubr.f32.gmra.mrb[52].mxu1 %v661_v56  ;;  %v10460_v56 = vld [vmem:[#allocation80_spill] sm:$0xff] }
 0x1a7   :  { %1986 = vmatmul.mubr.f32.gmra.mrb[50].mxu0 %v644_v59  ;;  %671 = vmatprep.mubr.f32.mxu1 %v670_v57  ;;  %v10443_v59 = vld [vmem:[#allocation81_spill] sm:$0xff]  ;;  %v10465_v57 = vld [vmem:[#allocation83_spill] sm:$0xff] }
 0x1a8   :  { %1993 = vmatprep.mubr.f32.mxu0 %v653_v54  ;;  %v10448_v54 = vld [vmem:[#allocation84_spill] sm:$0xff] }
 0x1aa   :  { %677 = vmatmul.mubr.f32.gmra.mrb[54].mxu1 %v676_v7  ;;  %v10468_v7 = vld [vmem:[#allocation35_spill] sm:$0xff] }
 0x1ab   :  { %1997 = vmatmul.mubr.f32.gmra.mrb[52].mxu0 %v659_v63  ;;  %686 = vmatprep.mubr.f32.mxu1 %v685_v55  ;;  %v10451_v63 = vld [vmem:[#allocation101_spill] sm:$0xff]  ;;  %v10473_v55 = vld [vmem:[#allocation40_spill] sm:$0xff] }
 0x1ac   :  { %2004 = vmatprep.mubr.f32.mxu0 %v668_v2  ;;  %v10456_v2 = vld [vmem:[#allocation104_spill] sm:$0xff] }
 0x1ae   :  { %692 = vmatmul.mubr.f32.gmra.mrb[56].mxu1 %v691_v10  ;;  %v10476_v10 = vld [vmem:[#allocation126_spill] sm:$0xff] }
 0x1af   :  { %2008 = vmatmul.mubr.f32.gmra.mrb[54].mxu0 %v674_v23  ;;  %701 = vmatprep.mubr.f32.mxu1 %v700_v39  ;;  %v10459_v23 = vld [vmem:[#allocation91_spill] sm:$0xff]  ;;  %v10481_v39 = vld [vmem:[#allocation130_spill] sm:$0xff] }
 0x1b0   :  { %2015 = vmatprep.mubr.f32.mxu0 %v683_v3  ;;  %v10464_v3 = vld [vmem:[#allocation92_spill] sm:$0xff] }
 0x1b2   :  { %707 = vmatmul.mubr.f32.gmra.mrb[58].mxu1 %v706_v8  ;;  %v10484_v8 = vld [vmem:[#allocation52_spill] sm:$0xff] }
 0x1b3   :  { %2019 = vmatmul.mubr.f32.gmra.mrb[56].mxu0 %v689_v27  ;;  %716 = vmatprep.mubr.f32.mxu1 %v715_v32  ;;  %v10467_v27 = vld [vmem:[#allocation116_spill] sm:$0xff]  ;;  %v10489_v32 = vld [vmem:[#allocation107_spill] sm:$0xff] }
 0x1b4   :  { %2026 = vmatprep.mubr.f32.mxu0 %v698_v12  ;;  %v10472_v12 = vld [vmem:[#allocation124_spill] sm:$0xff] }
 0x1b6   :  { %722 = vmatmul.mubr.f32.gmra.mrb[60].mxu1 %v721_v24  ;;  %v10492_v24 = vld [vmem:[#allocation140_spill] sm:$0xff] }
 0x1b7   :  { %2030 = vmatmul.mubr.f32.gmra.mrb[58].mxu0 %v704_v25  ;;  %731 = vmatprep.mubr.f32.mxu1 %v730_v0  ;;  %v10475_v25 = vld [vmem:[#allocation89_spill] sm:$0xff] }
 0x1b8   :  { %2037 = vmatprep.mubr.f32.mxu0 %v713_v46  ;;  %v10480_v46 = vld [vmem:[#allocation29_spill] sm:$0xff] }
 0x1b9   :  { %v10495_v0 = vld [vmem:[#allocation41_spill] sm:$0xff] }
 0x1ba   :  { %737 = vmatmul.mubr.f32.gmra.mrb[62].mxu1 %v736_v4  ;;  %v10496_v4 = vld [vmem:[#allocation142_spill] sm:$0xff] }
 0x1bb   :  { %2041 = vmatmul.mubr.f32.gmra.mrb[60].mxu0 %v719_v43  ;;  %1079 = vmatprep.mubr.f32.mxu1 %v10434_v22  ;;  %v10483_v43 = vld [vmem:[#allocation103_spill] sm:$0xff] }
 0x1bc   :  { %2048 = vmatprep.mubr.f32.mxu0 %v728_v16  ;;  %v10488_v16 = vld [vmem:[#allocation106_spill] sm:$0xff] }
 0x1be   :  { %1081 = vmatmul.mubr.f32.vlgmr.msra.gmra.mrb[32].mxu1 %v10436_v49 }
 0x1bf   :  { %2052 = vmatmul.mubr.f32.gmra.mrb[62].mxu0 %v734_v45  ;;  %1086 = vmatprep.mubr.f32.mxu1 %v10437_v38  ;;  %v10491_v45 = vld [vmem:[#allocation138_spill] sm:$0xff] }
 0x1c0   :  { %2218 = vmatprep.mubr.f32.mxu0 %v10435_v61 }
 0x1c2   :  { %1088 = vmatmul.mubr.f32.gmra.mrb[34].mxu1 %v10441_v47 }
 0x1c3   :  { %2220 = vmatmul.mubr.f32.vlgmr.msra.gmra.mrb[0].mxu0 %v10438_v44  ;;  %1093 = vmatprep.mubr.f32.mxu1 %v10442_v21 }
 0x1c4   :  { %5854 = vmatpush1.bf16.msra.mxu0 %v10439_v34  ;;  %2225 = vmatprep.mubr.f32.mxu0 %v10440_v15  ;;  %v10497_v34 = vld [vmem:[#allocation144_spill] sm:$0xff] }
 0x1c5   :  { %5855 = vmatprep.subr.bf16.mxu0 %v10082_v18 }
 0x1c6   :  { %1095 = vmatmul.mubr.f32.gmra.mrb[36].mxu1 %v10446_v33 }
 0x1c7   :  { %2227 = vmatmul.mubr.f32.gmra.mrb[2].mxu0 %v10443_v59  ;;  %1100 = vmatprep.mubr.f32.mxu1 %v10447_v36 }
 0x1c8   :  { %2232 = vmatprep.mubr.f32.mxu0 %v10444_v35  ;;  %5857 = vmatpush1.bf16.msra.mxu0 %v10445_v5  ;;  %v10498_v5 = vld [vmem:[#allocation113_spill] sm:$0xff] }
 0x1c9   :  { %5858 = vmatprep.subr.bf16.mxu0 %v10082_v18 }
 0x1ca   :  { %1102 = vmatmul.mubr.f32.gmra.mrb[38].mxu1 %v10451_v63 }
 0x1cb   :  { %2234 = vmatmul.mubr.f32.gmra.mrb[4].mxu0 %v10448_v54  ;;  %1107 = vmatprep.mubr.f32.mxu1 %v10452_v9 }
 0x1cc   :  { %2239 = vmatprep.mubr.f32.mxu0 %v10449_v19  ;;  %5860 = vmatpush1.bf16.msra.mxu0 %v10450_v30  ;;  %v10499_v30 = vld [vmem:[#allocation114_spill] sm:$0xff] }
 0x1cd   :  { %5861 = vmatprep.subr.bf16.mxu0 %v10082_v18 }
 0x1ce   :  { %1109 = vmatmul.mubr.f32.gmra.mrb[40].mxu1 %v10456_v2 }
 0x1cf   :  { %2241 = vmatmul.mubr.f32.gmra.mrb[6].mxu0 %v10453_v17  ;;  %1114 = vmatprep.mubr.f32.mxu1 %v10457_v48 }
 0x1d0   :  { %2246 = vmatprep.mubr.f32.mxu0 %v10454_v58  ;;  %5863 = vmatpush1.bf16.msra.mxu0 %v10455_v20  ;;  %v10500_v20 = vld [vmem:[#allocation47_spill] sm:$0xff] }
 0x1d1   :  { %5864 = vmatprep.subr.bf16.mxu0 %v10082_v18 }
 0x1d2   :  { %1116 = vmatmul.mubr.f32.gmra.mrb[42].mxu1 %v10461_v13 }
 0x1d3   :  { %2248 = vmatmul.mubr.f32.gmra.mrb[8].mxu0 %v10458_v14  ;;  %1121 = vmatprep.mubr.f32.mxu1 %v10462_v52 }
 0x1d4   :  { %2253 = vmatprep.mubr.f32.mxu0 %v10459_v23  ;;  %5866 = vmatpush1.bf16.msra.mxu0 %v10460_v56  ;;  %v10501_v56 = vld [vmem:[#allocation146_spill] sm:$0xff] }
 0x1d5   :  { %5867 = vmatprep.subr.bf16.mxu0 %v10082_v18 }
 0x1d6   :  { %1123 = vmatmul.mubr.f32.gmra.mrb[44].mxu1 %v10466_v62 }
 0x1d7   :  { %2255 = vmatmul.mubr.f32.gmra.mrb[10].mxu0 %v10463_v50  ;;  %1128 = vmatprep.mubr.f32.mxu1 %v10467_v27 }
 0x1d8   :  { %2260 = vmatprep.mubr.f32.mxu0 %v10464_v3  ;;  %5869 = vmatpush1.bf16.msra.mxu0 %v10465_v57  ;;  %v10502_v57 = vld [vmem:[#allocation148_spill] sm:$0xff] }
 0x1d9   :  { %5870 = vmatprep.subr.bf16.mxu0 %v10082_v18 }
 0x1da   :  { %1130 = vmatmul.mubr.f32.gmra.mrb[46].mxu1 %v10471_v29 }
 0x1db   :  { %2262 = vmatmul.mubr.f32.gmra.mrb[12].mxu0 %v10468_v7  ;;  %1135 = vmatprep.mubr.f32.mxu1 %v10472_v12 }
 0x1dc   :  { %2267 = vmatprep.mubr.f32.mxu0 %v10469_v60  ;;  %5872 = vmatpush1.bf16.msra.mxu0 %v10470_v53  ;;  %v10503_v53 = vld [vmem:[#allocation117_spill] sm:$0xff] }
 0x1dd   :  { %5873 = vmatprep.subr.bf16.mxu0 %v10082_v18 }
 0x1de   :  { %1137 = vmatmul.mubr.f32.gmra.mrb[48].mxu1 %v10476_v10 }
 0x1df   :  { %2269 = vmatmul.mubr.f32.gmra.mrb[14].mxu0 %v10473_v55  ;;  %1142 = vmatprep.mubr.f32.mxu1 %v10477_v6 }
 0x1e0   :  { %2274 = vmatprep.mubr.f32.mxu0 %v10474_v37  ;;  %5875 = vmatpush1.bf16.msra.mxu0 %v10475_v25  ;;  %v10504_v25 = vld [vmem:[#allocation61_spill] sm:$0xff] }
 0x1e1   :  { %5876 = vmatprep.subr.bf16.mxu0 %v10082_v18 }
 0x1e2   :  { %1144 = vmatmul.mubr.f32.gmra.mrb[50].mxu1 %v10481_v39 }
 0x1e3   :  { %2276 = vmatmul.mubr.f32.gmra.mrb[16].mxu0 %v10478_v26  ;;  %1149 = vmatprep.mubr.f32.mxu1 %v10482_v31 }
 0x1e4   :  { %2281 = vmatprep.mubr.f32.mxu0 %v10479_v42  ;;  %5878 = vmatpush1.bf16.msra.mxu0 %v10480_v46  ;;  %v10505_v46 = vld [vmem:[#allocation54_spill] sm:$0xff] }
 0x1e5   :  { %5879 = vmatprep.subr.bf16.mxu0 %v10082_v18 }
 0x1e6   :  { %1151 = vmatmul.mubr.f32.gmra.mrb[52].mxu1 %v10486_v41 }
 0x1e7   :  { %2283 = vmatmul.mubr.f32.gmra.mrb[18].mxu0 %v10483_v43  ;;  %1156 = vmatprep.mubr.f32.mxu1 %v10487_v40 }
 0x1e8   :  { %2288 = vmatprep.mubr.f32.mxu0 %v10484_v8  ;;  %5881 = vmatpush1.bf16.msra.mxu0 %v10485_v1  ;;  %v10506_v1 = vld [vmem:[#allocation150_spill] sm:$0xff] }
 0x1e9   :  { %5882 = vmatprep.subr.bf16.mxu0 %v10082_v18 }
 0x1ea   :  { %1158 = vmatmul.mubr.f32.gmra.mrb[54].mxu1 %v10491_v45 }
 0x1eb   :  { %2290 = vmatmul.mubr.f32.gmra.mrb[20].mxu0 %v10488_v16  ;;  %1163 = vmatprep.mubr.f32.mxu1 %v10492_v24 }
 0x1ec   :  { %2295 = vmatprep.mubr.f32.mxu0 %v10489_v32  ;;  %5884 = vmatpush1.bf16.msra.mxu0 %v10490_v28  ;;  %v10507_v28 = vld [vmem:[#allocation152_spill] sm:$0xff] }
 0x1ed   :  { %5885 = vmatprep.subr.bf16.mxu0 %v10082_v18 }
 0x1ee   :  { %1165 = vmatmul.mubr.f32.gmra.mrb[56].mxu1 %v10496_v4 }
 0x1ef   :  { %2297 = vmatmul.mubr.f32.gmra.mrb[22].mxu0 %v10493_v51  ;;  %1170 = vmatprep.mubr.f32.mxu1 %v10497_v34 }
 0x1f0   :  { %2302 = vmatprep.mubr.f32.mxu0 %v10494_v11  ;;  %5887 = vmatpush1.bf16.msra.mxu0 %v10495_v0  ;;  %v10508_v0 = vld [vmem:[#allocation120_spill] sm:$0xff] }
 0x1f1   :  { %5888 = vmatprep.subr.bf16.mxu0 %v10082_v18 }
 0x1f2   :  { %1172 = vmatmul.mubr.f32.gmra.mrb[58].mxu1 %v10501_v56 }
 0x1f3   :  { %2304 = vmatmul.mubr.f32.gmra.mrb[24].mxu0 %v10498_v5  ;;  %1177 = vmatprep.mubr.f32.mxu1 %v10502_v57  ;;  %v10511_v5 = vld [vmem:[#allocation154_spill] sm:$0xff] }
 0x1f4   :  { %2309 = vmatprep.mubr.f32.mxu0 %v10499_v30  ;;  %5890 = vmatpush1.bf16.msra.mxu0 %v10500_v20  ;;  %v10509_v20 = vld [vmem:[#allocation121_spill] sm:$0xff]  ;;  %v10510_v30 = vld [vmem:[#allocation58_spill] sm:$0xff] }
 0x1f5   :  { %5891 = vmatprep.subr.bf16.mxu0 %v10082_v18 }
 0x1f6   :  { %1179 = vmatmul.mubr.f32.gmra.mrb[60].mxu1 %v10506_v1 }
 0x1f7   :  { %2311 = vmatmul.mubr.f32.gmra.mrb[26].mxu0 %v10503_v53  ;;  %1184 = vmatprep.mubr.f32.mxu1 %v10507_v28  ;;  %v10512_v53 = vld [vmem:[#allocation122_spill] sm:$0xff] }
 0x1f8   :  { %2316 = vmatprep.mubr.f32.mxu0 %v10504_v25  ;;  %5893 = vmatpush1.bf16.msra.mxu0 %v10505_v46  ;;  %v10513_v46 = vld [vmem:[#allocation66_spill] sm:$0xff] }
 0x1f9   :  { %5894 = vmatprep.subr.bf16.mxu0 %v10082_v18 }
 0x1fa   :  { %1186 = vmatmul.mubr.f32.gmra.mrb[62].mxu1 %v10511_v5 }
 0x1fb   :  { %2318 = vmatmul.mubr.f32.gmra.mrb[28].mxu0 %v10508_v0 }
 0x1fc   :  { %2323 = vmatprep.mubr.f32.mxu0 %v10509_v20  ;;  %5896 = vmatpush1.bf16.msra.mxu0 %v10510_v30  ;;  %v8438_v30 = vld [vmem:[#allocation7] sm:$0xff] }
 0x1fd   :  { %5897 = vmatprep.subr.bf16.mxu0 %v10082_v18  ;;  %10515 = vst [vmem:[#allocation13_spill] sm:$0xff] %v8438_v30 }
 0x1ff   :  { %2325 = vmatmul.mubr.f32.gmra.mrb[30].mxu0 %v10512_v53 }
 0x200   :  { %2330 = vmatprep.mubr.f32.mxu0 %v10434_v22  ;;  %5899 = vmatpush1.bf16.msra.mxu0 %v10513_v46  ;;  %v8440_v46 = vld [vmem:[#allocation7 + $0x8] sm:$0xff] }
 0x203   :  { %2332 = vmatmul.mubr.f32.gmra.mrb[32].mxu0 %v10436_v49 }
 0x204   :  { %2337 = vmatprep.mubr.f32.mxu0 %v10437_v38 }
 0x207   :  { %2339 = vmatmul.mubr.f32.gmra.mrb[34].mxu0 %v10441_v47 }
 0x208   :  { %2344 = vmatprep.mubr.f32.mxu0 %v10442_v21 }
 0x20b   :  { %2346 = vmatmul.mubr.f32.gmra.mrb[36].mxu0 %v10446_v33 }
 0x20c   :  { %2351 = vmatprep.mubr.f32.mxu0 %v10447_v36 }
 0x20f   :  { %2353 = vmatmul.mubr.f32.gmra.mrb[38].mxu0 %v10451_v63  ;;  %v8436_v18 = vpop.f32.mrb[0].mxu1 }
 0x210   :  { %2358 = vmatprep.mubr.f32.mxu0 %v10452_v9  ;;  %10514 = vst [vmem:[#allocation12_spill] sm:$0xff] %v8436_v18 }
 0x213   :  { %2360 = vmatmul.mubr.f32.gmra.mrb[40].mxu0 %v10456_v2 }
 0x214   :  { %2365 = vmatprep.mubr.f32.mxu0 %v10457_v48 }
 0x217   :  { %2367 = vmatmul.mubr.f32.gmra.mrb[42].mxu0 %v10461_v13 }
 0x218   :  { %2372 = vmatprep.mubr.f32.mxu0 %v10462_v52 }
 0x21b   :  { %2374 = vmatmul.mubr.f32.gmra.mrb[44].mxu0 %v10466_v62 }
 0x21c   :  { %2379 = vmatprep.mubr.f32.mxu0 %v10467_v27 }
 0x21f   :  { %2381 = vmatmul.mubr.f32.gmra.mrb[46].mxu0 %v10471_v29 }
 0x220   :  { %2386 = vmatprep.mubr.f32.mxu0 %v10472_v12 }
 0x223   :  { %2388 = vmatmul.mubr.f32.gmra.mrb[48].mxu0 %v10476_v10 }
 0x224   :  { %2393 = vmatprep.mubr.f32.mxu0 %v10477_v6 }
 0x227   :  { %2395 = vmatmul.mubr.f32.gmra.mrb[50].mxu0 %v10481_v39 }
 0x228   :  { %2400 = vmatprep.mubr.f32.mxu0 %v10482_v31 }
 0x22b   :  { %2402 = vmatmul.mubr.f32.gmra.mrb[52].mxu0 %v10486_v41 }
 0x22c   :  { %2407 = vmatprep.mubr.f32.mxu0 %v10487_v40 }
 0x22f   :  { %2409 = vmatmul.mubr.f32.gmra.mrb[54].mxu0 %v10491_v45  ;;  %v8455_v45 = vld [vmem:[#allocation7 + $0x28] sm:$0xff] }
 0x230   :  { %2414 = vmatprep.mubr.f32.mxu0 %v10492_v24  ;;  %v9877_v41 = vand.u32 4294901760, %v8455_v45 }
 0x233   :  { %2416 = vmatmul.mubr.f32.gmra.mrb[56].mxu0 %v10496_v4  ;;  %v275_v4 = vpop.f32.mrb[1].mxu1 }
 0x234   :  { %2421 = vmatprep.mubr.f32.mxu0 %v10497_v34  ;;  %v9872_v34 = vand.u32 4294901760, %v8438_v30  ;;  %v8476_v30 = vld [vmem:[#allocation7 + $0x38] sm:$0xff] }
 0x237   :  { %2423 = vmatmul.mubr.f32.gmra.mrb[58].mxu0 %v10501_v56  ;;  %v9871_v56 = vand.u32 4294901760, %v8440_v46 }
 0x238   :  { %2428 = vmatprep.mubr.f32.mxu0 %v10502_v57  ;;  %v8445_v57 = vld [vmem:[#allocation7 + $0x10] sm:$0xff] }
 0x239   :  { %v9874_v18 = vand.u32 4294901760, %v8445_v57  ;;  %v8461_v4 = vpack.c.bf16 %v9871_v56, %v9872_v34 }
 0x23b   :  { %2430 = vmatmul.mubr.f32.gmra.mrb[60].mxu0 %v10506_v1  ;;  %v8447_v1 = vld [vmem:[#allocation7 + $0x18] sm:$0xff]  ;;  %10517 = vst [vmem:[#allocation14_spill] sm:$0xff] %v8461_v4  ;;  %5901 = vmatprep.subr.bf16.mxu1 %v8461_v4 }
 0x23c   :  { %2435 = vmatprep.mubr.f32.mxu0 %v10507_v28  ;;  %v8449_v28 = vld [vmem:[#allocation7 + $0x20] sm:$0xff]  ;;  %v9873_v24 = vand.u32 4294901760, %v8447_v1  ;;  %5903 = vmatpush3.bf16.msra.mxu1 %v8461_v4 }
 0x23d   :  { %v9878_v40 = vand.u32 4294901760, %v8449_v28 }
 0x23e   :  { %v8472_v31 = vpack.c.bf16 %v9873_v24, %v9874_v18 }
 0x23f   :  { %2437 = vmatmul.mubr.f32.gmra.mrb[62].mxu0 %v10511_v5  ;;  %v8451_v5 = vpop.f32.mrb[2].mxu1  ;;  %v8488_v24 = vpack.c.bf16 %v9877_v41, %v9878_v40 }
 0x240   :  { %2539 = vmatprep.mubr.f32.mxu0 %v10435_v61  ;;  %10516 = vst [vmem:[#allocation20_spill] sm:$0xff] %v8451_v5  ;;  %v290_v61 = vpop.f32.mrb[3].mxu1  ;;  %10518 = vst [vmem:[#allocation15_spill] sm:$0xff] %v8472_v31  ;;  %5905 = vmatprep.subr.bf16.mxu1 %v8472_v31 }
 0x241   :  { %v8466_v5 = vpop.f32.mrb[4].mxu1  ;;  %v8474_v61 = vld [vmem:[#allocation7 + $0x30] sm:$0xff]  ;;  %10520 = vst [vmem:[#allocation16_spill] sm:$0xff] %v8488_v24  ;;  %5907 = vmatpush3.bf16.msra.mxu1 %v8472_v31 }
 0x242   :  { %v305_v56 = vpop.f32.mrb[5].mxu1  ;;  %v9880_v18 = vand.u32 4294901760, %v8474_v61  ;;  %5909 = vmatprep.subr.bf16.mxu1 %v8488_v24 }
 0x243   :  { %2541 = vmatmul.mubr.f32.vlgmr.msra.gmra.mrb[0].mxu0 %v10438_v44  ;;  %v8480_v34 = vpop.f32.mrb[6].mxu1 }
 0x244   :  { %2546 = vmatprep.mubr.f32.mxu0 %v10440_v15  ;;  %10519 = vst [vmem:[#allocation21_spill] sm:$0xff] %v8480_v34  ;;  %v320_v44 = vpop.f32.mrb[7].mxu1  ;;  %v9879_v15 = vand.u32 4294901760, %v8476_v30 }
 0x245   :  { %v8493_v56 = vpop.f32.mrb[8].mxu1  ;;  %5911 = vmatpush3.bf16.msra.mxu1 %v8488_v24 }
 0x246   :  { %v335_v4 = vpop.f32.mrb[9].mxu1  ;;  %v8504_v41 = vpack.c.bf16 %v9879_v15, %v9880_v18 }
 0x247   :  { %2548 = vmatmul.mubr.f32.gmra.mrb[2].mxu0 %v10443_v59  ;;  %v8496_v44 = vpop.f32.mrb[10].mxu1 }
 0x248   :  { %2553 = vmatprep.mubr.f32.mxu0 %v10444_v35  ;;  %v350_v34 = vpop.f32.mrb[11].mxu1  ;;  %10521 = vst [vmem:[#allocation17_spill] sm:$0xff] %v8504_v41  ;;  %5913 = vmatprep.subr.bf16.mxu1 %v8504_v41 }
 0x249   :  { %v8507_v59 = vpop.f32.mrb[12].mxu1  ;;  %5915 = vmatpush3.bf16.msra.mxu1 %v8504_v41 }
 0x24a   :  { %v365_v35 = vpop.f32.mrb[13].mxu1 }
 0x24b   :  { %2555 = vmatmul.mubr.f32.gmra.mrb[4].mxu0 %v10448_v54  ;;  %v8510_v4 = vpop.f32.mrb[14].mxu1 }
 0x24c   :  { %2560 = vmatprep.mubr.f32.mxu0 %v10449_v19  ;;  %v380_v34 = vpop.f32.mrb[15].mxu1 }
 0x24d   :  { %v8515_v40 = vpop.f32.mrb[16].mxu1 }
 0x24e   :  { %v395_v15 = vpop.f32.mrb[17].mxu1 }
 0x24f   :  { %2562 = vmatmul.mubr.f32.gmra.mrb[6].mxu0 %v10453_v17  ;;  %v8518_v54 = vpop.f32.mrb[18].mxu1 }
 0x250   :  { %2567 = vmatprep.mubr.f32.mxu0 %v10454_v58  ;;  %v410_v19 = vpop.f32.mrb[19].mxu1 }
 0x251   :  { %v8522_v35 = vpop.f32.mrb[20].mxu1 }
 0x252   :  { %v425_v34 = vpop.f32.mrb[21].mxu1 }
 0x253   :  { %2569 = vmatmul.mubr.f32.gmra.mrb[8].mxu0 %v10458_v14  ;;  %v8525_v18 = vpop.f32.mrb[22].mxu1 }
 0x254   :  { %2574 = vmatprep.mubr.f32.mxu0 %v10459_v23  ;;  %v440_v17 = vpop.f32.mrb[23].mxu1 }
 0x255   :  { %v8528_v24 = vpop.f32.mrb[24].mxu1 }
 0x256   :  { %v455_v58 = vpop.f32.mrb[25].mxu1 }
 0x257   :  { %2576 = vmatmul.mubr.f32.gmra.mrb[10].mxu0 %v10463_v50  ;;  %v8531_v15 = vpop.f32.mrb[26].mxu1  ;;  %v10522_v50 = vld [vmem:[#allocation113_spill] sm:$0xff]  ;;  %v10530_v58 = vld [vmem:[#allocation134_spill] sm:$0xff] }
 0x258   :  { %2581 = vmatprep.mubr.f32.mxu0 %v10464_v3  ;;  %v470_v19 = vpop.f32.mrb[27].mxu1  ;;  %v10523_v3 = vld [vmem:[#allocation114_spill] sm:$0xff] }
 0x259   :  { %v8534_v14 = vpop.f32.mrb[28].mxu1  ;;  %v10531_v19 = vld [vmem:[#allocation136_spill] sm:$0xff] }
 0x25a   :  { %v485_v23 = vpop.f32.mrb[29].mxu1 }
 0x25b   :  { %2583 = vmatmul.mubr.f32.gmra.mrb[12].mxu0 %v10468_v7  ;;  %v8537_v34 = vpop.f32.mrb[30].mxu1  ;;  %v10524_v7 = vld [vmem:[#allocation117_spill] sm:$0xff] }
 0x25c   :  { %2588 = vmatprep.mubr.f32.mxu0 %v10469_v60  ;;  %v500_v17 = vpop.f32.mrb[31].mxu1 }
 0x25d   :  { %v10532_v17 = vld [vmem:[#allocation138_spill] sm:$0xff] }
 0x25f   :  { %2590 = vmatmul.mubr.f32.gmra.mrb[14].mxu0 %v10473_v55 }
 0x260   :  { %2595 = vmatprep.mubr.f32.mxu0 %v10474_v37  ;;  %v8603_v37 = vld [vmem:[#allocation7 + $0x60] sm:$0xff] }
 0x263   :  { %2597 = vmatmul.mubr.f32.gmra.mrb[16].mxu0 %v10478_v26  ;;  %v8605_v26 = vld [vmem:[#allocation7 + $0x68] sm:$0xff] }
 0x264   :  { %2602 = vmatprep.mubr.f32.mxu0 %v10479_v42 }
 0x267   :  { %2604 = vmatmul.mubr.f32.gmra.mrb[18].mxu0 %v10483_v43  ;;  %v9886_v43 = vand.u32 4294901760, %v8603_v37 }
 0x268   :  { %2609 = vmatprep.mubr.f32.mxu0 %v10484_v8 }
 0x26b   :  { %2611 = vmatmul.mubr.f32.gmra.mrb[20].mxu0 %v10488_v16  ;;  %v8621_v16 = vld [vmem:[#allocation7 + $0x70] sm:$0xff] }
 0x26c   :  { %2616 = vmatprep.mubr.f32.mxu0 %v10489_v32  ;;  %v8623_v32 = vld [vmem:[#allocation7 + $0x78] sm:$0xff] }
 0x26f   :  { %2618 = vmatmul.mubr.f32.gmra.mrb[22].mxu0 %v10493_v51 }
 0x270   :  { %2623 = vmatprep.mubr.f32.mxu0 %v10494_v11  ;;  %v9884_v11 = vand.u32 4294901760, %v8621_v16 }
 0x273   :  { %2625 = vmatmul.mubr.f32.gmra.mrb[24].mxu0 %v10522_v50  ;;  %v10533_v50 = vld [vmem:[#allocation140_spill] sm:$0xff] }
 0x274   :  { %2630 = vmatprep.mubr.f32.mxu0 %v10523_v3 }
 0x277   :  { %2632 = vmatmul.mubr.f32.gmra.mrb[26].mxu0 %v10524_v7 }
 0x278   :  { %2637 = vmatprep.mubr.f32.mxu0 %v10504_v25 }
 0x27b   :  { %2639 = vmatmul.mubr.f32.gmra.mrb[28].mxu0 %v10508_v0  ;;  %v10529_v0 = vld [vmem:[#allocation132_spill] sm:$0xff] }
 0x27c   :  { %2644 = vmatprep.mubr.f32.mxu0 %v10509_v20 }
 0x27f   :  { %2646 = vmatmul.mubr.f32.gmra.mrb[30].mxu0 %v10512_v53 }
 0x280   :  { %2651 = vmatprep.mubr.f32.mxu0 %v10434_v22 }
 0x283   :  { %2653 = vmatmul.mubr.f32.gmra.mrb[32].mxu0 %v10436_v49  ;;  %v8569_v49 = vld [vmem:[#allocation7 + $0x40] sm:$0xff] }
 0x284   :  { %2658 = vmatprep.mubr.f32.mxu0 %v10437_v38  ;;  %v8571_v38 = vld [vmem:[#allocation7 + $0x48] sm:$0xff] }
 0x287   :  { %2660 = vmatmul.mubr.f32.gmra.mrb[34].mxu0 %v10441_v47 }
 0x288   :  { %2665 = vmatprep.mubr.f32.mxu0 %v10442_v21  ;;  %v9892_v21 = vand.u32 4294901760, %v8569_v49 }
 0x28b   :  { %2667 = vmatmul.mubr.f32.gmra.mrb[36].mxu0 %v10446_v33  ;;  %v9891_v33 = vand.u32 4294901760, %v8571_v38 }
 0x28c   :  { %2672 = vmatprep.mubr.f32.mxu0 %v10447_v36 }
 0x28d   :  { %v8580_v36 = vpack.c.bf16 %v9891_v33, %v9892_v21  ;;  %v10557_v33 = vld [vmem:[#allocation20_spill] sm:$0xff] }
 0x28f   :  { %2674 = vmatmul.mubr.f32.gmra.mrb[38].mxu0 %v10451_v63  ;;  %10525 = vst [vmem:[#allocation18_spill] sm:$0xff] %v8580_v36  ;;  %5917 = vmatprep.subr.bf16.mxu1 %v8580_v36 }
 0x290   :  { %2679 = vmatprep.mubr.f32.mxu0 %v10452_v9  ;;  %v8585_v9 = vld [vmem:[#allocation7 + $0x50] sm:$0xff]  ;;  %5919 = vmatpush3.bf16.msra.mxu1 %v8580_v36 }
 0x291   :  { %v8567_v22 = vpop.f32.mrb[32].mxu1  ;;  %v9888_v60 = vand.u32 4294901760, %v8585_v9 }
 0x292   :  { %v1084_v47 = vpop.f32.mrb[33].mxu1 }
 0x293   :  { %2681 = vmatmul.mubr.f32.gmra.mrb[40].mxu0 %v10456_v2  ;;  %v8587_v2 = vld [vmem:[#allocation7 + $0x58] sm:$0xff]  ;;  %v10535_v47 = vld [vmem:[#allocation144_spill] sm:$0xff] }
 0x294   :  { %2686 = vmatprep.mubr.f32.mxu0 %v10457_v48 }
 0x295   :  { %v8583_v63 = vpop.f32.mrb[34].mxu1 }
 0x296   :  { %v1091_v48 = vpop.f32.mrb[35].mxu1 }
 0x297   :  { %2688 = vmatmul.mubr.f32.gmra.mrb[42].mxu0 %v10461_v13  ;;  %v9887_v13 = vand.u32 4294901760, %v8587_v2 }
 0x298   :  { %2693 = vmatprep.mubr.f32.mxu0 %v10462_v52 }
 0x299   :  { %v8598_v52 = vpack.c.bf16 %v9887_v13, %v9888_v60  ;;  %v8601_v55 = vpop.f32.mrb[36].mxu1  ;;  %v10554_v13 = vand.u32 4294901760, %v8447_v1 }
 0x29a   :  { %v1098_v42 = vpop.f32.mrb[37].mxu1 }
 0x29b   :  { %2695 = vmatmul.mubr.f32.gmra.mrb[44].mxu0 %v10466_v62  ;;  %10526 = vst [vmem:[#allocation19_spill] sm:$0xff] %v8598_v52  ;;  %5921 = vmatprep.subr.bf16.mxu1 %v8598_v52  ;;  %v9885_v62 = vand.u32 4294901760, %v8605_v26  ;;  %v8705_v60 = vsub.f32 %v8447_v1, %v10554_v13 }
 0x29c   :  { %2700 = vmatprep.mubr.f32.mxu0 %v10467_v27  ;;  %5923 = vmatpush3.bf16.msra.mxu1 %v8598_v52 }
 0x29d   :  { %v8616_v27 = vpack.c.bf16 %v9885_v62, %v9886_v43  ;;  %v8619_v8 = vpop.f32.mrb[38].mxu1  ;;  %10555 = vst [vmem:[#allocation37_spill] sm:$0xff] %v8705_v60 }
 0x29e   :  { %v1105_v51 = vpop.f32.mrb[39].mxu1 }
 0x29f   :  { %2702 = vmatmul.mubr.f32.gmra.mrb[46].mxu0 %v10471_v29  ;;  %10527 = vst [vmem:[#allocation28_spill] sm:$0xff] %v8616_v27  ;;  %5925 = vmatprep.subr.bf16.mxu1 %v8616_v27  ;;  %v9883_v29 = vand.u32 4294901760, %v8623_v32  ;;  %v10536_v51 = vld [vmem:[#allocation146_spill] sm:$0xff] }
 0x2a0   :  { %2707 = vmatprep.mubr.f32.mxu0 %v10472_v12  ;;  %5927 = vmatpush3.bf16.msra.mxu1 %v8616_v27  ;;  %v10558_v27 = vand.u32 4294901760, %v8449_v28 }
 0x2a1   :  { %v8634_v12 = vpack.c.bf16 %v9883_v29, %v9884_v11  ;;  %v8637_v53 = vpop.f32.mrb[40].mxu1  ;;  %v10547_v11 = vld [vmem:[#allocation13_spill] sm:$0xff] }
 0x2a2   :  { %v1112_v25 = vpop.f32.mrb[41].mxu1  ;;  %v10548_v62 = vand.u32 4294901760, %v10547_v11  ;;  %v8727_v52 = vsub.f32 %v8449_v28, %v10558_v27 }
 0x2a3   :  { %2709 = vmatmul.mubr.f32.gmra.mrb[48].mxu0 %v10476_v10  ;;  %10528 = vst [vmem:[#allocation22_spill] sm:$0xff] %v8634_v12  ;;  %5929 = vmatprep.subr.bf16.mxu1 %v8634_v12  ;;  %v10537_v25 = vld [vmem:[#allocation148_spill] sm:$0xff] }
 0x2a4   :  { %2714 = vmatprep.mubr.f32.mxu0 %v10477_v6  ;;  %5931 = vmatpush3.bf16.msra.mxu1 %v8634_v12  ;;  %10559 = vst [vmem:[#allocation38_spill] sm:$0xff] %v8727_v52 }
 0x2a5   :  { %v8643_v10 = vpop.f32.mrb[42].mxu1 }
 0x2a6   :  { %v1119_v20 = vpop.f32.mrb[43].mxu1 }
 0x2a7   :  { %2716 = vmatmul.mubr.f32.gmra.mrb[50].mxu0 %v10481_v39  ;;  %v10534_v39 = vld [vmem:[#allocation142_spill] sm:$0xff] }
 0x2a8   :  { %2721 = vmatprep.mubr.f32.mxu0 %v10529_v0 }
 0x2a9   :  { %v8647_v23 = vpop.f32.mrb[44].mxu1 }
 0x2aa   :  { %v1126_v6 = vpop.f32.mrb[45].mxu1 }
 0x2ab   :  { %2723 = vmatmul.mubr.f32.gmra.mrb[52].mxu0 %v10530_v58  ;;  %v10538_v58 = vld [vmem:[#allocation150_spill] sm:$0xff] }
 0x2ac   :  { %2728 = vmatprep.mubr.f32.mxu0 %v10531_v19  ;;  %v10539_v19 = vld [vmem:[#allocation152_spill] sm:$0xff] }
 0x2ad   :  { %v8651_v3 = vpop.f32.mrb[46].mxu1 }
 0x2ae   :  { %v1133_v7 = vpop.f32.mrb[47].mxu1 }
 0x2af   :  { %2730 = vmatmul.mubr.f32.gmra.mrb[54].mxu0 %v10532_v17 }
 0x2b0   :  { %2735 = vmatprep.mubr.f32.mxu0 %v10533_v50  ;;  %v10541_v50 = vld [vmem:[#allocation154_spill] sm:$0xff] }
 0x2b1   :  { %v8655_v48 = vpop.f32.mrb[48].mxu1 }
 0x2b2   :  { %v1140_v42 = vpop.f32.mrb[49].mxu1 }
 0x2b3   :  { %2737 = vmatmul.mubr.f32.gmra.mrb[56].mxu0 %v10534_v39 }
 0x2b4   :  { %2742 = vmatprep.mubr.f32.mxu0 %v10535_v47 }
 0x2b5   :  { %v8659_v0 = vpop.f32.mrb[50].mxu1 }
 0x2b6   :  { %v1147_v20 = vpop.f32.mrb[51].mxu1 }
 0x2b7   :  { %2744 = vmatmul.mubr.f32.gmra.mrb[58].mxu0 %v10536_v51 }
 0x2b8   :  { %2749 = vmatprep.mubr.f32.mxu0 %v10537_v25 }
 0x2b9   :  { %v8663_v6 = vpop.f32.mrb[52].mxu1 }
 0x2ba   :  { %10540 = vst [vmem:[#allocation23_spill] sm:$0xff] %v8663_v6  ;;  %v1154_v17 = vpop.f32.mrb[53].mxu1 }
 0x2bb   :  { %2751 = vmatmul.mubr.f32.gmra.mrb[60].mxu0 %v10538_v58  ;;  %v8679_v17 = vsub.f32 %v10547_v11, %v10548_v62 }
 0x2bc   :  { %2756 = vmatprep.mubr.f32.mxu0 %v10539_v19 }
 0x2bd   :  { %v8666_v7 = vpop.f32.mrb[54].mxu1  ;;  %10549 = vst [vmem:[#allocation30_spill] sm:$0xff] %v8679_v17 }
 0x2be   :  { %10542 = vst [vmem:[#allocation24_spill] sm:$0xff] %v8666_v7  ;;  %v1161_v39 = vpop.f32.mrb[55].mxu1 }
 0x2bf   :  { %2758 = vmatmul.mubr.f32.gmra.mrb[62].mxu0 %v10541_v50  ;;  %v10550_v50 = vand.u32 4294901760, %v8440_v46 }
 0x2c1   :  { %v8668_v47 = vpop.f32.mrb[56].mxu1  ;;  %v8684_v39 = vsub.f32 %v8440_v46, %v10550_v50  ;;  %v10552_v46 = vand.u32 4294901760, %v8445_v57 }
 0x2c2   :  { %10543 = vst [vmem:[#allocation25_spill] sm:$0xff] %v8668_v47  ;;  %v1168_v42 = vpop.f32.mrb[57].mxu1 }
 0x2c3   :  { %10551 = vst [vmem:[#allocation33_spill] sm:$0xff] %v8684_v39  ;;  %v9890_v42 = vand.u32 4294901760, %v8679_v17  ;;  %v8700_v50 = vsub.f32 %v8445_v57, %v10552_v46 }
 0x2c5   :  { %v8670_v51 = vpop.f32.mrb[58].mxu1  ;;  %10553 = vst [vmem:[#allocation36_spill] sm:$0xff] %v8700_v50 }
 0x2c6   :  { %10544 = vst [vmem:[#allocation32_spill] sm:$0xff] %v8670_v51  ;;  %v1175_v25 = vpop.f32.mrb[59].mxu1 }
 0x2c7   :  { %v9889_v25 = vand.u32 4294901760, %v8684_v39 }
 0x2c9   :  { %v8672_v29 = vpop.f32.mrb[60].mxu1 }
 0x2ca   :  { %10545 = vst [vmem:[#allocation26_spill] sm:$0xff] %v8672_v29  ;;  %v1182_v20 = vpop.f32.mrb[61].mxu1 }
 0x2cb   :  { %v3223_v20 = vsub.f32 %v8679_v17, %v9890_v42 }
 0x2cd   :  { %v8674_v58 = vpop.f32.mrb[62].mxu1  ;;  %v3224_v43 = vand.u32 4294901760, %v3223_v20  ;;  %v10556_v20 = vld [vmem:[#allocation12_spill] sm:$0xff] }
 0x2ce   :  { %10546 = vst [vmem:[#allocation27_spill] sm:$0xff] %v8674_v58  ;;  %v1189_v19 = vpop.f32.mrb[63].mxu1  ;;  %v10570_v58 = vand.u32 4294901760, %v8569_v49 }
 0x2cf   :  { %v3230_v19 = vsub.f32 %v8684_v39, %v9889_v25  ;;  %v8710_v25 = vld [vmem:[%s9535_s2] ss:$0 sm:$0xff] }
 0x2d0   :  { %v289_v21 = vadd.f32 %v8710_v25, %v10557_v33  ;;  %v10562_v33 = vand.u32 4294901760, %v8474_v61  ;;  %v304_v27 = vadd.f32 %v8710_v25, %v8466_v5 }
 0x2d1   :  { %v3231_v62 = vand.u32 4294901760, %v3230_v19  ;;  %v9900_v19 = vand.u32 4294901760, %v8700_v50 }
 0x2d3   :  { %v8694_v11 = vpack.c.bf16 %v3231_v62, %v3224_v43  ;;  %v274_v43 = vadd.f32 %v8710_v25, %v10556_v20  ;;  %v9899_v62 = vand.u32 4294901760, %v8705_v60  ;;  %v3237_v13 = vsub.f32 %v8700_v50, %v9900_v19 }
 0x2d5   :  { %5933 = vmatprep.subr.bf16.mxu1 %v8694_v11  ;;  %v3244_v12 = vsub.f32 %v8705_v60, %v9899_v62  ;;  %v3238_v41 = vand.u32 4294901760, %v3237_v13  ;;  %v349_v13 = vadd.f32 %v8710_v25, %v8496_v44 }
 0x2d7   :  { %v3245_v31 = vand.u32 4294901760, %v3244_v12  ;;  %v334_v12 = vadd.f32 %v8710_v25, %v8493_v56 }
 0x316   :  { %v2542_v42 = vpop.f32.mrb[0].mxu0 }
 0x317   :  { %v6125_v57 = vadd.f32 %v2542_v42, %v274_v43  ;;  %v2544_v46 = vpop.f32.mrb[1].mxu0  ;;  %v10560_v42 = vand.u32 4294901760, %v8455_v45 }
 0x318   :  { %v10564_v46 = vand.u32 4294901760, %v8476_v30 }
 0x319   :  { %v2763_v1 = vmax.f32 %v6125_v57, 0.0  ;;  %v8732_v43 = vsub.f32 %v8455_v45, %v10560_v42  ;;  %v8737_v57 = vsub.f32 %v8474_v61, %v10562_v33  ;;  %v9914_v33 = vand.u32 4294901760, %v8727_v52 }
 0x31a   :  { %v2549_v20 = vpop.f32.mrb[2].mxu0  ;;  %v8742_v62 = vsub.f32 %v8476_v30, %v10564_v46  ;;  %v8767_v30 = vsub.f32 %v8569_v49, %v10570_v58  ;;  %v10572_v46 = vand.u32 4294901760, %v8571_v38 }
 0x31b   :  { %10561 = vst [vmem:[#allocation43_spill] sm:$0xff] %v8732_v43  ;;  %10563 = vst [vmem:[#allocation44_spill] sm:$0xff] %v8737_v57  ;;  %v8744_v19 = vand.u32 4294901760, %v2763_v1  ;;  %v6127_v36 = vadd.f32 %v2549_v20, %v289_v21  ;;  %v2551_v28 = vpop.f32.mrb[3].mxu0  ;;  %v10568_v21 = vld [vmem:[#allocation21_spill] sm:$0xff]  ;;  %v3251_v49 = vsub.f32 %v8727_v52, %v9914_v33  ;;  %v10574_v58 = vand.u32 4294901760, %v8732_v43 }
 0x31c   :  { %10565 = vst [vmem:[#allocation45_spill] sm:$0xff] %v8742_v62  ;;  %v319_v20 = vadd.f32 %v8710_v25, %v10568_v21  ;;  %10571 = vst [vmem:[#allocation51_spill] sm:$0xff] %v8767_v30  ;;  %v8772_v21 = vsub.f32 %v8571_v38, %v10572_v46  ;;  %v10575_v38 = vand.u32 4294901760, %v8737_v57  ;;  %v10576_v46 = vand.u32 4294901760, %v8742_v62 }
 0x31d   :  { %10566 = vst [vmem:[#allocation46_spill] sm:$0xff] %v8744_v19  ;;  %v8749_v45 = vsub.f32 %v2763_v1, %v8744_v19  ;;  %v2764_v42 = vmax.f32 %v6127_v36, 0.0  ;;  %v3258_v19 = vsub.f32 %v8732_v43, %v10574_v58  ;;  %v10577_v58 = vand.u32 4294901760, %v8585_v9 }
 0x31e   :  { %v2556_v61 = vpop.f32.mrb[4].mxu0  ;;  %10573 = vst [vmem:[#allocation48_spill] sm:$0xff] %v8772_v21 }
 0x31f   :  { %10567 = vst [vmem:[#allocation49_spill] sm:$0xff] %v8749_v45  ;;  %v8757_v28 = vand.u32 4294901760, %v2764_v42  ;;  %v6129_v5 = vadd.f32 %v2556_v61, %v304_v27  ;;  %v2558_v1 = vpop.f32.mrb[5].mxu0  ;;  %v9909_v36 = vand.u32 4294901760, %v8749_v45  ;;  %v8800_v51 = vsub.f32 %v8585_v9, %v10577_v58 }
 0x320   :  { %v5936_v1 = vpack.c.bf16 %v3245_v31, %v3238_v41  ;;  %v3252_v58 = vand.u32 4294901760, %v3251_v49  ;;  %v3259_v29 = vand.u32 4294901760, %v3258_v19 }
 0x321   :  { %10569 = vst [vmem:[#allocation50_spill] sm:$0xff] %v8757_v28  ;;  %v8775_v27 = vsub.f32 %v2764_v42, %v8757_v28  ;;  %v2765_v61 = vmax.f32 %v6129_v5, 0.0  ;;  %v2902_v56 = vsub.f32 %v8749_v45, %v9909_v36  ;;  %v3265_v42 = vsub.f32 %v8737_v57, %v10575_v38  ;;  %10578 = vst [vmem:[#allocation57_spill] sm:$0xff] %v8800_v51 }
 0x322   :  { %v2563_v44 = vpop.f32.mrb[6].mxu0  ;;  %v3272_v5 = vsub.f32 %v8742_v62, %v10576_v46  ;;  %v10579_v38 = vand.u32 4294901760, %v8587_v2 }
 0x323   :  { %v9915_v36 = vand.u32 4294901760, %v8775_v27  ;;  %v8793_v31 = vand.u32 4294901760, %v2765_v61  ;;  %v6131_v41 = vadd.f32 %v2563_v44, %v319_v20  ;;  %v2565_v45 = vpop.f32.mrb[7].mxu0  ;;  %v2903_v28 = vand.u32 4294901760, %v2902_v56 }
 0x324   :  { %v8805_v46 = vsub.f32 %v8587_v2, %v10579_v38  ;;  %v8815_v44 = vpack.c.bf16 %v8684_v39, %v8679_v17  ;;  %v3266_v33 = vand.u32 4294901760, %v3265_v42  ;;  %v3273_v47 = vand.u32 4294901760, %v3272_v5 }
 0x325   :  { %v2912_v20 = vsub.f32 %v8775_v27, %v9915_v36  ;;  %v8811_v45 = vsub.f32 %v2765_v61, %v8793_v31  ;;  %v2766_v56 = vmax.f32 %v6131_v41, 0.0  ;;  %5164 = vmatprep.mubr.f32.mxu1 %v2903_v28  ;;  %v10581_v61 = vand.u32 4294901760, %v8767_v30 }
 0x326   :  { %10580 = vst [vmem:[#allocation60_spill] sm:$0xff] %v8805_v46  ;;  %v2570_v9 = vpop.f32.mrb[8].mxu0  ;;  %v10582_v41 = vand.u32 4294901760, %v8772_v21  ;;  %v364_v42 = vadd.f32 %v8710_v25, %v8507_v59  ;;  %v10585_v59 = vand.u32 4294901760, %v8605_v26 }
 0x327   :  { %v2913_v2 = vand.u32 4294901760, %v2912_v20  ;;  %v8817_v38 = vand.u32 4294901760, %v2766_v56  ;;  %v6133_v7 = vadd.f32 %v2570_v9, %v334_v12  ;;  %v2572_v6 = vpop.f32.mrb[9].mxu0  ;;  %v9917_v36 = vand.u32 4294901760, %v8811_v45 }
 0x328   :  { %v3279_v28 = vsub.f32 %v8767_v30, %v10581_v61  ;;  %v3286_v39 = vsub.f32 %v8772_v21, %v10582_v41  ;;  %v5940_v9 = vpack.c.bf16 %v3259_v29, %v3252_v58  ;;  %v5944_v61 = vpack.c.bf16 %v3273_v47, %v3266_v33 }
 0x329   :  { %v8831_v12 = vsub.f32 %v2766_v56, %v8817_v38  ;;  %v2767_v6 = vmax.f32 %v6133_v7, 0.0  ;;  %5165 = vmatmul.mubr.f32.vlgmr.msra.gmra.mrb[64].mxu1 %v2913_v2  ;;  %v2922_v5 = vsub.f32 %v8811_v45, %v9917_v36  ;;  %v10583_v41 = vand.u32 4294901760, %v8603_v37 }
 0x32a   :  { %v2577_v20 = vpop.f32.mrb[10].mxu0  ;;  %5935 = vmatpush3.bf16.msra.mxu1 %v8694_v11  ;;  %v8845_v56 = vsub.f32 %v8605_v26, %v10585_v59  ;;  %v3280_v29 = vand.u32 4294901760, %v3279_v28  ;;  %v3287_v47 = vand.u32 4294901760, %v3286_v39  ;;  %v10587_v11 = vand.u32 4294901760, %v8800_v51 }
 0x32b   :  { %v8840_v19 = vsub.f32 %v8603_v37, %v10583_v41  ;;  %v8847_v7 = vand.u32 4294901760, %v2767_v6  ;;  %v6135_v2 = vadd.f32 %v2577_v20, %v349_v13  ;;  %v2579_v49 = vpop.f32.mrb[11].mxu0  ;;  %v2923_v36 = vand.u32 4294901760, %v2922_v5  ;;  %5937 = vmatprep.subr.bf16.mxu1 %v5936_v1 }
 0x32c   :  { %10586 = vst [vmem:[#allocation64_spill] sm:$0xff] %v8845_v56  ;;  %v9919_v17 = vand.u32 4294901760, %v8831_v12  ;;  %v3293_v37 = vsub.f32 %v8800_v51, %v10587_v11  ;;  %v10588_v33 = vand.u32 4294901760, %v8805_v46  ;;  %v8864_v39 = vpack.c.bf16 %v8705_v60, %v8700_v50 }
 0x32d   :  { %10584 = vst [vmem:[#allocation63_spill] sm:$0xff] %v8840_v19  ;;  %v8857_v26 = vsub.f32 %v2767_v6, %v8847_v7  ;;  %v2768_v41 = vmax.f32 %v6135_v2, 0.0  ;;  %5167 = vmatprep.mubr.f32.mxu1 %v2923_v36  ;;  %v10589_v20 = vand.u32 4294901760, %v8621_v16  ;;  %v10590_v36 = vand.u32 4294901760, %v8623_v32 }
 0x32e   :  { %v3300_v58 = vsub.f32 %v8805_v46, %v10588_v33  ;;  %v2932_v13 = vsub.f32 %v8831_v12, %v9919_v17  ;;  %v2584_v28 = vpop.f32.mrb[12].mxu0  ;;  %5939 = vmatpush3.bf16.msra.mxu1 %v5936_v1  ;;  %v379_v5 = vadd.f32 %v8710_v25, %v8510_v4  ;;  %v3294_v49 = vand.u32 4294901760, %v3293_v37 }
 0x32f   :  { %v8871_v6 = vsub.f32 %v8621_v16, %v10589_v20  ;;  %v8876_v59 = vsub.f32 %v8623_v32, %v10590_v36  ;;  %v8878_v2 = vand.u32 4294901760, %v2768_v41  ;;  %v6137_v11 = vadd.f32 %v2584_v28, %v364_v42  ;;  %v2586_v33 = vpop.f32.mrb[13].mxu0  ;;  %5941 = vmatprep.subr.bf16.mxu1 %v5940_v9 }
 0x330   :  { %v2933_v17 = vand.u32 4294901760, %v2932_v13  ;;  %v9921_v1 = vand.u32 4294901760, %v8857_v26  ;;  %v3301_v60 = vand.u32 4294901760, %v3300_v58  ;;  %v5948_v42 = vpack.c.bf16 %v3287_v47, %v3280_v29 }
 0x331   :  { %v8884_v16 = vsub.f32 %v2768_v41, %v8878_v2  ;;  %v2769_v20 = vmax.f32 %v6137_v11, 0.0  ;;  %v10592_v13 = vand.u32 4294901760, %v8840_v19  ;;  %v10593_v4 = vand.u32 4294901760, %v8845_v56 }
 0x332   :  { %5168 = vmatmul.mubr.f32.gmra.mrb[66].mxu1 %v2933_v17  ;;  %v2942_v32 = vsub.f32 %v8857_v26, %v9921_v1  ;;  %v2591_v28 = vpop.f32.mrb[14].mxu0  ;;  %v9924_v58 = vand.u32 4294901760, %v8871_v6  ;;  %v5952_v47 = vpack.c.bf16 %v3301_v60, %v3294_v49  ;;  %v10594_v60 = vand.u32 4294901760, %v8876_v59 }
 0x333   :  { %10591 = vst [vmem:[#allocation53_spill] sm:$0xff] %v8884_v16  ;;  %5943 = vmatpush3.bf16.msra.mxu1 %v5940_v9  ;;  %v3307_v36 = vsub.f32 %v8840_v19, %v10592_v13  ;;  %v3314_v37 = vsub.f32 %v8845_v56, %v10593_v4  ;;  %v8897_v17 = vand.u32 4294901760, %v2769_v20  ;;  %v6139_v11 = vadd.f32 %v2591_v28, %v379_v5  ;;  %v2593_v33 = vpop.f32.mrb[15].mxu0 }
 0x334   :  { %v2943_v1 = vand.u32 4294901760, %v2942_v32  ;;  %v9922_v29 = vand.u32 4294901760, %v8884_v16  ;;  %5945 = vmatprep.subr.bf16.mxu1 %v5944_v61  ;;  %v394_v9 = vadd.f32 %v8710_v25, %v8515_v40  ;;  %v8910_v5 = vpack.c.bf16 %v8732_v43, %v8727_v52 }
 0x335   :  { %v8903_v13 = vsub.f32 %v2769_v20, %v8897_v17  ;;  %v2770_v4 = vmax.f32 %v6139_v11, 0.0  ;;  %v3308_v28 = vand.u32 4294901760, %v3307_v36  ;;  %v3315_v33 = vand.u32 4294901760, %v3314_v37 }
 0x336   :  { %5170 = vmatprep.mubr.f32.mxu1 %v2943_v1  ;;  %v2952_v41 = vsub.f32 %v8884_v16, %v9922_v29  ;;  %v2598_v32 = vpop.f32.mrb[16].mxu0  ;;  %v3321_v40 = vsub.f32 %v8871_v6, %v9924_v58  ;;  %v3328_v49 = vsub.f32 %v8876_v59, %v10594_v60 }
 0x337   :  { %5947 = vmatpush3.bf16.msra.mxu1 %v5944_v61  ;;  %v8918_v1 = vand.u32 4294901760, %v2770_v4  ;;  %v6141_v20 = vadd.f32 %v2598_v32, %v394_v9  ;;  %v2600_v11 = vpop.f32.mrb[17].mxu0  ;;  %v9934_v43 = vand.u32 4294901760, %v8903_v13  ;;  %v409_v61 = vadd.f32 %v8710_v25, %v8518_v54 }
 0x338   :  { %v2953_v29 = vand.u32 4294901760, %v2952_v41  ;;  %5949 = vmatprep.subr.bf16.mxu1 %v5948_v42  ;;  %v5956_v9 = vpack.c.bf16 %v3315_v33, %v3308_v28  ;;  %v3322_v32 = vand.u32 4294901760, %v3321_v40  ;;  %v3329_v41 = vand.u32 4294901760, %v3328_v49 }
 0x339   :  { %v8924_v36 = vsub.f32 %v2770_v4, %v8918_v1  ;;  %v2771_v37 = vmax.f32 %v6141_v20, 0.0  ;;  %v2962_v60 = vsub.f32 %v8903_v13, %v9934_v43 }
 0x33a   :  { %5171 = vmatmul.mubr.f32.gmra.mrb[68].mxu1 %v2953_v29  ;;  %v2605_v58 = vpop.f32.mrb[18].mxu0  ;;  %v424_v29 = vadd.f32 %v8710_v25, %v8522_v35  ;;  %v5960_v28 = vpack.c.bf16 %v3329_v41, %v3322_v32 }
 0x33b   :  { %5951 = vmatpush3.bf16.msra.mxu1 %v5948_v42  ;;  %v8929_v11 = vand.u32 4294901760, %v2771_v37  ;;  %v6143_v52 = vadd.f32 %v2605_v58, %v409_v61  ;;  %v2607_v50 = vpop.f32.mrb[19].mxu0  ;;  %v2963_v16 = vand.u32 4294901760, %v2962_v60  ;;  %v9932_v54 = vand.u32 4294901760, %v8924_v36 }
 0x33c   :  { %5953 = vmatprep.subr.bf16.mxu1 %v5952_v47  ;;  %v8942_v58 = vpack.c.bf16 %v8742_v62, %v8737_v57 }
 0x33d   :  { %v8935_v4 = vsub.f32 %v2771_v37, %v8929_v11  ;;  %v2772_v20 = vmax.f32 %v6143_v52, 0.0  ;;  %5173 = vmatprep.mubr.f32.mxu1 %v2963_v16  ;;  %v2972_v42 = vsub.f32 %v8924_v36, %v9932_v54  ;;  %v439_v52 = vadd.f32 %v8710_v25, %v8525_v18 }
 0x33e   :  { %v2612_v50 = vpop.f32.mrb[20].mxu0  ;;  %v454_v18 = vadd.f32 %v8710_v25, %v8528_v24 }
 0x33f   :  { %5955 = vmatpush3.bf16.msra.mxu1 %v5952_v47  ;;  %v8944_v33 = vand.u32 4294901760, %v2772_v20  ;;  %v6145_v40 = vadd.f32 %v2612_v50, %v424_v29  ;;  %v2614_v35 = vpop.f32.mrb[21].mxu0  ;;  %v2973_v49 = vand.u32 4294901760, %v2972_v42  ;;  %v9930_v61 = vand.u32 4294901760, %v8935_v4 }
 0x340   :  { %5957 = vmatprep.subr.bf16.mxu1 %v5956_v9  ;;  %v8968_v35 = vpack.c.bf16 %v8772_v21, %v8767_v30 }
 0x341   :  { %v8950_v16 = vsub.f32 %v2772_v20, %v8944_v33  ;;  %v2773_v37 = vmax.f32 %v6145_v40, 0.0  ;;  %5174 = vmatmul.mubr.f32.gmra.mrb[70].mxu1 %v2973_v49  ;;  %v2982_v47 = vsub.f32 %v8935_v4, %v9930_v61 }
 0x342   :  { %v2619_v60 = vpop.f32.mrb[22].mxu0 }
 0x343   :  { %5959 = vmatpush3.bf16.msra.mxu1 %v5956_v9  ;;  %v8955_v32 = vand.u32 4294901760, %v2773_v37  ;;  %v6147_v41 = vadd.f32 %v2619_v60, %v439_v52  ;;  %v2621_v29 = vpop.f32.mrb[23].mxu0  ;;  %v2983_v42 = vand.u32 4294901760, %v2982_v47  ;;  %v9929_v50 = vand.u32 4294901760, %v8950_v16 }
 0x344   :  { %5961 = vmatprep.subr.bf16.mxu1 %v5960_v28 }
 0x345   :  { %v8961_v20 = vsub.f32 %v2773_v37, %v8955_v32  ;;  %v2774_v40 = vmax.f32 %v6147_v41, 0.0  ;;  %5176 = vmatprep.mubr.f32.mxu1 %v2983_v42  ;;  %v2992_v9 = vsub.f32 %v8950_v16, %v9929_v50  ;;  %v469_v41 = vadd.f32 %v8710_v25, %v8531_v15 }
 0x346   :  { %v2626_v49 = vpop.f32.mrb[24].mxu0  ;;  %v484_v15 = vadd.f32 %v8710_v25, %v8534_v14 }
 0x347   :  { %5963 = vmatpush3.bf16.msra.mxu1 %v5960_v28  ;;  %v8970_v52 = vand.u32 4294901760, %v2774_v40  ;;  %v6149_v47 = vadd.f32 %v2626_v49, %v454_v18  ;;  %v2628_v60 = vpop.f32.mrb[25].mxu0  ;;  %v2993_v24 = vand.u32 4294901760, %v2992_v9  ;;  %v9931_v37 = vand.u32 4294901760, %v8961_v20 }
 0x348   :  { %5965 = vmatprep.subr.bf16.mxu1 %v8815_v44 }
 0x349   :  { %10595 = vst [vmem:[#allocation59_spill] sm:$0xff] %v8970_v52  ;;  %v8977_v29 = vsub.f32 %v2774_v40, %v8970_v52  ;;  %v2775_v42 = vmax.f32 %v6149_v47, 0.0  ;;  %5177 = vmatmul.mubr.f32.gmra.mrb[72].mxu1 %v2993_v24  ;;  %v3002_v28 = vsub.f32 %v8961_v20, %v9931_v37  ;;  %v8995_v37 = vpack.c.bf16 %v8805_v46, %v8800_v51 }
 0x34a   :  { %v2633_v50 = vpop.f32.mrb[26].mxu0 }
 0x34b   :  { %10596 = vst [vmem:[#allocation65_spill] sm:$0xff] %v8977_v29  ;;  %v8982_v18 = vand.u32 4294901760, %v2775_v42  ;;  %v6151_v9 = vadd.f32 %v2633_v50, %v469_v41  ;;  %v2635_v49 = vpop.f32.mrb[27].mxu0  ;;  %v3003_v60 = vand.u32 4294901760, %v3002_v28  ;;  %v9933_v61 = vand.u32 4294901760, %v8977_v29 }
 0x34d   :  { %10597 = vst [vmem:[#allocation68_spill] sm:$0xff] %v8982_v18  ;;  %v8988_v40 = vsub.f32 %v2775_v42, %v8982_v18  ;;  %v2776_v47 = vmax.f32 %v6151_v9, 0.0  ;;  %5179 = vmatprep.mubr.f32.mxu1 %v3003_v60  ;;  %v3012_v24 = vsub.f32 %v8977_v29, %v9933_v61  ;;  %v499_v42 = vadd.f32 %v8710_v25, %v8537_v34 }
 0x34e   :  { %v2640_v50 = vpop.f32.mrb[28].mxu0  ;;  %v6156_v34 = vadd.f32 %v8710_v25, %v8567_v22 }
 0x34f   :  { %10598 = vst [vmem:[#allocation69_spill] sm:$0xff] %v8988_v40  ;;  %v8997_v41 = vand.u32 4294901760, %v2776_v47  ;;  %v6153_v28 = vadd.f32 %v2640_v50, %v484_v15  ;;  %v2642_v49 = vpop.f32.mrb[29].mxu0  ;;  %v3013_v54 = vand.u32 4294901760, %v3012_v24  ;;  %v9936_v14 = vand.u32 4294901760, %v8988_v40 }
 0x351   :  { %10599 = vst [vmem:[#allocation111_spill] sm:$0xff] %v8997_v41  ;;  %v9003_v9 = vsub.f32 %v2776_v47, %v8997_v41  ;;  %v2777_v60 = vmax.f32 %v6153_v28, 0.0  ;;  %5180 = vmatmul.mubr.f32.gmra.mrb[74].mxu1 %v3013_v54  ;;  %v3022_v61 = vsub.f32 %v8988_v40, %v9936_v14  ;;  %v9021_v14 = vpack.c.bf16 %v8845_v56, %v8840_v19  ;;  %v10636_v40 = vld [vmem:[#allocation27_spill] sm:$0xff] }
 0x352   :  { %v2647_v43 = vpop.f32.mrb[30].mxu0 }
 0x353   :  { %10600 = vst [vmem:[#allocation70_spill] sm:$0xff] %v9003_v9  ;;  %v9008_v46 = vand.u32 4294901760, %v2777_v60  ;;  %v6155_v15 = vadd.f32 %v2647_v43, %v499_v42  ;;  %v2649_v50 = vpop.f32.mrb[31].mxu0  ;;  %v3023_v24 = vand.u32 4294901760, %v3022_v61  ;;  %v9938_v49 = vand.u32 4294901760, %v9003_v9 }
 0x355   :  { %10601 = vst [vmem:[#allocation115_spill] sm:$0xff] %v9008_v46  ;;  %v9014_v47 = vsub.f32 %v2777_v60, %v9008_v46  ;;  %v2778_v28 = vmax.f32 %v6155_v15, 0.0  ;;  %5182 = vmatprep.mubr.f32.mxu1 %v3023_v24  ;;  %v3032_v54 = vsub.f32 %v9003_v9, %v9938_v49  ;;  %v6158_v60 = vadd.f32 %v8710_v25, %v8583_v63  ;;  %v10634_v9 = vld [vmem:[#allocation26_spill] sm:$0xff] }
 0x356   :  { %v2654_v43 = vpop.f32.mrb[32].mxu0  ;;  %v6160_v63 = vadd.f32 %v8710_v25, %v8601_v55  ;;  %v6162_v55 = vadd.f32 %v8710_v25, %v8619_v8  ;;  %v6164_v8 = vadd.f32 %v8710_v25, %v8637_v53  ;;  %v6166_v53 = vadd.f32 %v8710_v25, %v8643_v10 }
 0x357   :  { %10602 = vst [vmem:[#allocation118_spill] sm:$0xff] %v9014_v47  ;;  %v9023_v61 = vand.u32 4294901760, %v2778_v28  ;;  %v6157_v42 = vadd.f32 %v6156_v34, %v2654_v43  ;;  %v2656_v50 = vpop.f32.mrb[33].mxu0  ;;  %v3033_v51 = vand.u32 4294901760, %v3032_v54  ;;  %v9941_v22 = vand.u32 4294901760, %v9014_v47 }
 0x358   :  { %v6168_v10 = vadd.f32 %v8710_v25, %v8647_v23  ;;  %v6170_v23 = vadd.f32 %v8710_v25, %v8651_v3  ;;  %v6172_v3 = vadd.f32 %v8710_v25, %v8655_v48  ;;  %v6174_v48 = vadd.f32 %v8710_v25, %v8659_v0 }
 0x359   :  { %10603 = vst [vmem:[#allocation72_spill] sm:$0xff] %v9023_v61  ;;  %v9029_v15 = vsub.f32 %v2778_v28, %v9023_v61  ;;  %v2779_v24 = vmax.f32 %v6157_v42, 0.0  ;;  %5183 = vmatmul.mubr.f32.gmra.mrb[76].mxu1 %v3033_v51  ;;  %v3042_v49 = vsub.f32 %v9014_v47, %v9941_v22  ;;  %v10631_v47 = vld [vmem:[#allocation32_spill] sm:$0xff] }
 0x35a   :  { %v2661_v56 = vpop.f32.mrb[34].mxu0 }
 0x35b   :  { %10604 = vst [vmem:[#allocation123_spill] sm:$0xff] %v9029_v15  ;;  %v9034_v19 = vand.u32 4294901760, %v2779_v24  ;;  %v6159_v34 = vadd.f32 %v6158_v60, %v2661_v56  ;;  %v2663_v43 = vpop.f32.mrb[35].mxu0  ;;  %v3043_v54 = vand.u32 4294901760, %v3042_v49  ;;  %v9943_v50 = vand.u32 4294901760, %v9029_v15 }
 0x35d   :  { %10605 = vst [vmem:[#allocation125_spill] sm:$0xff] %v9034_v19  ;;  %v9040_v28 = vsub.f32 %v2779_v24, %v9034_v19  ;;  %v2780_v42 = vmax.f32 %v6159_v34, 0.0  ;;  %5185 = vmatprep.mubr.f32.mxu1 %v3043_v54  ;;  %v3052_v51 = vsub.f32 %v9029_v15, %v9943_v50  ;;  %v10628_v15 = vld [vmem:[#allocation25_spill] sm:$0xff] }
 0x35e   :  { %v2668_v22 = vpop.f32.mrb[36].mxu0 }
 0x35f   :  { %10606 = vst [vmem:[#allocation74_spill] sm:$0xff] %v9040_v28  ;;  %v9045_v21 = vand.u32 4294901760, %v2780_v42  ;;  %v6161_v56 = vadd.f32 %v6160_v63, %v2668_v22  ;;  %v2670_v60 = vpop.f32.mrb[37].mxu0  ;;  %v3053_v49 = vand.u32 4294901760, %v3052_v51  ;;  %v9945_v43 = vand.u32 4294901760, %v9040_v28 }
 0x361   :  { %10607 = vst [vmem:[#allocation127_spill] sm:$0xff] %v9045_v21  ;;  %v9051_v24 = vsub.f32 %v2780_v42, %v9045_v21  ;;  %v2781_v34 = vmax.f32 %v6161_v56, 0.0  ;;  %5186 = vmatmul.mubr.f32.gmra.mrb[78].mxu1 %v3053_v49  ;;  %v3062_v54 = vsub.f32 %v9040_v28, %v9945_v43  ;;  %v10625_v28 = vld [vmem:[#allocation24_spill] sm:$0xff] }
 0x362   :  { %v2675_v50 = vpop.f32.mrb[38].mxu0 }
 0x363   :  { %10608 = vst [vmem:[#allocation129_spill] sm:$0xff] %v9051_v24  ;;  %v9056_v30 = vand.u32 4294901760, %v2781_v34  ;;  %v6163_v22 = vadd.f32 %v6162_v55, %v2675_v50  ;;  %v2677_v63 = vpop.f32.mrb[39].mxu0  ;;  %v3063_v51 = vand.u32 4294901760, %v3062_v54  ;;  %v9947_v60 = vand.u32 4294901760, %v9051_v24 }
 0x365   :  { %10609 = vst [vmem:[#allocation76_spill] sm:$0xff] %v9056_v30  ;;  %v9062_v42 = vsub.f32 %v2781_v34, %v9056_v30  ;;  %v2782_v56 = vmax.f32 %v6163_v22, 0.0  ;;  %5188 = vmatprep.mubr.f32.mxu1 %v3063_v51  ;;  %v3072_v49 = vsub.f32 %v9051_v24, %v9947_v60  ;;  %v10622_v24 = vld [vmem:[#allocation23_spill] sm:$0xff] }
 0x366   :  { %v2682_v43 = vpop.f32.mrb[40].mxu0  ;;  %v6176_v0 = vadd.f32 %v8710_v25, %v10622_v24  ;;  %v6178_v24 = vadd.f32 %v8710_v25, %v10625_v28  ;;  %v6180_v28 = vadd.f32 %v8710_v25, %v10628_v15  ;;  %v6182_v15 = vadd.f32 %v8710_v25, %v10631_v47 }
 0x367   :  { %10610 = vst [vmem:[#allocation131_spill] sm:$0xff] %v9062_v42  ;;  %v9067_v62 = vand.u32 4294901760, %v2782_v56  ;;  %v6165_v50 = vadd.f32 %v6164_v8, %v2682_v43  ;;  %v2684_v55 = vpop.f32.mrb[41].mxu0  ;;  %v3073_v54 = vand.u32 4294901760, %v3072_v49  ;;  %v9949_v63 = vand.u32 4294901760, %v9062_v42 }
 0x368   :  { %v6184_v47 = vadd.f32 %v8710_v25, %v10634_v9  ;;  %v6186_v9 = vadd.f32 %v8710_v25, %v10636_v40 }
 0x369   :  { %10611 = vst [vmem:[#allocation133_spill] sm:$0xff] %v9067_v62  ;;  %v9073_v34 = vsub.f32 %v2782_v56, %v9067_v62  ;;  %v2783_v22 = vmax.f32 %v6165_v50, 0.0  ;;  %5189 = vmatmul.mubr.f32.gmra.mrb[80].mxu1 %v3073_v54  ;;  %v3082_v51 = vsub.f32 %v9062_v42, %v9949_v63 }
 0x36a   :  { %v2689_v60 = vpop.f32.mrb[42].mxu0 }
 0x36b   :  { %10612 = vst [vmem:[#allocation135_spill] sm:$0xff] %v9073_v34  ;;  %v9078_v57 = vand.u32 4294901760, %v2783_v22  ;;  %v6167_v43 = vadd.f32 %v6166_v53, %v2689_v60  ;;  %v2691_v8 = vpop.f32.mrb[43].mxu0  ;;  %v3083_v49 = vand.u32 4294901760, %v3082_v51  ;;  %v9952_v55 = vand.u32 4294901760, %v9073_v34 }
 0x36d   :  { %10613 = vst [vmem:[#allocation137_spill] sm:$0xff] %v9078_v57  ;;  %v9084_v56 = vsub.f32 %v2783_v22, %v9078_v57  ;;  %v2784_v50 = vmax.f32 %v6167_v43, 0.0  ;;  %5191 = vmatprep.mubr.f32.mxu1 %v3083_v49  ;;  %v3092_v54 = vsub.f32 %v9073_v34, %v9952_v55 }
 0x36e   :  { %v2696_v63 = vpop.f32.mrb[44].mxu0 }
 0x36f   :  { %10614 = vst [vmem:[#allocation139_spill] sm:$0xff] %v9084_v56  ;;  %v9089_v42 = vand.u32 4294901760, %v2784_v50  ;;  %v6169_v60 = vadd.f32 %v6168_v10, %v2696_v63  ;;  %v2698_v53 = vpop.f32.mrb[45].mxu0  ;;  %v3093_v51 = vand.u32 4294901760, %v3092_v54  ;;  %v9955_v8 = vand.u32 4294901760, %v9084_v56 }
 0x371   :  { %10615 = vst [vmem:[#allocation141_spill] sm:$0xff] %v9089_v42  ;;  %v9095_v22 = vsub.f32 %v2784_v50, %v9089_v42  ;;  %v2785_v43 = vmax.f32 %v6169_v60, 0.0  ;;  %5192 = vmatmul.mubr.f32.gmra.mrb[82].mxu1 %v3093_v51  ;;  %v3102_v49 = vsub.f32 %v9084_v56, %v9955_v8 }
 0x372   :  { %v2703_v55 = vpop.f32.mrb[46].mxu0 }
 0x373   :  { %10616 = vst [vmem:[#allocation143_spill] sm:$0xff] %v9095_v22  ;;  %v9100_v34 = vand.u32 4294901760, %v2785_v43  ;;  %v6171_v63 = vadd.f32 %v6170_v23, %v2703_v55  ;;  %v2705_v10 = vpop.f32.mrb[47].mxu0  ;;  %v3103_v54 = vand.u32 4294901760, %v3102_v49  ;;  %v9958_v53 = vand.u32 4294901760, %v9095_v22 }
 0x375   :  { %10617 = vst [vmem:[#allocation145_spill] sm:$0xff] %v9100_v34  ;;  %v9106_v50 = vsub.f32 %v2785_v43, %v9100_v34  ;;  %v2786_v60 = vmax.f32 %v6171_v63, 0.0  ;;  %5194 = vmatprep.mubr.f32.mxu1 %v3103_v54  ;;  %v3112_v51 = vsub.f32 %v9095_v22, %v9958_v53 }
 0x376   :  { %v2710_v8 = vpop.f32.mrb[48].mxu0 }
 0x377   :  { %10618 = vst [vmem:[#allocation147_spill] sm:$0xff] %v9106_v50  ;;  %v9111_v56 = vand.u32 4294901760, %v2786_v60  ;;  %v6173_v55 = vadd.f32 %v6172_v3, %v2710_v8  ;;  %v2712_v23 = vpop.f32.mrb[49].mxu0  ;;  %v3113_v49 = vand.u32 4294901760, %v3112_v51  ;;  %v9963_v10 = vand.u32 4294901760, %v9106_v50 }
 0x379   :  { %10619 = vst [vmem:[#allocation149_spill] sm:$0xff] %v9111_v56  ;;  %v9117_v43 = vsub.f32 %v2786_v60, %v9111_v56  ;;  %v2787_v63 = vmax.f32 %v6173_v55, 0.0  ;;  %5195 = vmatmul.mubr.f32.gmra.mrb[84].mxu1 %v3113_v49  ;;  %v3122_v54 = vsub.f32 %v9106_v50, %v9963_v10 }
 0x37a   :  { %v2717_v53 = vpop.f32.mrb[50].mxu0 }
 0x37b   :  { %10620 = vst [vmem:[#allocation151_spill] sm:$0xff] %v9117_v43  ;;  %v9122_v22 = vand.u32 4294901760, %v2787_v63  ;;  %v6175_v8 = vadd.f32 %v6174_v48, %v2717_v53  ;;  %v2719_v3 = vpop.f32.mrb[51].mxu0  ;;  %v3123_v51 = vand.u32 4294901760, %v3122_v54  ;;  %v9968_v23 = vand.u32 4294901760, %v9117_v43 }
 0x37d   :  { %10621 = vst [vmem:[#allocation153_spill] sm:$0xff] %v9122_v22  ;;  %v9128_v60 = vsub.f32 %v2787_v63, %v9122_v22  ;;  %v2788_v55 = vmax.f32 %v6175_v8, 0.0  ;;  %5197 = vmatprep.mubr.f32.mxu1 %v3123_v51  ;;  %v3132_v49 = vsub.f32 %v9117_v43, %v9968_v23 }
 0x37e   :  { %v2724_v10 = vpop.f32.mrb[52].mxu0 }
 0x37f   :  { %10623 = vst [vmem:[#allocation155_spill] sm:$0xff] %v9128_v60  ;;  %v9133_v50 = vand.u32 4294901760, %v2788_v55  ;;  %v6177_v53 = vadd.f32 %v6176_v0, %v2724_v10  ;;  %v2726_v48 = vpop.f32.mrb[53].mxu0  ;;  %v3133_v54 = vand.u32 4294901760, %v3132_v49  ;;  %v9973_v3 = vand.u32 4294901760, %v9128_v60 }
 0x381   :  { %10624 = vst [vmem:[#allocation156_spill] sm:$0xff] %v9133_v50  ;;  %v9139_v63 = vsub.f32 %v2788_v55, %v9133_v50  ;;  %v2789_v8 = vmax.f32 %v6177_v53, 0.0  ;;  %5198 = vmatmul.mubr.f32.gmra.mrb[86].mxu1 %v3133_v54  ;;  %v3142_v51 = vsub.f32 %v9128_v60, %v9973_v3 }
 0x382   :  { %v2731_v23 = vpop.f32.mrb[54].mxu0 }
 0x383   :  { %10626 = vst [vmem:[#allocation67_spill] sm:$0xff] %v9139_v63  ;;  %v9144_v43 = vand.u32 4294901760, %v2789_v8  ;;  %v6179_v10 = vadd.f32 %v6178_v24, %v2731_v23  ;;  %v2733_v0 = vpop.f32.mrb[55].mxu0  ;;  %v3143_v49 = vand.u32 4294901760, %v3142_v51  ;;  %v9978_v48 = vand.u32 4294901760, %v9139_v63 }
 0x385   :  { %10627 = vst [vmem:[#allocation62_spill] sm:$0xff] %v9144_v43  ;;  %v9150_v55 = vsub.f32 %v2789_v8, %v9144_v43  ;;  %v2790_v53 = vmax.f32 %v6179_v10, 0.0  ;;  %5200 = vmatprep.mubr.f32.mxu1 %v3143_v49  ;;  %v3152_v54 = vsub.f32 %v9139_v63, %v9978_v48 }
 0x386   :  { %v2738_v3 = vpop.f32.mrb[56].mxu0 }
 0x387   :  { %10629 = vst [vmem:[#allocation56_spill] sm:$0xff] %v9150_v55  ;;  %v9155_v60 = vand.u32 4294901760, %v2790_v53  ;;  %v6181_v23 = vadd.f32 %v6180_v28, %v2738_v3  ;;  %v2740_v24 = vpop.f32.mrb[57].mxu0  ;;  %v3153_v51 = vand.u32 4294901760, %v3152_v54  ;;  %v9983_v0 = vand.u32 4294901760, %v9150_v55 }
 0x389   :  { %10630 = vst [vmem:[#allocation93_spill] sm:$0xff] %v9155_v60  ;;  %v9161_v8 = vsub.f32 %v2790_v53, %v9155_v60  ;;  %v2791_v10 = vmax.f32 %v6181_v23, 0.0  ;;  %5201 = vmatmul.mubr.f32.gmra.mrb[88].mxu1 %v3153_v51  ;;  %v3162_v49 = vsub.f32 %v9150_v55, %v9983_v0 }
 0x38a   :  { %v2745_v48 = vpop.f32.mrb[58].mxu0 }
 0x38b   :  { %10632 = vst [vmem:[#allocation78_spill] sm:$0xff] %v9161_v8  ;;  %v9166_v63 = vand.u32 4294901760, %v2791_v10  ;;  %v6183_v3 = vadd.f32 %v6182_v15, %v2745_v48  ;;  %v2747_v28 = vpop.f32.mrb[59].mxu0  ;;  %v3163_v54 = vand.u32 4294901760, %v3162_v49  ;;  %v9988_v24 = vand.u32 4294901760, %v9161_v8 }
 0x38d   :  { %10633 = vst [vmem:[#allocation71_spill] sm:$0xff] %v9166_v63  ;;  %v9172_v53 = vsub.f32 %v2791_v10, %v9166_v63  ;;  %v2792_v23 = vmax.f32 %v6183_v3, 0.0  ;;  %5203 = vmatprep.mubr.f32.mxu1 %v3163_v54  ;;  %v3172_v51 = vsub.f32 %v9161_v8, %v9988_v24 }
 0x38e   :  { %v2752_v0 = vpop.f32.mrb[60].mxu0 }
 0x38f   :  { %v9177_v55 = vand.u32 4294901760, %v2792_v23  ;;  %v6185_v48 = vadd.f32 %v6184_v47, %v2752_v0  ;;  %v2754_v15 = vpop.f32.mrb[61].mxu0  ;;  %v3173_v49 = vand.u32 4294901760, %v3172_v51  ;;  %v9996_v28 = vand.u32 4294901760, %v9172_v53 }
 0x391   :  { %10635 = vst [vmem:[#allocation79_spill] sm:$0xff] %v9177_v55  ;;  %v9183_v10 = vsub.f32 %v2792_v23, %v9177_v55  ;;  %v2793_v3 = vmax.f32 %v6185_v48, 0.0  ;;  %5204 = vmatmul.mubr.f32.gmra.mrb[90].mxu1 %v3173_v49  ;;  %v3182_v54 = vsub.f32 %v9172_v53, %v9996_v28  ;;  %v10657_v28 = vld [vmem:[#allocation33_spill] sm:$0xff] }
 0x392   :  { %v2759_v24 = vpop.f32.mrb[62].mxu0 }
 0x393   :  { %v9188_v8 = vand.u32 4294901760, %v2793_v3  ;;  %v6187_v0 = vadd.f32 %v6186_v9, %v2759_v24  ;;  %v2761_v47 = vpop.f32.mrb[63].mxu0  ;;  %v3183_v51 = vand.u32 4294901760, %v3182_v54  ;;  %v9995_v15 = vand.u32 4294901760, %v9183_v10 }
 0x395   :  { %10637 = vst [vmem:[#allocation95_spill] sm:$0xff] %v9188_v8  ;;  %v9192_v29 = vsub.f32 %v2793_v3, %v9188_v8  ;;  %v2794_v25 = vmax.f32 %v6187_v0, 0.0  ;;  %5206 = vmatprep.mubr.f32.mxu1 %v3183_v51  ;;  %v3192_v40 = vsub.f32 %v9183_v10, %v9995_v15  ;;  %v10639_v51 = vld [vmem:[#allocation46_spill] sm:$0xff] }
 0x397   :  { %v9197_v23 = vand.u32 4294901760, %v2794_v25  ;;  %v3193_v48 = vand.u32 4294901760, %v3192_v40  ;;  %v9994_v49 = vand.u32 4294901760, %v9192_v29  ;;  %v10640_v40 = vld [vmem:[#allocation50_spill] sm:$0xff] }
 0x399   :  { %10638 = vst [vmem:[#allocation96_spill] sm:$0xff] %v9197_v23  ;;  %v9201_v24 = vsub.f32 %v2794_v25, %v9197_v23  ;;  %5207 = vmatmul.mubr.f32.gmra.mrb[92].mxu1 %v3193_v48  ;;  %v3202_v9 = vsub.f32 %v9192_v29, %v9994_v49  ;;  %v10647_v25 = vld [vmem:[#allocation18_spill] sm:$0xff]  ;;  %v10648_v48 = vld [vmem:[#allocation19_spill] sm:$0xff] }
 0x39a   :  { %v10655_v49 = vld [vmem:[#allocation30_spill] sm:$0xff] }
 0x39b   :  { %v3203_v3 = vand.u32 4294901760, %v3202_v9  ;;  %v9993_v54 = vand.u32 4294901760, %v9201_v24  ;;  %v10649_v9 = vld [vmem:[#allocation65_spill] sm:$0xff]  ;;  %v10656_v15 = vand.u32 4294901760, %v10655_v49  ;;  %v10666_v49 = vld [vmem:[#allocation147_spill] sm:$0xff] }
 0x39d   :  { %5209 = vmatprep.mubr.f32.mxu1 %v3203_v3  ;;  %v3212_v0 = vsub.f32 %v9201_v24, %v9993_v54  ;;  %v10650_v3 = vld [vmem:[#allocation69_spill] sm:$0xff]  ;;  %v10654_v54 = vld [vmem:[#allocation22_spill] sm:$0xff] }
 0x39f   :  { %v3213_v47 = vand.u32 4294901760, %v3212_v0  ;;  %v10651_v0 = vld [vmem:[#allocation28_spill] sm:$0xff] }
 0x3a1   :  { %5210 = vmatmul.mubr.f32.gmra.mrb[94].mxu1 %v3213_v47  ;;  %v10652_v47 = vld [vmem:[#allocation70_spill] sm:$0xff] }
 0x3a2   :  { %5244 = vmatprep.mubr.f32.mxu1 %v10639_v51 }
 0x3a5   :  { %5245 = vmatmul.mubr.f32.vlgmr.msra.gmra.mrb[64].mxu1 %v10640_v40 }
 0x3a6   :  { %5247 = vmatprep.mubr.f32.mxu1 %v8793_v31  ;;  %5967 = vmatpush3.bf16.msra.mxu1 %v8815_v44  ;;  %v5992_v44 = vpack.c.bf16 %v8876_v59, %v8871_v6 }
 0x3a7   :  { %5969 = vmatprep.subr.bf16.mxu1 %v8864_v39 }
 0x3a9   :  { %5248 = vmatmul.mubr.f32.gmra.mrb[66].mxu1 %v8817_v38 }
 0x3aa   :  { %5250 = vmatprep.mubr.f32.mxu1 %v8847_v7  ;;  %5971 = vmatpush3.bf16.msra.mxu1 %v8864_v39  ;;  %v10641_v39 = vld [vmem:[#allocation14_spill] sm:$0xff] }
 0x3ab   :  { %5973 = vmatprep.subr.bf16.mxu1 %v8910_v5 }
 0x3ad   :  { %5251 = vmatmul.mubr.f32.gmra.mrb[68].mxu1 %v8878_v2 }
 0x3ae   :  { %5253 = vmatprep.mubr.f32.mxu1 %v8897_v17  ;;  %5975 = vmatpush3.bf16.msra.mxu1 %v8910_v5  ;;  %v10642_v5 = vld [vmem:[#allocation49_spill] sm:$0xff] }
 0x3af   :  { %5977 = vmatprep.subr.bf16.mxu1 %v8942_v58 }
 0x3b1   :  { %5254 = vmatmul.mubr.f32.gmra.mrb[70].mxu1 %v8918_v1 }
 0x3b2   :  { %5256 = vmatprep.mubr.f32.mxu1 %v8929_v11  ;;  %5979 = vmatpush3.bf16.msra.mxu1 %v8942_v58  ;;  %v10643_v58 = vld [vmem:[#allocation15_spill] sm:$0xff] }
 0x3b3   :  { %5981 = vmatprep.subr.bf16.mxu1 %v8968_v35 }
 0x3b5   :  { %5257 = vmatmul.mubr.f32.gmra.mrb[72].mxu1 %v8944_v33 }
 0x3b6   :  { %5259 = vmatprep.mubr.f32.mxu1 %v8955_v32  ;;  %5983 = vmatpush3.bf16.msra.mxu1 %v8968_v35  ;;  %v10644_v35 = vld [vmem:[#allocation16_spill] sm:$0xff] }
 0x3b7   :  { %5985 = vmatprep.subr.bf16.mxu1 %v8995_v37 }
 0x3b9   :  { %5260 = vmatmul.mubr.f32.gmra.mrb[74].mxu1 %v8970_v52 }
 0x3ba   :  { %5262 = vmatprep.mubr.f32.mxu1 %v8982_v18  ;;  %5987 = vmatpush3.bf16.msra.mxu1 %v8995_v37  ;;  %v10645_v37 = vld [vmem:[#allocation53_spill] sm:$0xff]  ;;  %v10681_v18 = vld [vmem:[#allocation43_spill] sm:$0xff] }
 0x3bb   :  { %5989 = vmatprep.subr.bf16.mxu1 %v9021_v14  ;;  %v10682_v52 = vand.u32 4294901760, %v10681_v18  ;;  %v10693_v18 = vld [vmem:[#allocation48_spill] sm:$0xff] }
 0x3bd   :  { %5263 = vmatmul.mubr.f32.gmra.mrb[76].mxu1 %v8997_v41  ;;  %v10679_v41 = vld [vmem:[#allocation38_spill] sm:$0xff] }
 0x3be   :  { %5265 = vmatprep.mubr.f32.mxu1 %v9008_v46  ;;  %5991 = vmatpush3.bf16.msra.mxu1 %v9021_v14  ;;  %v10646_v14 = vld [vmem:[#allocation17_spill] sm:$0xff]  ;;  %v10678_v46 = vand.u32 4294901760, %v8811_v45 }
 0x3bf   :  { %5993 = vmatprep.subr.bf16.mxu1 %v5992_v44 }
 0x3c1   :  { %5266 = vmatmul.mubr.f32.gmra.mrb[78].mxu1 %v9023_v61 }
 0x3c2   :  { %5268 = vmatprep.mubr.f32.mxu1 %v9034_v19  ;;  %5995 = vmatpush3.bf16.msra.mxu1 %v5992_v44  ;;  %v10653_v44 = vld [vmem:[#allocation118_spill] sm:$0xff] }
 0x3c3   :  { %5997 = vmatprep.subr.bf16.mxu1 %v10641_v39 }
 0x3c5   :  { %5269 = vmatmul.mubr.f32.gmra.mrb[80].mxu1 %v9045_v21  ;;  %v10675_v21 = vld [vmem:[#allocation37_spill] sm:$0xff] }
 0x3c6   :  { %5271 = vmatprep.mubr.f32.mxu1 %v9056_v30  ;;  %v10676_v19 = vand.u32 4294901760, %v10675_v21 }
 0x3c9   :  { %5272 = vmatmul.mubr.f32.gmra.mrb[82].mxu1 %v9067_v62  ;;  %v10673_v62 = vld [vmem:[#allocation36_spill] sm:$0xff] }
 0x3ca   :  { %5274 = vmatprep.mubr.f32.mxu1 %v9078_v57  ;;  %v10672_v57 = vand.u32 4294901760, %v10642_v5  ;;  %v10674_v30 = vand.u32 4294901760, %v10673_v62  ;;  %v10684_v62 = vand.u32 4294901760, %v8857_v26 }
 0x3cc   :  { %v6032_v61 = vpack.c.bf16 %v10676_v19, %v10674_v30  ;;  %v10685_v30 = vld [vmem:[#allocation44_spill] sm:$0xff]  ;;  %v10689_v19 = vand.u32 4294901760, %v10645_v37 }
 0x3cd   :  { %5275 = vmatmul.mubr.f32.gmra.mrb[84].mxu1 %v9089_v42  ;;  %v10671_v42 = vld [vmem:[#allocation78_spill] sm:$0xff]  ;;  %v10686_v21 = vand.u32 4294901760, %v10685_v30 }
 0x3ce   :  { %5277 = vmatprep.mubr.f32.mxu1 %v9100_v34  ;;  %v10670_v34 = vld [vmem:[#allocation56_spill] sm:$0xff] }
 0x3d1   :  { %5278 = vmatmul.mubr.f32.gmra.mrb[86].mxu1 %v9111_v56  ;;  %v10665_v56 = vld [vmem:[#allocation143_spill] sm:$0xff] }
 0x3d2   :  { %5280 = vmatprep.mubr.f32.mxu1 %v9122_v22  ;;  %v10664_v22 = vld [vmem:[#allocation139_spill] sm:$0xff] }
 0x3d5   :  { %5281 = vmatmul.mubr.f32.gmra.mrb[88].mxu1 %v9133_v50  ;;  %v10663_v50 = vld [vmem:[#allocation135_spill] sm:$0xff] }
 0x3d6   :  { %5283 = vmatprep.mubr.f32.mxu1 %v9144_v43  ;;  %v10662_v43 = vld [vmem:[#allocation131_spill] sm:$0xff] }
 0x3d9   :  { %5284 = vmatmul.mubr.f32.gmra.mrb[90].mxu1 %v9155_v60  ;;  %v10661_v60 = vld [vmem:[#allocation129_spill] sm:$0xff] }
 0x3da   :  { %5286 = vmatprep.mubr.f32.mxu1 %v9166_v63  ;;  %v10660_v63 = vld [vmem:[#allocation74_spill] sm:$0xff] }
 0x3dd   :  { %5287 = vmatmul.mubr.f32.gmra.mrb[92].mxu1 %v9177_v55  ;;  %v10659_v55 = vld [vmem:[#allocation123_spill] sm:$0xff] }
 0x3de   :  { %5289 = vmatprep.mubr.f32.mxu1 %v9188_v8 }
 0x3e1   :  { %5290 = vmatmul.mubr.f32.gmra.mrb[94].mxu1 %v9197_v23  ;;  %v10658_v23 = vand.u32 4294901760, %v10657_v28  ;;  %v10667_v28 = vld [vmem:[#allocation151_spill] sm:$0xff] }
 0x3e2   :  { %5324 = vmatprep.mubr.f32.mxu1 %v10642_v5  ;;  %v10697_v5 = vld [vmem:[#allocation57_spill] sm:$0xff] }
 0x3e3   :  { %v6028_v8 = vpack.c.bf16 %v10658_v23, %v10656_v15  ;;  %v10668_v15 = vld [vmem:[#allocation155_spill] sm:$0xff] }
 0x3e4   :  { %v10669_v23 = vld [vmem:[#allocation67_spill] sm:$0xff] }
 0x3e5   :  { %5325 = vmatmul.mubr.f32.vlgmr.msra.gmra.mrb[64].mxu1 %v8775_v27 }
 0x3e6   :  { %5327 = vmatprep.mubr.f32.mxu1 %v8811_v45  ;;  %5999 = vmatpush3.bf16.msra.mxu1 %v10641_v39 }
 0x3e7   :  { %6001 = vmatprep.subr.bf16.mxu1 %v10643_v58 }
 0x3e9   :  { %5328 = vmatmul.mubr.f32.gmra.mrb[66].mxu1 %v8831_v12 }
 0x3ea   :  { %5330 = vmatprep.mubr.f32.mxu1 %v8857_v26  ;;  %6003 = vmatpush3.bf16.msra.mxu1 %v10643_v58  ;;  %v10694_v26 = vand.u32 4294901760, %v10693_v18  ;;  %v10742_v18 = vld [vmem:[#allocation137_spill] sm:$0xff] }
 0x3eb   :  { %6005 = vmatprep.subr.bf16.mxu1 %v10644_v35 }
 0x3ed   :  { %5331 = vmatmul.mubr.f32.gmra.mrb[68].mxu1 %v10645_v37  ;;  %v10698_v37 = vand.u32 4294901760, %v10697_v5  ;;  %v10747_v5 = vld [vmem:[#allocation156_spill] sm:$0xff] }
 0x3ee   :  { %5333 = vmatprep.mubr.f32.mxu1 %v8903_v13  ;;  %6007 = vmatpush3.bf16.msra.mxu1 %v10644_v35 }
 0x3ef   :  { %6009 = vmatprep.subr.bf16.mxu1 %v10646_v14 }
 0x3f1   :  { %5334 = vmatmul.mubr.f32.gmra.mrb[70].mxu1 %v8924_v36 }
 0x3f2   :  { %5336 = vmatprep.mubr.f32.mxu1 %v8935_v4  ;;  %6011 = vmatpush3.bf16.msra.mxu1 %v10646_v14 }
 0x3f3   :  { %6013 = vmatprep.subr.bf16.mxu1 %v10647_v25 }
 0x3f5   :  { %5337 = vmatmul.mubr.f32.gmra.mrb[72].mxu1 %v8950_v16 }
 0x3f6   :  { %5339 = vmatprep.mubr.f32.mxu1 %v8961_v20  ;;  %6015 = vmatpush3.bf16.msra.mxu1 %v10647_v25 }
 0x3f7   :  { %6017 = vmatprep.subr.bf16.mxu1 %v10648_v48 }
 0x3f9   :  { %5340 = vmatmul.mubr.f32.gmra.mrb[74].mxu1 %v10649_v9 }
 0x3fa   :  { %5342 = vmatprep.mubr.f32.mxu1 %v10650_v3  ;;  %6019 = vmatpush3.bf16.msra.mxu1 %v10648_v48 }
 0x3fb   :  { %6021 = vmatprep.subr.bf16.mxu1 %v10651_v0 }
 0x3fd   :  { %5343 = vmatmul.mubr.f32.gmra.mrb[76].mxu1 %v10652_v47 }
 0x3fe   :  { %5345 = vmatprep.mubr.f32.mxu1 %v10653_v44  ;;  %6023 = vmatpush3.bf16.msra.mxu1 %v10651_v0  ;;  %v10680_v0 = vand.u32 4294901760, %v10679_v41  ;;  %v10690_v41 = vand.u32 4294901760, %v8903_v13 }
 0x3ff   :  { %6025 = vmatprep.subr.bf16.mxu1 %v10654_v54 }
 0x400   :  { %v6036_v48 = vpack.c.bf16 %v10682_v52, %v10680_v0  ;;  %v10699_v0 = vld [vmem:[#allocation60_spill] sm:$0xff] }
 0x401   :  { %5346 = vmatmul.mubr.f32.gmra.mrb[78].mxu1 %v10659_v55  ;;  %v10700_v13 = vand.u32 4294901760, %v10699_v0  ;;  %v10749_v0 = vld [vmem:[#allocation93_spill] sm:$0xff] }
 0x402   :  { %5348 = vmatprep.mubr.f32.mxu1 %v10660_v63  ;;  %6027 = vmatpush3.bf16.msra.mxu1 %v10654_v54  ;;  %v10677_v54 = vand.u32 4294901760, %v8775_v27  ;;  %v10687_v27 = vld [vmem:[#allocation45_spill] sm:$0xff] }
 0x403   :  { %6029 = vmatprep.subr.bf16.mxu1 %v6028_v8  ;;  %v10688_v45 = vand.u32 4294901760, %v10687_v27 }
 0x405   :  { %5349 = vmatmul.mubr.f32.gmra.mrb[80].mxu1 %v10661_v60 }
 0x406   :  { %5351 = vmatprep.mubr.f32.mxu1 %v10662_v43 }
 0x409   :  { %5352 = vmatmul.mubr.f32.gmra.mrb[82].mxu1 %v10663_v50 }
 0x40a   :  { %5354 = vmatprep.mubr.f32.mxu1 %v10664_v22 }
 0x40d   :  { %5355 = vmatmul.mubr.f32.gmra.mrb[84].mxu1 %v10665_v56 }
 0x40e   :  { %5357 = vmatprep.mubr.f32.mxu1 %v10666_v49 }
 0x411   :  { %5358 = vmatmul.mubr.f32.gmra.mrb[86].mxu1 %v10667_v28 }
 0x412   :  { %5360 = vmatprep.mubr.f32.mxu1 %v10668_v15 }
 0x415   :  { %5361 = vmatmul.mubr.f32.gmra.mrb[88].mxu1 %v10669_v23 }
 0x416   :  { %5363 = vmatprep.mubr.f32.mxu1 %v10670_v34 }
 0x419   :  { %5364 = vmatmul.mubr.f32.gmra.mrb[90].mxu1 %v10671_v42 }
 0x41a   :  { %5366 = vmatprep.mubr.f32.mxu1 %v9172_v53 }
 0x41d   :  { %5367 = vmatmul.mubr.f32.gmra.mrb[92].mxu1 %v9183_v10 }
 0x41e   :  { %5369 = vmatprep.mubr.f32.mxu1 %v9192_v29 }
 0x421   :  { %5370 = vmatmul.mubr.f32.gmra.mrb[94].mxu1 %v9201_v24 }
 0x422   :  { %5404 = vmatprep.mubr.f32.mxu1 %v10672_v57  ;;  %v10683_v57 = vand.u32 4294901760, %v8831_v12  ;;  %v10691_v12 = vld [vmem:[#allocation51_spill] sm:$0xff] }
 0x423   :  { %v10692_v52 = vand.u32 4294901760, %v10691_v12  ;;  %v10712_v12 = vand.u32 4294901760, %v10653_v44  ;;  %v10718_v44 = vand.u32 4294901760, %v10664_v22  ;;  %v10725_v22 = vand.u32 4294901760, %v10671_v42  ;;  %v10731_v42 = vld [vmem:[#allocation59_spill] sm:$0xff] }
 0x425   :  { %5405 = vmatmul.mubr.f32.vlgmr.msra.gmra.mrb[64].mxu1 %v10677_v54  ;;  %v10696_v54 = vand.u32 4294901760, %v8935_v4 }
 0x426   :  { %5407 = vmatprep.mubr.f32.mxu1 %v10678_v46  ;;  %6031 = vmatpush3.bf16.msra.mxu1 %v6028_v8  ;;  %v6040_v46 = vpack.c.bf16 %v10688_v45, %v10686_v21  ;;  %v6044_v8 = vpack.c.bf16 %v10694_v26, %v10692_v52  ;;  %v10705_v21 = vld [vmem:[#allocation64_spill] sm:$0xff]  ;;  %v10707_v45 = vand.u32 4294901760, %v10649_v9  ;;  %v10713_v9 = vand.u32 4294901760, %v10659_v55  ;;  %v10743_v26 = vld [vmem:[#allocation141_spill] sm:$0xff] }
 0x427   :  { %6033 = vmatprep.subr.bf16.mxu1 %v6032_v61  ;;  %v10706_v4 = vand.u32 4294901760, %v10705_v21  ;;  %v10719_v55 = vand.u32 4294901760, %v10665_v56  ;;  %v10721_v52 = vand.u32 4294901760, %v10667_v28  ;;  %v10726_v56 = vand.u32 4294901760, %v9172_v53  ;;  %v10733_v53 = vld [vmem:[#allocation28_spill] sm:$0xff] }
 0x428   :  { %v10728_v28 = vand.u32 4294901760, %v9192_v29  ;;  %v10730_v29 = vld [vmem:[#allocation19_spill] sm:$0xff] }
 0x429   :  { %5408 = vmatmul.mubr.f32.gmra.mrb[66].mxu1 %v10683_v57  ;;  %v6048_v57 = vpack.c.bf16 %v10700_v13, %v10698_v37  ;;  %v10748_v37 = vld [vmem:[#allocation62_spill] sm:$0xff]  ;;  %v10750_v13 = vld [vmem:[#allocation71_spill] sm:$0xff] }
 0x42a   :  { %5410 = vmatprep.mubr.f32.mxu1 %v10684_v62  ;;  %6035 = vmatpush3.bf16.msra.mxu1 %v6032_v61  ;;  %v10695_v61 = vand.u32 4294901760, %v8924_v36  ;;  %v10702_v62 = vand.u32 4294901760, %v8961_v20  ;;  %v10703_v36 = vld [vmem:[#allocation63_spill] sm:$0xff]  ;;  %v10710_v20 = vand.u32 4294901760, %v8876_v59  ;;  %v10716_v59 = vand.u32 4294901760, %v10662_v43 }
 0x42b   :  { %6037 = vmatprep.subr.bf16.mxu1 %v6036_v48  ;;  %v10704_v30 = vand.u32 4294901760, %v10703_v36  ;;  %v10723_v43 = vand.u32 4294901760, %v10669_v23  ;;  %v10741_v23 = vld [vmem:[#allocation133_spill] sm:$0xff] }
 0x42d   :  { %5411 = vmatmul.mubr.f32.gmra.mrb[68].mxu1 %v10689_v19  ;;  %v6052_v27 = vpack.c.bf16 %v10706_v4, %v10704_v30 }
 0x42e   :  { %5413 = vmatprep.mubr.f32.mxu1 %v10690_v41  ;;  %6039 = vmatpush3.bf16.msra.mxu1 %v6036_v48  ;;  %v10701_v48 = vand.u32 4294901760, %v8950_v16  ;;  %v10709_v16 = vand.u32 4294901760, %v8871_v6  ;;  %v10711_v41 = vand.u32 4294901760, %v10652_v47  ;;  %v10715_v6 = vand.u32 4294901760, %v10661_v60 }
 0x42f   :  { %6041 = vmatprep.subr.bf16.mxu1 %v6040_v46  ;;  %v10717_v47 = vand.u32 4294901760, %v10663_v50  ;;  %v10722_v60 = vand.u32 4294901760, %v10668_v15  ;;  %v10724_v50 = vand.u32 4294901760, %v10670_v34  ;;  %v10729_v15 = vand.u32 4294901760, %v9201_v24  ;;  %v10732_v34 = vld [vmem:[#allocation68_spill] sm:$0xff]  ;;  %v10735_v24 = vld [vmem:[#allocation115_spill] sm:$0xff] }
 0x430   :  { %v6056_v19 = vpack.c.bf16 %v10710_v20, %v10709_v16 }
 0x431   :  { %5414 = vmatmul.mubr.f32.gmra.mrb[70].mxu1 %v10695_v61  ;;  %v10745_v61 = vld [vmem:[#allocation149_spill] sm:$0xff] }
 0x432   :  { %5416 = vmatprep.mubr.f32.mxu1 %v10696_v54  ;;  %6043 = vmatpush3.bf16.msra.mxu1 %v6040_v46  ;;  %v10708_v46 = vand.u32 4294901760, %v10650_v3  ;;  %v10714_v3 = vand.u32 4294901760, %v10660_v63  ;;  %v10720_v63 = vand.u32 4294901760, %v10666_v49  ;;  %v10727_v49 = vand.u32 4294901760, %v9183_v10  ;;  %v10734_v10 = vld [vmem:[#allocation111_spill] sm:$0xff]  ;;  %v10746_v54 = vld [vmem:[#allocation153_spill] sm:$0xff] }
 0x433   :  { %6045 = vmatprep.subr.bf16.mxu1 %v6044_v8 }
 0x435   :  { %5417 = vmatmul.mubr.f32.gmra.mrb[72].mxu1 %v10701_v48  ;;  %v10752_v48 = vld [vmem:[#allocation95_spill] sm:$0xff] }
 0x436   :  { %5419 = vmatprep.mubr.f32.mxu1 %v10702_v62  ;;  %6047 = vmatpush3.bf16.msra.mxu1 %v6044_v8  ;;  %v10744_v8 = vld [vmem:[#allocation145_spill] sm:$0xff]  ;;  %v10753_v62 = vld [vmem:[#allocation96_spill] sm:$0xff] }
 0x437   :  { %6049 = vmatprep.subr.bf16.mxu1 %v6048_v57 }
 0x439   :  { %5420 = vmatmul.mubr.f32.gmra.mrb[74].mxu1 %v10707_v45 }
 0x43a   :  { %5422 = vmatprep.mubr.f32.mxu1 %v10708_v46  ;;  %6051 = vmatpush3.bf16.msra.mxu1 %v6048_v57  ;;  %v10751_v57 = vld [vmem:[#allocation79_spill] sm:$0xff] }
 0x43b   :  { %6053 = vmatprep.subr.bf16.mxu1 %v6052_v27 }
 0x43d   :  { %5423 = vmatmul.mubr.f32.gmra.mrb[76].mxu1 %v10711_v41 }
 0x43e   :  { %5425 = vmatprep.mubr.f32.mxu1 %v10712_v12  ;;  %6055 = vmatpush3.bf16.msra.mxu1 %v6052_v27 }
 0x43f   :  { %6057 = vmatprep.subr.bf16.mxu1 %v6056_v19 }
 0x441   :  { %5426 = vmatmul.mubr.f32.gmra.mrb[78].mxu1 %v10713_v9 }
 0x442   :  { %5428 = vmatprep.mubr.f32.mxu1 %v10714_v3  ;;  %6059 = vmatpush3.bf16.msra.mxu1 %v6056_v19 }
 0x443   :  { %6061 = vmatprep.subr.bf16.mxu1 %v10641_v39 }
 0x445   :  { %5429 = vmatmul.mubr.f32.gmra.mrb[80].mxu1 %v10715_v6 }
 0x446   :  { %5431 = vmatprep.mubr.f32.mxu1 %v10716_v59 }
 0x449   :  { %5432 = vmatmul.mubr.f32.gmra.mrb[82].mxu1 %v10717_v47 }
 0x44a   :  { %5434 = vmatprep.mubr.f32.mxu1 %v10718_v44 }
 0x44d   :  { %5435 = vmatmul.mubr.f32.gmra.mrb[84].mxu1 %v10719_v55 }
 0x44e   :  { %5437 = vmatprep.mubr.f32.mxu1 %v10720_v63 }
 0x451   :  { %5438 = vmatmul.mubr.f32.gmra.mrb[86].mxu1 %v10721_v52 }
 0x452   :  { %5440 = vmatprep.mubr.f32.mxu1 %v10722_v60 }
 0x455   :  { %5441 = vmatmul.mubr.f32.gmra.mrb[88].mxu1 %v10723_v43 }
 0x456   :  { %5443 = vmatprep.mubr.f32.mxu1 %v10724_v50 }
 0x459   :  { %5444 = vmatmul.mubr.f32.gmra.mrb[90].mxu1 %v10725_v22 }
 0x45a   :  { %5446 = vmatprep.mubr.f32.mxu1 %v10726_v56 }
 0x45d   :  { %5447 = vmatmul.mubr.f32.gmra.mrb[92].mxu1 %v10727_v49 }
 0x45e   :  { %5449 = vmatprep.mubr.f32.mxu1 %v10728_v28 }
 0x461   :  { %5450 = vmatmul.mubr.f32.gmra.mrb[94].mxu1 %v10729_v15 }
 0x462   :  { %5484 = vmatprep.mubr.f32.mxu1 %v10639_v51 }
 0x465   :  { %5485 = vmatmul.mubr.f32.vlgmr.msra.gmra.mrb[64].mxu1 %v10640_v40 }
 0x466   :  { %5487 = vmatprep.mubr.f32.mxu1 %v8793_v31  ;;  %6063 = vmatpush3.bf16.msra.mxu1 %v10641_v39  ;;  %v10736_v39 = vld [vmem:[#allocation22_spill] sm:$0xff] }
 0x467   :  { %6065 = vmatprep.subr.bf16.mxu1 %v10643_v58 }
 0x469   :  { %5488 = vmatmul.mubr.f32.gmra.mrb[66].mxu1 %v8817_v38 }
 0x46a   :  { %5490 = vmatprep.mubr.f32.mxu1 %v8847_v7  ;;  %6067 = vmatpush3.bf16.msra.mxu1 %v10643_v58  ;;  %v10737_v58 = vld [vmem:[#allocation72_spill] sm:$0xff] }
 0x46b   :  { %6069 = vmatprep.subr.bf16.mxu1 %v10644_v35 }
 0x46d   :  { %5491 = vmatmul.mubr.f32.gmra.mrb[68].mxu1 %v8878_v2 }
 0x46e   :  { %5493 = vmatprep.mubr.f32.mxu1 %v8897_v17  ;;  %6071 = vmatpush3.bf16.msra.mxu1 %v10644_v35  ;;  %v10738_v35 = vld [vmem:[#allocation125_spill] sm:$0xff] }
 0x46f   :  { %6073 = vmatprep.subr.bf16.mxu1 %v10646_v14 }
 0x471   :  { %5494 = vmatmul.mubr.f32.gmra.mrb[70].mxu1 %v8918_v1 }
 0x472   :  { %5496 = vmatprep.mubr.f32.mxu1 %v8929_v11  ;;  %6075 = vmatpush3.bf16.msra.mxu1 %v10646_v14  ;;  %v10739_v14 = vld [vmem:[#allocation127_spill] sm:$0xff] }
 0x473   :  { %6077 = vmatprep.subr.bf16.mxu1 %v10647_v25 }
 0x475   :  { %5497 = vmatmul.mubr.f32.gmra.mrb[72].mxu1 %v8944_v33 }
 0x476   :  { %5499 = vmatprep.mubr.f32.mxu1 %v8955_v32  ;;  %6079 = vmatpush3.bf16.msra.mxu1 %v10647_v25  ;;  %v10740_v25 = vld [vmem:[#allocation76_spill] sm:$0xff] }
 0x477   :  { %6081 = vmatprep.subr.bf16.mxu1 %v10730_v29 }
 0x479   :  { %5500 = vmatmul.mubr.f32.gmra.mrb[74].mxu1 %v10731_v42 }
 0x47a   :  { %5502 = vmatprep.mubr.f32.mxu1 %v10732_v34  ;;  %6083 = vmatpush3.bf16.msra.mxu1 %v10730_v29 }
 0x47b   :  { %6085 = vmatprep.subr.bf16.mxu1 %v10733_v53 }
 0x47d   :  { %5503 = vmatmul.mubr.f32.gmra.mrb[76].mxu1 %v10734_v10 }
 0x47e   :  { %5505 = vmatprep.mubr.f32.mxu1 %v10735_v24  ;;  %6087 = vmatpush3.bf16.msra.mxu1 %v10733_v53 }
 0x47f   :  { %6089 = vmatprep.subr.bf16.mxu1 %v10736_v39 }
 0x481   :  { %5506 = vmatmul.mubr.f32.gmra.mrb[78].mxu1 %v10737_v58 }
 0x482   :  { %5508 = vmatprep.mubr.f32.mxu1 %v10738_v35  ;;  %6091 = vmatpush3.bf16.msra.mxu1 %v10736_v39 }
 0x485   :  { %5509 = vmatmul.mubr.f32.gmra.mrb[80].mxu1 %v10739_v14 }
 0x486   :  { %5511 = vmatprep.mubr.f32.mxu1 %v10740_v25 }
 0x489   :  { %5512 = vmatmul.mubr.f32.gmra.mrb[82].mxu1 %v10741_v23 }
 0x48a   :  { %5514 = vmatprep.mubr.f32.mxu1 %v10742_v18 }
 0x48d   :  { %5515 = vmatmul.mubr.f32.gmra.mrb[84].mxu1 %v10743_v26 }
 0x48e   :  { %5517 = vmatprep.mubr.f32.mxu1 %v10744_v8 }
 0x491   :  { %5518 = vmatmul.mubr.f32.gmra.mrb[86].mxu1 %v10745_v61 }
 0x492   :  { %5520 = vmatprep.mubr.f32.mxu1 %v10746_v54 }
 0x495   :  { %5521 = vmatmul.mubr.f32.gmra.mrb[88].mxu1 %v10747_v5 }
 0x496   :  { %5523 = vmatprep.mubr.f32.mxu1 %v10748_v37 }
 0x499   :  { %5524 = vmatmul.mubr.f32.gmra.mrb[90].mxu1 %v10749_v0 }
 0x49a   :  { %5526 = vmatprep.mubr.f32.mxu1 %v10750_v13 }
 0x49d   :  { %5527 = vmatmul.mubr.f32.gmra.mrb[92].mxu1 %v10751_v57 }
 0x49e   :  { %5529 = vmatprep.mubr.f32.mxu1 %v10752_v48 }
 0x4a1   :  { %5530 = vmatmul.mubr.f32.gmra.mrb[94].mxu1 %v10753_v62 }
 0x4a2   :  { %5564 = vmatprep.mubr.f32.mxu1 %v10639_v51 }
 0x4a5   :  { %5565 = vmatmul.mubr.f32.vlgmr.msra.gmra.mrb[64].mxu1 %v10640_v40 }
 0x4a6   :  { %5567 = vmatprep.mubr.f32.mxu1 %v8793_v31  ;;  %v9484_v31 = vld [vmem:[%s9537_s4] ss:$0 sm:$0xff]  ;;  %s6747_s4 = smov [#allocation8]  }
 0x4a7   :  { %s4829_s10 = sshll.u32 %s6747_s4, 4  ;;  %s4830_s10 = int_to_ptr.vmem [resolvable:$true] %s4829_s10 }
 0x4a8   :  { %s6711_s11 = scalar_lea.vmem %s4830_s10, 4096  ;;  %p6716_p11 = scmp.lt.s32.totalorder %s4830_s10, %s4830_s10 }
 0x4a9   :  { %5568 = vmatmul.mubr.f32.gmra.mrb[66].mxu1 %v8817_v38  ;;  %p6712_p10 = scmp.ne.s32.totalorder %s4830_s10, %s6711_s11  ;;  %p6717_p12 = scmp.lt.s32.totalorder %s6711_s11, %s6711_s11 }
 0x4aa   :  { %5570 = vmatprep.mubr.f32.mxu1 %v8847_v7 }
 0x4ab   :  { %p6718_p13 = por %p6717_p12, %p6716_p11 }
 0x4ad   :  { %5571 = vmatmul.mubr.f32.gmra.mrb[68].mxu1 %v8878_v2  ;;  %p6719_p0 = pnand %p6718_p13, %p6712_p10 }
 0x4ae   :  { %5573 = vmatprep.mubr.f32.mxu1 %v8897_v17 }
 0x4b1   :  { %5574 = vmatmul.mubr.f32.gmra.mrb[70].mxu1 %v8918_v1 }
 0x4b2   :  { %5576 = vmatprep.mubr.f32.mxu1 %v8929_v11 }
 0x4b5   :  { %5577 = vmatmul.mubr.f32.gmra.mrb[72].mxu1 %v8944_v33 }
 0x4b6   :  { %5579 = vmatprep.mubr.f32.mxu1 %v8955_v32 }
 0x4b9   :  { %5580 = vmatmul.mubr.f32.gmra.mrb[74].mxu1 %v10731_v42 }
 0x4ba   :  { %5582 = vmatprep.mubr.f32.mxu1 %v10732_v34 }
 0x4bd   :  { %5583 = vmatmul.mubr.f32.gmra.mrb[76].mxu1 %v10734_v10 }
 0x4be   :  { %5585 = vmatprep.mubr.f32.mxu1 %v10735_v24 }
 0x4c1   :  { %5586 = vmatmul.mubr.f32.gmra.mrb[78].mxu1 %v10737_v58 }
 0x4c2   :  { %5588 = vmatprep.mubr.f32.mxu1 %v10738_v35 }
 0x4c5   :  { %5589 = vmatmul.mubr.f32.gmra.mrb[80].mxu1 %v10739_v14 }
 0x4c6   :  { %5591 = vmatprep.mubr.f32.mxu1 %v10740_v25 }
 0x4c9   :  { %5592 = vmatmul.mubr.f32.gmra.mrb[82].mxu1 %v10741_v23 }
 0x4ca   :  { %5594 = vmatprep.mubr.f32.mxu1 %v10742_v18 }
 0x4cd   :  { %5595 = vmatmul.mubr.f32.gmra.mrb[84].mxu1 %v10743_v26 }
 0x4ce   :  { %5597 = vmatprep.mubr.f32.mxu1 %v10744_v8 }
 0x4d1   :  { %5598 = vmatmul.mubr.f32.gmra.mrb[86].mxu1 %v10745_v61 }
 0x4d2   :  { %5600 = vmatprep.mubr.f32.mxu1 %v10746_v54 }
 0x4d5   :  { %5601 = vmatmul.mubr.f32.gmra.mrb[88].mxu1 %v10747_v5 }
 0x4d6   :  { %5603 = vmatprep.mubr.f32.mxu1 %v10748_v37 }
 0x4d9   :  { %5604 = vmatmul.mubr.f32.gmra.mrb[90].mxu1 %v10749_v0 }
 0x4da   :  { %5606 = vmatprep.mubr.f32.mxu1 %v10750_v13 }
 0x4dd   :  { %5607 = vmatmul.mubr.f32.gmra.mrb[92].mxu1 %v10751_v57 }
 0x4de   :  { %5609 = vmatprep.mubr.f32.mxu1 %v10752_v48 }
 0x4e1   :  { %5610 = vmatmul.mubr.f32.gmra.mrb[94].mxu1 %v10753_v62 }
 0x578   :  { %v5566_v38 = vpop.f32.mrb[64].mxu1 }
 0x579   :  { %v6188_v7 = vadd.f32 %v5566_v38, %v9484_v31  ;;  %v4602_v2 = vpop.f32.mrb[65].mxu1 }
 0x57a   :  { %v6189_v17 = vadd.f32 %v9484_v31, %v4602_v2 }
 0x57b   :  { %4793 = vst [vmem:[#allocation8 + $0x8] sm:$0xff] %v6188_v7 }
 0x57c   :  { %4792 = vst [vmem:[#allocation8] sm:$0xff] %v6189_v17  ;;  %v5569_v1 = vpop.f32.mrb[66].mxu1 }
 0x57d   :  { %v6190_v11 = vadd.f32 %v5569_v1, %v9484_v31  ;;  %v4614_v33 = vpop.f32.mrb[67].mxu1 }
 0x57e   :  { %v6191_v32 = vadd.f32 %v9484_v31, %v4614_v33 }
 0x57f   :  { %4795 = vst [vmem:[#allocation8 + $0x18] sm:$0xff] %v6190_v11 }
 0x580   :  { %4794 = vst [vmem:[#allocation8 + $0x10] sm:$0xff] %v6191_v32  ;;  %v5572_v51 = vpop.f32.mrb[68].mxu1 }
 0x581   :  { %v6192_v40 = vadd.f32 %v5572_v51, %v9484_v31  ;;  %v4626_v36 = vpop.f32.mrb[69].mxu1 }
 0x582   :  { %v6193_v30 = vadd.f32 %v9484_v31, %v4626_v36 }
 0x583   :  { %4797 = vst [vmem:[#allocation8 + $0x28] sm:$0xff] %v6192_v40 }
 0x584   :  { %4796 = vst [vmem:[#allocation8 + $0x20] sm:$0xff] %v6193_v30  ;;  %v5575_v21 = vpop.f32.mrb[70].mxu1 }
 0x585   :  { %v6194_v4 = vadd.f32 %v5575_v21, %v9484_v31  ;;  %v4638_v27 = vpop.f32.mrb[71].mxu1 }
 0x586   :  { %v6195_v45 = vadd.f32 %v9484_v31, %v4638_v27 }
 0x587   :  { %4799 = vst [vmem:[#allocation8 + $0x38] sm:$0xff] %v6194_v4 }
 0x588   :  { %4798 = vst [vmem:[#allocation8 + $0x30] sm:$0xff] %v6195_v45  ;;  %v5578_v46 = vpop.f32.mrb[72].mxu1 }
 0x589   :  { %v6196_v16 = vadd.f32 %v5578_v46, %v9484_v31  ;;  %v4650_v20 = vpop.f32.mrb[73].mxu1 }
 0x58a   :  { %v6197_v19 = vadd.f32 %v9484_v31, %v4650_v20 }
 0x58b   :  { %4801 = vst [vmem:[#allocation8 + $0x48] sm:$0xff] %v6196_v16 }
 0x58c   :  { %4800 = vst [vmem:[#allocation8 + $0x40] sm:$0xff] %v6197_v19  ;;  %v5581_v41 = vpop.f32.mrb[74].mxu1 }
 0x58d   :  { %v6198_v12 = vadd.f32 %v5581_v41, %v9484_v31  ;;  %v4662_v9 = vpop.f32.mrb[75].mxu1 }
 0x58e   :  { %v6199_v3 = vadd.f32 %v9484_v31, %v4662_v9 }
 0x58f   :  { %4803 = vst [vmem:[#allocation8 + $0x58] sm:$0xff] %v6198_v12 }
 0x590   :  { %4802 = vst [vmem:[#allocation8 + $0x50] sm:$0xff] %v6199_v3  ;;  %v5584_v6 = vpop.f32.mrb[76].mxu1 }
 0x591   :  { %v6200_v59 = vadd.f32 %v5584_v6, %v9484_v31  ;;  %v4674_v47 = vpop.f32.mrb[77].mxu1 }
 0x592   :  { %v6201_v44 = vadd.f32 %v9484_v31, %v4674_v47 }
 0x593   :  { %4805 = vst [vmem:[#allocation8 + $0x68] sm:$0xff] %v6200_v59 }
 0x594   :  { %4804 = vst [vmem:[#allocation8 + $0x60] sm:$0xff] %v6201_v44  ;;  %v5587_v55 = vpop.f32.mrb[78].mxu1 }
 0x595   :  { %v6202_v63 = vadd.f32 %v5587_v55, %v9484_v31  ;;  %v4686_v52 = vpop.f32.mrb[79].mxu1 }
 0x596   :  { %v6203_v60 = vadd.f32 %v9484_v31, %v4686_v52 }
 0x597   :  { %4807 = vst [vmem:[#allocation8 + $0x78] sm:$0xff] %v6202_v63 }
 0x598   :  { %4806 = vst [vmem:[#allocation8 + $0x70] sm:$0xff] %v6203_v60  ;;  %v5590_v43 = vpop.f32.mrb[80].mxu1 }
 0x599   :  { %v6204_v50 = vadd.f32 %v5590_v43, %v9484_v31  ;;  %v4698_v22 = vpop.f32.mrb[81].mxu1 }
 0x59a   :  { %v6205_v56 = vadd.f32 %v9484_v31, %v4698_v22 }
 0x59b   :  { %4809 = vst [vmem:[#allocation8 + $0x88] sm:$0xff] %v6204_v50 }
 0x59c   :  { %4808 = vst [vmem:[#allocation8 + $0x80] sm:$0xff] %v6205_v56  ;;  %v5593_v49 = vpop.f32.mrb[82].mxu1 }
 0x59d   :  { %v6206_v28 = vadd.f32 %v5593_v49, %v9484_v31  ;;  %v4710_v15 = vpop.f32.mrb[83].mxu1 }
 0x59e   :  { %v6207_v29 = vadd.f32 %v9484_v31, %v4710_v15 }
 0x59f   :  { %4811 = vst [vmem:[#allocation8 + $0x98] sm:$0xff] %v6206_v28 }
 0x5a0   :  { %4810 = vst [vmem:[#allocation8 + $0x90] sm:$0xff] %v6207_v29  ;;  %v5596_v42 = vpop.f32.mrb[84].mxu1 }
 0x5a1   :  { %v6208_v34 = vadd.f32 %v5596_v42, %v9484_v31  ;;  %v4722_v53 = vpop.f32.mrb[85].mxu1 }
 0x5a2   :  { %v6209_v10 = vadd.f32 %v9484_v31, %v4722_v53 }
 0x5a3   :  { %4813 = vst [vmem:[#allocation8 + $0xa8] sm:$0xff] %v6208_v34 }
 0x5a4   :  { %4812 = vst [vmem:[#allocation8 + $0xa0] sm:$0xff] %v6209_v10  ;;  %v5599_v24 = vpop.f32.mrb[86].mxu1 }
 0x5a5   :  { %v6210_v39 = vadd.f32 %v5599_v24, %v9484_v31  ;;  %v4734_v58 = vpop.f32.mrb[87].mxu1 }
 0x5a6   :  { %v6211_v35 = vadd.f32 %v9484_v31, %v4734_v58 }
 0x5a7   :  { %4815 = vst [vmem:[#allocation8 + $0xb8] sm:$0xff] %v6210_v39 }
 0x5a8   :  { %4814 = vst [vmem:[#allocation8 + $0xb0] sm:$0xff] %v6211_v35  ;;  %v5602_v14 = vpop.f32.mrb[88].mxu1 }
 0x5a9   :  { %v6212_v25 = vadd.f32 %v5602_v14, %v9484_v31  ;;  %v4746_v23 = vpop.f32.mrb[89].mxu1 }
 0x5aa   :  { %v6213_v18 = vadd.f32 %v9484_v31, %v4746_v23 }
 0x5ab   :  { %4817 = vst [vmem:[#allocation8 + $0xc8] sm:$0xff] %v6212_v25 }
 0x5ac   :  { %4816 = vst [vmem:[#allocation8 + $0xc0] sm:$0xff] %v6213_v18  ;;  %v5605_v26 = vpop.f32.mrb[90].mxu1 }
 0x5ad   :  { %v6214_v8 = vadd.f32 %v5605_v26, %v9484_v31  ;;  %v4758_v61 = vpop.f32.mrb[91].mxu1 }
 0x5ae   :  { %v6215_v54 = vadd.f32 %v9484_v31, %v4758_v61 }
 0x5af   :  { %4819 = vst [vmem:[#allocation8 + $0xd8] sm:$0xff] %v6214_v8 }
 0x5b0   :  { %4818 = vst [vmem:[#allocation8 + $0xd0] sm:$0xff] %v6215_v54  ;;  %v5608_v5 = vpop.f32.mrb[92].mxu1 }
 0x5b1   :  { %v6216_v37 = vadd.f32 %v5608_v5, %v9484_v31  ;;  %v4770_v0 = vpop.f32.mrb[93].mxu1 }
 0x5b2   :  { %v6217_v13 = vadd.f32 %v9484_v31, %v4770_v0 }
 0x5b3   :  { %4821 = vst [vmem:[#allocation8 + $0xe8] sm:$0xff] %v6216_v37 }
 0x5b4   :  { %4820 = vst [vmem:[#allocation8 + $0xe0] sm:$0xff] %v6217_v13  ;;  %v5611_v57 = vpop.f32.mrb[94].mxu1 }
 0x5b5   :  { %v6218_v48 = vadd.f32 %v5611_v57, %v9484_v31  ;;  %v4782_v62 = vpop.f32.mrb[95].mxu1 }
 0x5b6   :  { %v6219_v38 = vadd.f32 %v9484_v31, %v4782_v62 }
 0x5b7   :  { %4823 = vst [vmem:[#allocation8 + $0xf8] sm:$0xff] %v6218_v48 }
 0x5b8   :  { %4822 = vst [vmem:[#allocation8 + $0xf0] sm:$0xff] %v6219_v38 }
 0x5b9   :  { %6722 = shalt.err (!%p6719_p0)
}
 0x5ba   :  { %s6723_s14 = scalar_lea.hbm %s9538_s5, 4096 }
 0x5bb   :  { %p6724_p1 = scmp.ne.s32.totalorder %s9538_s5, %s6723_s14  ;;  %p6727_p2 = scmp.lt.u32.totalorder %s6723_s14, %s9538_s5 }
 0x5bd   :  { %p6729_p3 = pnand %p6727_p2, %p6724_p1 }
 0x5bf   :  { %6732 = shalt.err (!%p6729_p3)
}
 0x5c0   :  { %4835 = dma.vmem_to_hbm [thread:$0]  %s4830_s10, 4096, %s9538_s5, [#allocation4], %s6740_s28, %s6740_s28, %s6741_s29  }
 0x5c1   :  { %6737 = dma.done.wait [#allocation4], 4096  }
 0x5c2   :  { %6738 = vsyncadd [#allocation4], 4294963200 }
 0x5c3   :  { %4839 = vsyncpa [#allocation3], 1 }
 0x5c4   :  { %4840 = vsyncpa [#allocation6], 1 }
 0x5c5   :  { %4841 = vsyncpa [#allocation4], 1 }

// kernel: tpu_custom_call.1
= control target key start
LH: loop header
LB: loop body
LE: loop exit
PB: predicated region body
PF: predicated region fallthrough
CT: control target
= control target key end

     0   :  { %10 = vsyncpa [#allocation3], 0  ;;  %s9533_s0 = inlined_call_operand.hbm [shape: f32[256,256], index: 0, kind: input, shape index: {}]   ;;  %s9534_s1 = inlined_call_operand.hbm [shape: f32[256,128], index: 1, kind: input, shape index: {}]   ;;  %s9535_s2 = inlined_call_operand.vmem [shape: f32[1,128], index: 2, kind: input, shape index: {}]   ;;  %s9536_s3 = inlined_call_operand.hbm [shape: f32[128,128], index: 3, kind: input, shape index: {}]   ;;  %s9537_s4 = inlined_call_operand.vmem [shape: f32[1,128], index: 4, kind: input, shape index: {}]   ;;  %s9538_s5 = inlined_call_operand.hbm [shape: f32[256,128], index: 5, kind: output, shape index: {}]  }
   0x1   :  { %11 = vsyncpa [#allocation6], 0 }
   0x2   :  { %12 = vsyncpa [#allocation4], 0  ;;  %s6739_s18 = smov [#allocation5]   ;;  %s6645_s22 = scalar_lea.hbm %s9534_s1, 4096 }
   0x3   :  { %s30_s19 = sshll.u32 %s6739_s18, 4  ;;  %p6646_p0 = scmp.ne.s32.totalorder %s9534_s1, %s6645_s22  ;;  %s31_s19 = int_to_ptr.vmem [resolvable:$true] %s30_s19 }
   0x4   :  { %p6649_p1 = scmp.lt.u32.totalorder %s6645_s22, %s9534_s1 }
   0x6   :  { %p6651_p2 = pnand %p6649_p1, %p6646_p0 }
   0x8   :  { %6654 = shalt.err (!%p6651_p2)
}
   0x9   :  { %s6655_s27 = scalar_lea.vmem %s31_s19, 4096  ;;  %p6660_p4 = scmp.lt.s32.totalorder %s31_s19, %s31_s19 }
   0xa   :  { %p6656_p3 = scmp.ne.s32.totalorder %s31_s19, %s6655_s27  ;;  %p6661_p5 = scmp.lt.s32.totalorder %s6655_s27, %s6655_s27 }
   0xc   :  { %p6662_p6 = por %p6661_p5, %p6660_p4 }
   0xe   :  { %p6663_p7 = pnand %p6662_p6, %p6656_p3 }
  0x10   :  { %6666 = shalt.err (!%p6663_p7)
}
  0x11   :  { %s6740_s28 = smov 128   ;;  %s6741_s29 = smov 8  }
  0x12   :  { %36 = dma.hbm_to_vmem [thread:$0]  %s9534_s1, 4096, %s31_s19, [#allocation6], %s6740_s28, %s6740_s28, %s6741_s29  }
  0x13   :  { %s6742_s7 = smov [#allocation2]   ;;  %s6667_s11 = scalar_lea.hbm %s9533_s0, 8192 }
  0x14   :  { %s18_s8 = sshll.u32 %s6742_s7, 4  ;;  %p6668_p8 = scmp.ne.s32.totalorder %s9533_s0, %s6667_s11  ;;  %s19_s8 = int_to_ptr.vmem [resolvable:$true] %s18_s8 }
  0x15   :  { %p6671_p9 = scmp.lt.u32.totalorder %s6667_s11, %s9533_s0 }
  0x17   :  { %p6673_p10 = pnand %p6671_p9, %p6668_p8 }
  0x19   :  { %6676 = shalt.err (!%p6673_p10)
}
  0x1a   :  { %s6677_s16 = scalar_lea.vmem %s19_s8, 8192  ;;  %p6682_p12 = scmp.lt.s32.totalorder %s19_s8, %s19_s8 }
  0x1b   :  { %p6678_p11 = scmp.ne.s32.totalorder %s19_s8, %s6677_s16  ;;  %p6683_p13 = scmp.lt.s32.totalorder %s6677_s16, %s6677_s16 }
  0x1d   :  { %p6684_p0 = por %p6683_p13, %p6682_p12 }
  0x1f   :  { %p6685_p1 = pnand %p6684_p0, %p6678_p11 }
  0x21   :  { %6688 = shalt.err (!%p6685_p1)
}
  0x22   :  { %s6743_s1 = smov 256   ;;  %s6744_s17 = smov 16  }
  0x23   :  { %24 = dma.hbm_to_vmem [thread:$0]  %s9533_s0, 8192, %s19_s8, [#allocation3], %s6743_s1, %s6743_s1, %s6744_s17  }
  0x24   :  { %s6745_s20 = smov [#allocation7]   ;;  %s6689_s24 = scalar_lea.hbm %s9536_s3, 2048 }
  0x25   :  { %s44_s21 = sshll.u32 %s6745_s20, 4  ;;  %p6690_p2 = scmp.ne.s32.totalorder %s9536_s3, %s6689_s24  ;;  %s45_s21 = int_to_ptr.vmem [resolvable:$true] %s44_s21 }
  0x26   :  { %p6693_p3 = scmp.lt.u32.totalorder %s6689_s24, %s9536_s3 }
  0x28   :  { %p6695_p4 = pnand %p6693_p3, %p6690_p2 }
  0x2a   :  { %6698 = shalt.err (!%p6695_p4)
}
  0x2b   :  { %s6699_s6 = scalar_lea.vmem %s45_s21, 2048  ;;  %p6704_p6 = scmp.lt.s32.totalorder %s45_s21, %s45_s21 }
  0x2c   :  { %p6700_p5 = scmp.ne.s32.totalorder %s45_s21, %s6699_s6  ;;  %p6705_p7 = scmp.lt.s32.totalorder %s6699_s6, %s6699_s6 }
  0x2e   :  { %p6706_p8 = por %p6705_p7, %p6704_p6 }
  0x30   :  { %p6707_p9 = pnand %p6706_p8, %p6700_p5 }
  0x32   :  { %6710 = shalt.err (!%p6707_p9)
}
  0x33   :  { %50 = dma.hbm_to_vmem [thread:$0]  %s9536_s3, 2048, %s45_s21, [#allocation6], %s6740_s28, %s6740_s28, %s6741_s29  }
  0x34   :  { %6733 = dma.done.wait [#allocation3], 8192  }
  0x35   :  { %6734 = vsyncadd [#allocation3], 4294959104 }
  0x36   :  { %6735 = dma.done.wait [#allocation6], 6144  }
  0x37   :  { %6736 = vsyncadd [#allocation6], 4294961152  ;;  %v9577_v0 = vmov 0.0|0.0   ;;  %v6822_v1 = vld [vmem:[#allocation5] sm:$0xff]  ;;  %v6824_v2 = vld [vmem:[#allocation5 + $0x8] sm:$0xff] }
  0x38   :  { %5660 = vmatprep.subr.bf16.mxu0 %v9577_v0  ;;  %5612 = vmatprep.subr.bf16.mxu1 %v9577_v0  ;;  %v6826_v3 = vld [vmem:[#allocation5 + $0x10] sm:$0xff]  ;;  %v9573_v4 = vand.u32 4294901760, %v6822_v1  ;;  %v9571_v5 = vand.u32 4294901760, %v6824_v2  ;;  %v6830_v6 = vld [vmem:[#allocation5 + $0x18] sm:$0xff]  ;;  %v6833_v8 = vld [vmem:[#allocation5 + $0x20] sm:$0xff] }
  0x39   :  { %v9569_v7 = vand.u32 4294901760, %v6826_v3  ;;  %v6835_v9 = vld [vmem:[#allocation5 + $0x28] sm:$0xff]  ;;  %v9567_v10 = vand.u32 4294901760, %v6830_v6  ;;  %v9564_v11 = vand.u32 4294901760, %v6833_v8  ;;  %v6840_v13 = vld [vmem:[#allocation5 + $0x30] sm:$0xff]  ;;  %v6842_v14 = vld [vmem:[#allocation5 + $0x38] sm:$0xff] }
  0x3a   :  { %v9563_v12 = vand.u32 4294901760, %v6835_v9  ;;  %v6847_v15 = vsub.f32 %v6822_v1, %v9573_v4  ;;  %v6852_v16 = vsub.f32 %v6824_v2, %v9571_v5  ;;  %v9560_v18 = vand.u32 4294901760, %v6840_v13  ;;  %v6912_v39 = vld [vmem:[#allocation5 + $0x40] sm:$0xff]  ;;  %v6914_v40 = vld [vmem:[#allocation5 + $0x48] sm:$0xff]  ;;  %v6916_v44 = vld [vmem:[#allocation5 + $0x50] sm:$0xff] }
  0x3b   :  { %v6857_v17 = vsub.f32 %v6826_v3, %v9569_v7  ;;  %v6863_v19 = vsub.f32 %v6830_v6, %v9567_v10  ;;  %v6868_v20 = vsub.f32 %v6833_v8, %v9564_v11  ;;  %v9559_v22 = vand.u32 4294901760, %v6842_v14  ;;  %v6921_v47 = vld [vmem:[#allocation5 + $0x58] sm:$0xff]  ;;  %v6923_v48 = vld [vmem:[#allocation5 + $0x60] sm:$0xff]  ;;  %v6929_v53 = vld [vmem:[#allocation5 + $0x68] sm:$0xff] }
  0x3c   :  { %10042 = vst [vmem:[#allocation12_spill] sm:$0xff] %v6847_v15  ;;  %10043 = vst [vmem:[#allocation13_spill] sm:$0xff] %v6852_v16  ;;  %v6873_v21 = vsub.f32 %v6835_v9, %v9563_v12  ;;  %v9548_v23 = vand.u32 4294901760, %v6847_v15  ;;  %v9545_v24 = vand.u32 4294901760, %v6852_v16  ;;  %v6882_v26 = vsub.f32 %v6840_v13, %v9560_v18  ;;  %v6931_v54 = vld [vmem:[#allocation5 + $0x70] sm:$0xff]  ;;  %v6952_v63 = vld [vmem:[#allocation5 + $0x78] sm:$0xff] }
  0x3d   :  { %10044 = vst [vmem:[#allocation14_spill] sm:$0xff] %v6857_v17  ;;  %10045 = vst [vmem:[#allocation15_spill] sm:$0xff] %v6863_v19  ;;  %v9544_v25 = vand.u32 4294901760, %v6857_v17  ;;  %v9543_v27 = vand.u32 4294901760, %v6863_v19  ;;  %v9542_v28 = vand.u32 4294901760, %v6868_v20  ;;  %v6890_v30 = vsub.f32 %v6842_v14, %v9559_v22  ;;  %v7050_v12 = vld [vmem:[#allocation5 + $0xa8] sm:$0xff] }
  0x3e   :  { %10046 = vst [vmem:[#allocation16_spill] sm:$0xff] %v6868_v20  ;;  %10047 = vst [vmem:[#allocation17_spill] sm:$0xff] %v6873_v21  ;;  %v9541_v29 = vand.u32 4294901760, %v6873_v21  ;;  %v746_v31 = vsub.f32 %v6847_v15, %v9548_v23  ;;  %v753_v32 = vsub.f32 %v6852_v16, %v9545_v24  ;;  %v9540_v34 = vand.u32 4294901760, %v6882_v26 }
  0x3f   :  { %10048 = vst [vmem:[#allocation18_spill] sm:$0xff] %v6882_v26  ;;  %10049 = vst [vmem:[#allocation19_spill] sm:$0xff] %v6890_v30  ;;  %v760_v33 = vsub.f32 %v6857_v17, %v9544_v25  ;;  %v767_v35 = vsub.f32 %v6863_v19, %v9543_v27  ;;  %v774_v36 = vsub.f32 %v6868_v20, %v9542_v28  ;;  %v9539_v38 = vand.u32 4294901760, %v6890_v30  ;;  %v6992_v27 = vld [vmem:[#allocation5 + $0x80] sm:$0xff] }
  0x40   :  { %v781_v37 = vsub.f32 %v6873_v21, %v9541_v29  ;;  %v747_v41 = vand.u32 4294901760, %v746_v31  ;;  %v754_v42 = vand.u32 4294901760, %v753_v32  ;;  %v788_v46 = vsub.f32 %v6882_v26, %v9540_v34  ;;  %10059 = vst [vmem:[#allocation29_spill] sm:$0xff] %v6992_v27  ;;  %10070 = vst [vmem:[#allocation40_spill] sm:$0xff] %v7050_v12 }
  0x41   :  { %v761_v43 = vand.u32 4294901760, %v760_v33  ;;  %v768_v45 = vand.u32 4294901760, %v767_v35  ;;  %v775_v50 = vand.u32 4294901760, %v774_v36  ;;  %v9558_v51 = vand.u32 4294901760, %v6912_v39 }
  0x42   :  { %v6925_v49 = vpack.c.bf16 %v754_v42, %v747_v41  ;;  %v9557_v52 = vand.u32 4294901760, %v6914_v40  ;;  %v782_v56 = vand.u32 4294901760, %v781_v37  ;;  %v795_v57 = vsub.f32 %v6890_v30, %v9539_v38 }
  0x43   :  { %v6933_v55 = vpack.c.bf16 %v768_v45, %v761_v43  ;;  %v9556_v58 = vand.u32 4294901760, %v6916_v44  ;;  %v6943_v59 = vsub.f32 %v6912_v39, %v9558_v51  ;;  %v9552_v61 = vand.u32 4294901760, %v6921_v47 }
  0x44   :  { %10050 = vst [vmem:[#allocation20_spill] sm:$0xff] %v6925_v49  ;;  %5662 = vmatpush1.bf16.msra.mxu0 %v6925_v49  ;;  %v6948_v60 = vsub.f32 %v6914_v40, %v9557_v52  ;;  %v9550_v62 = vand.u32 4294901760, %v6923_v48  ;;  %v789_v31 = vand.u32 4294901760, %v788_v46  ;;  %v9549_v33 = vand.u32 4294901760, %v6929_v53 }
  0x45   :  { %10051 = vst [vmem:[#allocation21_spill] sm:$0xff] %v6933_v55  ;;  %10052 = vst [vmem:[#allocation22_spill] sm:$0xff] %v6943_v59  ;;  %5663 = vmatprep.subr.bf16.mxu0 %v9577_v0  ;;  %v6958_v32 = vsub.f32 %v6916_v44, %v9556_v58  ;;  %v9551_v35 = vand.u32 4294901760, %v6931_v54  ;;  %v9546_v36 = vand.u32 4294901760, %v6943_v59  ;;  %v6967_v41 = vsub.f32 %v6921_v47, %v9552_v61  ;;  %v7020_v61 = vld [vmem:[#allocation5 + $0x98] sm:$0xff] }
  0x46   :  { %10053 = vst [vmem:[#allocation23_spill] sm:$0xff] %v6948_v60  ;;  %v9547_v37 = vand.u32 4294901760, %v6948_v60  ;;  %v6972_v42 = vsub.f32 %v6923_v48, %v9550_v62  ;;  %v796_v43 = vand.u32 4294901760, %v795_v57  ;;  %v6978_v46 = vsub.f32 %v6929_v53, %v9549_v33  ;;  %10065 = vst [vmem:[#allocation35_spill] sm:$0xff] %v7020_v61 }
  0x47   :  { %10054 = vst [vmem:[#allocation24_spill] sm:$0xff] %v6958_v32  ;;  %10055 = vst [vmem:[#allocation25_spill] sm:$0xff] %v6967_v41  ;;  %v9553_v45 = vand.u32 4294901760, %v6958_v32  ;;  %v9554_v38 = vand.u32 4294901760, %v6952_v63  ;;  %v6982_v34 = vpack.c.bf16 %v782_v56, %v775_v50  ;;  %v802_v29 = vsub.f32 %v6943_v59, %v9546_v36  ;;  %v7001_v56 = vld [vmem:[#allocation5 + $0x88] sm:$0xff] }
  0x48   :  { %10056 = vst [vmem:[#allocation26_spill] sm:$0xff] %v6972_v42  ;;  %10057 = vst [vmem:[#allocation27_spill] sm:$0xff] %v6978_v46  ;;  %5665 = vmatpush1.bf16.msra.mxu0 %v6933_v55  ;;  %v809_v57 = vsub.f32 %v6948_v60, %v9547_v37  ;;  %v9555_v28 = vand.u32 4294901760, %v6967_v41  ;;  %v9561_v25 = vand.u32 4294901760, %v6972_v42  ;;  %v9562_v24 = vand.u32 4294901760, %v6978_v46 }
  0x49   :  { %10058 = vst [vmem:[#allocation28_spill] sm:$0xff] %v6982_v34  ;;  %5666 = vmatprep.subr.bf16.mxu0 %v9577_v0  ;;  %v6999_v50 = vsub.f32 %v6931_v54, %v9551_v35  ;;  %10061 = vst [vmem:[#allocation31_spill] sm:$0xff] %v7001_v56  ;;  %v7003_v36 = vpack.c.bf16 %v796_v43, %v789_v31  ;;  %v816_v37 = vsub.f32 %v6958_v32, %v9553_v45  ;;  %v7018_v43 = vld [vmem:[#allocation5 + $0x90] sm:$0xff] }
  0x4a   :  { %v7011_v23 = vsub.f32 %v6952_v63, %v9554_v38  ;;  %v803_v33 = vand.u32 4294901760, %v802_v29  ;;  %v810_v62 = vand.u32 4294901760, %v809_v57  ;;  %v823_v35 = vsub.f32 %v6967_v41, %v9555_v28  ;;  %10064 = vst [vmem:[#allocation34_spill] sm:$0xff] %v7018_v43 }
  0x4b   :  { %10060 = vst [vmem:[#allocation30_spill] sm:$0xff] %v6999_v50  ;;  %10062 = vst [vmem:[#allocation32_spill] sm:$0xff] %v7003_v36  ;;  %v9565_v31 = vand.u32 4294901760, %v6992_v27  ;;  %v9566_v45 = vand.u32 4294901760, %v7001_v56  ;;  %v830_v38 = vsub.f32 %v6972_v42, %v9561_v25  ;;  %v837_v29 = vsub.f32 %v6978_v46, %v9562_v24  ;;  %v7047_v24 = vld [vmem:[#allocation5 + $0xa0] sm:$0xff] }
  0x4c   :  { %10063 = vst [vmem:[#allocation33_spill] sm:$0xff] %v7011_v23  ;;  %5668 = vmatpush1.bf16.msra.mxu0 %v6982_v34  ;;  %v9568_v57 = vand.u32 4294901760, %v6999_v50  ;;  %v817_v28 = vand.u32 4294901760, %v816_v37  ;;  %v9570_v58 = vand.u32 4294901760, %v7011_v23  ;;  %v9572_v52 = vand.u32 4294901760, %v7018_v43  ;;  %10069 = vst [vmem:[#allocation39_spill] sm:$0xff] %v7047_v24 }
  0x4d   :  { %5669 = vmatprep.subr.bf16.mxu0 %v9577_v0  ;;  %v9574_v51 = vand.u32 4294901760, %v7020_v61  ;;  %v7035_v22 = vpack.c.bf16 %v810_v62, %v803_v33  ;;  %v824_v18 = vand.u32 4294901760, %v823_v35  ;;  %v7040_v25 = vsub.f32 %v6992_v27, %v9565_v31  ;;  %v7055_v35 = vld [vmem:[#allocation5 + $0xb0] sm:$0xff]  ;;  %v7057_v31 = vld [vmem:[#allocation5 + $0xb8] sm:$0xff] }
  0x4e   :  { %v7045_v37 = vsub.f32 %v7001_v56, %v9566_v45  ;;  %v831_v11 = vand.u32 4294901760, %v830_v38  ;;  %v838_v62 = vand.u32 4294901760, %v837_v29  ;;  %v844_v33 = vsub.f32 %v6999_v50, %v9568_v57  ;;  %10071 = vst [vmem:[#allocation41_spill] sm:$0xff] %v7055_v35  ;;  %10072 = vst [vmem:[#allocation42_spill] sm:$0xff] %v7057_v31  ;;  %v7195_v27 = vld [vmem:[#allocation5 + $0xf0] sm:$0xff] }
  0x4f   :  { %10066 = vst [vmem:[#allocation36_spill] sm:$0xff] %v7035_v22  ;;  %10067 = vst [vmem:[#allocation37_spill] sm:$0xff] %v7040_v25  ;;  %v851_v45 = vsub.f32 %v7011_v23, %v9570_v58  ;;  %v7065_v10 = vsub.f32 %v7018_v43, %v9572_v52  ;;  %v7070_v38 = vsub.f32 %v7020_v61, %v9574_v51  ;;  %v9579_v7 = vand.u32 4294901760, %v7040_v25  ;;  %v7089_v58 = vld [vmem:[#allocation5 + $0xc0] sm:$0xff] }
  0x50   :  { %5671 = vmatpush1.bf16.msra.mxu0 %v7003_v36  ;;  %10068 = vst [vmem:[#allocation38_spill] sm:$0xff] %v7045_v37  ;;  %v7074_v57 = vpack.c.bf16 %v824_v18, %v817_v28  ;;  %v9581_v5 = vand.u32 4294901760, %v7050_v12  ;;  %v9584_v52 = vand.u32 4294901760, %v7055_v35  ;;  %v9587_v4 = vand.u32 4294901760, %v7057_v31  ;;  %10078 = vst [vmem:[#allocation47_spill] sm:$0xff] %v7089_v58 }
  0x51   :  { %5672 = vmatprep.subr.bf16.mxu0 %v9577_v0  ;;  %10073 = vst [vmem:[#allocation43_spill] sm:$0xff] %v7065_v10  ;;  %10074 = vst [vmem:[#allocation44_spill] sm:$0xff] %v7070_v38  ;;  %v845_v51 = vand.u32 4294901760, %v844_v33  ;;  %v852_v36 = vand.u32 4294901760, %v851_v45  ;;  %v10076_v18 = vand.u32 4294901760, %v7047_v24  ;;  %v858_v33 = vsub.f32 %v7040_v25, %v9579_v7  ;;  %v7116_v7 = vld [vmem:[#allocation5 + $0xc8] sm:$0xff] }
  0x52   :  { %10075 = vst [vmem:[#allocation45_spill] sm:$0xff] %v7074_v57  ;;  %v10080_v45 = vand.u32 4294901760, %v7045_v37  ;;  %10085 = vst [vmem:[#allocation52_spill] sm:$0xff] %v7116_v7  ;;  %v10088_v55 = vand.u32 4294901760, %v7070_v38  ;;  %v10092_v49 = vand.u32 4294901760, %v7089_v58 }
  0x53   :  { %v7087_v28 = vsub.f32 %v7047_v24, %v10076_v18  ;;  %v10082_v18 = vmov 0.0|0.0   ;;  %10109 = vst [vmem:[#allocation66_spill] sm:$0xff] %v7195_v27 }
  0x54   :  { %5674 = vmatpush1.bf16.msra.mxu0 %v7035_v22  ;;  %v865_v29 = vsub.f32 %v7045_v37, %v10080_v45  ;;  %v7103_v22 = vsub.f32 %v7050_v12, %v9581_v5  ;;  %v10087_v5 = vand.u32 4294901760, %v7065_v10  ;;  %v7138_v12 = vld [vmem:[#allocation2 + $0x8] sm:$0xff] }
  0x55   :  { %5675 = vmatprep.subr.bf16.mxu0 %v9577_v0  ;;  %10077 = vst [vmem:[#allocation46_spill] sm:$0xff] %v7087_v28  ;;  %v7092_v0 = vpack.c.bf16 %v838_v62, %v831_v11  ;;  %v7109_v11 = vsub.f32 %v7055_v35, %v9584_v52  ;;  %v7114_v62 = vsub.f32 %v7057_v31, %v9587_v4  ;;  %v7128_v35 = vld [vmem:[#allocation5 + $0xd0] sm:$0xff]  ;;  %v859_v4 = vand.u32 4294901760, %v858_v33 }
  0x56   :  { %10081 = vst [vmem:[#allocation49_spill] sm:$0xff] %v7103_v22  ;;  %v872_v34 = vsub.f32 %v7065_v10, %v10087_v5  ;;  %v879_v52 = vsub.f32 %v7070_v38, %v10088_v55  ;;  %10089 = vst [vmem:[#allocation54_spill] sm:$0xff] %v7128_v35  ;;  %v866_v31 = vand.u32 4294901760, %v865_v29  ;;  %v7150_v5 = vld [vmem:[#allocation5 + $0xe0] sm:$0xff]  ;;  %v10097_v43 = vand.u32 4294901760, %v7103_v22 }
  0x57   :  { %10079 = vst [vmem:[#allocation48_spill] sm:$0xff] %v7092_v0  ;;  %10083 = vst [vmem:[#allocation50_spill] sm:$0xff] %v7109_v11  ;;  %v10098_v29 = vand.u32 4294901760, %v7116_v7  ;;  %v10102_v61 = vand.u32 4294901760, %v7109_v11 }
  0x58   :  { %5677 = vmatpush1.bf16.msra.mxu0 %v7074_v57  ;;  %10084 = vst [vmem:[#allocation51_spill] sm:$0xff] %v7114_v62  ;;  %v7119_v57 = vpack.c.bf16 %v852_v36, %v845_v51  ;;  %v7133_v36 = vld [vmem:[#allocation5 + $0xd8] sm:$0xff]  ;;  %10091 = vst [vmem:[#allocation56_spill] sm:$0xff] %v7138_v12  ;;  %v873_v33 = vand.u32 4294901760, %v872_v34  ;;  %v880_v45 = vand.u32 4294901760, %v879_v52  ;;  %v10094_v51 = vand.u32 4294901760, %v7087_v28 }
  0x59   :  { %5678 = vmatprep.subr.bf16.mxu0 %v10082_v18  ;;  %10090 = vst [vmem:[#allocation55_spill] sm:$0xff] %v7133_v36  ;;  %10095 = vst [vmem:[#allocation58_spill] sm:$0xff] %v7150_v5  ;;  %v7153_v55 = vpack.c.bf16 %v866_v31, %v859_v4  ;;  %v7161_v34 = vsub.f32 %v7116_v7, %v10098_v29  ;;  %v7163_v52 = vld [vmem:[#allocation5 + $0xe8] sm:$0xff]  ;;  %v900_v4 = vsub.f32 %v7109_v11, %v10102_v61 }
  0x5a   :  { %10086 = vst [vmem:[#allocation53_spill] sm:$0xff] %v7119_v57  ;;  %v886_v24 = vsub.f32 %v7087_v28, %v10094_v51  ;;  %10100 = vst [vmem:[#allocation61_spill] sm:$0xff] %v7163_v52  ;;  %v7166_v51 = vand.u32 4294901760, %v7138_v12  ;;  %v10103_v31 = vand.u32 4294901760, %v7114_v62  ;;  %v10104_v29 = vand.u32 4294901760, %v7128_v35 }
  0x5b   :  { %10096 = vst [vmem:[#allocation59_spill] sm:$0xff] %v7153_v55  ;;  %10099 = vst [vmem:[#allocation60_spill] sm:$0xff] %v7161_v34  ;;  %v10113_v12 = vand.u32 4294901760, %v7163_v52 }
  0x5c   :  { %5680 = vmatpush1.bf16.msra.mxu0 %v7092_v0  ;;  %v7143_v0 = vsub.f32 %v7089_v58, %v10092_v49  ;;  %v893_v49 = vsub.f32 %v7103_v22, %v10097_v43  ;;  %10101 = vst [vmem:[#allocation62_spill] sm:$0xff] %v7166_v51  ;;  %v907_v43 = vsub.f32 %v7114_v62, %v10103_v31  ;;  %v10106_v58 = vand.u32 4294901760, %v7133_v36 }
  0x5d   :  { %5681 = vmatprep.subr.bf16.mxu0 %v10082_v18  ;;  %v7179_v7 = vsub.f32 %v7128_v35, %v10104_v29  ;;  %967 = vmatprep.mubr.f32.mxu0 %v7166_v51  ;;  %v887_v29 = vand.u32 4294901760, %v886_v24  ;;  %v901_v51 = vand.u32 4294901760, %v900_v4  ;;  %v7217_v61 = vsub.f32 %v7163_v52, %v10113_v12 }
  0x5e   :  { %10093 = vst [vmem:[#allocation57_spill] sm:$0xff] %v7143_v0  ;;  %v7186_v56 = vsub.f32 %v7133_v36, %v10106_v58  ;;  %v894_v35 = vand.u32 4294901760, %v893_v49  ;;  %v908_v58 = vand.u32 4294901760, %v907_v43  ;;  %v7198_v36 = vld [vmem:[#allocation5 + $0xf8] sm:$0xff]  ;;  %v10111_v31 = vand.u32 4294901760, %v7143_v0 }
  0x5f   :  { %10105 = vst [vmem:[#allocation63_spill] sm:$0xff] %v7179_v7  ;;  %10110 = vst [vmem:[#allocation67_spill] sm:$0xff] %v7198_v36  ;;  %v10120_v43 = vand.u32 4294901760, %v7198_v36 }
  0x60   :  { %5683 = vmatpush1.bf16.msra.mxu0 %v7119_v57  ;;  %10107 = vst [vmem:[#allocation64_spill] sm:$0xff] %v7186_v56  ;;  %v7192_v57 = vpack.c.bf16 %v880_v45, %v873_v33  ;;  %v914_v45 = vsub.f32 %v7143_v0, %v10111_v31  ;;  %v10112_v33 = vand.u32 4294901760, %v7150_v5  ;;  %v7223_v24 = vpack.c.bf16 %v894_v35, %v887_v29 }
  0x61   :  { %5684 = vmatprep.subr.bf16.mxu0 %v10082_v18  ;;  %v7232_v12 = vpack.c.bf16 %v908_v58, %v901_v51  ;;  %v10119_v31 = vand.u32 4294901760, %v7195_v27  ;;  %v10125_v58 = vand.u32 4294901760, %v6824_v2  ;;  %v10128_v2 = vand.u32 4294901760, %v6826_v3 }
  0x62   :  { %10108 = vst [vmem:[#allocation65_spill] sm:$0xff] %v7192_v57  ;;  %v7209_v49 = vsub.f32 %v7150_v5, %v10112_v33  ;;  %10114 = vst [vmem:[#allocation68_spill] sm:$0xff] %v7223_v24  ;;  %v10115_v33 = vand.u32 4294901760, %v7161_v34  ;;  %v915_v29 = vand.u32 4294901760, %v914_v45  ;;  %v7259_v5 = vsub.f32 %v7198_v36, %v10120_v43 }
  0x63   :  { %10116 = vst [vmem:[#allocation69_spill] sm:$0xff] %v7232_v12  ;;  %v7251_v35 = vsub.f32 %v7195_v27, %v10119_v31  ;;  %v10122_v27 = vand.u32 4294901760, %v7217_v61  ;;  %v10133_v3 = vand.u32 4294901760, %v6835_v9  ;;  %v10137_v9 = vand.u32 4294901760, %v6842_v14 }
  0x64   :  { %5686 = vmatpush1.bf16.msra.mxu0 %v7153_v55  ;;  %v921_v4 = vsub.f32 %v7161_v34, %v10115_v33  ;;  %v10117_v55 = vand.u32 4294901760, %v7179_v7  ;;  %v9611_v31 = vand.u32 4294901760, %v7259_v5  ;;  %v10141_v14 = vand.u32 4294901760, %v6912_v39  ;;  %v7372_v39 = vld [vmem:[#allocation2 + $0x20] sm:$0xff] }
  0x65   :  { %5687 = vmatprep.subr.bf16.mxu0 %v10082_v18 }
  0x66   :  { %v928_v33 = vsub.f32 %v7179_v7, %v10117_v55  ;;  %v922_v55 = vand.u32 4294901760, %v921_v4 }
  0x68   :  { %5689 = vmatpush1.bf16.msra.mxu0 %v7192_v57  ;;  %v10118_v57 = vand.u32 4294901760, %v7186_v56  ;;  %v929_v45 = vand.u32 4294901760, %v928_v33  ;;  %v7281_v33 = vpack.c.bf16 %v922_v55, %v915_v29 }
  0x69   :  { %5690 = vmatprep.subr.bf16.mxu0 %v10082_v18 }
  0x6a   :  { %v935_v51 = vsub.f32 %v7186_v56, %v10118_v57  ;;  %v949_v57 = vsub.f32 %v7217_v61, %v10122_v27  ;;  %10123 = vst [vmem:[#allocation70_spill] sm:$0xff] %v7281_v33  ;;  %v10124_v27 = vand.u32 4294901760, %v6822_v1  ;;  %v963_v1 = vsub.f32 %v7259_v5, %v9611_v31 }
  0x6c   :  { %5692 = vmatpush1.bf16.msra.mxu0 %v7223_v24  ;;  %v10121_v24 = vand.u32 4294901760, %v7209_v49  ;;  %v936_v36 = vand.u32 4294901760, %v935_v51  ;;  %v7292_v43 = vpack.c.bf16 %v10125_v58, %v10124_v27  ;;  %v950_v55 = vand.u32 4294901760, %v949_v57 }
  0x6d   :  { %5693 = vmatprep.subr.bf16.mxu0 %v10082_v18  ;;  %v10129_v58 = vand.u32 4294901760, %v6830_v6  ;;  %v964_v57 = vand.u32 4294901760, %v963_v1  ;;  %v10132_v27 = vand.u32 4294901760, %v6833_v8  ;;  %v10136_v8 = vand.u32 4294901760, %v6840_v13  ;;  %v7352_v13 = vld [vmem:[#allocation2 + $0x28] sm:$0xff] }
  0x6e   :  { %v942_v4 = vsub.f32 %v7209_v49, %v10121_v24  ;;  %v9612_v24 = vand.u32 4294901760, %v7251_v35  ;;  %10126 = vst [vmem:[#allocation71_spill] sm:$0xff] %v7292_v43  ;;  %5614 = vmatpush1.bf16.msra.mxu1 %v7292_v43  ;;  %v7296_v29 = vpack.c.bf16 %v936_v36, %v929_v45 }
  0x6f   :  { %5615 = vmatprep.subr.bf16.mxu1 %v10082_v18  ;;  %v7321_v31 = vpack.c.bf16 %v10133_v3, %v10132_v27  ;;  %v10145_v3 = vpack.c.bf16 %v6852_v16, %v6847_v15  ;;  %v10176_v15 = vld [vmem:[#allocation35_spill] sm:$0xff] }
  0x70   :  { %5695 = vmatpush1.bf16.msra.mxu0 %v7232_v12  ;;  %v943_v52 = vand.u32 4294901760, %v942_v4  ;;  %10127 = vst [vmem:[#allocation72_spill] sm:$0xff] %v7296_v29  ;;  %v956_v51 = vsub.f32 %v7251_v35, %v9612_v24  ;;  %v7309_v4 = vpack.c.bf16 %v10129_v58, %v10128_v2  ;;  %v7348_v58 = vld [vmem:[#allocation2 + $0x10] sm:$0xff]  ;;  %v10151_v24 = vpack.c.bf16 %v6863_v19, %v6857_v17  ;;  %v10167_v19 = vld [vmem:[#allocation31_spill] sm:$0xff] }
  0x71   :  { %5696 = vmatprep.subr.bf16.mxu0 %v10082_v18  ;;  %10134 = vst [vmem:[#allocation75_spill] sm:$0xff] %v7321_v31  ;;  %v7362_v27 = vand.u32 4294901760, %v7348_v58  ;;  %v10168_v17 = vand.u32 4294901760, %v10167_v19  ;;  %v7471_v19 = vld [vmem:[#allocation2 + $0x78] sm:$0xff] }
  0x72   :  { %10130 = vst [vmem:[#allocation73_spill] sm:$0xff] %v7309_v4  ;;  %5617 = vmatpush1.bf16.msra.mxu1 %v7309_v4  ;;  %v7314_v36 = vpack.c.bf16 %v950_v55, %v943_v52  ;;  %v957_v45 = vand.u32 4294901760, %v956_v51  ;;  %v7328_v52 = vld [vmem:[#allocation2] sm:$0xff]  ;;  %v7332_v51 = vld [vmem:[#allocation2 + $0x18] sm:$0xff]  ;;  %v7338_v55 = vpack.c.bf16 %v10137_v9, %v10136_v8  ;;  %v7370_v8 = vand.u32 4294901760, %v7352_v13  ;;  %10173 = vst [vmem:[#allocation93_spill] sm:$0xff] %v7471_v19 }
  0x73   :  { %5618 = vmatprep.subr.bf16.mxu1 %v10082_v18  ;;  %v7341_v1 = vand.u32 4294901760, %v7328_v52  ;;  %v7346_v2 = vand.u32 4294901760, %v7332_v51  ;;  %10144 = vst [vmem:[#allocation81_spill] sm:$0xff] %v7362_v27  ;;  %v10147_v9 = vand.u32 4294901760, %v6916_v44 }
  0x74   :  { %5698 = vmatpush1.bf16.msra.mxu0 %v7281_v33  ;;  %10131 = vst [vmem:[#allocation74_spill] sm:$0xff] %v7314_v36  ;;  %v7326_v6 = vpack.c.bf16 %v964_v57, %v957_v45  ;;  %10138 = vst [vmem:[#allocation77_spill] sm:$0xff] %v7338_v55  ;;  %v10142_v45 = vand.u32 4294901760, %v6914_v40  ;;  %v7375_v40 = vld [vmem:[#allocation2 + $0x38] sm:$0xff]  ;;  %v10160_v33 = vand.u32 4294901760, %v6952_v63  ;;  %v7444_v63 = vld [vmem:[#allocation2 + $0x50] sm:$0xff] }
  0x75   :  { %5699 = vmatprep.subr.bf16.mxu0 %v10082_v18  ;;  %10139 = vst [vmem:[#allocation78_spill] sm:$0xff] %v7341_v1  ;;  %10140 = vst [vmem:[#allocation79_spill] sm:$0xff] %v7346_v2  ;;  %v7394_v44 = vand.u32 4294901760, %v7375_v40 }
  0x76   :  { %5620 = vmatpush1.bf16.msra.mxu1 %v7321_v31  ;;  %10135 = vst [vmem:[#allocation76_spill] sm:$0xff] %v7326_v6  ;;  %v7358_v57 = vpack.c.bf16 %v10142_v45, %v10141_v14  ;;  %10146 = vst [vmem:[#allocation82_spill] sm:$0xff] %v7370_v8  ;;  %v10148_v14 = vand.u32 4294901760, %v6921_v47  ;;  %v7396_v47 = vld [vmem:[#allocation2 + $0x30] sm:$0xff] }
  0x77   :  { %5621 = vmatprep.subr.bf16.mxu1 %v10082_v18  ;;  %10152 = vst [vmem:[#allocation85_spill] sm:$0xff] %v7394_v44 }
  0x78   :  { %5701 = vmatpush1.bf16.msra.mxu0 %v7296_v29  ;;  %10143 = vst [vmem:[#allocation80_spill] sm:$0xff] %v7358_v57  ;;  %v7381_v45 = vpack.c.bf16 %v10148_v14, %v10147_v9  ;;  %v7399_v9 = vld [vmem:[#allocation2 + $0x48] sm:$0xff]  ;;  %v10153_v14 = vand.u32 4294901760, %v6923_v48  ;;  %v10157_v29 = vpack.c.bf16 %v6873_v21, %v6868_v20  ;;  %v10163_v21 = vpack.c.bf16 %v6890_v30, %v6882_v26 }
  0x79   :  { %5702 = vmatprep.subr.bf16.mxu0 %v10082_v18  ;;  %v7418_v48 = vand.u32 4294901760, %v7399_v9  ;;  %v10171_v30 = vpack.c.bf16 %v6948_v60, %v6943_v59  ;;  %v10180_v60 = vpack.c.bf16 %v6967_v41, %v6958_v32  ;;  %v10190_v41 = vpack.c.bf16 %v6978_v46, %v6972_v42 }
  0x7a   :  { %5623 = vmatpush1.bf16.msra.mxu1 %v7338_v55  ;;  %10149 = vst [vmem:[#allocation83_spill] sm:$0xff] %v7381_v45  ;;  %v10200_v46 = vpack.c.bf16 %v7011_v23, %v6999_v50  ;;  %v10205_v23 = vld [vmem:[#allocation47_spill] sm:$0xff]  ;;  %v10207_v50 = vld [vmem:[#allocation52_spill] sm:$0xff] }
  0x7b   :  { %5624 = vmatprep.subr.bf16.mxu1 %v10082_v18  ;;  %10158 = vst [vmem:[#allocation88_spill] sm:$0xff] %v7418_v48  ;;  %v10208_v42 = vand.u32 4294901760, %v10207_v50 }
  0x7c   :  { %5704 = vmatpush1.bf16.msra.mxu0 %v7314_v36 }
  0x7d   :  { %5705 = vmatprep.subr.bf16.mxu0 %v10082_v18 }
  0x7e   :  { %5626 = vmatpush1.bf16.msra.mxu1 %v7358_v57 }
  0x7f   :  { %5627 = vmatprep.subr.bf16.mxu1 %v10082_v18 }
  0x80   :  { %5707 = vmatpush1.bf16.msra.mxu0 %v7326_v6  ;;  %v10154_v6 = vand.u32 4294901760, %v6929_v53  ;;  %v7420_v53 = vld [vmem:[#allocation2 + $0x40] sm:$0xff] }
  0x81   :  { %5708 = vmatprep.subr.bf16.mxu0 %v10082_v18 }
  0x82   :  { %5629 = vmatpush1.bf16.msra.mxu1 %v7381_v45  ;;  %v7405_v36 = vpack.c.bf16 %v10154_v6, %v10153_v14  ;;  %v7423_v6 = vld [vmem:[#allocation2 + $0x58] sm:$0xff]  ;;  %v10159_v14 = vand.u32 4294901760, %v6931_v54 }
  0x83   :  { %969 = vmatmul.mubr.f32.vlgmr.msra.gmra.mrb[0].mxu0 %v7341_v1  ;;  %5630 = vmatprep.subr.bf16.mxu1 %v10082_v18  ;;  %v7442_v54 = vand.u32 4294901760, %v7423_v6 }
  0x84   :  { %5710 = vmatpush1.bf16.msra.mxu0 %v10145_v3  ;;  %974 = vmatprep.mubr.f32.mxu0 %v7346_v2  ;;  %v7386_v3 = vand.u32 4294901760, %v7372_v39  ;;  %10155 = vst [vmem:[#allocation86_spill] sm:$0xff] %v7405_v36  ;;  %v7429_v12 = vpack.c.bf16 %v10160_v33, %v10159_v14  ;;  %v7447_v33 = vld [vmem:[#allocation2 + $0x68] sm:$0xff] }
  0x85   :  { %5711 = vmatprep.subr.bf16.mxu0 %v10082_v18  ;;  %10164 = vst [vmem:[#allocation91_spill] sm:$0xff] %v7442_v54  ;;  %v10165_v14 = vld [vmem:[#allocation29_spill] sm:$0xff] }
  0x86   :  { %10150 = vst [vmem:[#allocation84_spill] sm:$0xff] %v7386_v3  ;;  %5632 = vmatpush1.bf16.msra.mxu1 %v7405_v36  ;;  %10161 = vst [vmem:[#allocation89_spill] sm:$0xff] %v7429_v12  ;;  %v10166_v20 = vand.u32 4294901760, %v10165_v14  ;;  %v7466_v14 = vand.u32 4294901760, %v7447_v33  ;;  %v10186_v36 = vld [vmem:[#allocation40_spill] sm:$0xff] }
  0x87   :  { %976 = vmatmul.mubr.f32.gmra.mrb[2].mxu0 %v7362_v27  ;;  %5633 = vmatprep.subr.bf16.mxu1 %v10082_v18  ;;  %v10187_v45 = vand.u32 4294901760, %v10186_v36  ;;  %v7519_v36 = vld [vmem:[#allocation2 + $0x98] sm:$0xff] }
  0x88   :  { %5713 = vmatpush1.bf16.msra.mxu0 %v10151_v24  ;;  %981 = vmatprep.mubr.f32.mxu0 %v7370_v8  ;;  %v7410_v24 = vand.u32 4294901760, %v7396_v47  ;;  %v7453_v16 = vpack.c.bf16 %v10168_v17, %v10166_v20  ;;  %10172 = vst [vmem:[#allocation92_spill] sm:$0xff] %v7466_v14  ;;  %v7468_v17 = vld [vmem:[#allocation2 + $0x60] sm:$0xff]  ;;  %v10174_v20 = vld [vmem:[#allocation34_spill] sm:$0xff]  ;;  %10193 = vst [vmem:[#allocation99_spill] sm:$0xff] %v7519_v36 }
  0x89   :  { %5714 = vmatprep.subr.bf16.mxu0 %v10082_v18  ;;  %v10175_v26 = vand.u32 4294901760, %v10174_v20  ;;  %v7490_v20 = vand.u32 4294901760, %v7471_v19 }
  0x8a   :  { %10156 = vst [vmem:[#allocation87_spill] sm:$0xff] %v7410_v24  ;;  %5635 = vmatpush1.bf16.msra.mxu1 %v7429_v12  ;;  %10169 = vst [vmem:[#allocation29_spill] sm:$0xff] %v7453_v16  ;;  %v10177_v12 = vand.u32 4294901760, %v10176_v15  ;;  %v7492_v15 = vld [vmem:[#allocation2 + $0x70] sm:$0xff] }
  0x8b   :  { %983 = vmatmul.mubr.f32.gmra.mrb[4].mxu0 %v7386_v3  ;;  %5636 = vmatprep.subr.bf16.mxu1 %v10082_v18  ;;  %10181 = vst [vmem:[#allocation94_spill] sm:$0xff] %v7490_v20  ;;  %10182 = vst [vmem:[#allocation95_spill] sm:$0xff] %v7492_v15 }
  0x8c   :  { %5716 = vmatpush1.bf16.msra.mxu0 %v10157_v29  ;;  %988 = vmatprep.mubr.f32.mxu0 %v7394_v44  ;;  %v7434_v29 = vand.u32 4294901760, %v7420_v53 }
  0x8d   :  { %5717 = vmatprep.subr.bf16.mxu0 %v10082_v18 }
  0x8e   :  { %10162 = vst [vmem:[#allocation90_spill] sm:$0xff] %v7434_v29  ;;  %5638 = vmatpush1.bf16.msra.mxu1 %v7453_v16  ;;  %v7477_v16 = vpack.c.bf16 %v10177_v12, %v10175_v26  ;;  %v7495_v26 = vld [vmem:[#allocation2 + $0x88] sm:$0xff]  ;;  %v10184_v12 = vld [vmem:[#allocation39_spill] sm:$0xff] }
  0x8f   :  { %990 = vmatmul.mubr.f32.gmra.mrb[6].mxu0 %v7410_v24  ;;  %5639 = vmatprep.subr.bf16.mxu1 %v10082_v18  ;;  %10183 = vst [vmem:[#allocation96_spill] sm:$0xff] %v7495_v26  ;;  %v10185_v59 = vand.u32 4294901760, %v10184_v12  ;;  %v7514_v12 = vand.u32 4294901760, %v7495_v26  ;;  %v7563_v26 = vld [vmem:[#allocation2 + $0xa0] sm:$0xff] }
  0x90   :  { %5719 = vmatpush1.bf16.msra.mxu0 %v10163_v21  ;;  %995 = vmatprep.mubr.f32.mxu0 %v7418_v48  ;;  %v7458_v21 = vand.u32 4294901760, %v7444_v63  ;;  %10178 = vst [vmem:[#allocation34_spill] sm:$0xff] %v7477_v16  ;;  %10212 = vst [vmem:[#allocation104_spill] sm:$0xff] %v7563_v26 }
  0x91   :  { %5720 = vmatprep.subr.bf16.mxu0 %v10082_v18  ;;  %10191 = vst [vmem:[#allocation97_spill] sm:$0xff] %v7514_v12 }
  0x92   :  { %10170 = vst [vmem:[#allocation31_spill] sm:$0xff] %v7458_v21  ;;  %5641 = vmatpush1.bf16.msra.mxu1 %v7477_v16  ;;  %v7501_v16 = vpack.c.bf16 %v10187_v45, %v10185_v59  ;;  %v7516_v59 = vld [vmem:[#allocation2 + $0x80] sm:$0xff]  ;;  %v10194_v45 = vld [vmem:[#allocation41_spill] sm:$0xff] }
  0x93   :  { %997 = vmatmul.mubr.f32.gmra.mrb[8].mxu0 %v7434_v29  ;;  %5642 = vmatprep.subr.bf16.mxu1 %v10082_v18  ;;  %10192 = vst [vmem:[#allocation98_spill] sm:$0xff] %v7516_v59  ;;  %v10195_v32 = vand.u32 4294901760, %v10194_v45  ;;  %v7538_v45 = vand.u32 4294901760, %v7519_v36  ;;  %v10210_v36 = vpack.c.bf16 %v7045_v37, %v7040_v25  ;;  %v10220_v25 = vld [vmem:[#allocation54_spill] sm:$0xff] }
  0x94   :  { %5722 = vmatpush1.bf16.msra.mxu0 %v10171_v30  ;;  %1002 = vmatprep.mubr.f32.mxu0 %v7442_v54  ;;  %v7482_v30 = vand.u32 4294901760, %v7468_v17  ;;  %10188 = vst [vmem:[#allocation39_spill] sm:$0xff] %v7501_v16 }
  0x95   :  { %5723 = vmatprep.subr.bf16.mxu0 %v10082_v18  ;;  %10201 = vst [vmem:[#allocation100_spill] sm:$0xff] %v7538_v45 }
  0x96   :  { %10179 = vst [vmem:[#allocation35_spill] sm:$0xff] %v7482_v30  ;;  %5644 = vmatpush1.bf16.msra.mxu1 %v7501_v16 }
  0x97   :  { %1004 = vmatmul.mubr.f32.gmra.mrb[10].mxu0 %v7458_v21  ;;  %5645 = vmatprep.subr.bf16.mxu1 %v10082_v18 }
  0x98   :  { %5725 = vmatpush1.bf16.msra.mxu0 %v10180_v60  ;;  %1009 = vmatprep.mubr.f32.mxu0 %v7466_v14  ;;  %v7506_v60 = vand.u32 4294901760, %v7492_v15  ;;  %v10196_v15 = vld [vmem:[#allocation42_spill] sm:$0xff] }
  0x99   :  { %5726 = vmatprep.subr.bf16.mxu0 %v10082_v18  ;;  %v10197_v19 = vand.u32 4294901760, %v10196_v15 }
  0x9a   :  { %10189 = vst [vmem:[#allocation40_spill] sm:$0xff] %v7506_v60 }
  0x9b   :  { %1011 = vmatmul.mubr.f32.gmra.mrb[12].mxu0 %v7482_v30  ;;  %v7525_v16 = vpack.c.bf16 %v10197_v19, %v10195_v32  ;;  %v7540_v32 = vld [vmem:[#allocation2 + $0x90] sm:$0xff]  ;;  %v7543_v19 = vld [vmem:[#allocation2 + $0xa8] sm:$0xff] }
  0x9c   :  { %5728 = vmatpush1.bf16.msra.mxu0 %v10190_v41  ;;  %1016 = vmatprep.mubr.f32.mxu0 %v7490_v20  ;;  %v7530_v41 = vand.u32 4294901760, %v7516_v59  ;;  %10202 = vst [vmem:[#allocation101_spill] sm:$0xff] %v7540_v32  ;;  %10203 = vst [vmem:[#allocation102_spill] sm:$0xff] %v7543_v19  ;;  %v7548_v15 = vand.u32 4294901760, %v7540_v32  ;;  %v7561_v59 = vand.u32 4294901760, %v7543_v19  ;;  %v7566_v32 = vld [vmem:[#allocation2 + $0xb8] sm:$0xff] }
  0x9d   :  { %5729 = vmatprep.subr.bf16.mxu0 %v10082_v18  ;;  %10198 = vst [vmem:[#allocation41_spill] sm:$0xff] %v7525_v16  ;;  %5647 = vmatpush1.bf16.msra.mxu1 %v7525_v16  ;;  %10213 = vst [vmem:[#allocation105_spill] sm:$0xff] %v7566_v32  ;;  %v7579_v50 = vand.u32 4294901760, %v7566_v32  ;;  %v10225_v32 = vpack.c.bf16 %v7103_v22, %v7087_v28  ;;  %v7603_v19 = vld [vmem:[#allocation2 + $0xc0] sm:$0xff]  ;;  %v10235_v28 = vld [vmem:[#allocation58_spill] sm:$0xff] }
  0x9e   :  { %10199 = vst [vmem:[#allocation42_spill] sm:$0xff] %v7530_v41  ;;  %5648 = vmatprep.subr.bf16.mxu1 %v10082_v18  ;;  %10204 = vst [vmem:[#allocation103_spill] sm:$0xff] %v7548_v15 }
  0x9f   :  { %1018 = vmatmul.mubr.f32.gmra.mrb[14].mxu0 %v7506_v60  ;;  %10211 = vst [vmem:[#allocation52_spill] sm:$0xff] %v7561_v59  ;;  %10216 = vst [vmem:[#allocation107_spill] sm:$0xff] %v7579_v50 }
  0xa0   :  { %5731 = vmatpush1.bf16.msra.mxu0 %v10200_v46  ;;  %1023 = vmatprep.mubr.f32.mxu0 %v7514_v12  ;;  %v10206_v46 = vand.u32 4294901760, %v10205_v23  ;;  %v7572_v23 = vand.u32 4294901760, %v7563_v26  ;;  %10227 = vst [vmem:[#allocation111_spill] sm:$0xff] %v7603_v19 }
  0xa1   :  { %5732 = vmatprep.subr.bf16.mxu0 %v10082_v18 }
  0xa2   :  { %v7554_v16 = vpack.c.bf16 %v10208_v42, %v10206_v46  ;;  %10214 = vst [vmem:[#allocation106_spill] sm:$0xff] %v7572_v23  ;;  %v10215_v42 = vpack.c.bf16 %v7070_v38, %v7065_v10  ;;  %v7584_v46 = vld [vmem:[#allocation2 + $0xc8] sm:$0xff]  ;;  %v10222_v38 = vld [vmem:[#allocation55_spill] sm:$0xff] }
  0xa3   :  { %1025 = vmatmul.mubr.f32.gmra.mrb[16].mxu0 %v7530_v41  ;;  %10218 = vst [vmem:[#allocation109_spill] sm:$0xff] %v7584_v46  ;;  %v7601_v26 = vand.u32 4294901760, %v7584_v46  ;;  %v7643_v46 = vld [vmem:[#allocation2 + $0xe0] sm:$0xff] }
  0xa4   :  { %10209 = vst [vmem:[#allocation47_spill] sm:$0xff] %v7554_v16  ;;  %5734 = vmatpush1.bf16.msra.mxu0 %v10210_v36  ;;  %1030 = vmatprep.mubr.f32.mxu0 %v7538_v45  ;;  %v7581_v36 = vld [vmem:[#allocation2 + $0xb0] sm:$0xff]  ;;  %10242 = vst [vmem:[#allocation118_spill] sm:$0xff] %v7643_v46 }
  0xa5   :  { %5735 = vmatprep.subr.bf16.mxu0 %v10082_v18  ;;  %5650 = vmatpush1.bf16.msra.mxu1 %v7554_v16  ;;  %10217 = vst [vmem:[#allocation108_spill] sm:$0xff] %v7581_v36  ;;  %v7588_v37 = vand.u32 4294901760, %v7581_v36  ;;  %v10221_v16 = vand.u32 4294901760, %v10220_v25  ;;  %10226 = vst [vmem:[#allocation55_spill] sm:$0xff] %v7601_v26  ;;  %v7606_v36 = vld [vmem:[#allocation2 + $0xd8] sm:$0xff]  ;;  %v10230_v25 = vpack.c.bf16 %v7114_v62, %v7109_v11  ;;  %v10237_v62 = vld [vmem:[#allocation61_spill] sm:$0xff] }
  0xa6   :  { %5651 = vmatprep.subr.bf16.mxu1 %v10082_v18  ;;  %10228 = vst [vmem:[#allocation112_spill] sm:$0xff] %v7606_v36 }
  0xa7   :  { %1032 = vmatmul.mubr.f32.gmra.mrb[18].mxu0 %v7548_v15  ;;  %10219 = vst [vmem:[#allocation110_spill] sm:$0xff] %v7588_v37 }
  0xa8   :  { %5737 = vmatpush1.bf16.msra.mxu0 %v10215_v42  ;;  %1037 = vmatprep.mubr.f32.mxu0 %v7561_v59  ;;  %v10223_v42 = vand.u32 4294901760, %v10222_v38  ;;  %v7619_v38 = vand.u32 4294901760, %v7606_v36  ;;  %v10240_v36 = vpack.c.bf16 %v7161_v34, %v7143_v0  ;;  %v10248_v34 = vld [vmem:[#allocation66_spill] sm:$0xff] }
  0xa9   :  { %5738 = vmatprep.subr.bf16.mxu0 %v10082_v18  ;;  %v10249_v0 = vand.u32 4294901760, %v10248_v34  ;;  %v7696_v34 = vsub.f32 %v7332_v51, %v7346_v2  ;;  %v7714_v51 = vsub.f32 %v7372_v39, %v7386_v3  ;;  %v7731_v39 = vsub.f32 %v7399_v9, %v7418_v48 }
  0xaa   :  { %v7594_v10 = vpack.c.bf16 %v10223_v42, %v10221_v16  ;;  %v7612_v16 = vand.u32 4294901760, %v7603_v19  ;;  %10231 = vst [vmem:[#allocation114_spill] sm:$0xff] %v7619_v38  ;;  %v7624_v42 = vld [vmem:[#allocation2 + $0xe8] sm:$0xff]  ;;  %v7750_v9 = vsub.f32 %v7444_v63, %v7458_v21 }
  0xab   :  { %1039 = vmatmul.mubr.f32.gmra.mrb[20].mxu0 %v7572_v23  ;;  %10233 = vst [vmem:[#allocation116_spill] sm:$0xff] %v7624_v42  ;;  %v7641_v19 = vand.u32 4294901760, %v7624_v42  ;;  %v10257_v63 = vld [vmem:[#allocation93_spill] sm:$0xff] }
  0xac   :  { %10224 = vst [vmem:[#allocation54_spill] sm:$0xff] %v7594_v10  ;;  %5740 = vmatpush1.bf16.msra.mxu0 %v10225_v32  ;;  %1044 = vmatprep.mubr.f32.mxu0 %v7579_v50  ;;  %10229 = vst [vmem:[#allocation113_spill] sm:$0xff] %v7612_v16  ;;  %v7621_v32 = vld [vmem:[#allocation2 + $0xd0] sm:$0xff] }
  0xad   :  { %5741 = vmatprep.subr.bf16.mxu0 %v10082_v18  ;;  %5653 = vmatpush1.bf16.msra.mxu1 %v7594_v10  ;;  %10232 = vst [vmem:[#allocation115_spill] sm:$0xff] %v7621_v32  ;;  %v7628_v22 = vand.u32 4294901760, %v7621_v32  ;;  %v10236_v10 = vand.u32 4294901760, %v10235_v28  ;;  %10241 = vst [vmem:[#allocation61_spill] sm:$0xff] %v7641_v19  ;;  %v7646_v32 = vld [vmem:[#allocation2 + $0xf8] sm:$0xff]  ;;  %v10245_v28 = vpack.c.bf16 %v7186_v56, %v7179_v7  ;;  %v10254_v7 = vld [vmem:[#allocation62_spill] sm:$0xff] }
  0xae   :  { %5654 = vmatprep.subr.bf16.mxu1 %v10082_v18  ;;  %10243 = vst [vmem:[#allocation119_spill] sm:$0xff] %v7646_v32 }
  0xaf   :  { %1046 = vmatmul.mubr.f32.gmra.mrb[22].mxu0 %v7588_v37  ;;  %10234 = vst [vmem:[#allocation117_spill] sm:$0xff] %v7628_v22 }
  0xb0   :  { %5743 = vmatpush1.bf16.msra.mxu0 %v10230_v25  ;;  %1051 = vmatprep.mubr.f32.mxu0 %v7601_v26  ;;  %v10238_v25 = vand.u32 4294901760, %v10237_v62  ;;  %v7659_v62 = vand.u32 4294901760, %v7646_v32  ;;  %v10255_v32 = vld [vmem:[#allocation56_spill] sm:$0xff] }
  0xb1   :  { %5744 = vmatprep.subr.bf16.mxu0 %v10082_v18  ;;  %v7680_v42 = vsub.f32 %v10255_v32, %v10254_v7  ;;  %v7767_v32 = vsub.f32 %v10257_v63, %v7490_v20  ;;  %v10262_v63 = vld [vmem:[#allocation98_spill] sm:$0xff] }
  0xb2   :  { %v7634_v11 = vpack.c.bf16 %v10238_v25, %v10236_v10  ;;  %v7652_v10 = vand.u32 4294901760, %v7643_v46  ;;  %10246 = vst [vmem:[#allocation121_spill] sm:$0xff] %v7659_v62  ;;  %v7786_v20 = vsub.f32 %v10262_v63, %v7530_v41  ;;  %v10266_v63 = vld [vmem:[#allocation102_spill] sm:$0xff] }
  0xb3   :  { %1053 = vmatmul.mubr.f32.gmra.mrb[24].mxu0 %v7612_v16  ;;  %v7803_v41 = vsub.f32 %v10266_v63, %v7561_v59  ;;  %v10271_v63 = vld [vmem:[#allocation108_spill] sm:$0xff] }
  0xb4   :  { %10239 = vst [vmem:[#allocation58_spill] sm:$0xff] %v7634_v11  ;;  %5746 = vmatpush1.bf16.msra.mxu0 %v10240_v36  ;;  %1058 = vmatprep.mubr.f32.mxu0 %v7619_v38  ;;  %10244 = vst [vmem:[#allocation120_spill] sm:$0xff] %v7652_v10  ;;  %v7661_v36 = vld [vmem:[#allocation2 + $0xf0] sm:$0xff]  ;;  %v7822_v59 = vsub.f32 %v10271_v63, %v7588_v37  ;;  %v10275_v63 = vld [vmem:[#allocation112_spill] sm:$0xff] }
  0xb5   :  { %5747 = vmatprep.subr.bf16.mxu0 %v10082_v18  ;;  %5656 = vmatpush1.bf16.msra.mxu1 %v7634_v11  ;;  %v7666_v25 = vand.u32 4294901760, %v7661_v36  ;;  %v10250_v11 = vld [vmem:[#allocation67_spill] sm:$0xff]  ;;  %v7839_v37 = vsub.f32 %v10275_v63, %v7619_v38  ;;  %v95_v63 = vld [vmem:[#allocation2 + $0x108] sm:$0xff]  ;;  %v10280_v38 = vld [vmem:[#allocation118_spill] sm:$0xff] }
  0xb6   :  { %5657 = vmatprep.subr.bf16.mxu1 %v10082_v18  ;;  %v10251_v46 = vand.u32 4294901760, %v10250_v11  ;;  %v10256_v11 = vpack.c.bf16 %v7259_v5, %v7251_v35  ;;  %v7865_v21 = vand.u32 4294901760, %v95_v63 }
  0xb7   :  { %1060 = vmatmul.mubr.f32.gmra.mrb[26].mxu0 %v7628_v22  ;;  %10247 = vst [vmem:[#allocation122_spill] sm:$0xff] %v7666_v25 }
  0xb8   :  { %5749 = vmatpush1.bf16.msra.mxu0 %v10245_v28  ;;  %1065 = vmatprep.mubr.f32.mxu0 %v7641_v19  ;;  %v7672_v56 = vpack.c.bf16 %v10251_v46, %v10249_v0  ;;  %v10253_v28 = vpack.c.bf16 %v7217_v61, %v7209_v49  ;;  %v7687_v0 = vsub.f32 %v7328_v52, %v7341_v1 }
  0xb9   :  { %5750 = vmatprep.subr.bf16.mxu0 %v10082_v18  ;;  %v7702_v52 = vsub.f32 %v7348_v58, %v7362_v27  ;;  %v7708_v46 = vsub.f32 %v7352_v13, %v7370_v8  ;;  %v7720_v58 = vsub.f32 %v7375_v40, %v7394_v44  ;;  %v7726_v13 = vsub.f32 %v7396_v47, %v7410_v24  ;;  %v103_v44 = vld [vmem:[#allocation2 + $0x148] sm:$0xff]  ;;  %v105_v8 = vld [vmem:[#allocation2 + $0x158] sm:$0xff] }
  0xba   :  { %10252 = vst [vmem:[#allocation66_spill] sm:$0xff] %v7672_v56  ;;  %5659 = vmatpush1.bf16.msra.mxu1 %v7672_v56  ;;  %v7738_v40 = vsub.f32 %v7420_v53, %v7434_v29  ;;  %v7743_v47 = vsub.f32 %v7423_v6, %v7442_v54  ;;  %v7755_v53 = vsub.f32 %v7447_v33, %v7466_v14  ;;  %v10259_v33 = vld [vmem:[#allocation95_spill] sm:$0xff]  ;;  %v10261_v14 = vld [vmem:[#allocation86_spill] sm:$0xff]  ;;  %10282 = vst [vmem:[#allocation67_spill] sm:$0xff] %v7865_v21 }
  0xbb   :  { %1067 = vmatmul.mubr.f32.gmra.mrb[28].mxu0 %v7652_v10  ;;  %6092 = vmatprep.subr.bf16.mxu1 %v10082_v18  ;;  %v7762_v6 = vsub.f32 %v7468_v17, %v7482_v30  ;;  %v10260_v17 = vld [vmem:[#allocation96_spill] sm:$0xff]  ;;  %v99_v54 = vld [vmem:[#allocation2 + $0x128] sm:$0xff] }
  0xbc   :  { %5752 = vmatpush1.bf16.msra.mxu0 %v10253_v28  ;;  %1072 = vmatprep.mubr.f32.mxu0 %v7659_v62  ;;  %v10258_v28 = vld [vmem:[#allocation83_spill] sm:$0xff]  ;;  %v7779_v30 = vsub.f32 %v10260_v17, %v7514_v12  ;;  %v10265_v17 = vld [vmem:[#allocation101_spill] sm:$0xff]  ;;  %v7894_v29 = vand.u32 4294901760, %v99_v54 }
  0xbd   :  { %5753 = vmatprep.subr.bf16.mxu0 %v10082_v18  ;;  %v7798_v12 = vsub.f32 %v10265_v17, %v7548_v15  ;;  %v10269_v17 = vld [vmem:[#allocation105_spill] sm:$0xff] }
  0xbe   :  { %v7815_v15 = vsub.f32 %v10269_v17, %v7579_v50  ;;  %v10274_v17 = vld [vmem:[#allocation111_spill] sm:$0xff]  ;;  %10288 = vst [vmem:[#allocation96_spill] sm:$0xff] %v7894_v29 }
  0xbf   :  { %1074 = vmatmul.mubr.f32.gmra.mrb[30].mxu0 %v7666_v25  ;;  %v7834_v50 = vsub.f32 %v10274_v17, %v7612_v16  ;;  %v10278_v17 = vld [vmem:[#allocation116_spill] sm:$0xff] }
  0xc0   :  { %5755 = vmatpush1.bf16.msra.mxu0 %v10256_v11  ;;  %1321 = vmatprep.mubr.f32.mxu0 %v7680_v42  ;;  %v7774_v11 = vsub.f32 %v10259_v33, %v7506_v60  ;;  %v10263_v33 = vld [vmem:[#allocation99_spill] sm:$0xff]  ;;  %v7851_v16 = vsub.f32 %v10278_v17, %v7641_v19  ;;  %v94_v17 = vld [vmem:[#allocation2 + $0x100] sm:$0xff]  ;;  %v10283_v19 = vld [vmem:[#allocation54_spill] sm:$0xff] }
  0xc1   :  { %5756 = vmatprep.subr.bf16.mxu0 %v10082_v18  ;;  %v7791_v60 = vsub.f32 %v10263_v33, %v7538_v45  ;;  %v10268_v33 = vld [vmem:[#allocation104_spill] sm:$0xff] }
  0xc2   :  { %v7810_v45 = vsub.f32 %v10268_v33, %v7572_v23  ;;  %v10272_v33 = vld [vmem:[#allocation109_spill] sm:$0xff] }
  0xc3   :  { %1324 = vmatmul.mubr.f32.vlgmr.msra.gmra.mrb[0].mxu0 %v7687_v0  ;;  %v7827_v23 = vsub.f32 %v10272_v33, %v7601_v26  ;;  %v10277_v33 = vld [vmem:[#allocation115_spill] sm:$0xff] }
  0xc4   :  { %5758 = vmatpush1.bf16.msra.mxu0 %v7292_v43  ;;  %1330 = vmatprep.mubr.f32.mxu0 %v7696_v34  ;;  %v7846_v26 = vsub.f32 %v10277_v33, %v7628_v22  ;;  %v10281_v33 = vld [vmem:[#allocation119_spill] sm:$0xff] }
  0xc5   :  { %5759 = vmatprep.subr.bf16.mxu0 %v10082_v18  ;;  %v7863_v22 = vsub.f32 %v10281_v33, %v7659_v62  ;;  %v7878_v33 = vsub.f32 %v95_v63, %v7865_v21 }
  0xc7   :  { %1333 = vmatmul.mubr.f32.gmra.mrb[2].mxu0 %v7702_v52 }
  0xc8   :  { %1339 = vmatprep.mubr.f32.mxu0 %v7708_v46  ;;  %5761 = vmatpush1.bf16.msra.mxu0 %v7309_v4  ;;  %v7920_v4 = vand.u32 4294901760, %v103_v44 }
  0xc9   :  { %5762 = vmatprep.subr.bf16.mxu0 %v10082_v18 }
  0xca   :  { %10292 = vst [vmem:[#allocation102_spill] sm:$0xff] %v7920_v4 }
  0xcb   :  { %1342 = vmatmul.mubr.f32.gmra.mrb[4].mxu0 %v7714_v51 }
  0xcc   :  { %1348 = vmatprep.mubr.f32.mxu0 %v7720_v58  ;;  %5764 = vmatpush1.bf16.msra.mxu0 %v7321_v31  ;;  %v100_v31 = vld [vmem:[#allocation2 + $0x130] sm:$0xff] }
  0xcd   :  { %5765 = vmatprep.subr.bf16.mxu0 %v10082_v18  ;;  %v7914_v3 = vand.u32 4294901760, %v100_v31 }
  0xcf   :  { %1351 = vmatmul.mubr.f32.gmra.mrb[6].mxu0 %v7726_v13  ;;  %10291 = vst [vmem:[#allocation101_spill] sm:$0xff] %v7914_v3  ;;  %v7924_v27 = vsub.f32 %v100_v31, %v7914_v3 }
  0xd0   :  { %1357 = vmatprep.mubr.f32.mxu0 %v7731_v39  ;;  %5767 = vmatpush1.bf16.msra.mxu0 %v7338_v55  ;;  %v98_v55 = vld [vmem:[#allocation2 + $0x120] sm:$0xff] }
  0xd1   :  { %5768 = vmatprep.subr.bf16.mxu0 %v10082_v18  ;;  %v7902_v48 = vand.u32 4294901760, %v98_v55 }
  0xd3   :  { %1360 = vmatmul.mubr.f32.gmra.mrb[8].mxu0 %v7738_v40  ;;  %10289 = vst [vmem:[#allocation98_spill] sm:$0xff] %v7902_v48 }
  0xd4   :  { %1366 = vmatprep.mubr.f32.mxu0 %v7743_v47  ;;  %5770 = vmatpush1.bf16.msra.mxu0 %v7358_v57  ;;  %v96_v57 = vld [vmem:[#allocation2 + $0x110] sm:$0xff] }
  0xd5   :  { %5771 = vmatprep.subr.bf16.mxu0 %v10082_v18 }
  0xd7   :  { %1369 = vmatmul.mubr.f32.gmra.mrb[10].mxu0 %v7750_v9 }
  0xd8   :  { %1375 = vmatprep.mubr.f32.mxu0 %v7755_v53  ;;  %5773 = vmatpush1.bf16.msra.mxu0 %v10258_v28  ;;  %v10264_v28 = vld [vmem:[#allocation89_spill] sm:$0xff] }
  0xd9   :  { %5774 = vmatprep.subr.bf16.mxu0 %v10082_v18 }
  0xdb   :  { %1378 = vmatmul.mubr.f32.gmra.mrb[12].mxu0 %v7762_v6 }
  0xdc   :  { %1384 = vmatprep.mubr.f32.mxu0 %v7767_v32  ;;  %5776 = vmatpush1.bf16.msra.mxu0 %v10261_v14  ;;  %v10267_v14 = vld [vmem:[#allocation29_spill] sm:$0xff] }
  0xdd   :  { %5777 = vmatprep.subr.bf16.mxu0 %v10082_v18 }
  0xdf   :  { %1387 = vmatmul.mubr.f32.gmra.mrb[14].mxu0 %v7774_v11 }
  0xe0   :  { %1393 = vmatprep.mubr.f32.mxu0 %v7779_v30  ;;  %5779 = vmatpush1.bf16.msra.mxu0 %v10264_v28  ;;  %v10270_v28 = vld [vmem:[#allocation34_spill] sm:$0xff] }
  0xe1   :  { %5780 = vmatprep.subr.bf16.mxu0 %v10082_v18 }
  0xe3   :  { %1396 = vmatmul.mubr.f32.gmra.mrb[16].mxu0 %v7786_v20 }
  0xe4   :  { %1402 = vmatprep.mubr.f32.mxu0 %v7791_v60  ;;  %5782 = vmatpush1.bf16.msra.mxu0 %v10267_v14  ;;  %v10273_v14 = vld [vmem:[#allocation39_spill] sm:$0xff] }
  0xe5   :  { %5783 = vmatprep.subr.bf16.mxu0 %v10082_v18 }
  0xe7   :  { %1405 = vmatmul.mubr.f32.gmra.mrb[18].mxu0 %v7798_v12 }
  0xe8   :  { %1411 = vmatprep.mubr.f32.mxu0 %v7803_v41  ;;  %5785 = vmatpush1.bf16.msra.mxu0 %v10270_v28  ;;  %v10276_v28 = vld [vmem:[#allocation41_spill] sm:$0xff] }
  0xe9   :  { %5786 = vmatprep.subr.bf16.mxu0 %v10082_v18 }
  0xeb   :  { %1414 = vmatmul.mubr.f32.gmra.mrb[20].mxu0 %v7810_v45 }
  0xec   :  { %1420 = vmatprep.mubr.f32.mxu0 %v7815_v15  ;;  %5788 = vmatpush1.bf16.msra.mxu0 %v10273_v14  ;;  %v10279_v14 = vld [vmem:[#allocation47_spill] sm:$0xff] }
  0xed   :  { %5789 = vmatprep.subr.bf16.mxu0 %v10082_v18 }
  0xef   :  { %1423 = vmatmul.mubr.f32.gmra.mrb[22].mxu0 %v7822_v59 }
  0xf0   :  { %1429 = vmatprep.mubr.f32.mxu0 %v7827_v23  ;;  %5791 = vmatpush1.bf16.msra.mxu0 %v10276_v28  ;;  %v7858_v28 = vsub.f32 %v10280_v38, %v7652_v10  ;;  %v7872_v38 = vsub.f32 %v7661_v36, %v7666_v25  ;;  %v7874_v10 = vand.u32 4294901760, %v94_v17  ;;  %v7888_v25 = vand.u32 4294901760, %v96_v57 }
  0xf1   :  { %5792 = vmatprep.subr.bf16.mxu0 %v10082_v18 }
  0xf2   :  { %10284 = vst [vmem:[#allocation56_spill] sm:$0xff] %v7874_v10  ;;  %v7886_v36 = vsub.f32 %v94_v17, %v7874_v10  ;;  %10287 = vst [vmem:[#allocation95_spill] sm:$0xff] %v7888_v25  ;;  %v7900_v17 = vsub.f32 %v96_v57, %v7888_v25 }
  0xf3   :  { %1432 = vmatmul.mubr.f32.gmra.mrb[24].mxu0 %v7834_v50 }
  0xf4   :  { %1438 = vmatprep.mubr.f32.mxu0 %v7839_v37  ;;  %5794 = vmatpush1.bf16.msra.mxu0 %v10279_v14  ;;  %v97_v14 = vld [vmem:[#allocation2 + $0x118] sm:$0xff] }
  0xf5   :  { %5795 = vmatprep.subr.bf16.mxu0 %v10082_v18  ;;  %v7880_v62 = vand.u32 4294901760, %v97_v14 }
  0xf7   :  { %1441 = vmatmul.mubr.f32.gmra.mrb[26].mxu0 %v7846_v26  ;;  %10285 = vst [vmem:[#allocation93_spill] sm:$0xff] %v7880_v62  ;;  %v7892_v63 = vsub.f32 %v97_v14, %v7880_v62  ;;  %v7906_v14 = vsub.f32 %v99_v54, %v7894_v29  ;;  %v102_v54 = vld [vmem:[#allocation2 + $0x140] sm:$0xff] }
  0xf8   :  { %1447 = vmatprep.mubr.f32.mxu0 %v7851_v16  ;;  %5797 = vmatpush1.bf16.msra.mxu0 %v10283_v19  ;;  %v10286_v19 = vld [vmem:[#allocation58_spill] sm:$0xff]  ;;  %v7926_v29 = vand.u32 4294901760, %v102_v54 }
  0xf9   :  { %5798 = vmatprep.subr.bf16.mxu0 %v10082_v18 }
  0xfa   :  { %10293 = vst [vmem:[#allocation104_spill] sm:$0xff] %v7926_v29  ;;  %v7936_v25 = vsub.f32 %v102_v54, %v7926_v29 }
  0xfb   :  { %1450 = vmatmul.mubr.f32.gmra.mrb[28].mxu0 %v7858_v28 }
  0xfc   :  { %1456 = vmatprep.mubr.f32.mxu0 %v7863_v22  ;;  %5800 = vmatpush1.bf16.msra.mxu0 %v10286_v19  ;;  %v101_v19 = vld [vmem:[#allocation2 + $0x138] sm:$0xff] }
  0xfd   :  { %5801 = vmatprep.subr.bf16.mxu0 %v10082_v18  ;;  %v7908_v24 = vand.u32 4294901760, %v101_v19 }
  0xff   :  { %1459 = vmatmul.mubr.f32.gmra.mrb[30].mxu0 %v7872_v38  ;;  %10290 = vst [vmem:[#allocation99_spill] sm:$0xff] %v7908_v24  ;;  %v7918_v57 = vsub.f32 %v101_v19, %v7908_v24  ;;  %v104_v19 = vld [vmem:[#allocation2 + $0x150] sm:$0xff]  ;;  %v107_v24 = vld [vmem:[#allocation2 + $0x168] sm:$0xff] }
 0x100   :  { %1465 = vmatprep.mubr.f32.mxu0 %v7878_v33  ;;  %5803 = vmatpush1.bf16.msra.mxu0 %v7672_v56  ;;  %v7912_v56 = vsub.f32 %v98_v55, %v7902_v48  ;;  %v7930_v55 = vsub.f32 %v103_v44, %v7920_v4  ;;  %v7932_v48 = vand.u32 4294901760, %v105_v8  ;;  %v7938_v2 = vand.u32 4294901760, %v104_v19  ;;  %v106_v44 = vld [vmem:[#allocation2 + $0x160] sm:$0xff]  ;;  %v109_v4 = vld [vmem:[#allocation2 + $0x178] sm:$0xff] }
 0x101   :  { %5804 = vmatprep.subr.bf16.mxu0 %v10082_v18  ;;  %v7944_v3 = vand.u32 4294901760, %v107_v24  ;;  %v7950_v1 = vand.u32 4294901760, %v106_v44  ;;  %v7956_v29 = vand.u32 4294901760, %v109_v4 }
 0x102   :  { %10294 = vst [vmem:[#allocation105_spill] sm:$0xff] %v7932_v48  ;;  %10295 = vst [vmem:[#allocation108_spill] sm:$0xff] %v7938_v2  ;;  %v7942_v31 = vsub.f32 %v105_v8, %v7932_v48  ;;  %v7948_v43 = vsub.f32 %v104_v19, %v7938_v2  ;;  %v108_v8 = vld [vmem:[#allocation2 + $0x170] sm:$0xff]  ;;  %v111_v48 = vld [vmem:[#allocation2 + $0x188] sm:$0xff] }
 0x103   :  { %1468 = vmatmul.mubr.f32.gmra.mrb[32].mxu0 %v7886_v36  ;;  %10296 = vst [vmem:[#allocation109_spill] sm:$0xff] %v7944_v3  ;;  %10298 = vst [vmem:[#allocation112_spill] sm:$0xff] %v7950_v1  ;;  %v7954_v54 = vsub.f32 %v107_v24, %v7944_v3  ;;  %v7960_v62 = vsub.f32 %v106_v44, %v7950_v1  ;;  %v7962_v10 = vand.u32 4294901760, %v108_v8  ;;  %v7968_v2 = vand.u32 4294901760, %v111_v48  ;;  %v110_v24 = vld [vmem:[#allocation2 + $0x180] sm:$0xff]  ;;  %v113_v3 = vld [vmem:[#allocation2 + $0x198] sm:$0xff] }
 0x104   :  { %1474 = vmatprep.mubr.f32.mxu0 %v7892_v63  ;;  %10297 = vst [vmem:[#allocation111_spill] sm:$0xff] %v7948_v43  ;;  %10300 = vst [vmem:[#allocation116_spill] sm:$0xff] %v7956_v29  ;;  %v7966_v19 = vsub.f32 %v109_v4, %v7956_v29  ;;  %v7974_v21 = vand.u32 4294901760, %v110_v24  ;;  %v7980_v1 = vand.u32 4294901760, %v113_v3  ;;  %v112_v4 = vld [vmem:[#allocation2 + $0x190] sm:$0xff]  ;;  %v115_v29 = vld [vmem:[#allocation2 + $0x1a8] sm:$0xff] }
 0x105   :  { %10299 = vst [vmem:[#allocation115_spill] sm:$0xff] %v7954_v54  ;;  %10301 = vst [vmem:[#allocation118_spill] sm:$0xff] %v7960_v62  ;;  %v7972_v7 = vsub.f32 %v108_v8, %v7962_v10  ;;  %v7978_v44 = vsub.f32 %v111_v48, %v7968_v2  ;;  %v114_v48 = vld [vmem:[#allocation2 + $0x1a0] sm:$0xff] }
 0x106   :  { %10302 = vst [vmem:[#allocation119_spill] sm:$0xff] %v7962_v10  ;;  %10303 = vst [vmem:[#allocation123_spill] sm:$0xff] %v7966_v19  ;;  %v7990_v8 = vsub.f32 %v113_v3, %v7980_v1  ;;  %v7992_v10 = vand.u32 4294901760, %v115_v29  ;;  %v116_v3 = vld [vmem:[#allocation2 + $0x1b0] sm:$0xff] }
 0x107   :  { %1477 = vmatmul.mubr.f32.gmra.mrb[34].mxu0 %v7900_v17  ;;  %10304 = vst [vmem:[#allocation124_spill] sm:$0xff] %v7968_v2  ;;  %10305 = vst [vmem:[#allocation125_spill] sm:$0xff] %v7972_v7  ;;  %v117_v2 = vld [vmem:[#allocation2 + $0x1b8] sm:$0xff] }
 0x108   :  { %1483 = vmatprep.mubr.f32.mxu0 %v7906_v14  ;;  %10306 = vst [vmem:[#allocation126_spill] sm:$0xff] %v7974_v21  ;;  %10307 = vst [vmem:[#allocation127_spill] sm:$0xff] %v7978_v44 }
 0x109   :  { %10308 = vst [vmem:[#allocation128_spill] sm:$0xff] %v7980_v1  ;;  %10311 = vst [vmem:[#allocation131_spill] sm:$0xff] %v7990_v8  ;;  %v119_v1 = vld [vmem:[#allocation2 + $0x1c8] sm:$0xff] }
 0x10a   :  { %10312 = vst [vmem:[#allocation132_spill] sm:$0xff] %v7992_v10 }
 0x10b   :  { %1486 = vmatmul.mubr.f32.gmra.mrb[36].mxu0 %v7912_v56 }
 0x10c   :  { %1492 = vmatprep.mubr.f32.mxu0 %v7918_v57 }
 0x10f   :  { %1495 = vmatmul.mubr.f32.gmra.mrb[38].mxu0 %v7924_v27 }
 0x110   :  { %1501 = vmatprep.mubr.f32.mxu0 %v7930_v55 }
 0x113   :  { %1504 = vmatmul.mubr.f32.gmra.mrb[40].mxu0 %v7936_v25 }
 0x114   :  { %1510 = vmatprep.mubr.f32.mxu0 %v7942_v31 }
 0x117   :  { %1513 = vmatmul.mubr.f32.gmra.mrb[42].mxu0 %v7948_v43  ;;  %v10341_v43 = vld [vmem:[#allocation20_spill] sm:$0xff] }
 0x118   :  { %1519 = vmatprep.mubr.f32.mxu0 %v7954_v54  ;;  %v7984_v54 = vsub.f32 %v110_v24, %v7974_v21  ;;  %v8002_v24 = vsub.f32 %v115_v29, %v7992_v10  ;;  %v8004_v21 = vand.u32 4294901760, %v117_v2  ;;  %v118_v29 = vld [vmem:[#allocation2 + $0x1c0] sm:$0xff]  ;;  %v121_v10 = vld [vmem:[#allocation2 + $0x1d8] sm:$0xff] }
 0x11a   :  { %10309 = vst [vmem:[#allocation129_spill] sm:$0xff] %v7984_v54  ;;  %10315 = vst [vmem:[#allocation135_spill] sm:$0xff] %v8002_v24 }
 0x11b   :  { %1522 = vmatmul.mubr.f32.gmra.mrb[44].mxu0 %v7960_v62  ;;  %v7986_v62 = vand.u32 4294901760, %v112_v4  ;;  %10316 = vst [vmem:[#allocation136_spill] sm:$0xff] %v8004_v21 }
 0x11c   :  { %1528 = vmatprep.mubr.f32.mxu0 %v7966_v19 }
 0x11d   :  { %10310 = vst [vmem:[#allocation130_spill] sm:$0xff] %v7986_v62  ;;  %v7996_v19 = vsub.f32 %v112_v4, %v7986_v62  ;;  %v8014_v4 = vsub.f32 %v117_v2, %v8004_v21  ;;  %v8016_v62 = vand.u32 4294901760, %v119_v1  ;;  %v120_v2 = vld [vmem:[#allocation2 + $0x1d0] sm:$0xff]  ;;  %v123_v21 = vld [vmem:[#allocation2 + $0x1e8] sm:$0xff] }
 0x11f   :  { %1531 = vmatmul.mubr.f32.gmra.mrb[46].mxu0 %v7972_v7  ;;  %10313 = vst [vmem:[#allocation133_spill] sm:$0xff] %v7996_v19  ;;  %v7998_v7 = vand.u32 4294901760, %v114_v48  ;;  %10319 = vst [vmem:[#allocation139_spill] sm:$0xff] %v8014_v4 }
 0x120   :  { %1537 = vmatprep.mubr.f32.mxu0 %v7978_v44  ;;  %10320 = vst [vmem:[#allocation140_spill] sm:$0xff] %v8016_v62 }
 0x121   :  { %10314 = vst [vmem:[#allocation134_spill] sm:$0xff] %v7998_v7  ;;  %v8008_v44 = vsub.f32 %v114_v48, %v7998_v7  ;;  %v8026_v48 = vsub.f32 %v119_v1, %v8016_v62  ;;  %v8028_v7 = vand.u32 4294901760, %v121_v10  ;;  %v122_v1 = vld [vmem:[#allocation2 + $0x1e0] sm:$0xff]  ;;  %v125_v62 = vld [vmem:[#allocation2 + $0x1f8] sm:$0xff] }
 0x123   :  { %1540 = vmatmul.mubr.f32.gmra.mrb[48].mxu0 %v7984_v54  ;;  %10317 = vst [vmem:[#allocation137_spill] sm:$0xff] %v8008_v44  ;;  %v8010_v54 = vand.u32 4294901760, %v116_v3  ;;  %10323 = vst [vmem:[#allocation143_spill] sm:$0xff] %v8026_v48 }
 0x124   :  { %1546 = vmatprep.mubr.f32.mxu0 %v7990_v8  ;;  %10324 = vst [vmem:[#allocation144_spill] sm:$0xff] %v8028_v7 }
 0x125   :  { %10318 = vst [vmem:[#allocation138_spill] sm:$0xff] %v8010_v54  ;;  %v8020_v8 = vsub.f32 %v116_v3, %v8010_v54  ;;  %v8038_v3 = vsub.f32 %v121_v10, %v8028_v7  ;;  %v8040_v54 = vand.u32 4294901760, %v123_v21  ;;  %v124_v10 = vld [vmem:[#allocation2 + $0x1f0] sm:$0xff] }
 0x127   :  { %1549 = vmatmul.mubr.f32.gmra.mrb[50].mxu0 %v7996_v19  ;;  %10321 = vst [vmem:[#allocation141_spill] sm:$0xff] %v8020_v8  ;;  %v8022_v19 = vand.u32 4294901760, %v118_v29  ;;  %10327 = vst [vmem:[#allocation147_spill] sm:$0xff] %v8038_v3 }
 0x128   :  { %1555 = vmatprep.mubr.f32.mxu0 %v8002_v24  ;;  %10328 = vst [vmem:[#allocation148_spill] sm:$0xff] %v8040_v54 }
 0x129   :  { %10322 = vst [vmem:[#allocation142_spill] sm:$0xff] %v8022_v19  ;;  %v8032_v24 = vsub.f32 %v118_v29, %v8022_v19  ;;  %v8050_v29 = vsub.f32 %v123_v21, %v8040_v54  ;;  %v8052_v19 = vand.u32 4294901760, %v125_v62  ;;  %v269_v21 = vand.u32 4294901760, %v7687_v0 }
 0x12b   :  { %1558 = vmatmul.mubr.f32.gmra.mrb[52].mxu0 %v8008_v44  ;;  %10325 = vst [vmem:[#allocation145_spill] sm:$0xff] %v8032_v24  ;;  %v8034_v44 = vand.u32 4294901760, %v120_v2  ;;  %10331 = vst [vmem:[#allocation151_spill] sm:$0xff] %v8050_v29 }
 0x12c   :  { %1564 = vmatprep.mubr.f32.mxu0 %v8014_v4  ;;  %10332 = vst [vmem:[#allocation152_spill] sm:$0xff] %v8052_v19 }
 0x12d   :  { %10326 = vst [vmem:[#allocation146_spill] sm:$0xff] %v8034_v44  ;;  %v8044_v4 = vsub.f32 %v120_v2, %v8034_v44  ;;  %v8062_v2 = vsub.f32 %v125_v62, %v8052_v19  ;;  %v263_v44 = vand.u32 4294901760, %v7680_v42  ;;  %v284_v62 = vand.u32 4294901760, %v7702_v52 }
 0x12f   :  { %1567 = vmatmul.mubr.f32.gmra.mrb[54].mxu0 %v8020_v8  ;;  %10329 = vst [vmem:[#allocation149_spill] sm:$0xff] %v8044_v4  ;;  %v8046_v8 = vand.u32 4294901760, %v122_v1  ;;  %10335 = vst [vmem:[#allocation155_spill] sm:$0xff] %v8062_v2 }
 0x130   :  { %1573 = vmatprep.mubr.f32.mxu0 %v8026_v48  ;;  %v8058_v48 = vand.u32 4294901760, %v124_v10 }
 0x131   :  { %10330 = vst [vmem:[#allocation150_spill] sm:$0xff] %v8046_v8  ;;  %v8056_v7 = vsub.f32 %v122_v1, %v8046_v8  ;;  %v270_v1 = vsub.f32 %v7687_v0, %v269_v21  ;;  %v278_v8 = vand.u32 4294901760, %v7696_v34  ;;  %v285_v0 = vsub.f32 %v7702_v52, %v284_v62 }
 0x132   :  { %10334 = vst [vmem:[#allocation154_spill] sm:$0xff] %v8058_v48  ;;  %v8068_v54 = vsub.f32 %v124_v10, %v8058_v48  ;;  %v10337_v10 = vld [vmem:[#allocation12_spill] sm:$0xff] }
 0x133   :  { %1576 = vmatmul.mubr.f32.gmra.mrb[56].mxu0 %v8032_v24  ;;  %10333 = vst [vmem:[#allocation153_spill] sm:$0xff] %v8056_v7  ;;  %v271_v19 = vand.u32 4294901760, %v270_v1  ;;  %v10338_v48 = vand.u32 4294901760, %v10337_v10  ;;  %v299_v1 = vand.u32 4294901760, %v7714_v51 }
 0x134   :  { %1582 = vmatprep.mubr.f32.mxu0 %v8038_v3  ;;  %10336 = vst [vmem:[#allocation156_spill] sm:$0xff] %v8068_v54  ;;  %v10339_v3 = vld [vmem:[#allocation13_spill] sm:$0xff] }
 0x137   :  { %1585 = vmatmul.mubr.f32.gmra.mrb[58].mxu0 %v8044_v4  ;;  %v264_v4 = vsub.f32 %v7680_v42, %v263_v44  ;;  %v10340_v42 = vand.u32 4294901760, %v10339_v3 }
 0x138   :  { %1591 = vmatprep.mubr.f32.mxu0 %v8050_v29 }
 0x139   :  { %v265_v29 = vand.u32 4294901760, %v264_v4  ;;  %v5805_v24 = vpack.c.bf16 %v10340_v42, %v10338_v48  ;;  %v10344_v48 = vld [vmem:[#allocation15_spill] sm:$0xff]  ;;  %v10346_v42 = vld [vmem:[#allocation21_spill] sm:$0xff] }
 0x13a   :  { %v10345_v52 = vand.u32 4294901760, %v10344_v48 }
 0x13b   :  { %1594 = vmatmul.mubr.f32.gmra.mrb[60].mxu0 %v8056_v7  ;;  %266 = vmatprep.mubr.f32.mxu1 %v265_v29  ;;  %v279_v7 = vsub.f32 %v7696_v34, %v278_v8 }
 0x13c   :  { %1600 = vmatprep.mubr.f32.mxu0 %v8062_v2  ;;  %272 = vmatmul.mubr.f32.vlgmr.msra.gmra.mrb[0].mxu1 %v271_v19  ;;  %v293_v2 = vand.u32 4294901760, %v7708_v46 }
 0x13d   :  { %v280_v4 = vand.u32 4294901760, %v279_v7  ;;  %6108 = vmatpush1.bf16.msra.mxu1 %v10341_v43  ;;  %v300_v7 = vsub.f32 %v7714_v51, %v299_v1  ;;  %v308_v43 = vand.u32 4294901760, %v7720_v58  ;;  %v10349_v51 = vld [vmem:[#allocation17_spill] sm:$0xff] }
 0x13e   :  { %6093 = vmatprep.subr.bf16.mxu1 %v10082_v18  ;;  %v294_v34 = vsub.f32 %v7708_v46, %v293_v2 }
 0x13f   :  { %1603 = vmatmul.mubr.f32.gmra.mrb[62].mxu0 %v8068_v54  ;;  %v286_v54 = vand.u32 4294901760, %v285_v0  ;;  %281 = vmatprep.mubr.f32.mxu1 %v280_v4  ;;  %v301_v10 = vand.u32 4294901760, %v300_v7  ;;  %v309_v46 = vsub.f32 %v7720_v58, %v308_v43  ;;  %v10350_v0 = vand.u32 4294901760, %v10349_v51 }
 0x140   :  { %1707 = vmatprep.mubr.f32.mxu0 %v263_v44  ;;  %v10342_v44 = vld [vmem:[#allocation14_spill] sm:$0xff]  ;;  %v295_v29 = vand.u32 4294901760, %v294_v34 }
 0x141   :  { %v10343_v19 = vand.u32 4294901760, %v10342_v44  ;;  %287 = vmatmul.mubr.f32.gmra.mrb[2].mxu1 %v286_v54  ;;  %v323_v54 = vand.u32 4294901760, %v7731_v39  ;;  %v310_v34 = vand.u32 4294901760, %v309_v46  ;;  %v10355_v46 = vld [vmem:[#allocation28_spill] sm:$0xff] }
 0x142   :  { %6109 = vmatpush1.bf16.msra.mxu1 %v10346_v42  ;;  %296 = vmatprep.mubr.f32.mxu1 %v295_v29  ;;  %v338_v29 = vand.u32 4294901760, %v7743_v47 }
 0x143   :  { %1711 = vmatmul.mubr.f32.vlgmr.msra.gmra.mrb[0].mxu0 %v269_v21  ;;  %v5808_v3 = vpack.c.bf16 %v10345_v52, %v10343_v19  ;;  %v314_v21 = vand.u32 4294901760, %v7726_v13  ;;  %6094 = vmatprep.subr.bf16.mxu1 %v10082_v18  ;;  %v324_v58 = vsub.f32 %v7731_v39, %v323_v54 }
 0x144   :  { %5806 = vmatpush1.bf16.msra.mxu0 %v5805_v24  ;;  %1718 = vmatprep.mubr.f32.mxu0 %v278_v8  ;;  %v10347_v8 = vld [vmem:[#allocation16_spill] sm:$0xff]  ;;  %v339_v39 = vsub.f32 %v7743_v47, %v338_v29 }
 0x145   :  { %5807 = vmatprep.subr.bf16.mxu0 %v10082_v18  ;;  %v10348_v24 = vand.u32 4294901760, %v10347_v8  ;;  %v315_v44 = vsub.f32 %v7726_v13, %v314_v21  ;;  %302 = vmatmul.mubr.f32.gmra.mrb[4].mxu1 %v301_v10  ;;  %v10353_v13 = vld [vmem:[#allocation19_spill] sm:$0xff]  ;;  %v325_v10 = vand.u32 4294901760, %v324_v58 }
 0x146   :  { %311 = vmatprep.mubr.f32.mxu1 %v310_v34  ;;  %v10354_v52 = vand.u32 4294901760, %v10353_v13  ;;  %6110 = vmatpush1.bf16.msra.mxu1 %v10355_v46  ;;  %v368_v13 = vand.u32 4294901760, %v7767_v32 }
 0x147   :  { %1722 = vmatmul.mubr.f32.gmra.mrb[2].mxu0 %v284_v62  ;;  %v5811_v4 = vpack.c.bf16 %v10350_v0, %v10348_v24  ;;  %v329_v62 = vand.u32 4294901760, %v7738_v40  ;;  %v316_v19 = vand.u32 4294901760, %v315_v44  ;;  %v340_v44 = vand.u32 4294901760, %v339_v39  ;;  %6095 = vmatprep.subr.bf16.mxu1 %v10082_v18 }
 0x148   :  { %1729 = vmatprep.mubr.f32.mxu0 %v293_v2  ;;  %5809 = vmatpush1.bf16.msra.mxu0 %v5808_v3  ;;  %v10351_v2 = vld [vmem:[#allocation18_spill] sm:$0xff] }
 0x149   :  { %5810 = vmatprep.subr.bf16.mxu0 %v10082_v18  ;;  %v10352_v48 = vand.u32 4294901760, %v10351_v2  ;;  %v330_v7 = vsub.f32 %v7738_v40, %v329_v62  ;;  %317 = vmatmul.mubr.f32.gmra.mrb[6].mxu1 %v316_v19  ;;  %v10358_v40 = vld [vmem:[#allocation23_spill] sm:$0xff] }
 0x14a   :  { %326 = vmatprep.mubr.f32.mxu1 %v325_v10  ;;  %v10359_v24 = vand.u32 4294901760, %v10358_v40 }
 0x14b   :  { %1733 = vmatmul.mubr.f32.gmra.mrb[4].mxu0 %v299_v1  ;;  %v5814_v3 = vpack.c.bf16 %v10354_v52, %v10352_v48  ;;  %v344_v1 = vand.u32 4294901760, %v7750_v9  ;;  %v331_v42 = vand.u32 4294901760, %v330_v7  ;;  %v10364_v7 = vld [vmem:[#allocation32_spill] sm:$0xff] }
 0x14c   :  { %1740 = vmatprep.mubr.f32.mxu0 %v308_v43  ;;  %5812 = vmatpush1.bf16.msra.mxu0 %v5811_v4  ;;  %v10356_v43 = vld [vmem:[#allocation22_spill] sm:$0xff]  ;;  %v353_v4 = vand.u32 4294901760, %v7755_v53 }
 0x14d   :  { %5813 = vmatprep.subr.bf16.mxu0 %v10082_v18  ;;  %v10357_v8 = vand.u32 4294901760, %v10356_v43  ;;  %v345_v0 = vsub.f32 %v7750_v9, %v344_v1  ;;  %332 = vmatmul.mubr.f32.gmra.mrb[8].mxu1 %v331_v42  ;;  %v10362_v9 = vld [vmem:[#allocation25_spill] sm:$0xff]  ;;  %v383_v43 = vand.u32 4294901760, %v7779_v30 }
 0x14e   :  { %341 = vmatprep.mubr.f32.mxu1 %v340_v44  ;;  %v354_v47 = vsub.f32 %v7755_v53, %v353_v4  ;;  %v10363_v58 = vand.u32 4294901760, %v10362_v9  ;;  %6111 = vmatpush1.bf16.msra.mxu1 %v10364_v7  ;;  %v369_v53 = vsub.f32 %v7767_v32, %v368_v13  ;;  %v10374_v9 = vld [vmem:[#allocation37_spill] sm:$0xff] }
 0x14f   :  { %1744 = vmatmul.mubr.f32.gmra.mrb[6].mxu0 %v314_v21  ;;  %v5817_v51 = vpack.c.bf16 %v10359_v24, %v10357_v8  ;;  %v359_v21 = vand.u32 4294901760, %v7762_v6  ;;  %v346_v34 = vand.u32 4294901760, %v345_v0  ;;  %6096 = vmatprep.subr.bf16.mxu1 %v10082_v18  ;;  %v384_v32 = vsub.f32 %v7779_v30, %v383_v43  ;;  %v10369_v24 = vld [vmem:[#allocation30_spill] sm:$0xff] }
 0x150   :  { %1751 = vmatprep.mubr.f32.mxu0 %v323_v54  ;;  %5815 = vmatpush1.bf16.msra.mxu0 %v5814_v3  ;;  %v10360_v54 = vld [vmem:[#allocation24_spill] sm:$0xff]  ;;  %v355_v52 = vand.u32 4294901760, %v354_v47  ;;  %v370_v8 = vand.u32 4294901760, %v369_v53  ;;  %v10378_v53 = vld [vmem:[#allocation43_spill] sm:$0xff] }
 0x151   :  { %5816 = vmatprep.subr.bf16.mxu0 %v10082_v18  ;;  %v10361_v19 = vand.u32 4294901760, %v10360_v54  ;;  %v360_v48 = vsub.f32 %v7762_v6, %v359_v21  ;;  %347 = vmatmul.mubr.f32.gmra.mrb[10].mxu1 %v346_v34  ;;  %v10367_v6 = vld [vmem:[#allocation27_spill] sm:$0xff]  ;;  %v398_v34 = vand.u32 4294901760, %v7791_v60  ;;  %v385_v47 = vand.u32 4294901760, %v384_v32 }
 0x152   :  { %356 = vmatprep.mubr.f32.mxu1 %v355_v52  ;;  %v10368_v42 = vand.u32 4294901760, %v10367_v6  ;;  %v413_v52 = vand.u32 4294901760, %v7803_v41 }
 0x153   :  { %1755 = vmatmul.mubr.f32.gmra.mrb[8].mxu0 %v329_v62  ;;  %v5820_v2 = vpack.c.bf16 %v10363_v58, %v10361_v19  ;;  %v374_v62 = vand.u32 4294901760, %v7774_v11  ;;  %v361_v3 = vand.u32 4294901760, %v360_v48  ;;  %v10373_v19 = vld [vmem:[#allocation36_spill] sm:$0xff]  ;;  %v399_v30 = vsub.f32 %v7791_v60, %v398_v34 }
 0x154   :  { %1762 = vmatprep.mubr.f32.mxu0 %v338_v29  ;;  %5818 = vmatpush1.bf16.msra.mxu0 %v5817_v51  ;;  %v10365_v29 = vld [vmem:[#allocation26_spill] sm:$0xff]  ;;  %v10370_v51 = vand.u32 4294901760, %v10369_v24  ;;  %v10375_v58 = vand.u32 4294901760, %v10374_v9  ;;  %v414_v60 = vsub.f32 %v7803_v41, %v413_v52  ;;  %v458_v9 = vand.u32 4294901760, %v7839_v37 }
 0x155   :  { %5819 = vmatprep.subr.bf16.mxu0 %v10082_v18  ;;  %v10366_v10 = vand.u32 4294901760, %v10365_v29  ;;  %v375_v39 = vsub.f32 %v7774_v11, %v374_v62  ;;  %362 = vmatmul.mubr.f32.gmra.mrb[12].mxu1 %v361_v3  ;;  %v10371_v11 = vld [vmem:[#allocation33_spill] sm:$0xff]  ;;  %v400_v3 = vand.u32 4294901760, %v399_v30  ;;  %v10379_v29 = vand.u32 4294901760, %v10378_v53 }
 0x156   :  { %371 = vmatprep.mubr.f32.mxu1 %v370_v8  ;;  %v10372_v0 = vand.u32 4294901760, %v10371_v11  ;;  %6112 = vmatpush1.bf16.msra.mxu1 %v10373_v19 }
 0x157   :  { %1766 = vmatmul.mubr.f32.gmra.mrb[10].mxu0 %v344_v1  ;;  %v5823_v46 = vpack.c.bf16 %v10368_v42, %v10366_v10  ;;  %v389_v1 = vand.u32 4294901760, %v7786_v20  ;;  %v376_v40 = vand.u32 4294901760, %v375_v39  ;;  %6097 = vmatprep.subr.bf16.mxu1 %v10082_v18  ;;  %v415_v39 = vand.u32 4294901760, %v414_v60 }
 0x158   :  { %1773 = vmatprep.mubr.f32.mxu0 %v353_v4  ;;  %5821 = vmatpush1.bf16.msra.mxu0 %v5820_v2  ;;  %v5826_v4 = vpack.c.bf16 %v10372_v0, %v10370_v51  ;;  %v443_v0 = vand.u32 4294901760, %v7827_v23  ;;  %v473_v60 = vand.u32 4294901760, %v7851_v16 }
 0x159   :  { %5822 = vmatprep.subr.bf16.mxu0 %v10082_v18  ;;  %v390_v44 = vsub.f32 %v7786_v20, %v389_v1  ;;  %377 = vmatmul.mubr.f32.gmra.mrb[14].mxu1 %v376_v40  ;;  %v10376_v20 = vld [vmem:[#allocation38_spill] sm:$0xff] }
 0x15a   :  { %386 = vmatprep.mubr.f32.mxu1 %v385_v47  ;;  %v10377_v2 = vand.u32 4294901760, %v10376_v20  ;;  %v10383_v40 = vld [vmem:[#allocation46_spill] sm:$0xff]  ;;  %v464_v20 = vand.u32 4294901760, %v7846_v26 }
 0x15b   :  { %1777 = vmatmul.mubr.f32.gmra.mrb[12].mxu0 %v359_v21  ;;  %v404_v21 = vand.u32 4294901760, %v7798_v12  ;;  %v391_v54 = vand.u32 4294901760, %v390_v44  ;;  %v10384_v32 = vand.u32 4294901760, %v10383_v40  ;;  %v449_v44 = vand.u32 4294901760, %v7834_v50  ;;  %v10387_v47 = vld [vmem:[#allocation50_spill] sm:$0xff]  ;;  %v10400_v40 = vld [vmem:[#allocation53_spill] sm:$0xff] }
 0x15c   :  { %1784 = vmatprep.mubr.f32.mxu0 %v368_v13  ;;  %5824 = vmatpush1.bf16.msra.mxu0 %v5823_v46  ;;  %v5829_v48 = vpack.c.bf16 %v10377_v2, %v10375_v58  ;;  %v428_v46 = vand.u32 4294901760, %v7815_v15 }
 0x15d   :  { %5825 = vmatprep.subr.bf16.mxu0 %v10082_v18  ;;  %v405_v13 = vsub.f32 %v7798_v12, %v404_v21  ;;  %392 = vmatmul.mubr.f32.gmra.mrb[16].mxu1 %v391_v54  ;;  %v10380_v12 = vld [vmem:[#allocation44_spill] sm:$0xff]  ;;  %v450_v30 = vsub.f32 %v7834_v50, %v449_v44 }
 0x15e   :  { %401 = vmatprep.mubr.f32.mxu1 %v400_v3  ;;  %v10381_v10 = vand.u32 4294901760, %v10380_v12  ;;  %v429_v41 = vsub.f32 %v7815_v15, %v428_v46  ;;  %v444_v15 = vsub.f32 %v7827_v23, %v443_v0  ;;  %v459_v23 = vsub.f32 %v7839_v37, %v458_v9  ;;  %v10394_v50 = vld [vmem:[#allocation60_spill] sm:$0xff] }
 0x15f   :  { %1788 = vmatmul.mubr.f32.gmra.mrb[14].mxu0 %v374_v62  ;;  %v419_v62 = vand.u32 4294901760, %v7810_v45  ;;  %v406_v7 = vand.u32 4294901760, %v405_v13  ;;  %v451_v2 = vand.u32 4294901760, %v450_v30  ;;  %v10392_v13 = vld [vmem:[#allocation57_spill] sm:$0xff]  ;;  %v10395_v3 = vand.u32 4294901760, %v10394_v50 }
 0x160   :  { %1795 = vmatprep.mubr.f32.mxu0 %v383_v43  ;;  %5827 = vmatpush1.bf16.msra.mxu0 %v5826_v4  ;;  %v5832_v6 = vpack.c.bf16 %v10381_v10, %v10379_v29  ;;  %v434_v43 = vand.u32 4294901760, %v7822_v59  ;;  %v430_v4 = vand.u32 4294901760, %v429_v41  ;;  %v445_v58 = vand.u32 4294901760, %v444_v15  ;;  %v10396_v10 = vld [vmem:[#allocation63_spill] sm:$0xff] }
 0x161   :  { %5828 = vmatprep.subr.bf16.mxu0 %v10082_v18  ;;  %v420_v42 = vsub.f32 %v7810_v45, %v419_v62  ;;  %407 = vmatmul.mubr.f32.gmra.mrb[18].mxu1 %v406_v7  ;;  %v10385_v45 = vld [vmem:[#allocation49_spill] sm:$0xff]  ;;  %v465_v7 = vsub.f32 %v7846_v26, %v464_v20  ;;  %v460_v53 = vand.u32 4294901760, %v459_v23  ;;  %v479_v29 = vand.u32 4294901760, %v7858_v28  ;;  %v10398_v26 = vld [vmem:[#allocation64_spill] sm:$0xff] }
 0x162   :  { %416 = vmatprep.mubr.f32.mxu1 %v415_v39  ;;  %v10386_v24 = vand.u32 4294901760, %v10385_v45  ;;  %v435_v11 = vsub.f32 %v7822_v59, %v434_v43  ;;  %v10389_v59 = vld [vmem:[#allocation51_spill] sm:$0xff]  ;;  %v474_v37 = vsub.f32 %v7851_v16, %v473_v60  ;;  %v10407_v23 = vld [vmem:[#allocation68_spill] sm:$0xff] }
 0x163   :  { %1799 = vmatmul.mubr.f32.gmra.mrb[16].mxu0 %v389_v1  ;;  %v421_v8 = vand.u32 4294901760, %v420_v42  ;;  %v10382_v1 = vld [vmem:[#allocation45_spill] sm:$0xff]  ;;  %v10390_v54 = vand.u32 4294901760, %v10389_v59  ;;  %v466_v12 = vand.u32 4294901760, %v465_v7  ;;  %v10399_v42 = vand.u32 4294901760, %v10398_v26  ;;  %v10405_v59 = vld [vmem:[#allocation59_spill] sm:$0xff] }
 0x164   :  { %1806 = vmatprep.mubr.f32.mxu0 %v398_v34  ;;  %5830 = vmatpush1.bf16.msra.mxu0 %v5829_v48  ;;  %v5835_v51 = vpack.c.bf16 %v10386_v24, %v10384_v32  ;;  %v436_v34 = vand.u32 4294901760, %v435_v11  ;;  %v10391_v48 = vld [vmem:[#allocation48_spill] sm:$0xff]  ;;  %v480_v39 = vsub.f32 %v7858_v28, %v479_v29  ;;  %v10401_v32 = vand.u32 4294901760, %v7209_v49  ;;  %v10412_v26 = vld [vmem:[#allocation118_spill] sm:$0xff] }
 0x165   :  { %5831 = vmatprep.subr.bf16.mxu0 %v10082_v18  ;;  %6113 = vmatpush1.bf16.msra.mxu1 %v10382_v1  ;;  %v494_v1 = vand.u32 4294901760, %v7872_v38  ;;  %v10402_v28 = vand.u32 4294901760, %v7217_v61  ;;  %v10403_v61 = vand.u32 4294901760, %v7251_v35  ;;  %v10404_v49 = vand.u32 4294901760, %v7259_v5 }
 0x166   :  { %422 = vmatmul.mubr.f32.gmra.mrb[20].mxu1 %v421_v8  ;;  %6098 = vmatprep.subr.bf16.mxu1 %v10082_v18  ;;  %v475_v8 = vand.u32 4294901760, %v474_v37  ;;  %v481_v41 = vand.u32 4294901760, %v480_v39  ;;  %v10410_v37 = vld [vmem:[#allocation70_spill] sm:$0xff] }
 0x167   :  { %1810 = vmatmul.mubr.f32.gmra.mrb[18].mxu0 %v404_v21  ;;  %431 = vmatprep.mubr.f32.mxu1 %v430_v4  ;;  %v10388_v21 = vand.u32 4294901760, %v10387_v47  ;;  %v5847_v45 = vpack.c.bf16 %v10402_v28, %v10401_v32  ;;  %v495_v24 = vsub.f32 %v7872_v38, %v494_v1  ;;  %v5850_v38 = vpack.c.bf16 %v10404_v49, %v10403_v61 }
 0x168   :  { %1817 = vmatprep.mubr.f32.mxu0 %v413_v52  ;;  %5833 = vmatpush1.bf16.msra.mxu0 %v5832_v6  ;;  %v10393_v52 = vand.u32 4294901760, %v10392_v13  ;;  %v10397_v6 = vand.u32 4294901760, %v10396_v10  ;;  %v524_v47 = vand.u32 4294901760, %v7900_v17 }
 0x169   :  { %5834 = vmatprep.subr.bf16.mxu0 %v10082_v18  ;;  %v5838_v19 = vpack.c.bf16 %v10390_v54, %v10388_v21  ;;  %6114 = vmatpush1.bf16.msra.mxu1 %v10391_v48  ;;  %v496_v4 = vand.u32 4294901760, %v495_v24  ;;  %v539_v54 = vand.u32 4294901760, %v7912_v56  ;;  %v10416_v24 = vld [vmem:[#allocation74_spill] sm:$0xff] }
 0x16a   :  { %437 = vmatmul.mubr.f32.gmra.mrb[22].mxu1 %v436_v34  ;;  %6099 = vmatprep.subr.bf16.mxu1 %v10082_v18  ;;  %v518_v34 = vand.u32 4294901760, %v7892_v63  ;;  %v525_v5 = vsub.f32 %v7900_v17, %v524_v47  ;;  %v548_v17 = vand.u32 4294901760, %v7918_v57 }
 0x16b   :  { %1821 = vmatmul.mubr.f32.gmra.mrb[20].mxu0 %v419_v62  ;;  %446 = vmatprep.mubr.f32.mxu1 %v445_v58  ;;  %v5841_v62 = vpack.c.bf16 %v10395_v3, %v10393_v52  ;;  %v569_v52 = vand.u32 4294901760, %v7936_v25 }
 0x16c   :  { %1828 = vmatprep.mubr.f32.mxu0 %v428_v46  ;;  %5836 = vmatpush1.bf16.msra.mxu0 %v5835_v51  ;;  %v5844_v46 = vpack.c.bf16 %v10399_v42, %v10397_v6  ;;  %v503_v51 = vand.u32 4294901760, %v7878_v33  ;;  %v519_v35 = vsub.f32 %v7892_v63, %v518_v34  ;;  %v540_v63 = vsub.f32 %v7912_v56, %v539_v54 }
 0x16d   :  { %5837 = vmatprep.subr.bf16.mxu0 %v10082_v18  ;;  %6115 = vmatpush1.bf16.msra.mxu1 %v10400_v40  ;;  %v549_v48 = vsub.f32 %v7918_v57, %v548_v17  ;;  %v563_v56 = vand.u32 4294901760, %v7930_v55  ;;  %v570_v57 = vsub.f32 %v7936_v25, %v569_v52  ;;  %v10411_v25 = vld [vmem:[#allocation115_spill] sm:$0xff]  ;;  %v599_v42 = vand.u32 4294901760, %v10412_v26  ;;  %v10415_v40 = vld [vmem:[#allocation125_spill] sm:$0xff] }
 0x16e   :  { %452 = vmatmul.mubr.f32.gmra.mrb[24].mxu1 %v451_v2  ;;  %6100 = vmatprep.subr.bf16.mxu1 %v10082_v18  ;;  %v541_v2 = vand.u32 4294901760, %v540_v63  ;;  %v593_v10 = vand.u32 4294901760, %v10411_v25 }
 0x16f   :  { %1832 = vmatmul.mubr.f32.gmra.mrb[22].mxu0 %v434_v43  ;;  %461 = vmatprep.mubr.f32.mxu1 %v460_v53  ;;  %v488_v43 = vand.u32 4294901760, %v7863_v22  ;;  %v550_v13 = vand.u32 4294901760, %v549_v48  ;;  %v564_v3 = vsub.f32 %v7930_v55, %v563_v56 }
 0x170   :  { %1839 = vmatprep.mubr.f32.mxu0 %v443_v0  ;;  %5839 = vmatpush1.bf16.msra.mxu0 %v5838_v19  ;;  %v509_v0 = vand.u32 4294901760, %v7886_v36  ;;  %v526_v19 = vand.u32 4294901760, %v525_v5  ;;  %v594_v39 = vsub.f32 %v10411_v25, %v593_v10 }
 0x171   :  { %5840 = vmatprep.subr.bf16.mxu0 %v10082_v18  ;;  %v489_v16 = vsub.f32 %v7863_v22, %v488_v43  ;;  %v504_v22 = vsub.f32 %v7878_v33, %v503_v51  ;;  %6116 = vmatpush1.bf16.msra.mxu1 %v10405_v59  ;;  %v533_v33 = vand.u32 4294901760, %v7906_v14  ;;  %v565_v7 = vand.u32 4294901760, %v564_v3 }
 0x172   :  { %467 = vmatmul.mubr.f32.gmra.mrb[26].mxu1 %v466_v12  ;;  %6101 = vmatprep.subr.bf16.mxu1 %v10082_v18 }
 0x173   :  { %1843 = vmatmul.mubr.f32.gmra.mrb[24].mxu0 %v449_v44  ;;  %476 = vmatprep.mubr.f32.mxu1 %v475_v8  ;;  %v490_v11 = vand.u32 4294901760, %v489_v16  ;;  %v510_v44 = vsub.f32 %v7886_v36, %v509_v0  ;;  %v505_v15 = vand.u32 4294901760, %v504_v22  ;;  %v520_v36 = vand.u32 4294901760, %v519_v35  ;;  %v10414_v8 = vld [vmem:[#allocation123_spill] sm:$0xff] }
 0x174   :  { %1850 = vmatprep.mubr.f32.mxu0 %v458_v9  ;;  %5842 = vmatpush1.bf16.msra.mxu0 %v5841_v62  ;;  %v534_v30 = vsub.f32 %v7906_v14, %v533_v33  ;;  %v10406_v9 = vld [vmem:[#allocation65_spill] sm:$0xff]  ;;  %v614_v16 = vand.u32 4294901760, %v10415_v40 }
 0x175   :  { %5843 = vmatprep.subr.bf16.mxu0 %v10082_v18  ;;  %v511_v21 = vand.u32 4294901760, %v510_v44  ;;  %6117 = vmatpush1.bf16.msra.mxu1 %v10406_v9  ;;  %v10408_v62 = vld [vmem:[#allocation69_spill] sm:$0xff]  ;;  %v10419_v44 = vld [vmem:[#allocation76_spill] sm:$0xff] }
 0x176   :  { %482 = vmatmul.mubr.f32.gmra.mrb[28].mxu1 %v481_v41  ;;  %v535_v58 = vand.u32 4294901760, %v534_v30  ;;  %6102 = vmatprep.subr.bf16.mxu1 %v10082_v18  ;;  %v595_v41 = vand.u32 4294901760, %v594_v39  ;;  %v10423_v30 = vld [vmem:[#allocation137_spill] sm:$0xff] }
 0x177   :  { %1854 = vmatmul.mubr.f32.gmra.mrb[26].mxu0 %v464_v20  ;;  %491 = vmatprep.mubr.f32.mxu1 %v490_v11  ;;  %v554_v20 = vand.u32 4294901760, %v7924_v27  ;;  %v659_v63 = vand.u32 4294901760, %v10423_v30 }
 0x178   :  { %1861 = vmatprep.mubr.f32.mxu0 %v473_v60  ;;  %5845 = vmatpush1.bf16.msra.mxu0 %v5844_v46  ;;  %v10409_v60 = vld [vmem:[#allocation111_spill] sm:$0xff] }
 0x179   :  { %5846 = vmatprep.subr.bf16.mxu0 %v10082_v18  ;;  %v555_v14 = vsub.f32 %v7924_v27, %v554_v20  ;;  %6118 = vmatpush1.bf16.msra.mxu1 %v10407_v23  ;;  %v578_v27 = vand.u32 4294901760, %v7942_v31  ;;  %v584_v53 = vand.u32 4294901760, %v10409_v60 }
 0x17a   :  { %497 = vmatmul.mubr.f32.gmra.mrb[30].mxu1 %v496_v4  ;;  %6103 = vmatprep.subr.bf16.mxu1 %v10082_v18  ;;  %v10418_v4 = vld [vmem:[#allocation129_spill] sm:$0xff] }
 0x17b   :  { %1865 = vmatmul.mubr.f32.gmra.mrb[28].mxu0 %v479_v29  ;;  %506 = vmatprep.mubr.f32.mxu1 %v505_v15  ;;  %v556_v50 = vand.u32 4294901760, %v555_v14  ;;  %v571_v29 = vand.u32 4294901760, %v570_v57  ;;  %v579_v12 = vsub.f32 %v7942_v31, %v578_v27  ;;  %v585_v55 = vsub.f32 %v10409_v60, %v584_v53  ;;  %v10425_v14 = vld [vmem:[#allocation141_spill] sm:$0xff] }
 0x17c   :  { %1872 = vmatprep.mubr.f32.mxu0 %v488_v43  ;;  %5848 = vmatpush1.bf16.msra.mxu0 %v5847_v45  ;;  %v600_v31 = vsub.f32 %v10412_v26, %v599_v42  ;;  %v10413_v43 = vld [vmem:[#allocation72_spill] sm:$0xff]  ;;  %v615_v45 = vsub.f32 %v10415_v40, %v614_v16  ;;  %v629_v22 = vand.u32 4294901760, %v10418_v4  ;;  %v674_v23 = vand.u32 4294901760, %v10425_v14  ;;  %v10432_v40 = vld [vmem:[#allocation155_spill] sm:$0xff] }
 0x17d   :  { %5849 = vmatprep.subr.bf16.mxu0 %v10082_v18  ;;  %6119 = vmatpush1.bf16.msra.mxu1 %v10408_v62  ;;  %v580_v6 = vand.u32 4294901760, %v579_v12  ;;  %v586_v46 = vand.u32 4294901760, %v585_v55  ;;  %v10427_v62 = vld [vmem:[#allocation145_spill] sm:$0xff] }
 0x17e   :  { %512 = vmatmul.mubr.f32.gmra.mrb[32].mxu1 %v511_v21  ;;  %6104 = vmatprep.subr.bf16.mxu1 %v10082_v18  ;;  %v601_v32 = vand.u32 4294901760, %v600_v31  ;;  %v616_v61 = vand.u32 4294901760, %v615_v45  ;;  %v10421_v21 = vld [vmem:[#allocation133_spill] sm:$0xff] }
 0x17f   :  { %1876 = vmatmul.mubr.f32.gmra.mrb[30].mxu0 %v494_v1  ;;  %521 = vmatprep.mubr.f32.mxu1 %v520_v36  ;;  %v608_v1 = vand.u32 4294901760, %v10414_v8  ;;  %v644_v59 = vand.u32 4294901760, %v10421_v21  ;;  %v10422_v36 = vld [vmem:[#allocation135_spill] sm:$0xff]  ;;  %v10431_v31 = vld [vmem:[#allocation153_spill] sm:$0xff] }
 0x180   :  { %1883 = vmatprep.mubr.f32.mxu0 %v503_v51  ;;  %5851 = vmatpush1.bf16.msra.mxu0 %v5850_v38  ;;  %v10417_v51 = vld [vmem:[#allocation127_spill] sm:$0xff]  ;;  %v630_v38 = vsub.f32 %v10418_v4, %v629_v22 }
 0x181   :  { %5852 = vmatprep.subr.bf16.mxu0 %v10082_v18  ;;  %6120 = vmatpush1.bf16.msra.mxu1 %v10410_v37  ;;  %v609_v28 = vsub.f32 %v10414_v8, %v608_v1  ;;  %v623_v11 = vand.u32 4294901760, %v10417_v51  ;;  %v10429_v37 = vld [vmem:[#allocation149_spill] sm:$0xff] }
 0x182   :  { %527 = vmatmul.mubr.f32.gmra.mrb[34].mxu1 %v526_v19  ;;  %6105 = vmatprep.subr.bf16.mxu1 %v10082_v18  ;;  %v631_v35 = vand.u32 4294901760, %v630_v38  ;;  %v704_v25 = vand.u32 4294901760, %v10429_v37  ;;  %v10437_v38 = vld [vmem:[#allocation93_spill] sm:$0xff] }
 0x183   :  { %1887 = vmatmul.mubr.f32.gmra.mrb[32].mxu0 %v509_v0  ;;  %536 = vmatprep.mubr.f32.mxu1 %v535_v58  ;;  %v610_v0 = vand.u32 4294901760, %v609_v28  ;;  %v624_v49 = vsub.f32 %v10417_v51, %v623_v11  ;;  %v660_v58 = vsub.f32 %v10423_v30, %v659_v63  ;;  %v10433_v28 = vld [vmem:[#allocation156_spill] sm:$0xff]  ;;  %v10450_v30 = vld [vmem:[#allocation75_spill] sm:$0xff] }
 0x184   :  { %1894 = vmatprep.mubr.f32.mxu0 %v518_v34  ;;  %v10420_v34 = vld [vmem:[#allocation131_spill] sm:$0xff]  ;;  %v705_v26 = vsub.f32 %v10429_v37, %v704_v25  ;;  %v734_v45 = vand.u32 4294901760, %v10433_v28  ;;  %v10474_v37 = vld [vmem:[#allocation97_spill] sm:$0xff] }
 0x185   :  { %6121 = vmatpush1.bf16.msra.mxu1 %v10413_v43  ;;  %v638_v15 = vand.u32 4294901760, %v10420_v34  ;;  %v719_v43 = vand.u32 4294901760, %v10431_v31 }
 0x186   :  { %542 = vmatmul.mubr.f32.gmra.mrb[36].mxu1 %v541_v2  ;;  %6106 = vmatprep.subr.bf16.mxu1 %v10082_v18  ;;  %v706_v8 = vand.u32 4294901760, %v705_v26  ;;  %v10478_v26 = vld [vmem:[#allocation42_spill] sm:$0xff] }
 0x187   :  { %1898 = vmatmul.mubr.f32.gmra.mrb[34].mxu0 %v524_v47  ;;  %551 = vmatprep.mubr.f32.mxu1 %v550_v13  ;;  %v625_v47 = vand.u32 4294901760, %v624_v49  ;;  %v639_v5 = vsub.f32 %v10420_v34, %v638_v15  ;;  %v10436_v49 = vld [vmem:[#allocation56_spill] sm:$0xff]  ;;  %v10439_v34 = vld [vmem:[#allocation71_spill] sm:$0xff] }
 0x188   :  { %1905 = vmatprep.mubr.f32.mxu0 %v533_v33  ;;  %v645_v33 = vsub.f32 %v10421_v21, %v644_v59  ;;  %v10442_v21 = vld [vmem:[#allocation96_spill] sm:$0xff] }
 0x189   :  { %6122 = vmatpush1.bf16.msra.mxu1 %v10416_v24  ;;  %v640_v19 = vand.u32 4294901760, %v639_v5  ;;  %v10445_v5 = vld [vmem:[#allocation73_spill] sm:$0xff] }
 0x18a   :  { %557 = vmatmul.mubr.f32.gmra.mrb[38].mxu1 %v556_v50  ;;  %6107 = vmatprep.subr.bf16.mxu1 %v10082_v18  ;;  %v646_v9 = vand.u32 4294901760, %v645_v33  ;;  %v10426_v50 = vld [vmem:[#allocation143_spill] sm:$0xff]  ;;  %v10446_v33 = vld [vmem:[#allocation98_spill] sm:$0xff] }
 0x18b   :  { %1909 = vmatmul.mubr.f32.gmra.mrb[36].mxu0 %v539_v54  ;;  %566 = vmatprep.mubr.f32.mxu1 %v565_v7  ;;  %v653_v54 = vand.u32 4294901760, %v10422_v36  ;;  %v683_v3 = vand.u32 4294901760, %v10426_v50 }
 0x18c   :  { %1916 = vmatprep.mubr.f32.mxu0 %v548_v17 }
 0x18d   :  { %6123 = vmatpush1.bf16.msra.mxu1 %v10419_v44  ;;  %v654_v17 = vsub.f32 %v10422_v36, %v653_v54  ;;  %v684_v60 = vsub.f32 %v10426_v50, %v683_v3  ;;  %v10438_v44 = vld [vmem:[#allocation78_spill] sm:$0xff]  ;;  %v10447_v36 = vld [vmem:[#allocation99_spill] sm:$0xff] }
 0x18e   :  { %572 = vmatmul.mubr.f32.gmra.mrb[40].mxu1 %v571_v29  ;;  %v10428_v29 = vld [vmem:[#allocation147_spill] sm:$0xff] }
 0x18f   :  { %1920 = vmatmul.mubr.f32.gmra.mrb[38].mxu0 %v554_v20  ;;  %581 = vmatprep.mubr.f32.mxu1 %v580_v6  ;;  %v10424_v20 = vld [vmem:[#allocation139_spill] sm:$0xff]  ;;  %v655_v48 = vand.u32 4294901760, %v654_v17  ;;  %v698_v12 = vand.u32 4294901760, %v10428_v29  ;;  %v685_v55 = vand.u32 4294901760, %v684_v60  ;;  %v10469_v60 = vld [vmem:[#allocation94_spill] sm:$0xff] }
 0x190   :  { %1927 = vmatprep.mubr.f32.mxu0 %v563_v56  ;;  %v668_v2 = vand.u32 4294901760, %v10424_v20  ;;  %v661_v56 = vand.u32 4294901760, %v660_v58  ;;  %v10453_v17 = vld [vmem:[#allocation87_spill] sm:$0xff]  ;;  %v10454_v58 = vld [vmem:[#allocation88_spill] sm:$0xff] }
 0x191   :  { %v699_v6 = vsub.f32 %v10428_v29, %v698_v12  ;;  %v10463_v50 = vld [vmem:[#allocation31_spill] sm:$0xff] }
 0x192   :  { %587 = vmatmul.mubr.f32.gmra.mrb[42].mxu1 %v586_v46  ;;  %v669_v13 = vsub.f32 %v10424_v20, %v668_v2  ;;  %v10455_v20 = vld [vmem:[#allocation77_spill] sm:$0xff]  ;;  %v10471_v29 = vld [vmem:[#allocation119_spill] sm:$0xff] }
 0x193   :  { %1931 = vmatmul.mubr.f32.gmra.mrb[40].mxu0 %v569_v52  ;;  %596 = vmatprep.mubr.f32.mxu1 %v595_v41  ;;  %v675_v52 = vsub.f32 %v10425_v14, %v674_v23  ;;  %v700_v39 = vand.u32 4294901760, %v699_v6  ;;  %v720_v41 = vsub.f32 %v10431_v31, %v719_v43  ;;  %v10458_v14 = vld [vmem:[#allocation90_spill] sm:$0xff]  ;;  %v10477_v6 = vld [vmem:[#allocation128_spill] sm:$0xff] }
 0x194   :  { %1938 = vmatprep.mubr.f32.mxu0 %v578_v27  ;;  %v670_v57 = vand.u32 4294901760, %v669_v13  ;;  %v689_v27 = vand.u32 4294901760, %v10427_v62  ;;  %v10461_v13 = vld [vmem:[#allocation108_spill] sm:$0xff] }
 0x195   :  { %v676_v7 = vand.u32 4294901760, %v675_v52  ;;  %v721_v24 = vand.u32 4294901760, %v720_v41  ;;  %v10462_v52 = vld [vmem:[#allocation109_spill] sm:$0xff]  ;;  %v10482_v31 = vld [vmem:[#allocation132_spill] sm:$0xff]  ;;  %v10486_v41 = vld [vmem:[#allocation134_spill] sm:$0xff] }
 0x196   :  { %602 = vmatmul.mubr.f32.gmra.mrb[44].mxu1 %v601_v32 }
 0x197   :  { %1942 = vmatmul.mubr.f32.gmra.mrb[42].mxu0 %v584_v53  ;;  %611 = vmatprep.mubr.f32.mxu1 %v610_v0  ;;  %v690_v53 = vsub.f32 %v10427_v62, %v689_v27  ;;  %v10466_v62 = vld [vmem:[#allocation112_spill] sm:$0xff] }
 0x198   :  { %1949 = vmatprep.mubr.f32.mxu0 %v593_v10 }
 0x199   :  { %v691_v10 = vand.u32 4294901760, %v690_v53  ;;  %v10470_v53 = vld [vmem:[#allocation86_spill] sm:$0xff] }
 0x19a   :  { %617 = vmatmul.mubr.f32.gmra.mrb[46].mxu1 %v616_v61  ;;  %v10435_v61 = vld [vmem:[#allocation62_spill] sm:$0xff] }
 0x19b   :  { %1953 = vmatmul.mubr.f32.gmra.mrb[44].mxu0 %v599_v42  ;;  %626 = vmatprep.mubr.f32.mxu1 %v625_v47  ;;  %v10430_v42 = vld [vmem:[#allocation151_spill] sm:$0xff] }
 0x19c   :  { %1960 = vmatprep.mubr.f32.mxu0 %v608_v1  ;;  %v713_v46 = vand.u32 4294901760, %v10430_v42  ;;  %v10441_v47 = vld [vmem:[#allocation95_spill] sm:$0xff] }
 0x19e   :  { %632 = vmatmul.mubr.f32.gmra.mrb[48].mxu1 %v631_v35  ;;  %v714_v1 = vsub.f32 %v10430_v42, %v713_v46  ;;  %v10444_v35 = vld [vmem:[#allocation82_spill] sm:$0xff]  ;;  %v10479_v42 = vld [vmem:[#allocation100_spill] sm:$0xff] }
 0x19f   :  { %1964 = vmatmul.mubr.f32.gmra.mrb[46].mxu0 %v614_v16  ;;  %641 = vmatprep.mubr.f32.mxu1 %v640_v19  ;;  %v728_v16 = vand.u32 4294901760, %v10432_v40  ;;  %v10449_v19 = vld [vmem:[#allocation85_spill] sm:$0xff] }
 0x1a0   :  { %1971 = vmatprep.mubr.f32.mxu0 %v623_v11  ;;  %v715_v32 = vand.u32 4294901760, %v714_v1  ;;  %v735_v11 = vsub.f32 %v10433_v28, %v734_v45  ;;  %v10485_v1 = vld [vmem:[#allocation34_spill] sm:$0xff]  ;;  %v10490_v28 = vld [vmem:[#allocation39_spill] sm:$0xff] }
 0x1a1   :  { %v729_v51 = vsub.f32 %v10432_v40, %v728_v16  ;;  %v10487_v40 = vld [vmem:[#allocation136_spill] sm:$0xff] }
 0x1a2   :  { %647 = vmatmul.mubr.f32.gmra.mrb[50].mxu1 %v646_v9  ;;  %v736_v4 = vand.u32 4294901760, %v735_v11  ;;  %v10452_v9 = vld [vmem:[#allocation102_spill] sm:$0xff]  ;;  %v10494_v11 = vld [vmem:[#allocation55_spill] sm:$0xff] }
 0x1a3   :  { %1975 = vmatmul.mubr.f32.gmra.mrb[48].mxu0 %v629_v22  ;;  %656 = vmatprep.mubr.f32.mxu1 %v655_v48  ;;  %v730_v0 = vand.u32 4294901760, %v729_v51  ;;  %v10434_v22 = vld [vmem:[#allocation67_spill] sm:$0xff]  ;;  %v10457_v48 = vld [vmem:[#allocation105_spill] sm:$0xff]  ;;  %v10493_v51 = vld [vmem:[#allocation110_spill] sm:$0xff] }
 0x1a4   :  { %1982 = vmatprep.mubr.f32.mxu0 %v638_v15  ;;  %v10440_v15 = vld [vmem:[#allocation79_spill] sm:$0xff] }
 0x1a6   :  { %662 = vmatmul.mubr.f32.gmra.mrb[52].mxu1 %v661_v56  ;;  %v10460_v56 = vld [vmem:[#allocation80_spill] sm:$0xff] }
 0x1a7   :  { %1986 = vmatmul.mubr.f32.gmra.mrb[50].mxu0 %v644_v59  ;;  %671 = vmatprep.mubr.f32.mxu1 %v670_v57  ;;  %v10443_v59 = vld [vmem:[#allocation81_spill] sm:$0xff]  ;;  %v10465_v57 = vld [vmem:[#allocation83_spill] sm:$0xff] }
 0x1a8   :  { %1993 = vmatprep.mubr.f32.mxu0 %v653_v54  ;;  %v10448_v54 = vld [vmem:[#allocation84_spill] sm:$0xff] }
 0x1aa   :  { %677 = vmatmul.mubr.f32.gmra.mrb[54].mxu1 %v676_v7  ;;  %v10468_v7 = vld [vmem:[#allocation35_spill] sm:$0xff] }
 0x1ab   :  { %1997 = vmatmul.mubr.f32.gmra.mrb[52].mxu0 %v659_v63  ;;  %686 = vmatprep.mubr.f32.mxu1 %v685_v55  ;;  %v10451_v63 = vld [vmem:[#allocation101_spill] sm:$0xff]  ;;  %v10473_v55 = vld [vmem:[#allocation40_spill] sm:$0xff] }
 0x1ac   :  { %2004 = vmatprep.mubr.f32.mxu0 %v668_v2  ;;  %v10456_v2 = vld [vmem:[#allocation104_spill] sm:$0xff] }
 0x1ae   :  { %692 = vmatmul.mubr.f32.gmra.mrb[56].mxu1 %v691_v10  ;;  %v10476_v10 = vld [vmem:[#allocation126_spill] sm:$0xff] }
 0x1af   :  { %2008 = vmatmul.mubr.f32.gmra.mrb[54].mxu0 %v674_v23  ;;  %701 = vmatprep.mubr.f32.mxu1 %v700_v39  ;;  %v10459_v23 = vld [vmem:[#allocation91_spill] sm:$0xff]  ;;  %v10481_v39 = vld [vmem:[#allocation130_spill] sm:$0xff] }
 0x1b0   :  { %2015 = vmatprep.mubr.f32.mxu0 %v683_v3  ;;  %v10464_v3 = vld [vmem:[#allocation92_spill] sm:$0xff] }
 0x1b2   :  { %707 = vmatmul.mubr.f32.gmra.mrb[58].mxu1 %v706_v8  ;;  %v10484_v8 = vld [vmem:[#allocation52_spill] sm:$0xff] }
 0x1b3   :  { %2019 = vmatmul.mubr.f32.gmra.mrb[56].mxu0 %v689_v27  ;;  %716 = vmatprep.mubr.f32.mxu1 %v715_v32  ;;  %v10467_v27 = vld [vmem:[#allocation116_spill] sm:$0xff]  ;;  %v10489_v32 = vld [vmem:[#allocation107_spill] sm:$0xff] }
 0x1b4   :  { %2026 = vmatprep.mubr.f32.mxu0 %v698_v12  ;;  %v10472_v12 = vld [vmem:[#allocation124_spill] sm:$0xff] }
 0x1b6   :  { %722 = vmatmul.mubr.f32.gmra.mrb[60].mxu1 %v721_v24  ;;  %v10492_v24 = vld [vmem:[#allocation140_spill] sm:$0xff] }
 0x1b7   :  { %2030 = vmatmul.mubr.f32.gmra.mrb[58].mxu0 %v704_v25  ;;  %731 = vmatprep.mubr.f32.mxu1 %v730_v0  ;;  %v10475_v25 = vld [vmem:[#allocation89_spill] sm:$0xff] }
 0x1b8   :  { %2037 = vmatprep.mubr.f32.mxu0 %v713_v46  ;;  %v10480_v46 = vld [vmem:[#allocation29_spill] sm:$0xff] }
 0x1b9   :  { %v10495_v0 = vld [vmem:[#allocation41_spill] sm:$0xff] }
 0x1ba   :  { %737 = vmatmul.mubr.f32.gmra.mrb[62].mxu1 %v736_v4  ;;  %v10496_v4 = vld [vmem:[#allocation142_spill] sm:$0xff] }
 0x1bb   :  { %2041 = vmatmul.mubr.f32.gmra.mrb[60].mxu0 %v719_v43  ;;  %1079 = vmatprep.mubr.f32.mxu1 %v10434_v22  ;;  %v10483_v43 = vld [vmem:[#allocation103_spill] sm:$0xff] }
 0x1bc   :  { %2048 = vmatprep.mubr.f32.mxu0 %v728_v16  ;;  %v10488_v16 = vld [vmem:[#allocation106_spill] sm:$0xff] }
 0x1be   :  { %1081 = vmatmul.mubr.f32.vlgmr.msra.gmra.mrb[32].mxu1 %v10436_v49 }
 0x1bf   :  { %2052 = vmatmul.mubr.f32.gmra.mrb[62].mxu0 %v734_v45  ;;  %1086 = vmatprep.mubr.f32.mxu1 %v10437_v38  ;;  %v10491_v45 = vld [vmem:[#allocation138_spill] sm:$0xff] }
 0x1c0   :  { %2218 = vmatprep.mubr.f32.mxu0 %v10435_v61 }
 0x1c2   :  { %1088 = vmatmul.mubr.f32.gmra.mrb[34].mxu1 %v10441_v47 }
 0x1c3   :  { %2220 = vmatmul.mubr.f32.vlgmr.msra.gmra.mrb[0].mxu0 %v10438_v44  ;;  %1093 = vmatprep.mubr.f32.mxu1 %v10442_v21 }
 0x1c4   :  { %5854 = vmatpush1.bf16.msra.mxu0 %v10439_v34  ;;  %2225 = vmatprep.mubr.f32.mxu0 %v10440_v15  ;;  %v10497_v34 = vld [vmem:[#allocation144_spill] sm:$0xff] }
 0x1c5   :  { %5855 = vmatprep.subr.bf16.mxu0 %v10082_v18 }
 0x1c6   :  { %1095 = vmatmul.mubr.f32.gmra.mrb[36].mxu1 %v10446_v33 }
 0x1c7   :  { %2227 = vmatmul.mubr.f32.gmra.mrb[2].mxu0 %v10443_v59  ;;  %1100 = vmatprep.mubr.f32.mxu1 %v10447_v36 }
 0x1c8   :  { %2232 = vmatprep.mubr.f32.mxu0 %v10444_v35  ;;  %5857 = vmatpush1.bf16.msra.mxu0 %v10445_v5  ;;  %v10498_v5 = vld [vmem:[#allocation113_spill] sm:$0xff] }
 0x1c9   :  { %5858 = vmatprep.subr.bf16.mxu0 %v10082_v18 }
 0x1ca   :  { %1102 = vmatmul.mubr.f32.gmra.mrb[38].mxu1 %v10451_v63 }
 0x1cb   :  { %2234 = vmatmul.mubr.f32.gmra.mrb[4].mxu0 %v10448_v54  ;;  %1107 = vmatprep.mubr.f32.mxu1 %v10452_v9 }
 0x1cc   :  { %2239 = vmatprep.mubr.f32.mxu0 %v10449_v19  ;;  %5860 = vmatpush1.bf16.msra.mxu0 %v10450_v30  ;;  %v10499_v30 = vld [vmem:[#allocation114_spill] sm:$0xff] }
 0x1cd   :  { %5861 = vmatprep.subr.bf16.mxu0 %v10082_v18 }
 0x1ce   :  { %1109 = vmatmul.mubr.f32.gmra.mrb[40].mxu1 %v10456_v2 }
 0x1cf   :  { %2241 = vmatmul.mubr.f32.gmra.mrb[6].mxu0 %v10453_v17  ;;  %1114 = vmatprep.mubr.f32.mxu1 %v10457_v48 }
 0x1d0   :  { %2246 = vmatprep.mubr.f32.mxu0 %v10454_v58  ;;  %5863 = vmatpush1.bf16.msra.mxu0 %v10455_v20  ;;  %v10500_v20 = vld [vmem:[#allocation47_spill] sm:$0xff] }
 0x1d1   :  { %5864 = vmatprep.subr.bf16.mxu0 %v10082_v18 }
 0x1d2   :  { %1116 = vmatmul.mubr.f32.gmra.mrb[42].mxu1 %v10461_v13 }
 0x1d3   :  { %2248 = vmatmul.mubr.f32.gmra.mrb[8].mxu0 %v10458_v14  ;;  %1121 = vmatprep.mubr.f32.mxu1 %v10462_v52 }
 0x1d4   :  { %2253 = vmatprep.mubr.f32.mxu0 %v10459_v23  ;;  %5866 = vmatpush1.bf16.msra.mxu0 %v10460_v56  ;;  %v10501_v56 = vld [vmem:[#allocation146_spill] sm:$0xff] }
 0x1d5   :  { %5867 = vmatprep.subr.bf16.mxu0 %v10082_v18 }
 0x1d6   :  { %1123 = vmatmul.mubr.f32.gmra.mrb[44].mxu1 %v10466_v62 }
 0x1d7   :  { %2255 = vmatmul.mubr.f32.gmra.mrb[10].mxu0 %v10463_v50  ;;  %1128 = vmatprep.mubr.f32.mxu1 %v10467_v27 }
 0x1d8   :  { %2260 = vmatprep.mubr.f32.mxu0 %v10464_v3  ;;  %5869 = vmatpush1.bf16.msra.mxu0 %v10465_v57  ;;  %v10502_v57 = vld [vmem:[#allocation148_spill] sm:$0xff] }
 0x1d9   :  { %5870 = vmatprep.subr.bf16.mxu0 %v10082_v18 }
 0x1da   :  { %1130 = vmatmul.mubr.f32.gmra.mrb[46].mxu1 %v10471_v29 }
 0x1db   :  { %2262 = vmatmul.mubr.f32.gmra.mrb[12].mxu0 %v10468_v7  ;;  %1135 = vmatprep.mubr.f32.mxu1 %v10472_v12 }
 0x1dc   :  { %2267 = vmatprep.mubr.f32.mxu0 %v10469_v60  ;;  %5872 = vmatpush1.bf16.msra.mxu0 %v10470_v53  ;;  %v10503_v53 = vld [vmem:[#allocation117_spill] sm:$0xff] }
 0x1dd   :  { %5873 = vmatprep.subr.bf16.mxu0 %v10082_v18 }
 0x1de   :  { %1137 = vmatmul.mubr.f32.gmra.mrb[48].mxu1 %v10476_v10 }
 0x1df   :  { %2269 = vmatmul.mubr.f32.gmra.mrb[14].mxu0 %v10473_v55  ;;  %1142 = vmatprep.mubr.f32.mxu1 %v10477_v6 }
 0x1e0   :  { %2274 = vmatprep.mubr.f32.mxu0 %v10474_v37  ;;  %5875 = vmatpush1.bf16.msra.mxu0 %v10475_v25  ;;  %v10504_v25 = vld [vmem:[#allocation61_spill] sm:$0xff] }
 0x1e1   :  { %5876 = vmatprep.subr.bf16.mxu0 %v10082_v18 }
 0x1e2   :  { %1144 = vmatmul.mubr.f32.gmra.mrb[50].mxu1 %v10481_v39 }
 0x1e3   :  { %2276 = vmatmul.mubr.f32.gmra.mrb[16].mxu0 %v10478_v26  ;;  %1149 = vmatprep.mubr.f32.mxu1 %v10482_v31 }
 0x1e4   :  { %2281 = vmatprep.mubr.f32.mxu0 %v10479_v42  ;;  %5878 = vmatpush1.bf16.msra.mxu0 %v10480_v46  ;;  %v10505_v46 = vld [vmem:[#allocation54_spill] sm:$0xff] }
 0x1e5   :  { %5879 = vmatprep.subr.bf16.mxu0 %v10082_v18 }
 0x1e6   :  { %1151 = vmatmul.mubr.f32.gmra.mrb[52].mxu1 %v10486_v41 }
 0x1e7   :  { %2283 = vmatmul.mubr.f32.gmra.mrb[18].mxu0 %v10483_v43  ;;  %1156 = vmatprep.mubr.f32.mxu1 %v10487_v40 }
 0x1e8   :  { %2288 = vmatprep.mubr.f32.mxu0 %v10484_v8  ;;  %5881 = vmatpush1.bf16.msra.mxu0 %v10485_v1  ;;  %v10506_v1 = vld [vmem:[#allocation150_spill] sm:$0xff] }
 0x1e9   :  { %5882 = vmatprep.subr.bf16.mxu0 %v10082_v18 }
 0x1ea   :  { %1158 = vmatmul.mubr.f32.gmra.mrb[54].mxu1 %v10491_v45 }
 0x1eb   :  { %2290 = vmatmul.mubr.f32.gmra.mrb[20].mxu0 %v10488_v16  ;;  %1163 = vmatprep.mubr.f32.mxu1 %v10492_v24 }
 0x1ec   :  { %2295 = vmatprep.mubr.f32.mxu0 %v10489_v32  ;;  %5884 = vmatpush1.bf16.msra.mxu0 %v10490_v28  ;;  %v10507_v28 = vld [vmem:[#allocation152_spill] sm:$0xff] }
 0x1ed   :  { %5885 = vmatprep.subr.bf16.mxu0 %v10082_v18 }
 0x1ee   :  { %1165 = vmatmul.mubr.f32.gmra.mrb[56].mxu1 %v10496_v4 }
 0x1ef   :  { %2297 = vmatmul.mubr.f32.gmra.mrb[22].mxu0 %v10493_v51  ;;  %1170 = vmatprep.mubr.f32.mxu1 %v10497_v34 }
 0x1f0   :  { %2302 = vmatprep.mubr.f32.mxu0 %v10494_v11  ;;  %5887 = vmatpush1.bf16.msra.mxu0 %v10495_v0  ;;  %v10508_v0 = vld [vmem:[#allocation120_spill] sm:$0xff] }
 0x1f1   :  { %5888 = vmatprep.subr.bf16.mxu0 %v10082_v18 }
 0x1f2   :  { %1172 = vmatmul.mubr.f32.gmra.mrb[58].mxu1 %v10501_v56 }
 0x1f3   :  { %2304 = vmatmul.mubr.f32.gmra.mrb[24].mxu0 %v10498_v5  ;;  %1177 = vmatprep.mubr.f32.mxu1 %v10502_v57  ;;  %v10511_v5 = vld [vmem:[#allocation154_spill] sm:$0xff] }
 0x1f4   :  { %2309 = vmatprep.mubr.f32.mxu0 %v10499_v30  ;;  %5890 = vmatpush1.bf16.msra.mxu0 %v10500_v20  ;;  %v10509_v20 = vld [vmem:[#allocation121_spill] sm:$0xff]  ;;  %v10510_v30 = vld [vmem:[#allocation58_spill] sm:$0xff] }
 0x1f5   :  { %5891 = vmatprep.subr.bf16.mxu0 %v10082_v18 }
 0x1f6   :  { %1179 = vmatmul.mubr.f32.gmra.mrb[60].mxu1 %v10506_v1 }
 0x1f7   :  { %2311 = vmatmul.mubr.f32.gmra.mrb[26].mxu0 %v10503_v53  ;;  %1184 = vmatprep.mubr.f32.mxu1 %v10507_v28  ;;  %v10512_v53 = vld [vmem:[#allocation122_spill] sm:$0xff] }
 0x1f8   :  { %2316 = vmatprep.mubr.f32.mxu0 %v10504_v25  ;;  %5893 = vmatpush1.bf16.msra.mxu0 %v10505_v46  ;;  %v10513_v46 = vld [vmem:[#allocation66_spill] sm:$0xff] }
 0x1f9   :  { %5894 = vmatprep.subr.bf16.mxu0 %v10082_v18 }
 0x1fa   :  { %1186 = vmatmul.mubr.f32.gmra.mrb[62].mxu1 %v10511_v5 }
 0x1fb   :  { %2318 = vmatmul.mubr.f32.gmra.mrb[28].mxu0 %v10508_v0 }
 0x1fc   :  { %2323 = vmatprep.mubr.f32.mxu0 %v10509_v20  ;;  %5896 = vmatpush1.bf16.msra.mxu0 %v10510_v30  ;;  %v8438_v30 = vld [vmem:[#allocation7] sm:$0xff] }
 0x1fd   :  { %5897 = vmatprep.subr.bf16.mxu0 %v10082_v18  ;;  %10515 = vst [vmem:[#allocation13_spill] sm:$0xff] %v8438_v30 }
 0x1ff   :  { %2325 = vmatmul.mubr.f32.gmra.mrb[30].mxu0 %v10512_v53 }
 0x200   :  { %2330 = vmatprep.mubr.f32.mxu0 %v10434_v22  ;;  %5899 = vmatpush1.bf16.msra.mxu0 %v10513_v46  ;;  %v8440_v46 = vld [vmem:[#allocation7 + $0x8] sm:$0xff] }
 0x203   :  { %2332 = vmatmul.mubr.f32.gmra.mrb[32].mxu0 %v10436_v49 }
 0x204   :  { %2337 = vmatprep.mubr.f32.mxu0 %v10437_v38 }
 0x207   :  { %2339 = vmatmul.mubr.f32.gmra.mrb[34].mxu0 %v10441_v47 }
 0x208   :  { %2344 = vmatprep.mubr.f32.mxu0 %v10442_v21 }
 0x20b   :  { %2346 = vmatmul.mubr.f32.gmra.mrb[36].mxu0 %v10446_v33 }
 0x20c   :  { %2351 = vmatprep.mubr.f32.mxu0 %v10447_v36 }
 0x20f   :  { %2353 = vmatmul.mubr.f32.gmra.mrb[38].mxu0 %v10451_v63  ;;  %v8436_v18 = vpop.f32.mrb[0].mxu1 }
 0x210   :  { %2358 = vmatprep.mubr.f32.mxu0 %v10452_v9  ;;  %10514 = vst [vmem:[#allocation12_spill] sm:$0xff] %v8436_v18 }
 0x213   :  { %2360 = vmatmul.mubr.f32.gmra.mrb[40].mxu0 %v10456_v2 }
 0x214   :  { %2365 = vmatprep.mubr.f32.mxu0 %v10457_v48 }
 0x217   :  { %2367 = vmatmul.mubr.f32.gmra.mrb[42].mxu0 %v10461_v13 }
 0x218   :  { %2372 = vmatprep.mubr.f32.mxu0 %v10462_v52 }
 0x21b   :  { %2374 = vmatmul.mubr.f32.gmra.mrb[44].mxu0 %v10466_v62 }
 0x21c   :  { %2379 = vmatprep.mubr.f32.mxu0 %v10467_v27 }
 0x21f   :  { %2381 = vmatmul.mubr.f32.gmra.mrb[46].mxu0 %v10471_v29 }
 0x220   :  { %2386 = vmatprep.mubr.f32.mxu0 %v10472_v12 }
 0x223   :  { %2388 = vmatmul.mubr.f32.gmra.mrb[48].mxu0 %v10476_v10 }
 0x224   :  { %2393 = vmatprep.mubr.f32.mxu0 %v10477_v6 }
 0x227   :  { %2395 = vmatmul.mubr.f32.gmra.mrb[50].mxu0 %v10481_v39 }
 0x228   :  { %2400 = vmatprep.mubr.f32.mxu0 %v10482_v31 }
 0x22b   :  { %2402 = vmatmul.mubr.f32.gmra.mrb[52].mxu0 %v10486_v41 }
 0x22c   :  { %2407 = vmatprep.mubr.f32.mxu0 %v10487_v40 }
 0x22f   :  { %2409 = vmatmul.mubr.f32.gmra.mrb[54].mxu0 %v10491_v45  ;;  %v8455_v45 = vld [vmem:[#allocation7 + $0x28] sm:$0xff] }
 0x230   :  { %2414 = vmatprep.mubr.f32.mxu0 %v10492_v24  ;;  %v9877_v41 = vand.u32 4294901760, %v8455_v45 }
 0x233   :  { %2416 = vmatmul.mubr.f32.gmra.mrb[56].mxu0 %v10496_v4  ;;  %v275_v4 = vpop.f32.mrb[1].mxu1 }
 0x234   :  { %2421 = vmatprep.mubr.f32.mxu0 %v10497_v34  ;;  %v9872_v34 = vand.u32 4294901760, %v8438_v30  ;;  %v8476_v30 = vld [vmem:[#allocation7 + $0x38] sm:$0xff] }
 0x237   :  { %2423 = vmatmul.mubr.f32.gmra.mrb[58].mxu0 %v10501_v56  ;;  %v9871_v56 = vand.u32 4294901760, %v8440_v46 }
 0x238   :  { %2428 = vmatprep.mubr.f32.mxu0 %v10502_v57  ;;  %v8445_v57 = vld [vmem:[#allocation7 + $0x10] sm:$0xff] }
 0x239   :  { %v9874_v18 = vand.u32 4294901760, %v8445_v57  ;;  %v8461_v4 = vpack.c.bf16 %v9871_v56, %v9872_v34 }
 0x23b   :  { %2430 = vmatmul.mubr.f32.gmra.mrb[60].mxu0 %v10506_v1  ;;  %v8447_v1 = vld [vmem:[#allocation7 + $0x18] sm:$0xff]  ;;  %10517 = vst [vmem:[#allocation14_spill] sm:$0xff] %v8461_v4  ;;  %5901 = vmatprep.subr.bf16.mxu1 %v8461_v4 }
 0x23c   :  { %2435 = vmatprep.mubr.f32.mxu0 %v10507_v28  ;;  %v8449_v28 = vld [vmem:[#allocation7 + $0x20] sm:$0xff]  ;;  %v9873_v24 = vand.u32 4294901760, %v8447_v1  ;;  %5903 = vmatpush3.bf16.msra.mxu1 %v8461_v4 }
 0x23d   :  { %v9878_v40 = vand.u32 4294901760, %v8449_v28 }
 0x23e   :  { %v8472_v31 = vpack.c.bf16 %v9873_v24, %v9874_v18 }
 0x23f   :  { %2437 = vmatmul.mubr.f32.gmra.mrb[62].mxu0 %v10511_v5  ;;  %v8451_v5 = vpop.f32.mrb[2].mxu1  ;;  %v8488_v24 = vpack.c.bf16 %v9877_v41, %v9878_v40 }
 0x240   :  { %2539 = vmatprep.mubr.f32.mxu0 %v10435_v61  ;;  %10516 = vst [vmem:[#allocation20_spill] sm:$0xff] %v8451_v5  ;;  %v290_v61 = vpop.f32.mrb[3].mxu1  ;;  %10518 = vst [vmem:[#allocation15_spill] sm:$0xff] %v8472_v31  ;;  %5905 = vmatprep.subr.bf16.mxu1 %v8472_v31 }
 0x241   :  { %v8466_v5 = vpop.f32.mrb[4].mxu1  ;;  %v8474_v61 = vld [vmem:[#allocation7 + $0x30] sm:$0xff]  ;;  %10520 = vst [vmem:[#allocation16_spill] sm:$0xff] %v8488_v24  ;;  %5907 = vmatpush3.bf16.msra.mxu1 %v8472_v31 }
 0x242   :  { %v305_v56 = vpop.f32.mrb[5].mxu1  ;;  %v9880_v18 = vand.u32 4294901760, %v8474_v61  ;;  %5909 = vmatprep.subr.bf16.mxu1 %v8488_v24 }
 0x243   :  { %2541 = vmatmul.mubr.f32.vlgmr.msra.gmra.mrb[0].mxu0 %v10438_v44  ;;  %v8480_v34 = vpop.f32.mrb[6].mxu1 }
 0x244   :  { %2546 = vmatprep.mubr.f32.mxu0 %v10440_v15  ;;  %10519 = vst [vmem:[#allocation21_spill] sm:$0xff] %v8480_v34  ;;  %v320_v44 = vpop.f32.mrb[7].mxu1  ;;  %v9879_v15 = vand.u32 4294901760, %v8476_v30 }
 0x245   :  { %v8493_v56 = vpop.f32.mrb[8].mxu1  ;;  %5911 = vmatpush3.bf16.msra.mxu1 %v8488_v24 }
 0x246   :  { %v335_v4 = vpop.f32.mrb[9].mxu1  ;;  %v8504_v41 = vpack.c.bf16 %v9879_v15, %v9880_v18 }
 0x247   :  { %2548 = vmatmul.mubr.f32.gmra.mrb[2].mxu0 %v10443_v59  ;;  %v8496_v44 = vpop.f32.mrb[10].mxu1 }
 0x248   :  { %2553 = vmatprep.mubr.f32.mxu0 %v10444_v35  ;;  %v350_v34 = vpop.f32.mrb[11].mxu1  ;;  %10521 = vst [vmem:[#allocation17_spill] sm:$0xff] %v8504_v41  ;;  %5913 = vmatprep.subr.bf16.mxu1 %v8504_v41 }
 0x249   :  { %v8507_v59 = vpop.f32.mrb[12].mxu1  ;;  %5915 = vmatpush3.bf16.msra.mxu1 %v8504_v41 }
 0x24a   :  { %v365_v35 = vpop.f32.mrb[13].mxu1 }
 0x24b   :  { %2555 = vmatmul.mubr.f32.gmra.mrb[4].mxu0 %v10448_v54  ;;  %v8510_v4 = vpop.f32.mrb[14].mxu1 }
 0x24c   :  { %2560 = vmatprep.mubr.f32.mxu0 %v10449_v19  ;;  %v380_v34 = vpop.f32.mrb[15].mxu1 }
 0x24d   :  { %v8515_v40 = vpop.f32.mrb[16].mxu1 }
 0x24e   :  { %v395_v15 = vpop.f32.mrb[17].mxu1 }
 0x24f   :  { %2562 = vmatmul.mubr.f32.gmra.mrb[6].mxu0 %v10453_v17  ;;  %v8518_v54 = vpop.f32.mrb[18].mxu1 }
 0x250   :  { %2567 = vmatprep.mubr.f32.mxu0 %v10454_v58  ;;  %v410_v19 = vpop.f32.mrb[19].mxu1 }
 0x251   :  { %v8522_v35 = vpop.f32.mrb[20].mxu1 }
 0x252   :  { %v425_v34 = vpop.f32.mrb[21].mxu1 }
 0x253   :  { %2569 = vmatmul.mubr.f32.gmra.mrb[8].mxu0 %v10458_v14  ;;  %v8525_v18 = vpop.f32.mrb[22].mxu1 }
 0x254   :  { %2574 = vmatprep.mubr.f32.mxu0 %v10459_v23  ;;  %v440_v17 = vpop.f32.mrb[23].mxu1 }
 0x255   :  { %v8528_v24 = vpop.f32.mrb[24].mxu1 }
 0x256   :  { %v455_v58 = vpop.f32.mrb[25].mxu1 }
 0x257   :  { %2576 = vmatmul.mubr.f32.gmra.mrb[10].mxu0 %v10463_v50  ;;  %v8531_v15 = vpop.f32.mrb[26].mxu1  ;;  %v10522_v50 = vld [vmem:[#allocation113_spill] sm:$0xff]  ;;  %v10530_v58 = vld [vmem:[#allocation134_spill] sm:$0xff] }
 0x258   :  { %2581 = vmatprep.mubr.f32.mxu0 %v10464_v3  ;;  %v470_v19 = vpop.f32.mrb[27].mxu1  ;;  %v10523_v3 = vld [vmem:[#allocation114_spill] sm:$0xff] }
 0x259   :  { %v8534_v14 = vpop.f32.mrb[28].mxu1  ;;  %v10531_v19 = vld [vmem:[#allocation136_spill] sm:$0xff] }
 0x25a   :  { %v485_v23 = vpop.f32.mrb[29].mxu1 }
 0x25b   :  { %2583 = vmatmul.mubr.f32.gmra.mrb[12].mxu0 %v10468_v7  ;;  %v8537_v34 = vpop.f32.mrb[30].mxu1  ;;  %v10524_v7 = vld [vmem:[#allocation117_spill] sm:$0xff] }
 0x25c   :  { %2588 = vmatprep.mubr.f32.mxu0 %v10469_v60  ;;  %v500_v17 = vpop.f32.mrb[31].mxu1 }
 0x25d   :  { %v10532_v17 = vld [vmem:[#allocation138_spill] sm:$0xff] }
 0x25f   :  { %2590 = vmatmul.mubr.f32.gmra.mrb[14].mxu0 %v10473_v55 }
 0x260   :  { %2595 = vmatprep.mubr.f32.mxu0 %v10474_v37  ;;  %v8603_v37 = vld [vmem:[#allocation7 + $0x60] sm:$0xff] }
 0x263   :  { %2597 = vmatmul.mubr.f32.gmra.mrb[16].mxu0 %v10478_v26  ;;  %v8605_v26 = vld [vmem:[#allocation7 + $0x68] sm:$0xff] }
 0x264   :  { %2602 = vmatprep.mubr.f32.mxu0 %v10479_v42 }
 0x267   :  { %2604 = vmatmul.mubr.f32.gmra.mrb[18].mxu0 %v10483_v43  ;;  %v9886_v43 = vand.u32 4294901760, %v8603_v37 }
 0x268   :  { %2609 = vmatprep.mubr.f32.mxu0 %v10484_v8 }
 0x26b   :  { %2611 = vmatmul.mubr.f32.gmra.mrb[20].mxu0 %v10488_v16  ;;  %v8621_v16 = vld [vmem:[#allocation7 + $0x70] sm:$0xff] }
 0x26c   :  { %2616 = vmatprep.mubr.f32.mxu0 %v10489_v32  ;;  %v8623_v32 = vld [vmem:[#allocation7 + $0x78] sm:$0xff] }
 0x26f   :  { %2618 = vmatmul.mubr.f32.gmra.mrb[22].mxu0 %v10493_v51 }
 0x270   :  { %2623 = vmatprep.mubr.f32.mxu0 %v10494_v11  ;;  %v9884_v11 = vand.u32 4294901760, %v8621_v16 }
 0x273   :  { %2625 = vmatmul.mubr.f32.gmra.mrb[24].mxu0 %v10522_v50  ;;  %v10533_v50 = vld [vmem:[#allocation140_spill] sm:$0xff] }
 0x274   :  { %2630 = vmatprep.mubr.f32.mxu0 %v10523_v3 }
 0x277   :  { %2632 = vmatmul.mubr.f32.gmra.mrb[26].mxu0 %v10524_v7 }
 0x278   :  { %2637 = vmatprep.mubr.f32.mxu0 %v10504_v25 }
 0x27b   :  { %2639 = vmatmul.mubr.f32.gmra.mrb[28].mxu0 %v10508_v0  ;;  %v10529_v0 = vld [vmem:[#allocation132_spill] sm:$0xff] }
 0x27c   :  { %2644 = vmatprep.mubr.f32.mxu0 %v10509_v20 }
 0x27f   :  { %2646 = vmatmul.mubr.f32.gmra.mrb[30].mxu0 %v10512_v53 }
 0x280   :  { %2651 = vmatprep.mubr.f32.mxu0 %v10434_v22 }
 0x283   :  { %2653 = vmatmul.mubr.f32.gmra.mrb[32].mxu0 %v10436_v49  ;;  %v8569_v49 = vld [vmem:[#allocation7 + $0x40] sm:$0xff] }
 0x284   :  { %2658 = vmatprep.mubr.f32.mxu0 %v10437_v38  ;;  %v8571_v38 = vld [vmem:[#allocation7 + $0x48] sm:$0xff] }
 0x287   :  { %2660 = vmatmul.mubr.f32.gmra.mrb[34].mxu0 %v10441_v47 }
 0x288   :  { %2665 = vmatprep.mubr.f32.mxu0 %v10442_v21  ;;  %v9892_v21 = vand.u32 4294901760, %v8569_v49 }
 0x28b   :  { %2667 = vmatmul.mubr.f32.gmra.mrb[36].mxu0 %v10446_v33  ;;  %v9891_v33 = vand.u32 4294901760, %v8571_v38 }
 0x28c   :  { %2672 = vmatprep.mubr.f32.mxu0 %v10447_v36 }
 0x28d   :  { %v8580_v36 = vpack.c.bf16 %v9891_v33, %v9892_v21  ;;  %v10557_v33 = vld [vmem:[#allocation20_spill] sm:$0xff] }
 0x28f   :  { %2674 = vmatmul.mubr.f32.gmra.mrb[38].mxu0 %v10451_v63  ;;  %10525 = vst [vmem:[#allocation18_spill] sm:$0xff] %v8580_v36  ;;  %5917 = vmatprep.subr.bf16.mxu1 %v8580_v36 }
 0x290   :  { %2679 = vmatprep.mubr.f32.mxu0 %v10452_v9  ;;  %v8585_v9 = vld [vmem:[#allocation7 + $0x50] sm:$0xff]  ;;  %5919 = vmatpush3.bf16.msra.mxu1 %v8580_v36 }
 0x291   :  { %v8567_v22 = vpop.f32.mrb[32].mxu1  ;;  %v9888_v60 = vand.u32 4294901760, %v8585_v9 }
 0x292   :  { %v1084_v47 = vpop.f32.mrb[33].mxu1 }
 0x293   :  { %2681 = vmatmul.mubr.f32.gmra.mrb[40].mxu0 %v10456_v2  ;;  %v8587_v2 = vld [vmem:[#allocation7 + $0x58] sm:$0xff]  ;;  %v10535_v47 = vld [vmem:[#allocation144_spill] sm:$0xff] }
 0x294   :  { %2686 = vmatprep.mubr.f32.mxu0 %v10457_v48 }
 0x295   :  { %v8583_v63 = vpop.f32.mrb[34].mxu1 }
 0x296   :  { %v1091_v48 = vpop.f32.mrb[35].mxu1 }
 0x297   :  { %2688 = vmatmul.mubr.f32.gmra.mrb[42].mxu0 %v10461_v13  ;;  %v9887_v13 = vand.u32 4294901760, %v8587_v2 }
 0x298   :  { %2693 = vmatprep.mubr.f32.mxu0 %v10462_v52 }
 0x299   :  { %v8598_v52 = vpack.c.bf16 %v9887_v13, %v9888_v60  ;;  %v8601_v55 = vpop.f32.mrb[36].mxu1  ;;  %v10554_v13 = vand.u32 4294901760, %v8447_v1 }
 0x29a   :  { %v1098_v42 = vpop.f32.mrb[37].mxu1 }
 0x29b   :  { %2695 = vmatmul.mubr.f32.gmra.mrb[44].mxu0 %v10466_v62  ;;  %10526 = vst [vmem:[#allocation19_spill] sm:$0xff] %v8598_v52  ;;  %5921 = vmatprep.subr.bf16.mxu1 %v8598_v52  ;;  %v9885_v62 = vand.u32 4294901760, %v8605_v26  ;;  %v8705_v60 = vsub.f32 %v8447_v1, %v10554_v13 }
 0x29c   :  { %2700 = vmatprep.mubr.f32.mxu0 %v10467_v27  ;;  %5923 = vmatpush3.bf16.msra.mxu1 %v8598_v52 }
 0x29d   :  { %v8616_v27 = vpack.c.bf16 %v9885_v62, %v9886_v43  ;;  %v8619_v8 = vpop.f32.mrb[38].mxu1  ;;  %10555 = vst [vmem:[#allocation37_spill] sm:$0xff] %v8705_v60 }
 0x29e   :  { %v1105_v51 = vpop.f32.mrb[39].mxu1 }
 0x29f   :  { %2702 = vmatmul.mubr.f32.gmra.mrb[46].mxu0 %v10471_v29  ;;  %10527 = vst [vmem:[#allocation28_spill] sm:$0xff] %v8616_v27  ;;  %5925 = vmatprep.subr.bf16.mxu1 %v8616_v27  ;;  %v9883_v29 = vand.u32 4294901760, %v8623_v32  ;;  %v10536_v51 = vld [vmem:[#allocation146_spill] sm:$0xff] }
 0x2a0   :  { %2707 = vmatprep.mubr.f32.mxu0 %v10472_v12  ;;  %5927 = vmatpush3.bf16.msra.mxu1 %v8616_v27  ;;  %v10558_v27 = vand.u32 4294901760, %v8449_v28 }
 0x2a1   :  { %v8634_v12 = vpack.c.bf16 %v9883_v29, %v9884_v11  ;;  %v8637_v53 = vpop.f32.mrb[40].mxu1  ;;  %v10547_v11 = vld [vmem:[#allocation13_spill] sm:$0xff] }
 0x2a2   :  { %v1112_v25 = vpop.f32.mrb[41].mxu1  ;;  %v10548_v62 = vand.u32 4294901760, %v10547_v11  ;;  %v8727_v52 = vsub.f32 %v8449_v28, %v10558_v27 }
 0x2a3   :  { %2709 = vmatmul.mubr.f32.gmra.mrb[48].mxu0 %v10476_v10  ;;  %10528 = vst [vmem:[#allocation22_spill] sm:$0xff] %v8634_v12  ;;  %5929 = vmatprep.subr.bf16.mxu1 %v8634_v12  ;;  %v10537_v25 = vld [vmem:[#allocation148_spill] sm:$0xff] }
 0x2a4   :  { %2714 = vmatprep.mubr.f32.mxu0 %v10477_v6  ;;  %5931 = vmatpush3.bf16.msra.mxu1 %v8634_v12  ;;  %10559 = vst [vmem:[#allocation38_spill] sm:$0xff] %v8727_v52 }
 0x2a5   :  { %v8643_v10 = vpop.f32.mrb[42].mxu1 }
 0x2a6   :  { %v1119_v20 = vpop.f32.mrb[43].mxu1 }
 0x2a7   :  { %2716 = vmatmul.mubr.f32.gmra.mrb[50].mxu0 %v10481_v39  ;;  %v10534_v39 = vld [vmem:[#allocation142_spill] sm:$0xff] }
 0x2a8   :  { %2721 = vmatprep.mubr.f32.mxu0 %v10529_v0 }
 0x2a9   :  { %v8647_v23 = vpop.f32.mrb[44].mxu1 }
 0x2aa   :  { %v1126_v6 = vpop.f32.mrb[45].mxu1 }
 0x2ab   :  { %2723 = vmatmul.mubr.f32.gmra.mrb[52].mxu0 %v10530_v58  ;;  %v10538_v58 = vld [vmem:[#allocation150_spill] sm:$0xff] }
 0x2ac   :  { %2728 = vmatprep.mubr.f32.mxu0 %v10531_v19  ;;  %v10539_v19 = vld [vmem:[#allocation152_spill] sm:$0xff] }
 0x2ad   :  { %v8651_v3 = vpop.f32.mrb[46].mxu1 }
 0x2ae   :  { %v1133_v7 = vpop.f32.mrb[47].mxu1 }
 0x2af   :  { %2730 = vmatmul.mubr.f32.gmra.mrb[54].mxu0 %v10532_v17 }
 0x2b0   :  { %2735 = vmatprep.mubr.f32.mxu0 %v10533_v50  ;;  %v10541_v50 = vld [vmem:[#allocation154_spill] sm:$0xff] }
 0x2b1   :  { %v8655_v48 = vpop.f32.mrb[48].mxu1 }
 0x2b2   :  { %v1140_v42 = vpop.f32.mrb[49].mxu1 }
 0x2b3   :  { %2737 = vmatmul.mubr.f32.gmra.mrb[56].mxu0 %v10534_v39 }
 0x2b4   :  { %2742 = vmatprep.mubr.f32.mxu0 %v10535_v47 }
 0x2b5   :  { %v8659_v0 = vpop.f32.mrb[50].mxu1 }
 0x2b6   :  { %v1147_v20 = vpop.f32.mrb[51].mxu1 }
 0x2b7   :  { %2744 = vmatmul.mubr.f32.gmra.mrb[58].mxu0 %v10536_v51 }
 0x2b8   :  { %2749 = vmatprep.mubr.f32.mxu0 %v10537_v25 }
 0x2b9   :  { %v8663_v6 = vpop.f32.mrb[52].mxu1 }
 0x2ba   :  { %10540 = vst [vmem:[#allocation23_spill] sm:$0xff] %v8663_v6  ;;  %v1154_v17 = vpop.f32.mrb[53].mxu1 }
 0x2bb   :  { %2751 = vmatmul.mubr.f32.gmra.mrb[60].mxu0 %v10538_v58  ;;  %v8679_v17 = vsub.f32 %v10547_v11, %v10548_v62 }
 0x2bc   :  { %2756 = vmatprep.mubr.f32.mxu0 %v10539_v19 }
 0x2bd   :  { %v8666_v7 = vpop.f32.mrb[54].mxu1  ;;  %10549 = vst [vmem:[#allocation30_spill] sm:$0xff] %v8679_v17 }
 0x2be   :  { %10542 = vst [vmem:[#allocation24_spill] sm:$0xff] %v8666_v7  ;;  %v1161_v39 = vpop.f32.mrb[55].mxu1 }
 0x2bf   :  { %2758 = vmatmul.mubr.f32.gmra.mrb[62].mxu0 %v10541_v50  ;;  %v10550_v50 = vand.u32 4294901760, %v8440_v46 }
 0x2c1   :  { %v8668_v47 = vpop.f32.mrb[56].mxu1  ;;  %v8684_v39 = vsub.f32 %v8440_v46, %v10550_v50  ;;  %v10552_v46 = vand.u32 4294901760, %v8445_v57 }
 0x2c2   :  { %10543 = vst [vmem:[#allocation25_spill] sm:$0xff] %v8668_v47  ;;  %v1168_v42 = vpop.f32.mrb[57].mxu1 }
 0x2c3   :  { %10551 = vst [vmem:[#allocation33_spill] sm:$0xff] %v8684_v39  ;;  %v9890_v42 = vand.u32 4294901760, %v8679_v17  ;;  %v8700_v50 = vsub.f32 %v8445_v57, %v10552_v46 }
 0x2c5   :  { %v8670_v51 = vpop.f32.mrb[58].mxu1  ;;  %10553 = vst [vmem:[#allocation36_spill] sm:$0xff] %v8700_v50 }
 0x2c6   :  { %10544 = vst [vmem:[#allocation32_spill] sm:$0xff] %v8670_v51  ;;  %v1175_v25 = vpop.f32.mrb[59].mxu1 }
 0x2c7   :  { %v9889_v25 = vand.u32 4294901760, %v8684_v39 }
 0x2c9   :  { %v8672_v29 = vpop.f32.mrb[60].mxu1 }
 0x2ca   :  { %10545 = vst [vmem:[#allocation26_spill] sm:$0xff] %v8672_v29  ;;  %v1182_v20 = vpop.f32.mrb[61].mxu1 }
 0x2cb   :  { %v3223_v20 = vsub.f32 %v8679_v17, %v9890_v42 }
 0x2cd   :  { %v8674_v58 = vpop.f32.mrb[62].mxu1  ;;  %v3224_v43 = vand.u32 4294901760, %v3223_v20  ;;  %v10556_v20 = vld [vmem:[#allocation12_spill] sm:$0xff] }
 0x2ce   :  { %10546 = vst [vmem:[#allocation27_spill] sm:$0xff] %v8674_v58  ;;  %v1189_v19 = vpop.f32.mrb[63].mxu1  ;;  %v10570_v58 = vand.u32 4294901760, %v8569_v49 }
 0x2cf   :  { %v3230_v19 = vsub.f32 %v8684_v39, %v9889_v25  ;;  %v8710_v25 = vld [vmem:[%s9535_s2] ss:$0 sm:$0xff] }
 0x2d0   :  { %v289_v21 = vadd.f32 %v8710_v25, %v10557_v33  ;;  %v10562_v33 = vand.u32 4294901760, %v8474_v61  ;;  %v304_v27 = vadd.f32 %v8710_v25, %v8466_v5 }
 0x2d1   :  { %v3231_v62 = vand.u32 4294901760, %v3230_v19  ;;  %v9900_v19 = vand.u32 4294901760, %v8700_v50 }
 0x2d3   :  { %v8694_v11 = vpack.c.bf16 %v3231_v62, %v3224_v43  ;;  %v274_v43 = vadd.f32 %v8710_v25, %v10556_v20  ;;  %v9899_v62 = vand.u32 4294901760, %v8705_v60  ;;  %v3237_v13 = vsub.f32 %v8700_v50, %v9900_v19 }
 0x2d5   :  { %5933 = vmatprep.subr.bf16.mxu1 %v8694_v11  ;;  %v3244_v12 = vsub.f32 %v8705_v60, %v9899_v62  ;;  %v3238_v41 = vand.u32 4294901760, %v3237_v13  ;;  %v349_v13 = vadd.f32 %v8710_v25, %v8496_v44 }
 0x2d7   :  { %v3245_v31 = vand.u32 4294901760, %v3244_v12  ;;  %v334_v12 = vadd.f32 %v8710_v25, %v8493_v56 }
 0x316   :  { %v2542_v42 = vpop.f32.mrb[0].mxu0 }
 0x317   :  { %v6125_v57 = vadd.f32 %v2542_v42, %v274_v43  ;;  %v2544_v46 = vpop.f32.mrb[1].mxu0  ;;  %v10560_v42 = vand.u32 4294901760, %v8455_v45 }
 0x318   :  { %v10564_v46 = vand.u32 4294901760, %v8476_v30 }
 0x319   :  { %v2763_v1 = vmax.f32 %v6125_v57, 0.0  ;;  %v8732_v43 = vsub.f32 %v8455_v45, %v10560_v42  ;;  %v8737_v57 = vsub.f32 %v8474_v61, %v10562_v33  ;;  %v9914_v33 = vand.u32 4294901760, %v8727_v52 }
 0x31a   :  { %v2549_v20 = vpop.f32.mrb[2].mxu0  ;;  %v8742_v62 = vsub.f32 %v8476_v30, %v10564_v46  ;;  %v8767_v30 = vsub.f32 %v8569_v49, %v10570_v58  ;;  %v10572_v46 = vand.u32 4294901760, %v8571_v38 }
 0x31b   :  { %10561 = vst [vmem:[#allocation43_spill] sm:$0xff] %v8732_v43  ;;  %10563 = vst [vmem:[#allocation44_spill] sm:$0xff] %v8737_v57  ;;  %v8744_v19 = vand.u32 4294901760, %v2763_v1  ;;  %v6127_v36 = vadd.f32 %v2549_v20, %v289_v21  ;;  %v2551_v28 = vpop.f32.mrb[3].mxu0  ;;  %v10568_v21 = vld [vmem:[#allocation21_spill] sm:$0xff]  ;;  %v3251_v49 = vsub.f32 %v8727_v52, %v9914_v33  ;;  %v10574_v58 = vand.u32 4294901760, %v8732_v43 }
 0x31c   :  { %10565 = vst [vmem:[#allocation45_spill] sm:$0xff] %v8742_v62  ;;  %v319_v20 = vadd.f32 %v8710_v25, %v10568_v21  ;;  %10571 = vst [vmem:[#allocation51_spill] sm:$0xff] %v8767_v30  ;;  %v8772_v21 = vsub.f32 %v8571_v38, %v10572_v46  ;;  %v10575_v38 = vand.u32 4294901760, %v8737_v57  ;;  %v10576_v46 = vand.u32 4294901760, %v8742_v62 }
 0x31d   :  { %10566 = vst [vmem:[#allocation46_spill] sm:$0xff] %v8744_v19  ;;  %v8749_v45 = vsub.f32 %v2763_v1, %v8744_v19  ;;  %v2764_v42 = vmax.f32 %v6127_v36, 0.0  ;;  %v3258_v19 = vsub.f32 %v8732_v43, %v10574_v58  ;;  %v10577_v58 = vand.u32 4294901760, %v8585_v9 }
 0x31e   :  { %v2556_v61 = vpop.f32.mrb[4].mxu0  ;;  %10573 = vst [vmem:[#allocation48_spill] sm:$0xff] %v8772_v21 }
 0x31f   :  { %10567 = vst [vmem:[#allocation49_spill] sm:$0xff] %v8749_v45  ;;  %v8757_v28 = vand.u32 4294901760, %v2764_v42  ;;  %v6129_v5 = vadd.f32 %v2556_v61, %v304_v27  ;;  %v2558_v1 = vpop.f32.mrb[5].mxu0  ;;  %v9909_v36 = vand.u32 4294901760, %v8749_v45  ;;  %v8800_v51 = vsub.f32 %v8585_v9, %v10577_v58 }
 0x320   :  { %v5936_v1 = vpack.c.bf16 %v3245_v31, %v3238_v41  ;;  %v3252_v58 = vand.u32 4294901760, %v3251_v49  ;;  %v3259_v29 = vand.u32 4294901760, %v3258_v19 }
 0x321   :  { %10569 = vst [vmem:[#allocation50_spill] sm:$0xff] %v8757_v28  ;;  %v8775_v27 = vsub.f32 %v2764_v42, %v8757_v28  ;;  %v2765_v61 = vmax.f32 %v6129_v5, 0.0  ;;  %v2902_v56 = vsub.f32 %v8749_v45, %v9909_v36  ;;  %v3265_v42 = vsub.f32 %v8737_v57, %v10575_v38  ;;  %10578 = vst [vmem:[#allocation57_spill] sm:$0xff] %v8800_v51 }
 0x322   :  { %v2563_v44 = vpop.f32.mrb[6].mxu0  ;;  %v3272_v5 = vsub.f32 %v8742_v62, %v10576_v46  ;;  %v10579_v38 = vand.u32 4294901760, %v8587_v2 }
 0x323   :  { %v9915_v36 = vand.u32 4294901760, %v8775_v27  ;;  %v8793_v31 = vand.u32 4294901760, %v2765_v61  ;;  %v6131_v41 = vadd.f32 %v2563_v44, %v319_v20  ;;  %v2565_v45 = vpop.f32.mrb[7].mxu0  ;;  %v2903_v28 = vand.u32 4294901760, %v2902_v56 }
 0x324   :  { %v8805_v46 = vsub.f32 %v8587_v2, %v10579_v38  ;;  %v8815_v44 = vpack.c.bf16 %v8684_v39, %v8679_v17  ;;  %v3266_v33 = vand.u32 4294901760, %v3265_v42  ;;  %v3273_v47 = vand.u32 4294901760, %v3272_v5 }
 0x325   :  { %v2912_v20 = vsub.f32 %v8775_v27, %v9915_v36  ;;  %v8811_v45 = vsub.f32 %v2765_v61, %v8793_v31  ;;  %v2766_v56 = vmax.f32 %v6131_v41, 0.0  ;;  %5164 = vmatprep.mubr.f32.mxu1 %v2903_v28  ;;  %v10581_v61 = vand.u32 4294901760, %v8767_v30 }
 0x326   :  { %10580 = vst [vmem:[#allocation60_spill] sm:$0xff] %v8805_v46  ;;  %v2570_v9 = vpop.f32.mrb[8].mxu0  ;;  %v10582_v41 = vand.u32 4294901760, %v8772_v21  ;;  %v364_v42 = vadd.f32 %v8710_v25, %v8507_v59  ;;  %v10585_v59 = vand.u32 4294901760, %v8605_v26 }
 0x327   :  { %v2913_v2 = vand.u32 4294901760, %v2912_v20  ;;  %v8817_v38 = vand.u32 4294901760, %v2766_v56  ;;  %v6133_v7 = vadd.f32 %v2570_v9, %v334_v12  ;;  %v2572_v6 = vpop.f32.mrb[9].mxu0  ;;  %v9917_v36 = vand.u32 4294901760, %v8811_v45 }
 0x328   :  { %v3279_v28 = vsub.f32 %v8767_v30, %v10581_v61  ;;  %v3286_v39 = vsub.f32 %v8772_v21, %v10582_v41  ;;  %v5940_v9 = vpack.c.bf16 %v3259_v29, %v3252_v58  ;;  %v5944_v61 = vpack.c.bf16 %v3273_v47, %v3266_v33 }
 0x329   :  { %v8831_v12 = vsub.f32 %v2766_v56, %v8817_v38  ;;  %v2767_v6 = vmax.f32 %v6133_v7, 0.0  ;;  %5165 = vmatmul.mubr.f32.vlgmr.msra.gmra.mrb[64].mxu1 %v2913_v2  ;;  %v2922_v5 = vsub.f32 %v8811_v45, %v9917_v36  ;;  %v10583_v41 = vand.u32 4294901760, %v8603_v37 }
 0x32a   :  { %v2577_v20 = vpop.f32.mrb[10].mxu0  ;;  %5935 = vmatpush3.bf16.msra.mxu1 %v8694_v11  ;;  %v8845_v56 = vsub.f32 %v8605_v26, %v10585_v59  ;;  %v3280_v29 = vand.u32 4294901760, %v3279_v28  ;;  %v3287_v47 = vand.u32 4294901760, %v3286_v39  ;;  %v10587_v11 = vand.u32 4294901760, %v8800_v51 }
 0x32b   :  { %v8840_v19 = vsub.f32 %v8603_v37, %v10583_v41  ;;  %v8847_v7 = vand.u32 4294901760, %v2767_v6  ;;  %v6135_v2 = vadd.f32 %v2577_v20, %v349_v13  ;;  %v2579_v49 = vpop.f32.mrb[11].mxu0  ;;  %v2923_v36 = vand.u32 4294901760, %v2922_v5  ;;  %5937 = vmatprep.subr.bf16.mxu1 %v5936_v1 }
 0x32c   :  { %10586 = vst [vmem:[#allocation64_spill] sm:$0xff] %v8845_v56  ;;  %v9919_v17 = vand.u32 4294901760, %v8831_v12  ;;  %v3293_v37 = vsub.f32 %v8800_v51, %v10587_v11  ;;  %v10588_v33 = vand.u32 4294901760, %v8805_v46  ;;  %v8864_v39 = vpack.c.bf16 %v8705_v60, %v8700_v50 }
 0x32d   :  { %10584 = vst [vmem:[#allocation63_spill] sm:$0xff] %v8840_v19  ;;  %v8857_v26 = vsub.f32 %v2767_v6, %v8847_v7  ;;  %v2768_v41 = vmax.f32 %v6135_v2, 0.0  ;;  %5167 = vmatprep.mubr.f32.mxu1 %v2923_v36  ;;  %v10589_v20 = vand.u32 4294901760, %v8621_v16  ;;  %v10590_v36 = vand.u32 4294901760, %v8623_v32 }
 0x32e   :  { %v3300_v58 = vsub.f32 %v8805_v46, %v10588_v33  ;;  %v2932_v13 = vsub.f32 %v8831_v12, %v9919_v17  ;;  %v2584_v28 = vpop.f32.mrb[12].mxu0  ;;  %5939 = vmatpush3.bf16.msra.mxu1 %v5936_v1  ;;  %v379_v5 = vadd.f32 %v8710_v25, %v8510_v4  ;;  %v3294_v49 = vand.u32 4294901760, %v3293_v37 }
 0x32f   :  { %v8871_v6 = vsub.f32 %v8621_v16, %v10589_v20  ;;  %v8876_v59 = vsub.f32 %v8623_v32, %v10590_v36  ;;  %v8878_v2 = vand.u32 4294901760, %v2768_v41  ;;  %v6137_v11 = vadd.f32 %v2584_v28, %v364_v42  ;;  %v2586_v33 = vpop.f32.mrb[13].mxu0  ;;  %5941 = vmatprep.subr.bf16.mxu1 %v5940_v9 }
 0x330   :  { %v2933_v17 = vand.u32 4294901760, %v2932_v13  ;;  %v9921_v1 = vand.u32 4294901760, %v8857_v26  ;;  %v3301_v60 = vand.u32 4294901760, %v3300_v58  ;;  %v5948_v42 = vpack.c.bf16 %v3287_v47, %v3280_v29 }
 0x331   :  { %v8884_v16 = vsub.f32 %v2768_v41, %v8878_v2  ;;  %v2769_v20 = vmax.f32 %v6137_v11, 0.0  ;;  %v10592_v13 = vand.u32 4294901760, %v8840_v19  ;;  %v10593_v4 = vand.u32 4294901760, %v8845_v56 }
 0x332   :  { %5168 = vmatmul.mubr.f32.gmra.mrb[66].mxu1 %v2933_v17  ;;  %v2942_v32 = vsub.f32 %v8857_v26, %v9921_v1  ;;  %v2591_v28 = vpop.f32.mrb[14].mxu0  ;;  %v9924_v58 = vand.u32 4294901760, %v8871_v6  ;;  %v5952_v47 = vpack.c.bf16 %v3301_v60, %v3294_v49  ;;  %v10594_v60 = vand.u32 4294901760, %v8876_v59 }
 0x333   :  { %10591 = vst [vmem:[#allocation53_spill] sm:$0xff] %v8884_v16  ;;  %5943 = vmatpush3.bf16.msra.mxu1 %v5940_v9  ;;  %v3307_v36 = vsub.f32 %v8840_v19, %v10592_v13  ;;  %v3314_v37 = vsub.f32 %v8845_v56, %v10593_v4  ;;  %v8897_v17 = vand.u32 4294901760, %v2769_v20  ;;  %v6139_v11 = vadd.f32 %v2591_v28, %v379_v5  ;;  %v2593_v33 = vpop.f32.mrb[15].mxu0 }
 0x334   :  { %v2943_v1 = vand.u32 4294901760, %v2942_v32  ;;  %v9922_v29 = vand.u32 4294901760, %v8884_v16  ;;  %5945 = vmatprep.subr.bf16.mxu1 %v5944_v61  ;;  %v394_v9 = vadd.f32 %v8710_v25, %v8515_v40  ;;  %v8910_v5 = vpack.c.bf16 %v8732_v43, %v8727_v52 }
 0x335   :  { %v8903_v13 = vsub.f32 %v2769_v20, %v8897_v17  ;;  %v2770_v4 = vmax.f32 %v6139_v11, 0.0  ;;  %v3308_v28 = vand.u32 4294901760, %v3307_v36  ;;  %v3315_v33 = vand.u32 4294901760, %v3314_v37 }
 0x336   :  { %5170 = vmatprep.mubr.f32.mxu1 %v2943_v1  ;;  %v2952_v41 = vsub.f32 %v8884_v16, %v9922_v29  ;;  %v2598_v32 = vpop.f32.mrb[16].mxu0  ;;  %v3321_v40 = vsub.f32 %v8871_v6, %v9924_v58  ;;  %v3328_v49 = vsub.f32 %v8876_v59, %v10594_v60 }
 0x337   :  { %5947 = vmatpush3.bf16.msra.mxu1 %v5944_v61  ;;  %v8918_v1 = vand.u32 4294901760, %v2770_v4  ;;  %v6141_v20 = vadd.f32 %v2598_v32, %v394_v9  ;;  %v2600_v11 = vpop.f32.mrb[17].mxu0  ;;  %v9934_v43 = vand.u32 4294901760, %v8903_v13  ;;  %v409_v61 = vadd.f32 %v8710_v25, %v8518_v54 }
 0x338   :  { %v2953_v29 = vand.u32 4294901760, %v2952_v41  ;;  %5949 = vmatprep.subr.bf16.mxu1 %v5948_v42  ;;  %v5956_v9 = vpack.c.bf16 %v3315_v33, %v3308_v28  ;;  %v3322_v32 = vand.u32 4294901760, %v3321_v40  ;;  %v3329_v41 = vand.u32 4294901760, %v3328_v49 }
 0x339   :  { %v8924_v36 = vsub.f32 %v2770_v4, %v8918_v1  ;;  %v2771_v37 = vmax.f32 %v6141_v20, 0.0  ;;  %v2962_v60 = vsub.f32 %v8903_v13, %v9934_v43 }
 0x33a   :  { %5171 = vmatmul.mubr.f32.gmra.mrb[68].mxu1 %v2953_v29  ;;  %v2605_v58 = vpop.f32.mrb[18].mxu0  ;;  %v424_v29 = vadd.f32 %v8710_v25, %v8522_v35  ;;  %v5960_v28 = vpack.c.bf16 %v3329_v41, %v3322_v32 }
 0x33b   :  { %5951 = vmatpush3.bf16.msra.mxu1 %v5948_v42  ;;  %v8929_v11 = vand.u32 4294901760, %v2771_v37  ;;  %v6143_v52 = vadd.f32 %v2605_v58, %v409_v61  ;;  %v2607_v50 = vpop.f32.mrb[19].mxu0  ;;  %v2963_v16 = vand.u32 4294901760, %v2962_v60  ;;  %v9932_v54 = vand.u32 4294901760, %v8924_v36 }
 0x33c   :  { %5953 = vmatprep.subr.bf16.mxu1 %v5952_v47  ;;  %v8942_v58 = vpack.c.bf16 %v8742_v62, %v8737_v57 }
 0x33d   :  { %v8935_v4 = vsub.f32 %v2771_v37, %v8929_v11  ;;  %v2772_v20 = vmax.f32 %v6143_v52, 0.0  ;;  %5173 = vmatprep.mubr.f32.mxu1 %v2963_v16  ;;  %v2972_v42 = vsub.f32 %v8924_v36, %v9932_v54  ;;  %v439_v52 = vadd.f32 %v8710_v25, %v8525_v18 }
 0x33e   :  { %v2612_v50 = vpop.f32.mrb[20].mxu0  ;;  %v454_v18 = vadd.f32 %v8710_v25, %v8528_v24 }
 0x33f   :  { %5955 = vmatpush3.bf16.msra.mxu1 %v5952_v47  ;;  %v8944_v33 = vand.u32 4294901760, %v2772_v20  ;;  %v6145_v40 = vadd.f32 %v2612_v50, %v424_v29  ;;  %v2614_v35 = vpop.f32.mrb[21].mxu0  ;;  %v2973_v49 = vand.u32 4294901760, %v2972_v42  ;;  %v9930_v61 = vand.u32 4294901760, %v8935_v4 }
 0x340   :  { %5957 = vmatprep.subr.bf16.mxu1 %v5956_v9  ;;  %v8968_v35 = vpack.c.bf16 %v8772_v21, %v8767_v30 }
 0x341   :  { %v8950_v16 = vsub.f32 %v2772_v20, %v8944_v33  ;;  %v2773_v37 = vmax.f32 %v6145_v40, 0.0  ;;  %5174 = vmatmul.mubr.f32.gmra.mrb[70].mxu1 %v2973_v49  ;;  %v2982_v47 = vsub.f32 %v8935_v4, %v9930_v61 }
 0x342   :  { %v2619_v60 = vpop.f32.mrb[22].mxu0 }
 0x343   :  { %5959 = vmatpush3.bf16.msra.mxu1 %v5956_v9  ;;  %v8955_v32 = vand.u32 4294901760, %v2773_v37  ;;  %v6147_v41 = vadd.f32 %v2619_v60, %v439_v52  ;;  %v2621_v29 = vpop.f32.mrb[23].mxu0  ;;  %v2983_v42 = vand.u32 4294901760, %v2982_v47  ;;  %v9929_v50 = vand.u32 4294901760, %v8950_v16 }
 0x344   :  { %5961 = vmatprep.subr.bf16.mxu1 %v5960_v28 }
 0x345   :  { %v8961_v20 = vsub.f32 %v2773_v37, %v8955_v32  ;;  %v2774_v40 = vmax.f32 %v6147_v41, 0.0  ;;  %5176 = vmatprep.mubr.f32.mxu1 %v2983_v42  ;;  %v2992_v9 = vsub.f32 %v8950_v16, %v9929_v50  ;;  %v469_v41 = vadd.f32 %v8710_v25, %v8531_v15 }
 0x346   :  { %v2626_v49 = vpop.f32.mrb[24].mxu0  ;;  %v484_v15 = vadd.f32 %v8710_v25, %v8534_v14 }
 0x347   :  { %5963 = vmatpush3.bf16.msra.mxu1 %v5960_v28  ;;  %v8970_v52 = vand.u32 4294901760, %v2774_v40  ;;  %v6149_v47 = vadd.f32 %v2626_v49, %v454_v18  ;;  %v2628_v60 = vpop.f32.mrb[25].mxu0  ;;  %v2993_v24 = vand.u32 4294901760, %v2992_v9  ;;  %v9931_v37 = vand.u32 4294901760, %v8961_v20 }
 0x348   :  { %5965 = vmatprep.subr.bf16.mxu1 %v8815_v44 }
 0x349   :  { %10595 = vst [vmem:[#allocation59_spill] sm:$0xff] %v8970_v52  ;;  %v8977_v29 = vsub.f32 %v2774_v40, %v8970_v52  ;;  %v2775_v42 = vmax.f32 %v6149_v47, 0.0  ;;  %5177 = vmatmul.mubr.f32.gmra.mrb[72].mxu1 %v2993_v24  ;;  %v3002_v28 = vsub.f32 %v8961_v20, %v9931_v37  ;;  %v8995_v37 = vpack.c.bf16 %v8805_v46, %v8800_v51 }
 0x34a   :  { %v2633_v50 = vpop.f32.mrb[26].mxu0 }
 0x34b   :  { %10596 = vst [vmem:[#allocation65_spill] sm:$0xff] %v8977_v29  ;;  %v8982_v18 = vand.u32 4294901760, %v2775_v42  ;;  %v6151_v9 = vadd.f32 %v2633_v50, %v469_v41  ;;  %v2635_v49 = vpop.f32.mrb[27].mxu0  ;;  %v3003_v60 = vand.u32 4294901760, %v3002_v28  ;;  %v9933_v61 = vand.u32 4294901760, %v8977_v29 }
 0x34d   :  { %10597 = vst [vmem:[#allocation68_spill] sm:$0xff] %v8982_v18  ;;  %v8988_v40 = vsub.f32 %v2775_v42, %v8982_v18  ;;  %v2776_v47 = vmax.f32 %v6151_v9, 0.0  ;;  %5179 = vmatprep.mubr.f32.mxu1 %v3003_v60  ;;  %v3012_v24 = vsub.f32 %v8977_v29, %v9933_v61  ;;  %v499_v42 = vadd.f32 %v8710_v25, %v8537_v34 }
 0x34e   :  { %v2640_v50 = vpop.f32.mrb[28].mxu0  ;;  %v6156_v34 = vadd.f32 %v8710_v25, %v8567_v22 }
 0x34f   :  { %10598 = vst [vmem:[#allocation69_spill] sm:$0xff] %v8988_v40  ;;  %v8997_v41 = vand.u32 4294901760, %v2776_v47  ;;  %v6153_v28 = vadd.f32 %v2640_v50, %v484_v15  ;;  %v2642_v49 = vpop.f32.mrb[29].mxu0  ;;  %v3013_v54 = vand.u32 4294901760, %v3012_v24  ;;  %v9936_v14 = vand.u32 4294901760, %v8988_v40 }
 0x351   :  { %10599 = vst [vmem:[#allocation111_spill] sm:$0xff] %v8997_v41  ;;  %v9003_v9 = vsub.f32 %v2776_v47, %v8997_v41  ;;  %v2777_v60 = vmax.f32 %v6153_v28, 0.0  ;;  %5180 = vmatmul.mubr.f32.gmra.mrb[74].mxu1 %v3013_v54  ;;  %v3022_v61 = vsub.f32 %v8988_v40, %v9936_v14  ;;  %v9021_v14 = vpack.c.bf16 %v8845_v56, %v8840_v19  ;;  %v10636_v40 = vld [vmem:[#allocation27_spill] sm:$0xff] }
 0x352   :  { %v2647_v43 = vpop.f32.mrb[30].mxu0 }
 0x353   :  { %10600 = vst [vmem:[#allocation70_spill] sm:$0xff] %v9003_v9  ;;  %v9008_v46 = vand.u32 4294901760, %v2777_v60  ;;  %v6155_v15 = vadd.f32 %v2647_v43, %v499_v42  ;;  %v2649_v50 = vpop.f32.mrb[31].mxu0  ;;  %v3023_v24 = vand.u32 4294901760, %v3022_v61  ;;  %v9938_v49 = vand.u32 4294901760, %v9003_v9 }
 0x355   :  { %10601 = vst [vmem:[#allocation115_spill] sm:$0xff] %v9008_v46  ;;  %v9014_v47 = vsub.f32 %v2777_v60, %v9008_v46  ;;  %v2778_v28 = vmax.f32 %v6155_v15, 0.0  ;;  %5182 = vmatprep.mubr.f32.mxu1 %v3023_v24  ;;  %v3032_v54 = vsub.f32 %v9003_v9, %v9938_v49  ;;  %v6158_v60 = vadd.f32 %v8710_v25, %v8583_v63  ;;  %v10634_v9 = vld [vmem:[#allocation26_spill] sm:$0xff] }
 0x356   :  { %v2654_v43 = vpop.f32.mrb[32].mxu0  ;;  %v6160_v63 = vadd.f32 %v8710_v25, %v8601_v55  ;;  %v6162_v55 = vadd.f32 %v8710_v25, %v8619_v8  ;;  %v6164_v8 = vadd.f32 %v8710_v25, %v8637_v53  ;;  %v6166_v53 = vadd.f32 %v8710_v25, %v8643_v10 }
 0x357   :  { %10602 = vst [vmem:[#allocation118_spill] sm:$0xff] %v9014_v47  ;;  %v9023_v61 = vand.u32 4294901760, %v2778_v28  ;;  %v6157_v42 = vadd.f32 %v6156_v34, %v2654_v43  ;;  %v2656_v50 = vpop.f32.mrb[33].mxu0  ;;  %v3033_v51 = vand.u32 4294901760, %v3032_v54  ;;  %v9941_v22 = vand.u32 4294901760, %v9014_v47 }
 0x358   :  { %v6168_v10 = vadd.f32 %v8710_v25, %v8647_v23  ;;  %v6170_v23 = vadd.f32 %v8710_v25, %v8651_v3  ;;  %v6172_v3 = vadd.f32 %v8710_v25, %v8655_v48  ;;  %v6174_v48 = vadd.f32 %v8710_v25, %v8659_v0 }
 0x359   :  { %10603 = vst [vmem:[#allocation72_spill] sm:$0xff] %v9023_v61  ;;  %v9029_v15 = vsub.f32 %v2778_v28, %v9023_v61  ;;  %v2779_v24 = vmax.f32 %v6157_v42, 0.0  ;;  %5183 = vmatmul.mubr.f32.gmra.mrb[76].mxu1 %v3033_v51  ;;  %v3042_v49 = vsub.f32 %v9014_v47, %v9941_v22  ;;  %v10631_v47 = vld [vmem:[#allocation32_spill] sm:$0xff] }
 0x35a   :  { %v2661_v56 = vpop.f32.mrb[34].mxu0 }
 0x35b   :  { %10604 = vst [vmem:[#allocation123_spill] sm:$0xff] %v9029_v15  ;;  %v9034_v19 = vand.u32 4294901760, %v2779_v24  ;;  %v6159_v34 = vadd.f32 %v6158_v60, %v2661_v56  ;;  %v2663_v43 = vpop.f32.mrb[35].mxu0  ;;  %v3043_v54 = vand.u32 4294901760, %v3042_v49  ;;  %v9943_v50 = vand.u32 4294901760, %v9029_v15 }
 0x35d   :  { %10605 = vst [vmem:[#allocation125_spill] sm:$0xff] %v9034_v19  ;;  %v9040_v28 = vsub.f32 %v2779_v24, %v9034_v19  ;;  %v2780_v42 = vmax.f32 %v6159_v34, 0.0  ;;  %5185 = vmatprep.mubr.f32.mxu1 %v3043_v54  ;;  %v3052_v51 = vsub.f32 %v9029_v15, %v9943_v50  ;;  %v10628_v15 = vld [vmem:[#allocation25_spill] sm:$0xff] }
 0x35e   :  { %v2668_v22 = vpop.f32.mrb[36].mxu0 }
 0x35f   :  { %10606 = vst [vmem:[#allocation74_spill] sm:$0xff] %v9040_v28  ;;  %v9045_v21 = vand.u32 4294901760, %v2780_v42  ;;  %v6161_v56 = vadd.f32 %v6160_v63, %v2668_v22  ;;  %v2670_v60 = vpop.f32.mrb[37].mxu0  ;;  %v3053_v49 = vand.u32 4294901760, %v3052_v51  ;;  %v9945_v43 = vand.u32 4294901760, %v9040_v28 }
 0x361   :  { %10607 = vst [vmem:[#allocation127_spill] sm:$0xff] %v9045_v21  ;;  %v9051_v24 = vsub.f32 %v2780_v42, %v9045_v21  ;;  %v2781_v34 = vmax.f32 %v6161_v56, 0.0  ;;  %5186 = vmatmul.mubr.f32.gmra.mrb[78].mxu1 %v3053_v49  ;;  %v3062_v54 = vsub.f32 %v9040_v28, %v9945_v43  ;;  %v10625_v28 = vld [vmem:[#allocation24_spill] sm:$0xff] }
 0x362   :  { %v2675_v50 = vpop.f32.mrb[38].mxu0 }
 0x363   :  { %10608 = vst [vmem:[#allocation129_spill] sm:$0xff] %v9051_v24  ;;  %v9056_v30 = vand.u32 4294901760, %v2781_v34  ;;  %v6163_v22 = vadd.f32 %v6162_v55, %v2675_v50  ;;  %v2677_v63 = vpop.f32.mrb[39].mxu0  ;;  %v3063_v51 = vand.u32 4294901760, %v3062_v54  ;;  %v9947_v60 = vand.u32 4294901760, %v9051_v24 }
 0x365   :  { %10609 = vst [vmem:[#allocation76_spill] sm:$0xff] %v9056_v30  ;;  %v9062_v42 = vsub.f32 %v2781_v34, %v9056_v30  ;;  %v2782_v56 = vmax.f32 %v6163_v22, 0.0  ;;  %5188 = vmatprep.mubr.f32.mxu1 %v3063_v51  ;;  %v3072_v49 = vsub.f32 %v9051_v24, %v9947_v60  ;;  %v10622_v24 = vld [vmem:[#allocation23_spill] sm:$0xff] }
 0x366   :  { %v2682_v43 = vpop.f32.mrb[40].mxu0  ;;  %v6176_v0 = vadd.f32 %v8710_v25, %v10622_v24  ;;  %v6178_v24 = vadd.f32 %v8710_v25, %v10625_v28  ;;  %v6180_v28 = vadd.f32 %v8710_v25, %v10628_v15  ;;  %v6182_v15 = vadd.f32 %v8710_v25, %v10631_v47 }
 0x367   :  { %10610 = vst [vmem:[#allocation131_spill] sm:$0xff] %v9062_v42  ;;  %v9067_v62 = vand.u32 4294901760, %v2782_v56  ;;  %v6165_v50 = vadd.f32 %v6164_v8, %v2682_v43  ;;  %v2684_v55 = vpop.f32.mrb[41].mxu0  ;;  %v3073_v54 = vand.u32 4294901760, %v3072_v49  ;;  %v9949_v63 = vand.u32 4294901760, %v9062_v42 }
 0x368   :  { %v6184_v47 = vadd.f32 %v8710_v25, %v10634_v9  ;;  %v6186_v9 = vadd.f32 %v8710_v25, %v10636_v40 }
 0x369   :  { %10611 = vst [vmem:[#allocation133_spill] sm:$0xff] %v9067_v62  ;;  %v9073_v34 = vsub.f32 %v2782_v56, %v9067_v62  ;;  %v2783_v22 = vmax.f32 %v6165_v50, 0.0  ;;  %5189 = vmatmul.mubr.f32.gmra.mrb[80].mxu1 %v3073_v54  ;;  %v3082_v51 = vsub.f32 %v9062_v42, %v9949_v63 }
 0x36a   :  { %v2689_v60 = vpop.f32.mrb[42].mxu0 }
 0x36b   :  { %10612 = vst [vmem:[#allocation135_spill] sm:$0xff] %v9073_v34  ;;  %v9078_v57 = vand.u32 4294901760, %v2783_v22  ;;  %v6167_v43 = vadd.f32 %v6166_v53, %v2689_v60  ;;  %v2691_v8 = vpop.f32.mrb[43].mxu0  ;;  %v3083_v49 = vand.u32 4294901760, %v3082_v51  ;;  %v9952_v55 = vand.u32 4294901760, %v9073_v34 }
 0x36d   :  { %10613 = vst [vmem:[#allocation137_spill] sm:$0xff] %v9078_v57  ;;  %v9084_v56 = vsub.f32 %v2783_v22, %v9078_v57  ;;  %v2784_v50 = vmax.f32 %v6167_v43, 0.0  ;;  %5191 = vmatprep.mubr.f32.mxu1 %v3083_v49  ;;  %v3092_v54 = vsub.f32 %v9073_v34, %v9952_v55 }
 0x36e   :  { %v2696_v63 = vpop.f32.mrb[44].mxu0 }
 0x36f   :  { %10614 = vst [vmem:[#allocation139_spill] sm:$0xff] %v9084_v56  ;;  %v9089_v42 = vand.u32 4294901760, %v2784_v50  ;;  %v6169_v60 = vadd.f32 %v6168_v10, %v2696_v63  ;;  %v2698_v53 = vpop.f32.mrb[45].mxu0  ;;  %v3093_v51 = vand.u32 4294901760, %v3092_v54  ;;  %v9955_v8 = vand.u32 4294901760, %v9084_v56 }
 0x371   :  { %10615 = vst [vmem:[#allocation141_spill] sm:$0xff] %v9089_v42  ;;  %v9095_v22 = vsub.f32 %v2784_v50, %v9089_v42  ;;  %v2785_v43 = vmax.f32 %v6169_v60, 0.0  ;;  %5192 = vmatmul.mubr.f32.gmra.mrb[82].mxu1 %v3093_v51  ;;  %v3102_v49 = vsub.f32 %v9084_v56, %v9955_v8 }
 0x372   :  { %v2703_v55 = vpop.f32.mrb[46].mxu0 }
 0x373   :  { %10616 = vst [vmem:[#allocation143_spill] sm:$0xff] %v9095_v22  ;;  %v9100_v34 = vand.u32 4294901760, %v2785_v43  ;;  %v6171_v63 = vadd.f32 %v6170_v23, %v2703_v55  ;;  %v2705_v10 = vpop.f32.mrb[47].mxu0  ;;  %v3103_v54 = vand.u32 4294901760, %v3102_v49  ;;  %v9958_v53 = vand.u32 4294901760, %v9095_v22 }
 0x375   :  { %10617 = vst [vmem:[#allocation145_spill] sm:$0xff] %v9100_v34  ;;  %v9106_v50 = vsub.f32 %v2785_v43, %v9100_v34  ;;  %v2786_v60 = vmax.f32 %v6171_v63, 0.0  ;;  %5194 = vmatprep.mubr.f32.mxu1 %v3103_v54  ;;  %v3112_v51 = vsub.f32 %v9095_v22, %v9958_v53 }
 0x376   :  { %v2710_v8 = vpop.f32.mrb[48].mxu0 }
 0x377   :  { %10618 = vst [vmem:[#allocation147_spill] sm:$0xff] %v9106_v50  ;;  %v9111_v56 = vand.u32 4294901760, %v2786_v60  ;;  %v6173_v55 = vadd.f32 %v6172_v3, %v2710_v8  ;;  %v2712_v23 = vpop.f32.mrb[49].mxu0  ;;  %v3113_v49 = vand.u32 4294901760, %v3112_v51  ;;  %v9963_v10 = vand.u32 4294901760, %v9106_v50 }
 0x379   :  { %10619 = vst [vmem:[#allocation149_spill] sm:$0xff] %v9111_v56  ;;  %v9117_v43 = vsub.f32 %v2786_v60, %v9111_v56  ;;  %v2787_v63 = vmax.f32 %v6173_v55, 0.0  ;;  %5195 = vmatmul.mubr.f32.gmra.mrb[84].mxu1 %v3113_v49  ;;  %v3122_v54 = vsub.f32 %v9106_v50, %v9963_v10 }
 0x37a   :  { %v2717_v53 = vpop.f32.mrb[50].mxu0 }
 0x37b   :  { %10620 = vst [vmem:[#allocation151_spill] sm:$0xff] %v9117_v43  ;;  %v9122_v22 = vand.u32 4294901760, %v2787_v63  ;;  %v6175_v8 = vadd.f32 %v6174_v48, %v2717_v53  ;;  %v2719_v3 = vpop.f32.mrb[51].mxu0  ;;  %v3123_v51 = vand.u32 4294901760, %v3122_v54  ;;  %v9968_v23 = vand.u32 4294901760, %v9117_v43 }
 0x37d   :  { %10621 = vst [vmem:[#allocation153_spill] sm:$0xff] %v9122_v22  ;;  %v9128_v60 = vsub.f32 %v2787_v63, %v9122_v22  ;;  %v2788_v55 = vmax.f32 %v6175_v8, 0.0  ;;  %5197 = vmatprep.mubr.f32.mxu1 %v3123_v51  ;;  %v3132_v49 = vsub.f32 %v9117_v43, %v9968_v23 }
 0x37e   :  { %v2724_v10 = vpop.f32.mrb[52].mxu0 }
 0x37f   :  { %10623 = vst [vmem:[#allocation155_spill] sm:$0xff] %v9128_v60  ;;  %v9133_v50 = vand.u32 4294901760, %v2788_v55  ;;  %v6177_v53 = vadd.f32 %v6176_v0, %v2724_v10  ;;  %v2726_v48 = vpop.f32.mrb[53].mxu0  ;;  %v3133_v54 = vand.u32 4294901760, %v3132_v49  ;;  %v9973_v3 = vand.u32 4294901760, %v9128_v60 }
 0x381   :  { %10624 = vst [vmem:[#allocation156_spill] sm:$0xff] %v9133_v50  ;;  %v9139_v63 = vsub.f32 %v2788_v55, %v9133_v50  ;;  %v2789_v8 = vmax.f32 %v6177_v53, 0.0  ;;  %5198 = vmatmul.mubr.f32.gmra.mrb[86].mxu1 %v3133_v54  ;;  %v3142_v51 = vsub.f32 %v9128_v60, %v9973_v3 }
 0x382   :  { %v2731_v23 = vpop.f32.mrb[54].mxu0 }
 0x383   :  { %10626 = vst [vmem:[#allocation67_spill] sm:$0xff] %v9139_v63  ;;  %v9144_v43 = vand.u32 4294901760, %v2789_v8  ;;  %v6179_v10 = vadd.f32 %v6178_v24, %v2731_v23  ;;  %v2733_v0 = vpop.f32.mrb[55].mxu0  ;;  %v3143_v49 = vand.u32 4294901760, %v3142_v51  ;;  %v9978_v48 = vand.u32 4294901760, %v9139_v63 }
 0x385   :  { %10627 = vst [vmem:[#allocation62_spill] sm:$0xff] %v9144_v43  ;;  %v9150_v55 = vsub.f32 %v2789_v8, %v9144_v43  ;;  %v2790_v53 = vmax.f32 %v6179_v10, 0.0  ;;  %5200 = vmatprep.mubr.f32.mxu1 %v3143_v49  ;;  %v3152_v54 = vsub.f32 %v9139_v63, %v9978_v48 }
 0x386   :  { %v2738_v3 = vpop.f32.mrb[56].mxu0 }
 0x387   :  { %10629 = vst [vmem:[#allocation56_spill] sm:$0xff] %v9150_v55  ;;  %v9155_v60 = vand.u32 4294901760, %v2790_v53  ;;  %v6181_v23 = vadd.f32 %v6180_v28, %v2738_v3  ;;  %v2740_v24 = vpop.f32.mrb[57].mxu0  ;;  %v3153_v51 = vand.u32 4294901760, %v3152_v54  ;;  %v9983_v0 = vand.u32 4294901760, %v9150_v55 }
 0x389   :  { %10630 = vst [vmem:[#allocation93_spill] sm:$0xff] %v9155_v60  ;;  %v9161_v8 = vsub.f32 %v2790_v53, %v9155_v60  ;;  %v2791_v10 = vmax.f32 %v6181_v23, 0.0  ;;  %5201 = vmatmul.mubr.f32.gmra.mrb[88].mxu1 %v3153_v51  ;;  %v3162_v49 = vsub.f32 %v9150_v55, %v9983_v0 }
 0x38a   :  { %v2745_v48 = vpop.f32.mrb[58].mxu0 }
 0x38b   :  { %10632 = vst [vmem:[#allocation78_spill] sm:$0xff] %v9161_v8  ;;  %v9166_v63 = vand.u32 4294901760, %v2791_v10  ;;  %v6183_v3 = vadd.f32 %v6182_v15, %v2745_v48  ;;  %v2747_v28 = vpop.f32.mrb[59].mxu0  ;;  %v3163_v54 = vand.u32 4294901760, %v3162_v49  ;;  %v9988_v24 = vand.u32 4294901760, %v9161_v8 }
 0x38d   :  { %10633 = vst [vmem:[#allocation71_spill] sm:$0xff] %v9166_v63  ;;  %v9172_v53 = vsub.f32 %v2791_v10, %v9166_v63  ;;  %v2792_v23 = vmax.f32 %v6183_v3, 0.0  ;;  %5203 = vmatprep.mubr.f32.mxu1 %v3163_v54  ;;  %v3172_v51 = vsub.f32 %v9161_v8, %v9988_v24 }
 0x38e   :  { %v2752_v0 = vpop.f32.mrb[60].mxu0 }
 0x38f   :  { %v9177_v55 = vand.u32 4294901760, %v2792_v23  ;;  %v6185_v48 = vadd.f32 %v6184_v47, %v2752_v0  ;;  %v2754_v15 = vpop.f32.mrb[61].mxu0  ;;  %v3173_v49 = vand.u32 4294901760, %v3172_v51  ;;  %v9996_v28 = vand.u32 4294901760, %v9172_v53 }
 0x391   :  { %10635 = vst [vmem:[#allocation79_spill] sm:$0xff] %v9177_v55  ;;  %v9183_v10 = vsub.f32 %v2792_v23, %v9177_v55  ;;  %v2793_v3 = vmax.f32 %v6185_v48, 0.0  ;;  %5204 = vmatmul.mubr.f32.gmra.mrb[90].mxu1 %v3173_v49  ;;  %v3182_v54 = vsub.f32 %v9172_v53, %v9996_v28  ;;  %v10657_v28 = vld [vmem:[#allocation33_spill] sm:$0xff] }
 0x392   :  { %v2759_v24 = vpop.f32.mrb[62].mxu0 }
 0x393   :  { %v9188_v8 = vand.u32 4294901760, %v2793_v3  ;;  %v6187_v0 = vadd.f32 %v6186_v9, %v2759_v24  ;;  %v2761_v47 = vpop.f32.mrb[63].mxu0  ;;  %v3183_v51 = vand.u32 4294901760, %v3182_v54  ;;  %v9995_v15 = vand.u32 4294901760, %v9183_v10 }
 0x395   :  { %10637 = vst [vmem:[#allocation95_spill] sm:$0xff] %v9188_v8  ;;  %v9192_v29 = vsub.f32 %v2793_v3, %v9188_v8  ;;  %v2794_v25 = vmax.f32 %v6187_v0, 0.0  ;;  %5206 = vmatprep.mubr.f32.mxu1 %v3183_v51  ;;  %v3192_v40 = vsub.f32 %v9183_v10, %v9995_v15  ;;  %v10639_v51 = vld [vmem:[#allocation46_spill] sm:$0xff] }
 0x397   :  { %v9197_v23 = vand.u32 4294901760, %v2794_v25  ;;  %v3193_v48 = vand.u32 4294901760, %v3192_v40  ;;  %v9994_v49 = vand.u32 4294901760, %v9192_v29  ;;  %v10640_v40 = vld [vmem:[#allocation50_spill] sm:$0xff] }
 0x399   :  { %10638 = vst [vmem:[#allocation96_spill] sm:$0xff] %v9197_v23  ;;  %v9201_v24 = vsub.f32 %v2794_v25, %v9197_v23  ;;  %5207 = vmatmul.mubr.f32.gmra.mrb[92].mxu1 %v3193_v48  ;;  %v3202_v9 = vsub.f32 %v9192_v29, %v9994_v49  ;;  %v10647_v25 = vld [vmem:[#allocation18_spill] sm:$0xff]  ;;  %v10648_v48 = vld [vmem:[#allocation19_spill] sm:$0xff] }
 0x39a   :  { %v10655_v49 = vld [vmem:[#allocation30_spill] sm:$0xff] }
 0x39b   :  { %v3203_v3 = vand.u32 4294901760, %v3202_v9  ;;  %v9993_v54 = vand.u32 4294901760, %v9201_v24  ;;  %v10649_v9 = vld [vmem:[#allocation65_spill] sm:$0xff]  ;;  %v10656_v15 = vand.u32 4294901760, %v10655_v49  ;;  %v10666_v49 = vld [vmem:[#allocation147_spill] sm:$0xff] }
 0x39d   :  { %5209 = vmatprep.mubr.f32.mxu1 %v3203_v3  ;;  %v3212_v0 = vsub.f32 %v9201_v24, %v9993_v54  ;;  %v10650_v3 = vld [vmem:[#allocation69_spill] sm:$0xff]  ;;  %v10654_v54 = vld [vmem:[#allocation22_spill] sm:$0xff] }
 0x39f   :  { %v3213_v47 = vand.u32 4294901760, %v3212_v0  ;;  %v10651_v0 = vld [vmem:[#allocation28_spill] sm:$0xff] }
 0x3a1   :  { %5210 = vmatmul.mubr.f32.gmra.mrb[94].mxu1 %v3213_v47  ;;  %v10652_v47 = vld [vmem:[#allocation70_spill] sm:$0xff] }
 0x3a2   :  { %5244 = vmatprep.mubr.f32.mxu1 %v10639_v51 }
 0x3a5   :  { %5245 = vmatmul.mubr.f32.vlgmr.msra.gmra.mrb[64].mxu1 %v10640_v40 }
 0x3a6   :  { %5247 = vmatprep.mubr.f32.mxu1 %v8793_v31  ;;  %5967 = vmatpush3.bf16.msra.mxu1 %v8815_v44  ;;  %v5992_v44 = vpack.c.bf16 %v8876_v59, %v8871_v6 }
 0x3a7   :  { %5969 = vmatprep.subr.bf16.mxu1 %v8864_v39 }
 0x3a9   :  { %5248 = vmatmul.mubr.f32.gmra.mrb[66].mxu1 %v8817_v38 }
 0x3aa   :  { %5250 = vmatprep.mubr.f32.mxu1 %v8847_v7  ;;  %5971 = vmatpush3.bf16.msra.mxu1 %v8864_v39  ;;  %v10641_v39 = vld [vmem:[#allocation14_spill] sm:$0xff] }
 0x3ab   :  { %5973 = vmatprep.subr.bf16.mxu1 %v8910_v5 }
 0x3ad   :  { %5251 = vmatmul.mubr.f32.gmra.mrb[68].mxu1 %v8878_v2 }
 0x3ae   :  { %5253 = vmatprep.mubr.f32.mxu1 %v8897_v17  ;;  %5975 = vmatpush3.bf16.msra.mxu1 %v8910_v5  ;;  %v10642_v5 = vld [vmem:[#allocation49_spill] sm:$0xff] }
 0x3af   :  { %5977 = vmatprep.subr.bf16.mxu1 %v8942_v58 }
 0x3b1   :  { %5254 = vmatmul.mubr.f32.gmra.mrb[70].mxu1 %v8918_v1 }
 0x3b2   :  { %5256 = vmatprep.mubr.f32.mxu1 %v8929_v11  ;;  %5979 = vmatpush3.bf16.msra.mxu1 %v8942_v58  ;;  %v10643_v58 = vld [vmem:[#allocation15_spill] sm:$0xff] }
 0x3b3   :  { %5981 = vmatprep.subr.bf16.mxu1 %v8968_v35 }
 0x3b5   :  { %5257 = vmatmul.mubr.f32.gmra.mrb[72].mxu1 %v8944_v33 }
 0x3b6   :  { %5259 = vmatprep.mubr.f32.mxu1 %v8955_v32  ;;  %5983 = vmatpush3.bf16.msra.mxu1 %v8968_v35  ;;  %v10644_v35 = vld [vmem:[#allocation16_spill] sm:$0xff] }
 0x3b7   :  { %5985 = vmatprep.subr.bf16.mxu1 %v8995_v37 }
 0x3b9   :  { %5260 = vmatmul.mubr.f32.gmra.mrb[74].mxu1 %v8970_v52 }
 0x3ba   :  { %5262 = vmatprep.mubr.f32.mxu1 %v8982_v18  ;;  %5987 = vmatpush3.bf16.msra.mxu1 %v8995_v37  ;;  %v10645_v37 = vld [vmem:[#allocation53_spill] sm:$0xff]  ;;  %v10681_v18 = vld [vmem:[#allocation43_spill] sm:$0xff] }
 0x3bb   :  { %5989 = vmatprep.subr.bf16.mxu1 %v9021_v14  ;;  %v10682_v52 = vand.u32 4294901760, %v10681_v18  ;;  %v10693_v18 = vld [vmem:[#allocation48_spill] sm:$0xff] }
 0x3bd   :  { %5263 = vmatmul.mubr.f32.gmra.mrb[76].mxu1 %v8997_v41  ;;  %v10679_v41 = vld [vmem:[#allocation38_spill] sm:$0xff] }
 0x3be   :  { %5265 = vmatprep.mubr.f32.mxu1 %v9008_v46  ;;  %5991 = vmatpush3.bf16.msra.mxu1 %v9021_v14  ;;  %v10646_v14 = vld [vmem:[#allocation17_spill] sm:$0xff]  ;;  %v10678_v46 = vand.u32 4294901760, %v8811_v45 }
 0x3bf   :  { %5993 = vmatprep.subr.bf16.mxu1 %v5992_v44 }
 0x3c1   :  { %5266 = vmatmul.mubr.f32.gmra.mrb[78].mxu1 %v9023_v61 }
 0x3c2   :  { %5268 = vmatprep.mubr.f32.mxu1 %v9034_v19  ;;  %5995 = vmatpush3.bf16.msra.mxu1 %v5992_v44  ;;  %v10653_v44 = vld [vmem:[#allocation118_spill] sm:$0xff] }
 0x3c3   :  { %5997 = vmatprep.subr.bf16.mxu1 %v10641_v39 }
 0x3c5   :  { %5269 = vmatmul.mubr.f32.gmra.mrb[80].mxu1 %v9045_v21  ;;  %v10675_v21 = vld [vmem:[#allocation37_spill] sm:$0xff] }
 0x3c6   :  { %5271 = vmatprep.mubr.f32.mxu1 %v9056_v30  ;;  %v10676_v19 = vand.u32 4294901760, %v10675_v21 }
 0x3c9   :  { %5272 = vmatmul.mubr.f32.gmra.mrb[82].mxu1 %v9067_v62  ;;  %v10673_v62 = vld [vmem:[#allocation36_spill] sm:$0xff] }
 0x3ca   :  { %5274 = vmatprep.mubr.f32.mxu1 %v9078_v57  ;;  %v10672_v57 = vand.u32 4294901760, %v10642_v5  ;;  %v10674_v30 = vand.u32 4294901760, %v10673_v62  ;;  %v10684_v62 = vand.u32 4294901760, %v8857_v26 }
 0x3cc   :  { %v6032_v61 = vpack.c.bf16 %v10676_v19, %v10674_v30  ;;  %v10685_v30 = vld [vmem:[#allocation44_spill] sm:$0xff]  ;;  %v10689_v19 = vand.u32 4294901760, %v10645_v37 }
 0x3cd   :  { %5275 = vmatmul.mubr.f32.gmra.mrb[84].mxu1 %v9089_v42  ;;  %v10671_v42 = vld [vmem:[#allocation78_spill] sm:$0xff]  ;;  %v10686_v21 = vand.u32 4294901760, %v10685_v30 }
 0x3ce   :  { %5277 = vmatprep.mubr.f32.mxu1 %v9100_v34  ;;  %v10670_v34 = vld [vmem:[#allocation56_spill] sm:$0xff] }
 0x3d1   :  { %5278 = vmatmul.mubr.f32.gmra.mrb[86].mxu1 %v9111_v56  ;;  %v10665_v56 = vld [vmem:[#allocation143_spill] sm:$0xff] }
 0x3d2   :  { %5280 = vmatprep.mubr.f32.mxu1 %v9122_v22  ;;  %v10664_v22 = vld [vmem:[#allocation139_spill] sm:$0xff] }
 0x3d5   :  { %5281 = vmatmul.mubr.f32.gmra.mrb[88].mxu1 %v9133_v50  ;;  %v10663_v50 = vld [vmem:[#allocation135_spill] sm:$0xff] }
 0x3d6   :  { %5283 = vmatprep.mubr.f32.mxu1 %v9144_v43  ;;  %v10662_v43 = vld [vmem:[#allocation131_spill] sm:$0xff] }
 0x3d9   :  { %5284 = vmatmul.mubr.f32.gmra.mrb[90].mxu1 %v9155_v60  ;;  %v10661_v60 = vld [vmem:[#allocation129_spill] sm:$0xff] }
 0x3da   :  { %5286 = vmatprep.mubr.f32.mxu1 %v9166_v63  ;;  %v10660_v63 = vld [vmem:[#allocation74_spill] sm:$0xff] }
 0x3dd   :  { %5287 = vmatmul.mubr.f32.gmra.mrb[92].mxu1 %v9177_v55  ;;  %v10659_v55 = vld [vmem:[#allocation123_spill] sm:$0xff] }
 0x3de   :  { %5289 = vmatprep.mubr.f32.mxu1 %v9188_v8 }
 0x3e1   :  { %5290 = vmatmul.mubr.f32.gmra.mrb[94].mxu1 %v9197_v23  ;;  %v10658_v23 = vand.u32 4294901760, %v10657_v28  ;;  %v10667_v28 = vld [vmem:[#allocation151_spill] sm:$0xff] }
 0x3e2   :  { %5324 = vmatprep.mubr.f32.mxu1 %v10642_v5  ;;  %v10697_v5 = vld [vmem:[#allocation57_spill] sm:$0xff] }
 0x3e3   :  { %v6028_v8 = vpack.c.bf16 %v10658_v23, %v10656_v15  ;;  %v10668_v15 = vld [vmem:[#allocation155_spill] sm:$0xff] }
 0x3e4   :  { %v10669_v23 = vld [vmem:[#allocation67_spill] sm:$0xff] }
 0x3e5   :  { %5325 = vmatmul.mubr.f32.vlgmr.msra.gmra.mrb[64].mxu1 %v8775_v27 }
 0x3e6   :  { %5327 = vmatprep.mubr.f32.mxu1 %v8811_v45  ;;  %5999 = vmatpush3.bf16.msra.mxu1 %v10641_v39 }
 0x3e7   :  { %6001 = vmatprep.subr.bf16.mxu1 %v10643_v58 }
 0x3e9   :  { %5328 = vmatmul.mubr.f32.gmra.mrb[66].mxu1 %v8831_v12 }
 0x3ea   :  { %5330 = vmatprep.mubr.f32.mxu1 %v8857_v26  ;;  %6003 = vmatpush3.bf16.msra.mxu1 %v10643_v58  ;;  %v10694_v26 = vand.u32 4294901760, %v10693_v18  ;;  %v10742_v18 = vld [vmem:[#allocation137_spill] sm:$0xff] }
 0x3eb   :  { %6005 = vmatprep.subr.bf16.mxu1 %v10644_v35 }
 0x3ed   :  { %5331 = vmatmul.mubr.f32.gmra.mrb[68].mxu1 %v10645_v37  ;;  %v10698_v37 = vand.u32 4294901760, %v10697_v5  ;;  %v10747_v5 = vld [vmem:[#allocation156_spill] sm:$0xff] }
 0x3ee   :  { %5333 = vmatprep.mubr.f32.mxu1 %v8903_v13  ;;  %6007 = vmatpush3.bf16.msra.mxu1 %v10644_v35 }
 0x3ef   :  { %6009 = vmatprep.subr.bf16.mxu1 %v10646_v14 }
 0x3f1   :  { %5334 = vmatmul.mubr.f32.gmra.mrb[70].mxu1 %v8924_v36 }
 0x3f2   :  { %5336 = vmatprep.mubr.f32.mxu1 %v8935_v4  ;;  %6011 = vmatpush3.bf16.msra.mxu1 %v10646_v14 }
 0x3f3   :  { %6013 = vmatprep.subr.bf16.mxu1 %v10647_v25 }
 0x3f5   :  { %5337 = vmatmul.mubr.f32.gmra.mrb[72].mxu1 %v8950_v16 }
 0x3f6   :  { %5339 = vmatprep.mubr.f32.mxu1 %v8961_v20  ;;  %6015 = vmatpush3.bf16.msra.mxu1 %v10647_v25 }
 0x3f7   :  { %6017 = vmatprep.subr.bf16.mxu1 %v10648_v48 }
 0x3f9   :  { %5340 = vmatmul.mubr.f32.gmra.mrb[74].mxu1 %v10649_v9 }
 0x3fa   :  { %5342 = vmatprep.mubr.f32.mxu1 %v10650_v3  ;;  %6019 = vmatpush3.bf16.msra.mxu1 %v10648_v48 }
 0x3fb   :  { %6021 = vmatprep.subr.bf16.mxu1 %v10651_v0 }
 0x3fd   :  { %5343 = vmatmul.mubr.f32.gmra.mrb[76].mxu1 %v10652_v47 }
 0x3fe   :  { %5345 = vmatprep.mubr.f32.mxu1 %v10653_v44  ;;  %6023 = vmatpush3.bf16.msra.mxu1 %v10651_v0  ;;  %v10680_v0 = vand.u32 4294901760, %v10679_v41  ;;  %v10690_v41 = vand.u32 4294901760, %v8903_v13 }
 0x3ff   :  { %6025 = vmatprep.subr.bf16.mxu1 %v10654_v54 }
 0x400   :  { %v6036_v48 = vpack.c.bf16 %v10682_v52, %v10680_v0  ;;  %v10699_v0 = vld [vmem:[#allocation60_spill] sm:$0xff] }
 0x401   :  { %5346 = vmatmul.mubr.f32.gmra.mrb[78].mxu1 %v10659_v55  ;;  %v10700_v13 = vand.u32 4294901760, %v10699_v0  ;;  %v10749_v0 = vld [vmem:[#allocation93_spill] sm:$0xff] }
 0x402   :  { %5348 = vmatprep.mubr.f32.mxu1 %v10660_v63  ;;  %6027 = vmatpush3.bf16.msra.mxu1 %v10654_v54  ;;  %v10677_v54 = vand.u32 4294901760, %v8775_v27  ;;  %v10687_v27 = vld [vmem:[#allocation45_spill] sm:$0xff] }
 0x403   :  { %6029 = vmatprep.subr.bf16.mxu1 %v6028_v8  ;;  %v10688_v45 = vand.u32 4294901760, %v10687_v27 }
 0x405   :  { %5349 = vmatmul.mubr.f32.gmra.mrb[80].mxu1 %v10661_v60 }
 0x406   :  { %5351 = vmatprep.mubr.f32.mxu1 %v10662_v43 }
 0x409   :  { %5352 = vmatmul.mubr.f32.gmra.mrb[82].mxu1 %v10663_v50 }
 0x40a   :  { %5354 = vmatprep.mubr.f32.mxu1 %v10664_v22 }
 0x40d   :  { %5355 = vmatmul.mubr.f32.gmra.mrb[84].mxu1 %v10665_v56 }
 0x40e   :  { %5357 = vmatprep.mubr.f32.mxu1 %v10666_v49 }
 0x411   :  { %5358 = vmatmul.mubr.f32.gmra.mrb[86].mxu1 %v10667_v28 }
 0x412   :  { %5360 = vmatprep.mubr.f32.mxu1 %v10668_v15 }
 0x415   :  { %5361 = vmatmul.mubr.f32.gmra.mrb[88].mxu1 %v10669_v23 }
 0x416   :  { %5363 = vmatprep.mubr.f32.mxu1 %v10670_v34 }
 0x419   :  { %5364 = vmatmul.mubr.f32.gmra.mrb[90].mxu1 %v10671_v42 }
 0x41a   :  { %5366 = vmatprep.mubr.f32.mxu1 %v9172_v53 }
 0x41d   :  { %5367 = vmatmul.mubr.f32.gmra.mrb[92].mxu1 %v9183_v10 }
 0x41e   :  { %5369 = vmatprep.mubr.f32.mxu1 %v9192_v29 }
 0x421   :  { %5370 = vmatmul.mubr.f32.gmra.mrb[94].mxu1 %v9201_v24 }
 0x422   :  { %5404 = vmatprep.mubr.f32.mxu1 %v10672_v57  ;;  %v10683_v57 = vand.u32 4294901760, %v8831_v12  ;;  %v10691_v12 = vld [vmem:[#allocation51_spill] sm:$0xff] }
 0x423   :  { %v10692_v52 = vand.u32 4294901760, %v10691_v12  ;;  %v10712_v12 = vand.u32 4294901760, %v10653_v44  ;;  %v10718_v44 = vand.u32 4294901760, %v10664_v22  ;;  %v10725_v22 = vand.u32 4294901760, %v10671_v42  ;;  %v10731_v42 = vld [vmem:[#allocation59_spill] sm:$0xff] }
 0x425   :  { %5405 = vmatmul.mubr.f32.vlgmr.msra.gmra.mrb[64].mxu1 %v10677_v54  ;;  %v10696_v54 = vand.u32 4294901760, %v8935_v4 }
 0x426   :  { %5407 = vmatprep.mubr.f32.mxu1 %v10678_v46  ;;  %6031 = vmatpush3.bf16.msra.mxu1 %v6028_v8  ;;  %v6040_v46 = vpack.c.bf16 %v10688_v45, %v10686_v21  ;;  %v6044_v8 = vpack.c.bf16 %v10694_v26, %v10692_v52  ;;  %v10705_v21 = vld [vmem:[#allocation64_spill] sm:$0xff]  ;;  %v10707_v45 = vand.u32 4294901760, %v10649_v9  ;;  %v10713_v9 = vand.u32 4294901760, %v10659_v55  ;;  %v10743_v26 = vld [vmem:[#allocation141_spill] sm:$0xff] }
 0x427   :  { %6033 = vmatprep.subr.bf16.mxu1 %v6032_v61  ;;  %v10706_v4 = vand.u32 4294901760, %v10705_v21  ;;  %v10719_v55 = vand.u32 4294901760, %v10665_v56  ;;  %v10721_v52 = vand.u32 4294901760, %v10667_v28  ;;  %v10726_v56 = vand.u32 4294901760, %v9172_v53  ;;  %v10733_v53 = vld [vmem:[#allocation28_spill] sm:$0xff] }
 0x428   :  { %v10728_v28 = vand.u32 4294901760, %v9192_v29  ;;  %v10730_v29 = vld [vmem:[#allocation19_spill] sm:$0xff] }
 0x429   :  { %5408 = vmatmul.mubr.f32.gmra.mrb[66].mxu1 %v10683_v57  ;;  %v6048_v57 = vpack.c.bf16 %v10700_v13, %v10698_v37  ;;  %v10748_v37 = vld [vmem:[#allocation62_spill] sm:$0xff]  ;;  %v10750_v13 = vld [vmem:[#allocation71_spill] sm:$0xff] }
 0x42a   :  { %5410 = vmatprep.mubr.f32.mxu1 %v10684_v62  ;;  %6035 = vmatpush3.bf16.msra.mxu1 %v6032_v61  ;;  %v10695_v61 = vand.u32 4294901760, %v8924_v36  ;;  %v10702_v62 = vand.u32 4294901760, %v8961_v20  ;;  %v10703_v36 = vld [vmem:[#allocation63_spill] sm:$0xff]  ;;  %v10710_v20 = vand.u32 4294901760, %v8876_v59  ;;  %v10716_v59 = vand.u32 4294901760, %v10662_v43 }
 0x42b   :  { %6037 = vmatprep.subr.bf16.mxu1 %v6036_v48  ;;  %v10704_v30 = vand.u32 4294901760, %v10703_v36  ;;  %v10723_v43 = vand.u32 4294901760, %v10669_v23  ;;  %v10741_v23 = vld [vmem:[#allocation133_spill] sm:$0xff] }
 0x42d   :  { %5411 = vmatmul.mubr.f32.gmra.mrb[68].mxu1 %v10689_v19  ;;  %v6052_v27 = vpack.c.bf16 %v10706_v4, %v10704_v30 }
 0x42e   :  { %5413 = vmatprep.mubr.f32.mxu1 %v10690_v41  ;;  %6039 = vmatpush3.bf16.msra.mxu1 %v6036_v48  ;;  %v10701_v48 = vand.u32 4294901760, %v8950_v16  ;;  %v10709_v16 = vand.u32 4294901760, %v8871_v6  ;;  %v10711_v41 = vand.u32 4294901760, %v10652_v47  ;;  %v10715_v6 = vand.u32 4294901760, %v10661_v60 }
 0x42f   :  { %6041 = vmatprep.subr.bf16.mxu1 %v6040_v46  ;;  %v10717_v47 = vand.u32 4294901760, %v10663_v50  ;;  %v10722_v60 = vand.u32 4294901760, %v10668_v15  ;;  %v10724_v50 = vand.u32 4294901760, %v10670_v34  ;;  %v10729_v15 = vand.u32 4294901760, %v9201_v24  ;;  %v10732_v34 = vld [vmem:[#allocation68_spill] sm:$0xff]  ;;  %v10735_v24 = vld [vmem:[#allocation115_spill] sm:$0xff] }
 0x430   :  { %v6056_v19 = vpack.c.bf16 %v10710_v20, %v10709_v16 }
 0x431   :  { %5414 = vmatmul.mubr.f32.gmra.mrb[70].mxu1 %v10695_v61  ;;  %v10745_v61 = vld [vmem:[#allocation149_spill] sm:$0xff] }
 0x432   :  { %5416 = vmatprep.mubr.f32.mxu1 %v10696_v54  ;;  %6043 = vmatpush3.bf16.msra.mxu1 %v6040_v46  ;;  %v10708_v46 = vand.u32 4294901760, %v10650_v3  ;;  %v10714_v3 = vand.u32 4294901760, %v10660_v63  ;;  %v10720_v63 = vand.u32 4294901760, %v10666_v49  ;;  %v10727_v49 = vand.u32 4294901760, %v9183_v10  ;;  %v10734_v10 = vld [vmem:[#allocation111_spill] sm:$0xff]  ;;  %v10746_v54 = vld [vmem:[#allocation153_spill] sm:$0xff] }
 0x433   :  { %6045 = vmatprep.subr.bf16.mxu1 %v6044_v8 }
 0x435   :  { %5417 = vmatmul.mubr.f32.gmra.mrb[72].mxu1 %v10701_v48  ;;  %v10752_v48 = vld [vmem:[#allocation95_spill] sm:$0xff] }
 0x436   :  { %5419 = vmatprep.mubr.f32.mxu1 %v10702_v62  ;;  %6047 = vmatpush3.bf16.msra.mxu1 %v6044_v8  ;;  %v10744_v8 = vld [vmem:[#allocation145_spill] sm:$0xff]  ;;  %v10753_v62 = vld [vmem:[#allocation96_spill] sm:$0xff] }
 0x437   :  { %6049 = vmatprep.subr.bf16.mxu1 %v6048_v57 }
 0x439   :  { %5420 = vmatmul.mubr.f32.gmra.mrb[74].mxu1 %v10707_v45 }
 0x43a   :  { %5422 = vmatprep.mubr.f32.mxu1 %v10708_v46  ;;  %6051 = vmatpush3.bf16.msra.mxu1 %v6048_v57  ;;  %v10751_v57 = vld [vmem:[#allocation79_spill] sm:$0xff] }
 0x43b   :  { %6053 = vmatprep.subr.bf16.mxu1 %v6052_v27 }
 0x43d   :  { %5423 = vmatmul.mubr.f32.gmra.mrb[76].mxu1 %v10711_v41 }
 0x43e   :  { %5425 = vmatprep.mubr.f32.mxu1 %v10712_v12  ;;  %6055 = vmatpush3.bf16.msra.mxu1 %v6052_v27 }
 0x43f   :  { %6057 = vmatprep.subr.bf16.mxu1 %v6056_v19 }
 0x441   :  { %5426 = vmatmul.mubr.f32.gmra.mrb[78].mxu1 %v10713_v9 }
 0x442   :  { %5428 = vmatprep.mubr.f32.mxu1 %v10714_v3  ;;  %6059 = vmatpush3.bf16.msra.mxu1 %v6056_v19 }
 0x443   :  { %6061 = vmatprep.subr.bf16.mxu1 %v10641_v39 }
 0x445   :  { %5429 = vmatmul.mubr.f32.gmra.mrb[80].mxu1 %v10715_v6 }
 0x446   :  { %5431 = vmatprep.mubr.f32.mxu1 %v10716_v59 }
 0x449   :  { %5432 = vmatmul.mubr.f32.gmra.mrb[82].mxu1 %v10717_v47 }
 0x44a   :  { %5434 = vmatprep.mubr.f32.mxu1 %v10718_v44 }
 0x44d   :  { %5435 = vmatmul.mubr.f32.gmra.mrb[84].mxu1 %v10719_v55 }
 0x44e   :  { %5437 = vmatprep.mubr.f32.mxu1 %v10720_v63 }
 0x451   :  { %5438 = vmatmul.mubr.f32.gmra.mrb[86].mxu1 %v10721_v52 }
 0x452   :  { %5440 = vmatprep.mubr.f32.mxu1 %v10722_v60 }
 0x455   :  { %5441 = vmatmul.mubr.f32.gmra.mrb[88].mxu1 %v10723_v43 }
 0x456   :  { %5443 = vmatprep.mubr.f32.mxu1 %v10724_v50 }
 0x459   :  { %5444 = vmatmul.mubr.f32.gmra.mrb[90].mxu1 %v10725_v22 }
 0x45a   :  { %5446 = vmatprep.mubr.f32.mxu1 %v10726_v56 }
 0x45d   :  { %5447 = vmatmul.mubr.f32.gmra.mrb[92].mxu1 %v10727_v49 }
 0x45e   :  { %5449 = vmatprep.mubr.f32.mxu1 %v10728_v28 }
 0x461   :  { %5450 = vmatmul.mubr.f32.gmra.mrb[94].mxu1 %v10729_v15 }
 0x462   :  { %5484 = vmatprep.mubr.f32.mxu1 %v10639_v51 }
 0x465   :  { %5485 = vmatmul.mubr.f32.vlgmr.msra.gmra.mrb[64].mxu1 %v10640_v40 }
 0x466   :  { %5487 = vmatprep.mubr.f32.mxu1 %v8793_v31  ;;  %6063 = vmatpush3.bf16.msra.mxu1 %v10641_v39  ;;  %v10736_v39 = vld [vmem:[#allocation22_spill] sm:$0xff] }
 0x467   :  { %6065 = vmatprep.subr.bf16.mxu1 %v10643_v58 }
 0x469   :  { %5488 = vmatmul.mubr.f32.gmra.mrb[66].mxu1 %v8817_v38 }
 0x46a   :  { %5490 = vmatprep.mubr.f32.mxu1 %v8847_v7  ;;  %6067 = vmatpush3.bf16.msra.mxu1 %v10643_v58  ;;  %v10737_v58 = vld [vmem:[#allocation72_spill] sm:$0xff] }
 0x46b   :  { %6069 = vmatprep.subr.bf16.mxu1 %v10644_v35 }
 0x46d   :  { %5491 = vmatmul.mubr.f32.gmra.mrb[68].mxu1 %v8878_v2 }
 0x46e   :  { %5493 = vmatprep.mubr.f32.mxu1 %v8897_v17  ;;  %6071 = vmatpush3.bf16.msra.mxu1 %v10644_v35  ;;  %v10738_v35 = vld [vmem:[#allocation125_spill] sm:$0xff] }
 0x46f   :  { %6073 = vmatprep.subr.bf16.mxu1 %v10646_v14 }
 0x471   :  { %5494 = vmatmul.mubr.f32.gmra.mrb[70].mxu1 %v8918_v1 }
 0x472   :  { %5496 = vmatprep.mubr.f32.mxu1 %v8929_v11  ;;  %6075 = vmatpush3.bf16.msra.mxu1 %v10646_v14  ;;  %v10739_v14 = vld [vmem:[#allocation127_spill] sm:$0xff] }
 0x473   :  { %6077 = vmatprep.subr.bf16.mxu1 %v10647_v25 }
 0x475   :  { %5497 = vmatmul.mubr.f32.gmra.mrb[72].mxu1 %v8944_v33 }
 0x476   :  { %5499 = vmatprep.mubr.f32.mxu1 %v8955_v32  ;;  %6079 = vmatpush3.bf16.msra.mxu1 %v10647_v25  ;;  %v10740_v25 = vld [vmem:[#allocation76_spill] sm:$0xff] }
 0x477   :  { %6081 = vmatprep.subr.bf16.mxu1 %v10730_v29 }
 0x479   :  { %5500 = vmatmul.mubr.f32.gmra.mrb[74].mxu1 %v10731_v42 }
 0x47a   :  { %5502 = vmatprep.mubr.f32.mxu1 %v10732_v34  ;;  %6083 = vmatpush3.bf16.msra.mxu1 %v10730_v29 }
 0x47b   :  { %6085 = vmatprep.subr.bf16.mxu1 %v10733_v53 }
 0x47d   :  { %5503 = vmatmul.mubr.f32.gmra.mrb[76].mxu1 %v10734_v10 }
 0x47e   :  { %5505 = vmatprep.mubr.f32.mxu1 %v10735_v24  ;;  %6087 = vmatpush3.bf16.msra.mxu1 %v10733_v53 }
 0x47f   :  { %6089 = vmatprep.subr.bf16.mxu1 %v10736_v39 }
 0x481   :  { %5506 = vmatmul.mubr.f32.gmra.mrb[78].mxu1 %v10737_v58 }
 0x482   :  { %5508 = vmatprep.mubr.f32.mxu1 %v10738_v35  ;;  %6091 = vmatpush3.bf16.msra.mxu1 %v10736_v39 }
 0x485   :  { %5509 = vmatmul.mubr.f32.gmra.mrb[80].mxu1 %v10739_v14 }
 0x486   :  { %5511 = vmatprep.mubr.f32.mxu1 %v10740_v25 }
 0x489   :  { %5512 = vmatmul.mubr.f32.gmra.mrb[82].mxu1 %v10741_v23 }
 0x48a   :  { %5514 = vmatprep.mubr.f32.mxu1 %v10742_v18 }
 0x48d   :  { %5515 = vmatmul.mubr.f32.gmra.mrb[84].mxu1 %v10743_v26 }
 0x48e   :  { %5517 = vmatprep.mubr.f32.mxu1 %v10744_v8 }
 0x491   :  { %5518 = vmatmul.mubr.f32.gmra.mrb[86].mxu1 %v10745_v61 }
 0x492   :  { %5520 = vmatprep.mubr.f32.mxu1 %v10746_v54 }
 0x495   :  { %5521 = vmatmul.mubr.f32.gmra.mrb[88].mxu1 %v10747_v5 }
 0x496   :  { %5523 = vmatprep.mubr.f32.mxu1 %v10748_v37 }
 0x499   :  { %5524 = vmatmul.mubr.f32.gmra.mrb[90].mxu1 %v10749_v0 }
 0x49a   :  { %5526 = vmatprep.mubr.f32.mxu1 %v10750_v13 }
 0x49d   :  { %5527 = vmatmul.mubr.f32.gmra.mrb[92].mxu1 %v10751_v57 }
 0x49e   :  { %5529 = vmatprep.mubr.f32.mxu1 %v10752_v48 }
 0x4a1   :  { %5530 = vmatmul.mubr.f32.gmra.mrb[94].mxu1 %v10753_v62 }
 0x4a2   :  { %5564 = vmatprep.mubr.f32.mxu1 %v10639_v51 }
 0x4a5   :  { %5565 = vmatmul.mubr.f32.vlgmr.msra.gmra.mrb[64].mxu1 %v10640_v40 }
 0x4a6   :  { %5567 = vmatprep.mubr.f32.mxu1 %v8793_v31  ;;  %v9484_v31 = vld [vmem:[%s9537_s4] ss:$0 sm:$0xff]  ;;  %s6747_s4 = smov [#allocation8]  }
 0x4a7   :  { %s4829_s10 = sshll.u32 %s6747_s4, 4  ;;  %s4830_s10 = int_to_ptr.vmem [resolvable:$true] %s4829_s10 }
 0x4a8   :  { %s6711_s11 = scalar_lea.vmem %s4830_s10, 4096  ;;  %p6716_p11 = scmp.lt.s32.totalorder %s4830_s10, %s4830_s10 }
 0x4a9   :  { %5568 = vmatmul.mubr.f32.gmra.mrb[66].mxu1 %v8817_v38  ;;  %p6712_p10 = scmp.ne.s32.totalorder %s4830_s10, %s6711_s11  ;;  %p6717_p12 = scmp.lt.s32.totalorder %s6711_s11, %s6711_s11 }
 0x4aa   :  { %5570 = vmatprep.mubr.f32.mxu1 %v8847_v7 }
 0x4ab   :  { %p6718_p13 = por %p6717_p12, %p6716_p11 }
 0x4ad   :  { %5571 = vmatmul.mubr.f32.gmra.mrb[68].mxu1 %v8878_v2  ;;  %p6719_p0 = pnand %p6718_p13, %p6712_p10 }
 0x4ae   :  { %5573 = vmatprep.mubr.f32.mxu1 %v8897_v17 }
 0x4b1   :  { %5574 = vmatmul.mubr.f32.gmra.mrb[70].mxu1 %v8918_v1 }
 0x4b2   :  { %5576 = vmatprep.mubr.f32.mxu1 %v8929_v11 }
 0x4b5   :  { %5577 = vmatmul.mubr.f32.gmra.mrb[72].mxu1 %v8944_v33 }
 0x4b6   :  { %5579 = vmatprep.mubr.f32.mxu1 %v8955_v32 }
 0x4b9   :  { %5580 = vmatmul.mubr.f32.gmra.mrb[74].mxu1 %v10731_v42 }
 0x4ba   :  { %5582 = vmatprep.mubr.f32.mxu1 %v10732_v34 }
 0x4bd   :  { %5583 = vmatmul.mubr.f32.gmra.mrb[76].mxu1 %v10734_v10 }
 0x4be   :  { %5585 = vmatprep.mubr.f32.mxu1 %v10735_v24 }
 0x4c1   :  { %5586 = vmatmul.mubr.f32.gmra.mrb[78].mxu1 %v10737_v58 }
 0x4c2   :  { %5588 = vmatprep.mubr.f32.mxu1 %v10738_v35 }
 0x4c5   :  { %5589 = vmatmul.mubr.f32.gmra.mrb[80].mxu1 %v10739_v14 }
 0x4c6   :  { %5591 = vmatprep.mubr.f32.mxu1 %v10740_v25 }
 0x4c9   :  { %5592 = vmatmul.mubr.f32.gmra.mrb[82].mxu1 %v10741_v23 }
 0x4ca   :  { %5594 = vmatprep.mubr.f32.mxu1 %v10742_v18 }
 0x4cd   :  { %5595 = vmatmul.mubr.f32.gmra.mrb[84].mxu1 %v10743_v26 }
 0x4ce   :  { %5597 = vmatprep.mubr.f32.mxu1 %v10744_v8 }
 0x4d1   :  { %5598 = vmatmul.mubr.f32.gmra.mrb[86].mxu1 %v10745_v61 }
 0x4d2   :  { %5600 = vmatprep.mubr.f32.mxu1 %v10746_v54 }
 0x4d5   :  { %5601 = vmatmul.mubr.f32.gmra.mrb[88].mxu1 %v10747_v5 }
 0x4d6   :  { %5603 = vmatprep.mubr.f32.mxu1 %v10748_v37 }
 0x4d9   :  { %5604 = vmatmul.mubr.f32.gmra.mrb[90].mxu1 %v10749_v0 }
 0x4da   :  { %5606 = vmatprep.mubr.f32.mxu1 %v10750_v13 }
 0x4dd   :  { %5607 = vmatmul.mubr.f32.gmra.mrb[92].mxu1 %v10751_v57 }
 0x4de   :  { %5609 = vmatprep.mubr.f32.mxu1 %v10752_v48 }
 0x4e1   :  { %5610 = vmatmul.mubr.f32.gmra.mrb[94].mxu1 %v10753_v62 }
 0x578   :  { %v5566_v38 = vpop.f32.mrb[64].mxu1 }
 0x579   :  { %v6188_v7 = vadd.f32 %v5566_v38, %v9484_v31  ;;  %v4602_v2 = vpop.f32.mrb[65].mxu1 }
 0x57a   :  { %v6189_v17 = vadd.f32 %v9484_v31, %v4602_v2 }
 0x57b   :  { %4793 = vst [vmem:[#allocation8 + $0x8] sm:$0xff] %v6188_v7 }
 0x57c   :  { %4792 = vst [vmem:[#allocation8] sm:$0xff] %v6189_v17  ;;  %v5569_v1 = vpop.f32.mrb[66].mxu1 }
 0x57d   :  { %v6190_v11 = vadd.f32 %v5569_v1, %v9484_v31  ;;  %v4614_v33 = vpop.f32.mrb[67].mxu1 }
 0x57e   :  { %v6191_v32 = vadd.f32 %v9484_v31, %v4614_v33 }
 0x57f   :  { %4795 = vst [vmem:[#allocation8 + $0x18] sm:$0xff] %v6190_v11 }
 0x580   :  { %4794 = vst [vmem:[#allocation8 + $0x10] sm:$0xff] %v6191_v32  ;;  %v5572_v51 = vpop.f32.mrb[68].mxu1 }
 0x581   :  { %v6192_v40 = vadd.f32 %v5572_v51, %v9484_v31  ;;  %v4626_v36 = vpop.f32.mrb[69].mxu1 }
 0x582   :  { %v6193_v30 = vadd.f32 %v9484_v31, %v4626_v36 }
 0x583   :  { %4797 = vst [vmem:[#allocation8 + $0x28] sm:$0xff] %v6192_v40 }
 0x584   :  { %4796 = vst [vmem:[#allocation8 + $0x20] sm:$0xff] %v6193_v30  ;;  %v5575_v21 = vpop.f32.mrb[70].mxu1 }
 0x585   :  { %v6194_v4 = vadd.f32 %v5575_v21, %v9484_v31  ;;  %v4638_v27 = vpop.f32.mrb[71].mxu1 }
 0x586   :  { %v6195_v45 = vadd.f32 %v9484_v31, %v4638_v27 }
 0x587   :  { %4799 = vst [vmem:[#allocation8 + $0x38] sm:$0xff] %v6194_v4 }
 0x588   :  { %4798 = vst [vmem:[#allocation8 + $0x30] sm:$0xff] %v6195_v45  ;;  %v5578_v46 = vpop.f32.mrb[72].mxu1 }
 0x589   :  { %v6196_v16 = vadd.f32 %v5578_v46, %v9484_v31  ;;  %v4650_v20 = vpop.f32.mrb[73].mxu1 }
 0x58a   :  { %v6197_v19 = vadd.f32 %v9484_v31, %v4650_v20 }
 0x58b   :  { %4801 = vst [vmem:[#allocation8 + $0x48] sm:$0xff] %v6196_v16 }
 0x58c   :  { %4800 = vst [vmem:[#allocation8 + $0x40] sm:$0xff] %v6197_v19  ;;  %v5581_v41 = vpop.f32.mrb[74].mxu1 }
 0x58d   :  { %v6198_v12 = vadd.f32 %v5581_v41, %v9484_v31  ;;  %v4662_v9 = vpop.f32.mrb[75].mxu1 }
 0x58e   :  { %v6199_v3 = vadd.f32 %v9484_v31, %v4662_v9 }
 0x58f   :  { %4803 = vst [vmem:[#allocation8 + $0x58] sm:$0xff] %v6198_v12 }
 0x590   :  { %4802 = vst [vmem:[#allocation8 + $0x50] sm:$0xff] %v6199_v3  ;;  %v5584_v6 = vpop.f32.mrb[76].mxu1 }
 0x591   :  { %v6200_v59 = vadd.f32 %v5584_v6, %v9484_v31  ;;  %v4674_v47 = vpop.f32.mrb[77].mxu1 }
 0x592   :  { %v6201_v44 = vadd.f32 %v9484_v31, %v4674_v47 }
 0x593   :  { %4805 = vst [vmem:[#allocation8 + $0x68] sm:$0xff] %v6200_v59 }
 0x594   :  { %4804 = vst [vmem:[#allocation8 + $0x60] sm:$0xff] %v6201_v44  ;;  %v5587_v55 = vpop.f32.mrb[78].mxu1 }
 0x595   :  { %v6202_v63 = vadd.f32 %v5587_v55, %v9484_v31  ;;  %v4686_v52 = vpop.f32.mrb[79].mxu1 }
 0x596   :  { %v6203_v60 = vadd.f32 %v9484_v31, %v4686_v52 }
 0x597   :  { %4807 = vst [vmem:[#allocation8 + $0x78] sm:$0xff] %v6202_v63 }
 0x598   :  { %4806 = vst [vmem:[#allocation8 + $0x70] sm:$0xff] %v6203_v60  ;;  %v5590_v43 = vpop.f32.mrb[80].mxu1 }
 0x599   :  { %v6204_v50 = vadd.f32 %v5590_v43, %v9484_v31  ;;  %v4698_v22 = vpop.f32.mrb[81].mxu1 }
 0x59a   :  { %v6205_v56 = vadd.f32 %v9484_v31, %v4698_v22 }
 0x59b   :  { %4809 = vst [vmem:[#allocation8 + $0x88] sm:$0xff] %v6204_v50 }
 0x59c   :  { %4808 = vst [vmem:[#allocation8 + $0x80] sm:$0xff] %v6205_v56  ;;  %v5593_v49 = vpop.f32.mrb[82].mxu1 }
 0x59d   :  { %v6206_v28 = vadd.f32 %v5593_v49, %v9484_v31  ;;  %v4710_v15 = vpop.f32.mrb[83].mxu1 }
 0x59e   :  { %v6207_v29 = vadd.f32 %v9484_v31, %v4710_v15 }
 0x59f   :  { %4811 = vst [vmem:[#allocation8 + $0x98] sm:$0xff] %v6206_v28 }
 0x5a0   :  { %4810 = vst [vmem:[#allocation8 + $0x90] sm:$0xff] %v6207_v29  ;;  %v5596_v42 = vpop.f32.mrb[84].mxu1 }
 0x5a1   :  { %v6208_v34 = vadd.f32 %v5596_v42, %v9484_v31  ;;  %v4722_v53 = vpop.f32.mrb[85].mxu1 }
 0x5a2   :  { %v6209_v10 = vadd.f32 %v9484_v31, %v4722_v53 }
 0x5a3   :  { %4813 = vst [vmem:[#allocation8 + $0xa8] sm:$0xff] %v6208_v34 }
 0x5a4   :  { %4812 = vst [vmem:[#allocation8 + $0xa0] sm:$0xff] %v6209_v10  ;;  %v5599_v24 = vpop.f32.mrb[86].mxu1 }
 0x5a5   :  { %v6210_v39 = vadd.f32 %v5599_v24, %v9484_v31  ;;  %v4734_v58 = vpop.f32.mrb[87].mxu1 }
 0x5a6   :  { %v6211_v35 = vadd.f32 %v9484_v31, %v4734_v58 }
 0x5a7   :  { %4815 = vst [vmem:[#allocation8 + $0xb8] sm:$0xff] %v6210_v39 }
 0x5a8   :  { %4814 = vst [vmem:[#allocation8 + $0xb0] sm:$0xff] %v6211_v35  ;;  %v5602_v14 = vpop.f32.mrb[88].mxu1 }
 0x5a9   :  { %v6212_v25 = vadd.f32 %v5602_v14, %v9484_v31  ;;  %v4746_v23 = vpop.f32.mrb[89].mxu1 }
 0x5aa   :  { %v6213_v18 = vadd.f32 %v9484_v31, %v4746_v23 }
 0x5ab   :  { %4817 = vst [vmem:[#allocation8 + $0xc8] sm:$0xff] %v6212_v25 }
 0x5ac   :  { %4816 = vst [vmem:[#allocation8 + $0xc0] sm:$0xff] %v6213_v18  ;;  %v5605_v26 = vpop.f32.mrb[90].mxu1 }
 0x5ad   :  { %v6214_v8 = vadd.f32 %v5605_v26, %v9484_v31  ;;  %v4758_v61 = vpop.f32.mrb[91].mxu1 }
 0x5ae   :  { %v6215_v54 = vadd.f32 %v9484_v31, %v4758_v61 }
 0x5af   :  { %4819 = vst [vmem:[#allocation8 + $0xd8] sm:$0xff] %v6214_v8 }
 0x5b0   :  { %4818 = vst [vmem:[#allocation8 + $0xd0] sm:$0xff] %v6215_v54  ;;  %v5608_v5 = vpop.f32.mrb[92].mxu1 }
 0x5b1   :  { %v6216_v37 = vadd.f32 %v5608_v5, %v9484_v31  ;;  %v4770_v0 = vpop.f32.mrb[93].mxu1 }
 0x5b2   :  { %v6217_v13 = vadd.f32 %v9484_v31, %v4770_v0 }
 0x5b3   :  { %4821 = vst [vmem:[#allocation8 + $0xe8] sm:$0xff] %v6216_v37 }
 0x5b4   :  { %4820 = vst [vmem:[#allocation8 + $0xe0] sm:$0xff] %v6217_v13  ;;  %v5611_v57 = vpop.f32.mrb[94].mxu1 }
 0x5b5   :  { %v6218_v48 = vadd.f32 %v5611_v57, %v9484_v31  ;;  %v4782_v62 = vpop.f32.mrb[95].mxu1 }
 0x5b6   :  { %v6219_v38 = vadd.f32 %v9484_v31, %v4782_v62 }
 0x5b7   :  { %4823 = vst [vmem:[#allocation8 + $0xf8] sm:$0xff] %v6218_v48 }
 0x5b8   :  { %4822 = vst [vmem:[#allocation8 + $0xf0] sm:$0xff] %v6219_v38 }
 0x5b9   :  { %6722 = shalt.err (!%p6719_p0)
}
 0x5ba   :  { %s6723_s14 = scalar_lea.hbm %s9538_s5, 4096 }
 0x5bb   :  { %p6724_p1 = scmp.ne.s32.totalorder %s9538_s5, %s6723_s14  ;;  %p6727_p2 = scmp.lt.u32.totalorder %s6723_s14, %s9538_s5 }
 0x5bd   :  { %p6729_p3 = pnand %p6727_p2, %p6724_p1 }
 0x5bf   :  { %6732 = shalt.err (!%p6729_p3)
}
 0x5c0   :  { %4835 = dma.vmem_to_hbm [thread:$0]  %s4830_s10, 4096, %s9538_s5, [#allocation4], %s6740_s28, %s6740_s28, %s6741_s29  }
 0x5c1   :  { %6737 = dma.done.wait [#allocation4], 4096  }
 0x5c2   :  { %6738 = vsyncadd [#allocation4], 4294963200 }
 0x5c3   :  { %4839 = vsyncpa [#allocation3], 1 }
 0x5c4   :  { %4840 = vsyncpa [#allocation6], 1 }
 0x5c5   :  { %4841 = vsyncpa [#allocation4], 1 }

</bundles_post_ra>
